<compile_context>
chip_gen: v5e
topology: v5e:2x2
jax: 0.10.0
libtpu: 0.0.40
codegen_flags: <defaults>
</compile_context>

<pallas_src>
import jax
import jax.numpy as jnp
from jax.experimental import pallas as pl
from jax.experimental.pallas import tpu as pltpu

K_IN = 3
MLP = (64, 128, 512, 1024)
LEAKY_SLOPE = 0.01   # nn.LeakyReLU() default
BN_EPS = 1e-5


def _leaky(h):
    return jnp.maximum(h, LEAKY_SLOPE * h)


def _round_up(x, m):
    return ((x + m - 1) // m) * m


def _pointnet_kernel(x_ref, w1, b1, w2, b2, w3, b3, w4, b4, o_ref):
    # x_ref block: (BT, C, TN, 3); o_ref block: (BT, C, 1024)
    bt, C, tn, k = x_ref.shape
    nt = pl.program_id(1)                          # point-tile (reduction) axis

    x = x_ref[...].reshape(bt * C * tn, k)         # (M, 3) f32, M = BT*C*TN

    # Layer 1 on the VPU: K=3 is too lane-sparse to be worth an MXU pass.
    # TODO(synk): if a bundle dump ever shows the XLU/VPU saturated here, try one
    #             (M,3)@(3,64) bf16 MXU dot instead.
    h = (x[:, 0:1] * w1[0:1, :]
         + x[:, 1:2] * w1[1:2, :]
         + x[:, 2:3] * w1[2:3, :]
         + b1[...])                                # (M, 64) f32
    h = _leaky(h)

    # Layers 2-4 on the MXU: bf16 operands, f32 accumulation, f32 epilogue.
    # TODO(synk): int8 (v6e) / fp8 (v7x) paths for layers 3-4 need an accuracy study.
    h = _leaky(jnp.dot(h.astype(jnp.bfloat16), w2[...],
                       preferred_element_type=jnp.float32) + b2[...])   # (M, 128)
    h = _leaky(jnp.dot(h.astype(jnp.bfloat16), w3[...],
                       preferred_element_type=jnp.float32) + b3[...])   # (M, 512)
    h = _leaky(jnp.dot(h.astype(jnp.bfloat16), w4[...],
                       preferred_element_type=jnp.float32) + b4[...])   # (M, 1024)

    # tn is always a multiple of 8 -> this reshape is a free view (no extra VMEM copy).
    feat = h.reshape(bt, C, tn, MLP[-1])
    cur = jnp.max(feat, axis=2)                    # (BT, C, 1024) f32, sublane reduce

    # Running max over point tiles, accumulated in the (resident) output block.
    @pl.when(nt == 0)
    def _():
        o_ref[...] = cur

    @pl.when(nt > 0)
    def _():
        o_ref[...] = jnp.maximum(o_ref[...], cur)


def _device_config():
    """Generation-aware (target MXU rows per step, vmem_limit_bytes)."""
    vmem_cap = 64 * 1024 * 1024                    # conservative default (v7x-class)
    try:
        vmem_cap = int(getattr(pltpu.get_tpu_info(), "vmem_capacity_bytes", vmem_cap))
    except Exception:
        pass
    if vmem_cap >= 96 * 1024 * 1024:               # v5e / v6e: 128 MiB physical VMEM
        return 4096, 100 * 1024 * 1024
    return 2048, 48 * 1024 * 1024                  # v7x: 64 MiB physical VMEM


def _choose_tiles(B, C, N, target_rows):
    """Pick (batch-fold BT, point tile TN, padded N).

    TN is always a multiple of 8; BT*C*TN targets `target_rows` rows per MXU step
    (~5 MiB of live intermediates per 1024 rows, so this stays well inside the vmem
    limit for both generations).  The batch grid axis is kept >= 2 whenever B >= 2
    so both v7x TensorCores receive work from the "parallel" axis.
    """
    tn_cap = max(8, (target_rows // max(C, 1)) // 8 * 8)
    tn = min(tn_cap, _round_up(N, 8))
    n_pad = _round_up(N, tn)

    bt = 1
    if C * tn < target_rows:                       # fold batches to fill the MXU M dim
        for cand in range(1, B + 1):
            if (B % cand == 0 and cand * C * tn <= target_rows
                    and (B // cand >= 2 or B == 1)):
                bt = cand
    return bt, tn, n_pad


def make_params(key):
    """Deterministic Conv2d(1x1) + BatchNorm2d params, BN folded into (W_eff, b_eff).
    Layer 1 weights stay f32 (VPU path); layers 2-4 are stored in bfloat16 (MXU path)."""
    params = []
    in_d = K_IN
    for i, out_d in enumerate(MLP):
        ks = jax.random.split(jax.random.fold_in(key, i), 6)
        w = jax.random.normal(ks[0], (out_d, in_d), jnp.float32) / jnp.sqrt(in_d)
        b = 0.01 * jax.random.normal(ks[1], (out_d,), jnp.float32)
        gamma = 1.0 + 0.1 * jax.random.normal(ks[2], (out_d,), jnp.float32)
        beta = 0.05 * jax.random.normal(ks[3], (out_d,), jnp.float32)
        r_mean = 0.1 * jax.random.normal(ks[4], (out_d,), jnp.float32)
        r_var = jnp.abs(jax.random.normal(ks[5], (out_d,), jnp.float32)) + 0.5
        scale = gamma / jnp.sqrt(r_var + BN_EPS)
        w_eff = (w * scale[:, None]).T                  # (in_d, out_d) for x @ W
        b_eff = ((b - r_mean) * scale + beta)[None, :]  # (1, out_d)
        w_dtype = jnp.float32 if i == 0 else jnp.bfloat16
        params.append((w_eff.astype(w_dtype), b_eff.astype(jnp.float32)))
        in_d = out_d
    return params


def _call_pallas(x_kern, flat_params, bt, tn, vmem_limit, single_buffer_weights):
    B, C, n_pad, _ = x_kern.shape
    grid = (B // bt, n_pad // tn)

    # Constant-index weight/bias blocks: fetched once, so single-buffer them to save VMEM.
    w_kwargs = {"pipeline_mode": pl.Buffered(1)} if single_buffer_weights else {}
    w_specs = [pl.BlockSpec(p.shape, lambda bi, ni: (0, 0), **w_kwargs)
               for p in flat_params]

    return pl.pallas_call(
        _pointnet_kernel,
        out_shape=jax.ShapeDtypeStruct((B, C, MLP[-1]), jnp.float32),
        grid=grid,
        in_specs=[pl.BlockSpec((bt, C, tn, K_IN), lambda bi, ni: (bi, 0, ni, 0))] + w_specs,
        out_specs=pl.BlockSpec((bt, C, MLP[-1]), lambda bi, ni: (bi, 0, 0)),
        compiler_params=pltpu.CompilerParams(
            dimension_semantics=("parallel", "arbitrary"),
            vmem_limit_bytes=vmem_limit),
    )(x_kern, *flat_params)


def simple_pointnet_forward(x, params):
    """x: (B, 3, N, C) float32  ->  (B, 1024*C) float32 (matches PyTorch view)."""
    B, k, N, C = x.shape
    assert k == K_IN
    # (B,3,N,C) -> (B,C,N,3): each row along N is one point's (x,y,z).
    x_kern = jnp.transpose(x, (0, 3, 2, 1))

    target_rows, vmem_limit = _device_config()
    bt, tn, n_pad = _choose_tiles(B, C, N, target_rows)
    if n_pad != N:
        # Pad the point axis by duplicating the last point: the max over N is unchanged
        # and no in-kernel masking is required.
        x_kern = jnp.pad(x_kern, ((0, 0), (0, 0), (0, n_pad - N), (0, 0)), mode="edge")

    flat_params = [p for pair in params for p in pair]          # w1,b1,...,w4,b4
    try:
        out = _call_pallas(x_kern, flat_params, bt, tn, vmem_limit, True)
    except Exception:
        # pipeline_mode=pl.Buffered(1) is an optimization only; fall back if unsupported.
        out = _call_pallas(x_kern, flat_params, bt, tn, vmem_limit, False)

    # (B, C, 1024) -> (B, 1024, C) -> (B, 1024*C)  [same row-major order as torch .view]
    return jnp.transpose(out, (0, 2, 1)).reshape(B, MLP[-1] * C)


def reference_forward_bf16(x, params):
    """Pure-JAX reference mirroring the kernel's numerics (bf16 matmul operands, f32 acc)."""
    B, k, N, C = x.shape
    (w1, b1), (w2, b2), (w3, b3), (w4, b4) = params
    h = jnp.transpose(x, (0, 3, 2, 1)).reshape(B * C * N, k)
    h = _leaky(h @ w1 + b1)
    h = _leaky(jnp.dot(h.astype(jnp.bfloat16), w2, preferred_element_type=jnp.float32) + b2)
    h = _leaky(jnp.dot(h.astype(jnp.bfloat16), w3, preferred_element_type=jnp.float32) + b3)
    h = _leaky(jnp.dot(h.astype(jnp.bfloat16), w4, preferred_element_type=jnp.float32) + b4)
    h = h.reshape(B, C, N, MLP[-1]).max(axis=2)                 # (B, C, 1024)
    return jnp.transpose(h, (0, 2, 1)).reshape(B, MLP[-1] * C)


def reference_forward_f32(x, params):
    """Pure float32 reference (PyTorch-like numerics) to bound the bf16 error."""
    B, k, N, C = x.shape
    (w1, b1), (w2, b2), (w3, b3), (w4, b4) = params
    h = jnp.transpose(x, (0, 3, 2, 1)).reshape(B * C * N, k)
    h = _leaky(h @ w1.astype(jnp.float32) + b1)
    h = _leaky(h @ w2.astype(jnp.float32) + b2)
    h = _leaky(h @ w3.astype(jnp.float32) + b3)
    h = _leaky(h @ w4.astype(jnp.float32) + b4)
    h = h.reshape(B, C, N, MLP[-1]).max(axis=2)                 # (B, C, 1024)
    return jnp.transpose(h, (0, 2, 1)).reshape(B, MLP[-1] * C)


if __name__ == "__main__":
    key = jax.random.PRNGKey(0)
    k_in, k_par = jax.random.split(key)

    # N=20 deliberately exercises the padded (non-multiple-of-8) point-axis path.
    B, N, C = 2, 20, 4
    x = jax.random.normal(k_in, (B, K_IN, N, C), jnp.float32)

    params = make_params(k_par)

    out = jax.block_until_ready(simple_pointnet_forward(x, params))
    assert out.shape == (B, MLP[-1] * C), out.shape

    ref_bf16 = jax.block_until_ready(reference_forward_bf16(x, params))
    err_bf16 = float(jnp.max(jnp.abs(out - ref_bf16)))
    assert jnp.allclose(out, ref_bf16, atol=1e-2, rtol=1e-2), err_bf16

    # Quantify the bf16 (layers 2-4) error against full-precision numerics.
    ref_f32 = jax.block_until_ready(reference_forward_f32(x, params))
    err_f32 = float(jnp.max(jnp.abs(out - ref_f32)))
    assert jnp.allclose(out, ref_f32, atol=1e-1, rtol=5e-2), err_f32

    print("KERNEL_OK")
</pallas_src>

<mosaic_0001>
module attributes {stable_mosaic.version = 11 : i64} {
  func.func @_pointnet_kernel(%arg0: i32, %arg1: i32, %arg2: memref<1x4x24x3xf32, #tpu.memory_space<vmem>>, %arg3: memref<3x64xf32, #tpu.memory_space<vmem>>, %arg4: memref<1x64xf32, #tpu.memory_space<vmem>>, %arg5: memref<64x128xbf16, #tpu.memory_space<vmem>>, %arg6: memref<1x128xf32, #tpu.memory_space<vmem>>, %arg7: memref<128x512xbf16, #tpu.memory_space<vmem>>, %arg8: memref<1x512xf32, #tpu.memory_space<vmem>>, %arg9: memref<512x1024xbf16, #tpu.memory_space<vmem>>, %arg10: memref<1x1024xf32, #tpu.memory_space<vmem>>, %arg11: memref<1x4x1024xf32, #tpu.memory_space<vmem>>) attributes {dimension_semantics = [#tpu.dimension_semantics<parallel>, #tpu.dimension_semantics<arbitrary>], iteration_bounds = array<i64: 2, 1>, scalar_prefetch = 0 : i64, scratch_operands = 0 : i64, tpu.core_type = #tpu.core_type<tc>, window_params = [{transform_indices = @transform_0, window_bounds = array<i64: 1, 4, 24, 3>}, {pipeline_mode = #tpu.pipeline_mode<synchronous>, transform_indices = @transform_1, window_bounds = array<i64: 3, 64>}, {pipeline_mode = #tpu.pipeline_mode<synchronous>, transform_indices = @transform_2, window_bounds = array<i64: 1, 64>}, {pipeline_mode = #tpu.pipeline_mode<synchronous>, transform_indices = @transform_3, window_bounds = array<i64: 64, 128>}, {pipeline_mode = #tpu.pipeline_mode<synchronous>, transform_indices = @transform_4, window_bounds = array<i64: 1, 128>}, {pipeline_mode = #tpu.pipeline_mode<synchronous>, transform_indices = @transform_5, window_bounds = array<i64: 128, 512>}, {pipeline_mode = #tpu.pipeline_mode<synchronous>, transform_indices = @transform_6, window_bounds = array<i64: 1, 512>}, {pipeline_mode = #tpu.pipeline_mode<synchronous>, transform_indices = @transform_7, window_bounds = array<i64: 512, 1024>}, {pipeline_mode = #tpu.pipeline_mode<synchronous>, transform_indices = @transform_8, window_bounds = array<i64: 1, 1024>}, {transform_indices = @transform_9, window_bounds = array<i64: 1, 4, 1024>}]} {
    %c0 = arith.constant 0 : index
    %c0_0 = arith.constant 0 : index
    %c0_1 = arith.constant 0 : index
    %c0_2 = arith.constant 0 : index
    %0 = vector.load %arg2[%c0, %c0_0, %c0_1, %c0_2] : memref<1x4x24x3xf32, #tpu.memory_space<vmem>>, vector<1x4x24x3xf32>
    %1 = vector.shape_cast %0 : vector<1x4x24x3xf32> to vector<96x3xf32>
    %2 = vector.extract_strided_slice %1 {offsets = [0, 0], sizes = [96, 1], strides = [1, 1]} : vector<96x3xf32> to vector<96x1xf32>
    %c0_3 = arith.constant 0 : index
    %c0_4 = arith.constant 0 : index
    %3 = vector.load %arg3[%c0_3, %c0_4] : memref<3x64xf32, #tpu.memory_space<vmem>>, vector<1x64xf32>
    %4 = vector.broadcast %2 : vector<96x1xf32> to vector<96x64xf32>
    %5 = vector.broadcast %3 : vector<1x64xf32> to vector<96x64xf32>
    %6 = arith.mulf %4, %5 : vector<96x64xf32>
    %7 = vector.extract_strided_slice %1 {offsets = [0, 1], sizes = [96, 1], strides = [1, 1]} : vector<96x3xf32> to vector<96x1xf32>
    %c1 = arith.constant 1 : index
    %c0_5 = arith.constant 0 : index
    %8 = vector.load %arg3[%c1, %c0_5] : memref<3x64xf32, #tpu.memory_space<vmem>>, vector<1x64xf32>
    %9 = vector.broadcast %7 : vector<96x1xf32> to vector<96x64xf32>
    %10 = vector.broadcast %8 : vector<1x64xf32> to vector<96x64xf32>
    %11 = arith.mulf %9, %10 : vector<96x64xf32>
    %12 = arith.addf %6, %11 : vector<96x64xf32>
    %13 = vector.extract_strided_slice %1 {offsets = [0, 2], sizes = [96, 1], strides = [1, 1]} : vector<96x3xf32> to vector<96x1xf32>
    %c2 = arith.constant 2 : index
    %c0_6 = arith.constant 0 : index
    %14 = vector.load %arg3[%c2, %c0_6] : memref<3x64xf32, #tpu.memory_space<vmem>>, vector<1x64xf32>
    %15 = vector.broadcast %13 : vector<96x1xf32> to vector<96x64xf32>
    %16 = vector.broadcast %14 : vector<1x64xf32> to vector<96x64xf32>
    %17 = arith.mulf %15, %16 : vector<96x64xf32>
    %18 = arith.addf %12, %17 : vector<96x64xf32>
    %c0_7 = arith.constant 0 : index
    %c0_8 = arith.constant 0 : index
    %19 = vector.load %arg4[%c0_7, %c0_8] : memref<1x64xf32, #tpu.memory_space<vmem>>, vector<1x64xf32>
    %20 = vector.broadcast %19 : vector<1x64xf32> to vector<96x64xf32>
    %21 = arith.addf %18, %20 : vector<96x64xf32>
    %cst = arith.constant 0.00999999977 : f32
    %22 = vector.broadcast %cst : f32 to vector<96x64xf32>
    %23 = arith.mulf %22, %21 : vector<96x64xf32>
    %24 = arith.maximumf %21, %23 : vector<96x64xf32>
    %25 = arith.truncf %24 : vector<96x64xf32> to vector<96x64xbf16>
    %c0_9 = arith.constant 0 : index
    %c0_10 = arith.constant 0 : index
    %26 = vector.load %arg5[%c0_9, %c0_10] : memref<64x128xbf16, #tpu.memory_space<vmem>>, vector<64x128xbf16>
    %cst_11 = arith.constant dense<0.000000e+00> : vector<96x128xf32>
    %27 = tpu.matmul %25, %26, %cst_11 {dimension_numbers = #tpu.dot_dimension_numbers<[1], [0], [0], [1], [0, 0, 1, 1], [], []>} : vector<96x64xbf16>, vector<64x128xbf16>, vector<96x128xf32> -> vector<96x128xf32>
    %c0_12 = arith.constant 0 : index
    %c0_13 = arith.constant 0 : index
    %28 = vector.load %arg6[%c0_12, %c0_13] : memref<1x128xf32, #tpu.memory_space<vmem>>, vector<1x128xf32>
    %29 = vector.broadcast %28 : vector<1x128xf32> to vector<96x128xf32>
    %30 = arith.addf %27, %29 : vector<96x128xf32>
    %cst_14 = arith.constant 0.00999999977 : f32
    %31 = vector.broadcast %cst_14 : f32 to vector<96x128xf32>
    %32 = arith.mulf %31, %30 : vector<96x128xf32>
    %33 = arith.maximumf %30, %32 : vector<96x128xf32>
    %34 = arith.truncf %33 : vector<96x128xf32> to vector<96x128xbf16>
    %c0_15 = arith.constant 0 : index
    %c0_16 = arith.constant 0 : index
    %35 = vector.load %arg7[%c0_15, %c0_16] : memref<128x512xbf16, #tpu.memory_space<vmem>>, vector<128x512xbf16>
    %cst_17 = arith.constant dense<0.000000e+00> : vector<96x512xf32>
    %36 = tpu.matmul %34, %35, %cst_17 {dimension_numbers = #tpu.dot_dimension_numbers<[1], [0], [0], [1], [0, 0, 1, 1], [], []>} : vector<96x128xbf16>, vector<128x512xbf16>, vector<96x512xf32> -> vector<96x512xf32>
    %c0_18 = arith.constant 0 : index
    %c0_19 = arith.constant 0 : index
    %37 = vector.load %arg8[%c0_18, %c0_19] : memref<1x512xf32, #tpu.memory_space<vmem>>, vector<1x512xf32>
    %38 = vector.broadcast %37 : vector<1x512xf32> to vector<96x512xf32>
    %39 = arith.addf %36, %38 : vector<96x512xf32>
    %cst_20 = arith.constant 0.00999999977 : f32
    %40 = vector.broadcast %cst_20 : f32 to vector<96x512xf32>
    %41 = arith.mulf %40, %39 : vector<96x512xf32>
    %42 = arith.maximumf %39, %41 : vector<96x512xf32>
    %43 = arith.truncf %42 : vector<96x512xf32> to vector<96x512xbf16>
    %c0_21 = arith.constant 0 : index
    %c0_22 = arith.constant 0 : index
    %44 = vector.load %arg9[%c0_21, %c0_22] : memref<512x1024xbf16, #tpu.memory_space<vmem>>, vector<512x1024xbf16>
    %cst_23 = arith.constant dense<0.000000e+00> : vector<96x1024xf32>
    %45 = tpu.matmul %43, %44, %cst_23 {dimension_numbers = #tpu.dot_dimension_numbers<[1], [0], [0], [1], [0, 0, 1, 1], [], []>} : vector<96x512xbf16>, vector<512x1024xbf16>, vector<96x1024xf32> -> vector<96x1024xf32>
    %c0_24 = arith.constant 0 : index
    %c0_25 = arith.constant 0 : index
    %46 = vector.load %arg10[%c0_24, %c0_25] : memref<1x1024xf32, #tpu.memory_space<vmem>>, vector<1x1024xf32>
    %47 = vector.broadcast %46 : vector<1x1024xf32> to vector<96x1024xf32>
    %48 = arith.addf %45, %47 : vector<96x1024xf32>
    %cst_26 = arith.constant 0.00999999977 : f32
    %49 = vector.broadcast %cst_26 : f32 to vector<96x1024xf32>
    %50 = arith.mulf %49, %48 : vector<96x1024xf32>
    %51 = arith.maximumf %48, %50 : vector<96x1024xf32>
    %52 = vector.shape_cast %51 : vector<96x1024xf32> to vector<1x4x24x1024xf32>
    %cst_27 = arith.constant dense<0xFF800000> : vector<1x4x1024xf32>
    %53 = vector.multi_reduction <maximumf>, %52, %cst_27 [2] : vector<1x4x24x1024xf32> to vector<1x4x1024xf32>
    %c0_i32 = arith.constant 0 : i32
    %54 = arith.cmpi eq, %arg1, %c0_i32 : i32
    %55 = arith.extui %54 : i1 to i32
    %c0_i32_28 = arith.constant 0 : i32
    %56 = arith.cmpi ne, %55, %c0_i32_28 : i32
    scf.if %56 {
      %c0_31 = arith.constant 0 : index
      %c0_32 = arith.constant 0 : index
      %c0_33 = arith.constant 0 : index
      %60 = vector.load %arg11[%c0_31, %c0_32, %c0_33] : memref<1x4x1024xf32, #tpu.memory_space<vmem>>, vector<1x4x1024xf32>
      tpu.vector_store %arg11[%c0_31, %c0_32, %c0_33], %53 {strides = array<i32>} : memref<1x4x1024xf32, #tpu.memory_space<vmem>>, vector<1x4x1024xf32>,
    } else {
    }
    %c0_i32_29 = arith.constant 0 : i32
    %57 = arith.cmpi sgt, %arg1, %c0_i32_29 : i32
    %58 = arith.extui %57 : i1 to i32
    %c0_i32_30 = arith.constant 0 : i32
    %59 = arith.cmpi ne, %58, %c0_i32_30 : i32
    scf.if %59 {
      %c0_31 = arith.constant 0 : index
      %c0_32 = arith.constant 0 : index
      %c0_33 = arith.constant 0 : index
      %60 = vector.load %arg11[%c0_31, %c0_32, %c0_33] : memref<1x4x1024xf32, #tpu.memory_space<vmem>>, vector<1x4x1024xf32>
      %61 = arith.maximumf %60, %53 : vector<1x4x1024xf32>
      %c0_34 = arith.constant 0 : index
      %c0_35 = arith.constant 0 : index
      %c0_36 = arith.constant 0 : index
      %62 = vector.load %arg11[%c0_34, %c0_35, %c0_36] : memref<1x4x1024xf32, #tpu.memory_space<vmem>>, vector<1x4x1024xf32>
      tpu.vector_store %arg11[%c0_34, %c0_35, %c0_36], %61 {strides = array<i32>} : memref<1x4x1024xf32, #tpu.memory_space<vmem>>, vector<1x4x1024xf32>,
    } else {
    }
    return
  }
  func.func @transform_0(%arg0: i32, %arg1: i32) -> (i32, i32, i32, i32) {
    %c0_i32 = arith.constant 0 : i32
    %c0_i32_0 = arith.constant 0 : i32
    %c0_i32_1 = arith.constant 0 : i32
    return %arg0, %c0_i32, %arg1, %c0_i32_0 : i32, i32, i32, i32
  }
  func.func @transform_1(%arg0: i32, %arg1: i32) -> (i32, i32) {
    %c0_i32 = arith.constant 0 : i32
    %c0_i32_0 = arith.constant 0 : i32
    %c0_i32_1 = arith.constant 0 : i32
    return %c0_i32, %c0_i32_0 : i32, i32
  }
  func.func @transform_2(%arg0: i32, %arg1: i32) -> (i32, i32) {
    %c0_i32 = arith.constant 0 : i32
    %c0_i32_0 = arith.constant 0 : i32
    %c0_i32_1 = arith.constant 0 : i32
    return %c0_i32, %c0_i32_0 : i32, i32
  }
  func.func @transform_3(%arg0: i32, %arg1: i32) -> (i32, i32) {
    %c0_i32 = arith.constant 0 : i32
    %c0_i32_0 = arith.constant 0 : i32
    %c0_i32_1 = arith.constant 0 : i32
    return %c0_i32, %c0_i32_0 : i32, i32
  }
  func.func @transform_4(%arg0: i32, %arg1: i32) -> (i32, i32) {
    %c0_i32 = arith.constant 0 : i32
    %c0_i32_0 = arith.constant 0 : i32
    %c0_i32_1 = arith.constant 0 : i32
    return %c0_i32, %c0_i32_0 : i32, i32
  }
  func.func @transform_5(%arg0: i32, %arg1: i32) -> (i32, i32) {
    %c0_i32 = arith.constant 0 : i32
    %c0_i32_0 = arith.constant 0 : i32
    %c0_i32_1 = arith.constant 0 : i32
    return %c0_i32, %c0_i32_0 : i32, i32
  }
  func.func @transform_6(%arg0: i32, %arg1: i32) -> (i32, i32) {
    %c0_i32 = arith.constant 0 : i32
    %c0_i32_0 = arith.constant 0 : i32
    %c0_i32_1 = arith.constant 0 : i32
    return %c0_i32, %c0_i32_0 : i32, i32
  }
  func.func @transform_7(%arg0: i32, %arg1: i32) -> (i32, i32) {
    %c0_i32 = arith.constant 0 : i32
    %c0_i32_0 = arith.constant 0 : i32
    %c0_i32_1 = arith.constant 0 : i32
    return %c0_i32, %c0_i32_0 : i32, i32
  }
  func.func @transform_8(%arg0: i32, %arg1: i32) -> (i32, i32) {
    %c0_i32 = arith.constant 0 : i32
    %c0_i32_0 = arith.constant 0 : i32
    %c0_i32_1 = arith.constant 0 : i32
    return %c0_i32, %c0_i32_0 : i32, i32
  }
  func.func @transform_9(%arg0: i32, %arg1: i32) -> (i32, i32, i32) {
    %c0_i32 = arith.constant 0 : i32
    %c0_i32_0 = arith.constant 0 : i32
    %c0_i32_1 = arith.constant 0 : i32
    return %arg0, %c0_i32, %c0_i32_0 : i32, i32, i32
  }
}

module attributes {stable_mosaic.version = 11 : i64} {
  func.func @_pointnet_kernel(%arg0: i32, %arg1: i32, %arg2: memref<1x4x24x3xf32, #tpu.memory_space<vmem>>, %arg3: memref<3x64xf32, #tpu.memory_space<vmem>>, %arg4: memref<1x64xf32, #tpu.memory_space<vmem>>, %arg5: memref<64x128xbf16, #tpu.memory_space<vmem>>, %arg6: memref<1x128xf32, #tpu.memory_space<vmem>>, %arg7: memref<128x512xbf16, #tpu.memory_space<vmem>>, %arg8: memref<1x512xf32, #tpu.memory_space<vmem>>, %arg9: memref<512x1024xbf16, #tpu.memory_space<vmem>>, %arg10: memref<1x1024xf32, #tpu.memory_space<vmem>>, %arg11: memref<1x4x1024xf32, #tpu.memory_space<vmem>>) attributes {dimension_semantics = [#tpu.dimension_semantics<parallel>, #tpu.dimension_semantics<arbitrary>], iteration_bounds = array<i64: 2, 1>, scalar_prefetch = 0 : i64, scratch_operands = 0 : i64, tpu.core_type = #tpu.core_type<tc>, window_params = [{transform_indices = @transform_0, window_bounds = array<i64: 1, 4, 24, 3>}, {pipeline_mode = #tpu.pipeline_mode<synchronous>, transform_indices = @transform_1, window_bounds = array<i64: 3, 64>}, {pipeline_mode = #tpu.pipeline_mode<synchronous>, transform_indices = @transform_2, window_bounds = array<i64: 1, 64>}, {pipeline_mode = #tpu.pipeline_mode<synchronous>, transform_indices = @transform_3, window_bounds = array<i64: 64, 128>}, {pipeline_mode = #tpu.pipeline_mode<synchronous>, transform_indices = @transform_4, window_bounds = array<i64: 1, 128>}, {pipeline_mode = #tpu.pipeline_mode<synchronous>, transform_indices = @transform_5, window_bounds = array<i64: 128, 512>}, {pipeline_mode = #tpu.pipeline_mode<synchronous>, transform_indices = @transform_6, window_bounds = array<i64: 1, 512>}, {pipeline_mode = #tpu.pipeline_mode<synchronous>, transform_indices = @transform_7, window_bounds = array<i64: 512, 1024>}, {pipeline_mode = #tpu.pipeline_mode<synchronous>, transform_indices = @transform_8, window_bounds = array<i64: 1, 1024>}, {transform_indices = @transform_9, window_bounds = array<i64: 1, 4, 1024>}]} {
    %c0 = arith.constant 0 : index
    %c0_0 = arith.constant 0 : index
    %c0_1 = arith.constant 0 : index
    %c0_2 = arith.constant 0 : index
    %0 = vector.load %arg2[%c0, %c0_0, %c0_1, %c0_2] : memref<1x4x24x3xf32, #tpu.memory_space<vmem>>, vector<1x4x24x3xf32>
    %1 = vector.shape_cast %0 : vector<1x4x24x3xf32> to vector<96x3xf32>
    %2 = vector.extract_strided_slice %1 {offsets = [0, 0], sizes = [96, 1], strides = [1, 1]} : vector<96x3xf32> to vector<96x1xf32>
    %c0_3 = arith.constant 0 : index
    %c0_4 = arith.constant 0 : index
    %3 = vector.load %arg3[%c0_3, %c0_4] : memref<3x64xf32, #tpu.memory_space<vmem>>, vector<1x64xf32>
    %4 = vector.broadcast %2 : vector<96x1xf32> to vector<96x64xf32>
    %5 = vector.broadcast %3 : vector<1x64xf32> to vector<96x64xf32>
    %6 = arith.mulf %4, %5 : vector<96x64xf32>
    %7 = vector.extract_strided_slice %1 {offsets = [0, 1], sizes = [96, 1], strides = [1, 1]} : vector<96x3xf32> to vector<96x1xf32>
    %c1 = arith.constant 1 : index
    %c0_5 = arith.constant 0 : index
    %8 = vector.load %arg3[%c1, %c0_5] : memref<3x64xf32, #tpu.memory_space<vmem>>, vector<1x64xf32>
    %9 = vector.broadcast %7 : vector<96x1xf32> to vector<96x64xf32>
    %10 = vector.broadcast %8 : vector<1x64xf32> to vector<96x64xf32>
    %11 = arith.mulf %9, %10 : vector<96x64xf32>
    %12 = arith.addf %6, %11 : vector<96x64xf32>
    %13 = vector.extract_strided_slice %1 {offsets = [0, 2], sizes = [96, 1], strides = [1, 1]} : vector<96x3xf32> to vector<96x1xf32>
    %c2 = arith.constant 2 : index
    %c0_6 = arith.constant 0 : index
    %14 = vector.load %arg3[%c2, %c0_6] : memref<3x64xf32, #tpu.memory_space<vmem>>, vector<1x64xf32>
    %15 = vector.broadcast %13 : vector<96x1xf32> to vector<96x64xf32>
    %16 = vector.broadcast %14 : vector<1x64xf32> to vector<96x64xf32>
    %17 = arith.mulf %15, %16 : vector<96x64xf32>
    %18 = arith.addf %12, %17 : vector<96x64xf32>
    %c0_7 = arith.constant 0 : index
    %c0_8 = arith.constant 0 : index
    %19 = vector.load %arg4[%c0_7, %c0_8] : memref<1x64xf32, #tpu.memory_space<vmem>>, vector<1x64xf32>
    %20 = vector.broadcast %19 : vector<1x64xf32> to vector<96x64xf32>
    %21 = arith.addf %18, %20 : vector<96x64xf32>
    %cst = arith.constant 0.00999999977 : f32
    %22 = vector.broadcast %cst : f32 to vector<96x64xf32>
    %23 = arith.mulf %22, %21 : vector<96x64xf32>
    %24 = arith.maximumf %21, %23 : vector<96x64xf32>
    %25 = arith.truncf %24 : vector<96x64xf32> to vector<96x64xbf16>
    %c0_9 = arith.constant 0 : index
    %c0_10 = arith.constant 0 : index
    %26 = vector.load %arg5[%c0_9, %c0_10] : memref<64x128xbf16, #tpu.memory_space<vmem>>, vector<64x128xbf16>
    %cst_11 = arith.constant dense<0.000000e+00> : vector<96x128xf32>
    %27 = tpu.matmul %25, %26, %cst_11 {dimension_numbers = #tpu.dot_dimension_numbers<[1], [0], [0], [1], [0, 0, 1, 1], [], []>} : vector<96x64xbf16>, vector<64x128xbf16>, vector<96x128xf32> -> vector<96x128xf32>
    %c0_12 = arith.constant 0 : index
    %c0_13 = arith.constant 0 : index
    %28 = vector.load %arg6[%c0_12, %c0_13] : memref<1x128xf32, #tpu.memory_space<vmem>>, vector<1x128xf32>
    %29 = vector.broadcast %28 : vector<1x128xf32> to vector<96x128xf32>
    %30 = arith.addf %27, %29 : vector<96x128xf32>
    %cst_14 = arith.constant 0.00999999977 : f32
    %31 = vector.broadcast %cst_14 : f32 to vector<96x128xf32>
    %32 = arith.mulf %31, %30 : vector<96x128xf32>
    %33 = arith.maximumf %30, %32 : vector<96x128xf32>
    %34 = arith.truncf %33 : vector<96x128xf32> to vector<96x128xbf16>
    %c0_15 = arith.constant 0 : index
    %c0_16 = arith.constant 0 : index
    %35 = vector.load %arg7[%c0_15, %c0_16] : memref<128x512xbf16, #tpu.memory_space<vmem>>, vector<128x512xbf16>
    %cst_17 = arith.constant dense<0.000000e+00> : vector<96x512xf32>
    %36 = tpu.matmul %34, %35, %cst_17 {dimension_numbers = #tpu.dot_dimension_numbers<[1], [0], [0], [1], [0, 0, 1, 1], [], []>} : vector<96x128xbf16>, vector<128x512xbf16>, vector<96x512xf32> -> vector<96x512xf32>
    %c0_18 = arith.constant 0 : index
    %c0_19 = arith.constant 0 : index
    %37 = vector.load %arg8[%c0_18, %c0_19] : memref<1x512xf32, #tpu.memory_space<vmem>>, vector<1x512xf32>
    %38 = vector.broadcast %37 : vector<1x512xf32> to vector<96x512xf32>
    %39 = arith.addf %36, %38 : vector<96x512xf32>
    %cst_20 = arith.constant 0.00999999977 : f32
    %40 = vector.broadcast %cst_20 : f32 to vector<96x512xf32>
    %41 = arith.mulf %40, %39 : vector<96x512xf32>
    %42 = arith.maximumf %39, %41 : vector<96x512xf32>
    %43 = arith.truncf %42 : vector<96x512xf32> to vector<96x512xbf16>
    %c0_21 = arith.constant 0 : index
    %c0_22 = arith.constant 0 : index
    %44 = vector.load %arg9[%c0_21, %c0_22] : memref<512x1024xbf16, #tpu.memory_space<vmem>>, vector<512x1024xbf16>
    %cst_23 = arith.constant dense<0.000000e+00> : vector<96x1024xf32>
    %45 = tpu.matmul %43, %44, %cst_23 {dimension_numbers = #tpu.dot_dimension_numbers<[1], [0], [0], [1], [0, 0, 1, 1], [], []>} : vector<96x512xbf16>, vector<512x1024xbf16>, vector<96x1024xf32> -> vector<96x1024xf32>
    %c0_24 = arith.constant 0 : index
    %c0_25 = arith.constant 0 : index
    %46 = vector.load %arg10[%c0_24, %c0_25] : memref<1x1024xf32, #tpu.memory_space<vmem>>, vector<1x1024xf32>
    %47 = vector.broadcast %46 : vector<1x1024xf32> to vector<96x1024xf32>
    %48 = arith.addf %45, %47 : vector<96x1024xf32>
    %cst_26 = arith.constant 0.00999999977 : f32
    %49 = vector.broadcast %cst_26 : f32 to vector<96x1024xf32>
    %50 = arith.mulf %49, %48 : vector<96x1024xf32>
    %51 = arith.maximumf %48, %50 : vector<96x1024xf32>
    %52 = vector.shape_cast %51 : vector<96x1024xf32> to vector<1x4x24x1024xf32>
    %cst_27 = arith.constant dense<0xFF800000> : vector<1x4x1024xf32>
    %53 = vector.multi_reduction <maximumf>, %52, %cst_27 [2] : vector<1x4x24x1024xf32> to vector<1x4x1024xf32>
    %c0_i32 = arith.constant 0 : i32
    %54 = arith.cmpi eq, %arg1, %c0_i32 : i32
    %55 = arith.extui %54 : i1 to i32
    %c0_i32_28 = arith.constant 0 : i32
    %56 = arith.cmpi ne, %55, %c0_i32_28 : i32
    scf.if %56 {
      %c0_31 = arith.constant 0 : index
      %c0_32 = arith.constant 0 : index
      %c0_33 = arith.constant 0 : index
      %60 = vector.load %arg11[%c0_31, %c0_32, %c0_33] : memref<1x4x1024xf32, #tpu.memory_space<vmem>>, vector<1x4x1024xf32>
      tpu.vector_store %arg11[%c0_31, %c0_32, %c0_33], %53 {strides = array<i32>} : memref<1x4x1024xf32, #tpu.memory_space<vmem>>, vector<1x4x1024xf32>,
    } else {
    }
    %c0_i32_29 = arith.constant 0 : i32
    %57 = arith.cmpi sgt, %arg1, %c0_i32_29 : i32
    %58 = arith.extui %57 : i1 to i32
    %c0_i32_30 = arith.constant 0 : i32
    %59 = arith.cmpi ne, %58, %c0_i32_30 : i32
    scf.if %59 {
      %c0_31 = arith.constant 0 : index
      %c0_32 = arith.constant 0 : index
      %c0_33 = arith.constant 0 : index
      %60 = vector.load %arg11[%c0_31, %c0_32, %c0_33] : memref<1x4x1024xf32, #tpu.memory_space<vmem>>, vector<1x4x1024xf32>
      %61 = arith.maximumf %60, %53 : vector<1x4x1024xf32>
      %c0_34 = arith.constant 0 : index
      %c0_35 = arith.constant 0 : index
      %c0_36 = arith.constant 0 : index
      %62 = vector.load %arg11[%c0_34, %c0_35, %c0_36] : memref<1x4x1024xf32, #tpu.memory_space<vmem>>, vector<1x4x1024xf32>
      tpu.vector_store %arg11[%c0_34, %c0_35, %c0_36], %61 {strides = array<i32>} : memref<1x4x1024xf32, #tpu.memory_space<vmem>>, vector<1x4x1024xf32>,
    } else {
    }
    return
  }
  func.func @transform_0(%arg0: i32, %arg1: i32) -> (i32, i32, i32, i32) {
    %c0_i32 = arith.constant 0 : i32
    %c0_i32_0 = arith.constant 0 : i32
    %c0_i32_1 = arith.constant 0 : i32
    return %arg0, %c0_i32, %arg1, %c0_i32_0 : i32, i32, i32, i32
  }
  func.func @transform_1(%arg0: i32, %arg1: i32) -> (i32, i32) {
    %c0_i32 = arith.constant 0 : i32
    %c0_i32_0 = arith.constant 0 : i32
    %c0_i32_1 = arith.constant 0 : i32
    return %c0_i32, %c0_i32_0 : i32, i32
  }
  func.func @transform_2(%arg0: i32, %arg1: i32) -> (i32, i32) {
    %c0_i32 = arith.constant 0 : i32
    %c0_i32_0 = arith.constant 0 : i32
    %c0_i32_1 = arith.constant 0 : i32
    return %c0_i32, %c0_i32_0 : i32, i32
  }
  func.func @transform_3(%arg0: i32, %arg1: i32) -> (i32, i32) {
    %c0_i32 = arith.constant 0 : i32
    %c0_i32_0 = arith.constant 0 : i32
    %c0_i32_1 = arith.constant 0 : i32
    return %c0_i32, %c0_i32_0 : i32, i32
  }
  func.func @transform_4(%arg0: i32, %arg1: i32) -> (i32, i32) {
    %c0_i32 = arith.constant 0 : i32
    %c0_i32_0 = arith.constant 0 : i32
    %c0_i32_1 = arith.constant 0 : i32
    return %c0_i32, %c0_i32_0 : i32, i32
  }
  func.func @transform_5(%arg0: i32, %arg1: i32) -> (i32, i32) {
    %c0_i32 = arith.constant 0 : i32
    %c0_i32_0 = arith.constant 0 : i32
    %c0_i32_1 = arith.constant 0 : i32
    return %c0_i32, %c0_i32_0 : i32, i32
  }
  func.func @transform_6(%arg0: i32, %arg1: i32) -> (i32, i32) {
    %c0_i32 = arith.constant 0 : i32
    %c0_i32_0 = arith.constant 0 : i32
    %c0_i32_1 = arith.constant 0 : i32
    return %c0_i32, %c0_i32_0 : i32, i32
  }
  func.func @transform_7(%arg0: i32, %arg1: i32) -> (i32, i32) {
    %c0_i32 = arith.constant 0 : i32
    %c0_i32_0 = arith.constant 0 : i32
    %c0_i32_1 = arith.constant 0 : i32
    return %c0_i32, %c0_i32_0 : i32, i32
  }
  func.func @transform_8(%arg0: i32, %arg1: i32) -> (i32, i32) {
    %c0_i32 = arith.constant 0 : i32
    %c0_i32_0 = arith.constant 0 : i32
    %c0_i32_1 = arith.constant 0 : i32
    return %c0_i32, %c0_i32_0 : i32, i32
  }
  func.func @transform_9(%arg0: i32, %arg1: i32) -> (i32, i32, i32) {
    %c0_i32 = arith.constant 0 : i32
    %c0_i32_0 = arith.constant 0 : i32
    %c0_i32_1 = arith.constant 0 : i32
    return %arg0, %c0_i32, %c0_i32_0 : i32, i32, i32
  }
}

</mosaic_0001>

<bundles_post_ra>
// kernel: tpu_custom_call.1
= control target key start
LH: loop header
LB: loop body
LE: loop exit
PB: predicated region body
PF: predicated region fallthrough
CT: control target
= control target key end

     0   :  { %s7682_s0 = inlined_call_operand.vmem [shape: f32[2,4,24,3], index: 0, kind: input, shape index: {}]   ;;  %s7683_s1 = inlined_call_operand.vmem [shape: f32[3,64], index: 1, kind: input, shape index: {}]   ;;  %s7684_s2 = inlined_call_operand.vmem [shape: f32[1,64], index: 2, kind: input, shape index: {}]   ;;  %s7685_s3 = inlined_call_operand.vmem [shape: bf16[64,128], index: 3, kind: input, shape index: {}]   ;;  %s7686_s4 = inlined_call_operand.vmem [shape: f32[1,128], index: 4, kind: input, shape index: {}]   ;;  %s7687_s5 = inlined_call_operand.hbm [shape: bf16[128,512], index: 5, kind: input, shape index: {}]   ;;  %s7688_s6 = inlined_call_operand.vmem [shape: f32[1,512], index: 6, kind: input, shape index: {}]   ;;  %s7689_s7 = inlined_call_operand.hbm [shape: bf16[512,1024], index: 7, kind: input, shape index: {}]   ;;  %s7690_s8 = inlined_call_operand.vmem [shape: f32[1,1024], index: 8, kind: input, shape index: {}]   ;;  %s7691_s9 = inlined_call_operand.hbm [shape: f32[2,4,1024], index: 9, kind: output, shape index: {}]  }
   0x1   :  { %7694 = sst [smem:[#allocation13_spill]] %s7687_s5 }
   0x2   :  { %14 = vsyncpa [#allocation3], 0 }
   0x3   :  { %15 = vsyncpa [#allocation6], 0 }
   0x4   :  { %16 = vsyncpa [#allocation4], 0 }
   0x5   :  { %18 = vsyncpa [#allocation4 + $0x1], 0  ;;  %s6704_s30 = smov 0   ;;  %s6706_s10 = smov 0  }
   0x6   :  { %s6708_s11 = smov 0   ;;  %s6710_s12 = smov 0  }
   0x7   :  { %s6712_s13 = smov 0   ;;  %s6714_s14 = smov 0  }
   0x8 LB: > { %7695 = sst [smem:[#allocation11_spill]] %s6639_s13  ;;  %s4884_s15 = sadd.s32 4294967295, %s6643_s14   ;;  %s6643_s14 = sphi %s6714_s14, %s24_s14   ;;  %s6639_s13 = sphi %s6712_s13, %s7703_s13   ;;  %s6635_s12 = sphi %s6710_s12, %s7702_s12   ;;  %s6631_s11 = sphi %s6708_s11, %s7706_s11   ;;  %s6627_s10 = sphi %s6706_s10, %s7705_s10   ;;  %s6623_s30 = sphi %s6704_s30, %s7704_s30  }
   0x9   : > { %s4885_s16 = sadd.s32 4294967294, %s6643_s14   ;;  %s36_s17 = sadd.s32 1, %s6639_s13 }
   0xa   : > { %s239_s18 = sadd.s32 1, %s6631_s11  ;;  %p38_p0 = scmp.ge.s32.totalorder %s36_s17, 2 }
   0xb   : > { %p249_p1 = scmp.ne.s32.totalorder %s6631_s11, %s6627_s10  ;;  %p250_p2 = scmp.eq.s32.totalorder %s4884_s15, 1 }
   0xc   : > { %p255_p3 = scmp.ne.s32.totalorder %s6627_s10, %s6623_s30  ;;  %s7708_s17 = smov (%p38_p0, %s36_s17), 0 }
   0xd   : > { %7696 = sst [smem:[#allocation12_spill]] %s7708_s17  ;;  %p6744_p4 = por %p250_p2, %p249_p1 }
   0xe   : > { %p256_p5 = scmp.eq.s32.totalorder %s4885_s16, 1  ;;  %s236_s20 = ssub.s32 %s6639_s13, %s7708_s17 }
   0xf   : > { %p4886_p6 = scmp.ge.s32.totalorder %s6643_s14, 1  ;;  %p237_p7 = scmp.eq.s32.totalorder %s236_s20, 0 }
  0x10   : > { %p6751_p8 = por %p256_p5, %p255_p3  ;;  %p263_p9 = scmp.lt.s32.totalorder %s6643_s14, 3 }
  0x11   : > { %s6757_s22 = scalar_select %p237_p7, %s6631_s11, %s239_s18  }
  0x12   : > { %p6759_p10 = pnand %p4886_p6, %p263_p9  ;;  %p6763_p11 = scmp.eq.s32.totalorder %s4884_s15, 0 }
  0x13   : > { %s7701_s5 = sld [smem:[#allocation13_spill]]  ;;  %s6645_s28 = smov [#allocation2]  }
  0x14   : > { %p6386_p12 = pneg %p6759_p10  ;;  %s288_s29 = sshll.u32 %s6645_s28, 4  ;;  %s289_s29 = int_to_ptr.vmem [resolvable:$true] %s288_s29 }
  0x15   : > { %s303_s15 = sshll.u32 %s7689_s7, 4  ;;  %s6646_s20 = smov 256   ;;  %s304_s15 = int_to_ptr.hbm [resolvable:$true] %s303_s15 }
  0x16   : > { %p6387_p13 = pnand %p6763_p11, %p6386_p12  ;;  %s6647_s17 = smov 16  }
  0x17   : > { %s6648_s13 = smov [#allocation5]   ;;  %s6649_s26 = smov 512  }
  0x18   : > { %s305_s25 = sshll.u32 %s6648_s13, 4  ;;  %337 = sbr.rel (%p6759_p10) target bundleno = 1416 (0x588), region = 56  ;;  %s306_s25 = int_to_ptr.vmem [resolvable:$true] %s305_s25 }
  0x19   : > { %s286_s27 = sshll.u32 %s7701_s5, 4  ;;  %s6650_s5 = smov 32   ;;  %s287_s27 = int_to_ptr.hbm [resolvable:$true] %s286_s27 }
  0x1a   : > { %6389 = dma.hbm_to_vmem [thread:$0]  (!%p6387_p13), %s287_s27, 4096, %s289_s29, [#allocation3], %s6646_s20, %s6646_s20, %s6647_s17  }
  0x1b   : > { %6392 = dma.hbm_to_vmem [thread:$0]  (!%p6387_p13), %s304_s15, 32768, %s306_s25, [#allocation6], %s6649_s26, %s6649_s26, %s6650_s5  }
  0x1d   : > { %6610 = dma.done.wait (%p6763_p11), [#allocation3], 4096  }
  0x1e   : > { %6612 = vsyncadd (%p6763_p11), [#allocation3], 4294963200 }
  0x1f   : > { %6614 = dma.done.wait (%p6763_p11), [#allocation6], 32768  }
  0x20   : > { %6616 = vsyncadd (%p6763_p11), [#allocation6], 4294934528  ;;  %p384_p0 = scmp.lt.s32.totalorder %s6635_s12, 1  ;;  %v6651_v0 = vmov 1   ;;  %v6652_v1 = vmov 0   ;;  %v6653_v2 = vmov 2  }
  0x21   : > { %6460 = vset.pattern.permute.xlu1 %v6651_v0  ;;  %6459 = vset.pattern.permute.xlu0 %v6652_v1  ;;  %v6077_v15 = vld [vmem:[%s7685_s3 + $0x18] sm:$0xff]  ;;  %v6076_v17 = vld [vmem:[%s7685_s3 + $0x10] sm:$0xff]  ;;  %v6075_v18 = vld [vmem:[%s7685_s3 + $0x8] sm:$0xff]  ;;  %vm710_vm0 = vcmask 523264   ;;  %vm4578_vm1 = vcmask 1043456   ;;  %vm4596_vm2 = vcmask 1041409  }
  0x22   : > { %s385_s5 = scalar_select %p384_p0, %s6635_s12, 1  ;;  %6461 = vset.pattern.permute.xlu2 %v6653_v2  ;;  %733 = vmatpush.bf16.msra.mxu0 %v6077_v15  ;;  %v6074_v20 = vld [vmem:[%s7685_s3] sm:$0xff]  ;;  %vm4598_vm3 = vcmask 1045509   ;;  %vm4601_vm4 = vcmask 1042434   ;;  %vm4603_vm5 = vcmask 1046534   ;;  %vm4606_vm6 = vcmask 1043459  }
  0x23   : > { %6367 = vmatpush.bf16.msra.mxu1 %v6077_v15  ;;  %6368 = vmatpush.bf16.msra.mxu2 %v6077_v15  ;;  %v6851_v22 = vld [vmem:[%s7683_s1 + $0x1] ss:$0 sm:$0xff]  ;;  %v6856_v23 = vld [vmem:[%s7683_s1] ss:$0 sm:$0xff]  ;;  %v6861_v26 = vld [vmem:[%s7683_s1 + $0x2] ss:$0 sm:$0xff] }
  0x24   : > { %s6375_s13 = smul.u32 96, %s385_s5  ;;  %v6869_v32 = vld [vmem:[%s7684_s2] ss:$0 sm:$0xff]  ;;  %vm4608_vm7 = vcmask 1047559   ;;  %s6366_s16 = sshll.u32 %s6635_s12, 5 }
  0x25   : > { %s4784_s20 = scalar_lea.hbm %s7691_s9, %s6366_s16  ;;  %s6577_s28 = scalar_lea.hbm %s7691_s9, 64 }
  0x26   : > { %s6795_s27 = scalar_lea.vmem %s7682_s0, %s6375_s13  ;;  %734 = vmatpush.bf16.msra.mxu0 %v6076_v17  ;;  %s380_s13 = sand.u32 1, %s6627_s10  }
  0x27   : > { %v394_v3 = vld [vmem:[%s6795_s27] sm:$0xff]  ;;  %v395_v4 = vld [vmem:[%s6795_s27 + $0x8] sm:$0xff]  ;;  %v396_v5 = vld [vmem:[%s6795_s27 + $0x10] sm:$0xff]  ;;  %6369 = vmatpush.bf16.msra.mxu1 %v6076_v17  ;;  %6370 = vmatpush.bf16.msra.mxu2 %v6076_v17  ;;  %s4893_s17 = sshll.u32 %s380_s13, 5  ;;  %s4788_s26 = sshll.u32 %s4784_s20, 4  ;;  %s4789_s26 = int_to_ptr.hbm [resolvable:$true] %s4788_s26 }
  0x28   : > { %482 = vperm.xlu1 %6460, %v394_v3   ;;  %409 = vperm.xlu0 %6459, %v394_v3   ;;  %v397_v6 = vld [vmem:[%s6795_s27 + $0x18] sm:$0xff]  ;;  %v398_v7 = vld [vmem:[%s6795_s27 + $0x20] sm:$0xff]  ;;  %v399_v8 = vld [vmem:[%s6795_s27 + $0x28] sm:$0xff]  ;;  %s7292_s23 = scalar_lea.vmem [#allocation7], %s4893_s17  ;;  %s4773_s12 = scalar_lea.sflag [#allocation4], %s380_s13 }
  0x29   : > { %556 = vperm.xlu2 %6461, %v394_v3   ;;  %v400_v9 = vld [vmem:[%s6795_s27 + $0x30] sm:$0xff]  ;;  %v401_v10 = vld [vmem:[%s6795_s27 + $0x38] sm:$0xff]  ;;  %v403_v11 = vld [vmem:[%s6795_s27 + $0x48] sm:$0xff]  ;;  %s4786_s25 = sshll.u32 %s7292_s23, 4  ;;  %s6571_s5 = sshra.s32 %s4789_s26, 4  ;;  %s4787_s25 = int_to_ptr.vmem [resolvable:$true] %s4786_s25  ;;  %s6572_s5 = int_to_ptr.hbm [resolvable:$true] %s6571_s5 }
  0x2a   : > { %v404_v12 = vld [vmem:[%s6795_s27 + $0x50] sm:$0xff]  ;;  %v402_v13 = vld [vmem:[%s6795_s27 + $0x40] sm:$0xff]  ;;  %v405_v14 = vld [vmem:[%s6795_s27 + $0x58] sm:$0xff]  ;;  %735 = vmatpush.bf16.msra.mxu0 %v6075_v18  ;;  %s6573_s17 = scalar_lea.hbm %s6572_s5, 32  ;;  %p6578_p5 = scmp.lt.s32.totalorder %s6572_s5, %s7691_s9 }
  0x2b   : > { %6371 = vmatpush.bf16.msra.mxu1 %v6075_v18  ;;  %6372 = vmatpush.bf16.msra.mxu2 %v6075_v18  ;;  %p6574_p1 = scmp.ne.s32.totalorder %s6572_s5, %s6573_s17  ;;  %p6579_p6 = scmp.lt.s32.totalorder %s6577_s28, %s6573_s17 }
  0x2d   : > { %p6575_p2 = pnand %p6574_p1, %p6744_p4  ;;  %p6580_p7 = por %p6579_p6, %p6578_p5 }
  0x2e   : > { %736 = vmatpush.bf16.msra.mxu0 %v6074_v20 }
  0x2f   : > { %6373 = vmatpush.bf16.msra.mxu1 %v6074_v20  ;;  %6374 = vmatpush.bf16.msra.mxu2 %v6074_v20  ;;  %p6576_p3 = pneg %p6575_p2 }
  0x30   : > { %486 = vperm.xlu1 %6460, %v395_v4   ;;  %414 = vperm.xlu0 %6459, %v395_v4  }
  0x31   : > { %560 = vperm.xlu2 %6461, %v395_v4   ;;  %p6581_p9 = pnand %p6580_p7, %p6576_p3 }
  0x38   : > { %6462 = vset.pattern.permute.xlu1 %v6652_v1  ;;  %419 = vperm.xlu0 %6459, %v396_v5  }
  0x39   : > { %424 = vperm.xlu1 %6462, %v397_v6   ;;  %6463 = vset.pattern.permute.xlu2 %v6651_v0 }
  0x3a   : > { %490 = vperm.xlu2 %6463, %v396_v5  }
  0x40   : > { %6464 = vset.pattern.permute.xlu0 %v6651_v0 }
  0x41   : > { %6465 = vset.pattern.permute.xlu1 %v6653_v2  ;;  %494 = vperm.xlu0 %6464, %v397_v6  }
  0x42   : > { %564 = vperm.xlu1 %6465, %v396_v5   ;;  %6466 = vset.pattern.permute.xlu2 %v6653_v2 }
  0x43   : > { %568 = vperm.xlu2 %6466, %v397_v6  }
  0x49   : > { %498 = vperm.xlu0 %6464, %v398_v7  }
  0x4a   : > { %6467 = vset.pattern.permute.xlu1 %v6652_v1 }
  0x4b   : > { %429 = vperm.xlu1 %6467, %v398_v7   ;;  %6468 = vset.pattern.permute.xlu2 %v6652_v1 }
  0x4c   : > { %434 = vperm.xlu2 %6468, %v399_v8  }
  0x51   : > { %6471 = vset.pattern.permute.xlu0 %v6653_v2 }
  0x52   : > { %576 = vperm.xlu0 %6471, %v399_v8  }
  0x53   : > { %6469 = vset.pattern.permute.xlu1 %v6651_v0 }
  0x54   : > { %502 = vperm.xlu1 %6469, %v399_v8   ;;  %6470 = vset.pattern.permute.xlu2 %v6653_v2 }
  0x55   : > { %572 = vperm.xlu2 %6470, %v398_v7  }
  0x5a   : > { %580 = vperm.xlu0 %6471, %v400_v9  }
  0x5c   : > { %6472 = vset.pattern.permute.xlu1 %v6652_v1 }
  0x5d   : > { %439 = vperm.xlu1 %6472, %v400_v9   ;;  %6473 = vset.pattern.permute.xlu2 %v6652_v1 }
  0x5e   : > { %444 = vperm.xlu2 %6473, %v401_v10  }
  0x62   : > { %6478 = vset.pattern.permute.xlu0 %v6652_v1 }
  0x63   : > { %454 = vperm.xlu0 %6478, %v403_v11  }
  0x65   : > { %6474 = vset.pattern.permute.xlu1 %v6651_v0 }
  0x66   : > { %506 = vperm.xlu1 %6474, %v400_v9   ;;  %6475 = vset.pattern.permute.xlu2 %v6651_v0 }
  0x67   : > { %510 = vperm.xlu2 %6475, %v401_v10  }
  0x6b   : > { %459 = vperm.xlu0 %6478, %v404_v12  }
  0x6e   : > { %6476 = vset.pattern.permute.xlu1 %v6653_v2 }
  0x6f   : > { %584 = vperm.xlu1 %6476, %v401_v10   ;;  %6477 = vset.pattern.permute.xlu2 %v6652_v1 }
  0x70   : > { %449 = vperm.xlu2 %6477, %v402_v13  }
  0x73   : > { %6485 = vset.pattern.permute.xlu0 %v6651_v0 }
  0x74   : > { %526 = vperm.xlu0 %6485, %v405_v14  }
  0x77   : > { %6479 = vset.pattern.permute.xlu1 %v6651_v0 }
  0x78   : > { %514 = vperm.xlu1 %6479, %v402_v13   ;;  %6480 = vset.pattern.permute.xlu2 %v6651_v0 }
  0x79   : > { %518 = vperm.xlu2 %6480, %v403_v11  }
  0x7c   : > { %6488 = vset.pattern.permute.xlu0 %v6653_v2 }
  0x80   : > { %6481 = vset.pattern.permute.xlu1 %v6653_v2 }
  0x81   : > { %588 = vperm.xlu1 %6481, %v402_v13   ;;  %6482 = vset.pattern.permute.xlu2 %v6653_v2 }
  0x82   : > { %592 = vperm.xlu2 %6482, %v403_v11  }
  0x83   : > { %v557_v16 = vpop.permute.xlu2 %556 }
  0x84   : > { %v604_v31 = vmul.f32 %v6861_v26, %v557_v16 }
  0x89   : > { %6483 = vset.pattern.permute.xlu1 %v6652_v1 }
  0x8a   : > { %464 = vperm.xlu1 %6483, %v405_v14   ;;  %6484 = vset.pattern.permute.xlu2 %v6651_v0 }
  0x8b   : > { %522 = vperm.xlu2 %6484, %v404_v12   ;;  %v561_v19 = vpop.permute.xlu2 %560 }
  0x8c   : > { %v605_v38 = vmul.f32 %v6861_v26, %v561_v19 }
  0x92   : > { %6486 = vset.pattern.permute.xlu1 %v6653_v2 }
  0x93   : > { %596 = vperm.xlu1 %6486, %v404_v12   ;;  %6487 = vset.pattern.permute.xlu2 %v6653_v2 }
  0x94   : > { %600 = vperm.xlu2 %6487, %v405_v14   ;;  %v491_v21 = vpop.permute.xlu2 %490 }
  0x95   : > { %v532_v51 = vmul.f32 %v6851_v22, %v491_v21 }
  0x9a   : > { %v483_v24 = vpop.permute.xlu1 %482  ;;  %v410_v25 = vpop.permute.xlu0 %409 }
  0x9b   : > { %v530_v27 = vmul.f32 %v6851_v22, %v483_v24  ;;  %v468_v28 = vmul.f32 %v6856_v23, %v410_v25 }
  0x9d   : > { %v542_v29 = vadd.f32 %v530_v27, %v468_v28  ;;  %v569_v30 = vpop.permute.xlu2 %568 }
  0x9e   : > { %v607_v56 = vmul.f32 %v6861_v26, %v569_v30 }
  0x9f   : > { %v616_v33 = vadd.f32 %v604_v31, %v542_v29 }
  0xa1   : > { %v632_v39 = vadd.f32 %v6869_v32, %v616_v33 }
  0xa2   : > { %v487_v34 = vpop.permute.xlu1 %486  ;;  %v415_v35 = vpop.permute.xlu0 %414 }
  0xa3   : > { %v531_v36 = vmul.f32 %v6851_v22, %v487_v34  ;;  %v469_v37 = vmul.f32 %v6856_v23, %v415_v35  ;;  %v644_v44 = vmul.f32 0.01, %v632_v39 }
  0xa5   : > { %v543_v40 = vadd.f32 %v531_v36, %v469_v37  ;;  %v656_v48 = vmax.f32 %v632_v39, %v644_v44 }
  0xa6   : > { %v435_v42 = vpop.permute.xlu2 %434 }
  0xa7   : > { %v617_v41 = vadd.f32 %v605_v38, %v543_v40  ;;  %v473_v18 = vmul.f32 %v6856_v23, %v435_v42 }
  0xa9   : > { %v633_v43 = vadd.f32 %v6869_v32, %v617_v41 }
  0xaa   : > { %v420_v45 = vpop.permute.xlu0 %419 }
  0xab   : > { %v425_v46 = vpop.permute.xlu1 %424  ;;  %v645_v47 = vmul.f32 0.01, %v633_v43  ;;  %v470_v52 = vmul.f32 %v6856_v23, %v420_v45 }
  0xac   : > { %v471_v55 = vmul.f32 %v6856_v23, %v425_v46 }
  0xad   : > { %v657_v49 = vmax.f32 %v633_v43, %v645_v47  ;;  %v544_v59 = vadd.f32 %v532_v51, %v470_v52 }
  0xaf   : > { %v668_v50 = vpack.c.bf16 %v657_v49, %v656_v48  ;;  %v573_v53 = vpop.permute.xlu2 %572 }
  0xb0   : > { %v608_v13 = vmul.f32 %v6861_v26, %v573_v53 }
  0xb1   : > { %4911 = vmatmul.msk.bf16.vlgmr.msra.gmra.mxu0 %vm710_vm0, %v668_v50 }
  0xb3   : > { %v495_v54 = vpop.permute.xlu0 %494 }
  0xb4   : > { %v533_v57 = vmul.f32 %v6851_v22, %v495_v54  ;;  %v565_v58 = vpop.permute.xlu1 %564 }
  0xb5   : > { %v606_v60 = vmul.f32 %v6861_v26, %v565_v58 }
  0xb6   : > { %v545_v61 = vadd.f32 %v533_v57, %v471_v55 }
  0xb7   : > { %v618_v62 = vadd.f32 %v606_v60, %v544_v59 }
  0xb8   : > { %v619_v63 = vadd.f32 %v607_v56, %v545_v61  ;;  %v445_v5 = vpop.permute.xlu2 %444 }
  0xb9   : > { %v634_v0 = vadd.f32 %v6869_v32, %v618_v62  ;;  %v475_v43 = vmul.f32 %v6856_v23, %v445_v5 }
  0xba   : > { %v635_v1 = vadd.f32 %v6869_v32, %v619_v63 }
  0xbb   : > { %v646_v2 = vmul.f32 0.01, %v634_v0  ;;  %v499_v3 = vpop.permute.xlu0 %498 }
  0xbc   : > { %v647_v4 = vmul.f32 0.01, %v635_v1  ;;  %v534_v7 = vmul.f32 %v6851_v22, %v499_v3 }
  0xbd   : > { %v430_v6 = vpop.permute.xlu1 %429  ;;  %v658_v8 = vmax.f32 %v634_v0, %v646_v2 }
  0xbe   : > { %v472_v9 = vmul.f32 %v6856_v23, %v430_v6  ;;  %v659_v10 = vmax.f32 %v635_v1, %v647_v4 }
  0xc0   : > { %v669_v11 = vpack.c.bf16 %v659_v10, %v658_v8  ;;  %v546_v12 = vadd.f32 %v534_v7, %v472_v9  ;;  %v5031_v7 = vld [vmem:[#allocation2 + $0xe0] sm:$0xf]  ;;  %v6108_v8 = vld [vmem:[#allocation2 + $0xec] sm:$0xf0]  ;;  %v6106_v9 = vld [vmem:[#allocation2 + $0xe4] sm:$0xf] }
  0xc1   : > { %v511_v17 = vpop.permute.xlu2 %510 }
  0xc2   : > { %4912 = vmatmul.msk.bf16.gmra.mxu0 %vm710_vm0, %v669_v11  ;;  %v620_v15 = vadd.f32 %v608_v13, %v546_v12  ;;  %v537_v44 = vmul.f32 %v6851_v22, %v511_v17  ;;  %v5032_v11 = vor.u32 %v6108_v8, %v5031_v7  ;;  %v5033_v12 = vld [vmem:[#allocation2 + $0xf0] sm:$0xf0]  ;;  %v5039_v13 = vld [vmem:[#allocation2 + $0xe8] sm:$0xf] }
  0xc3   : > { %v5036_v17 = vor.u32 %v6106_v9, %v5033_v12 }
  0xc4   : > { %v577_v14 = vpop.permute.xlu0 %576  ;;  %v636_v21 = vadd.f32 %v6869_v32, %v620_v15  ;;  %v549_v50 = vadd.f32 %v537_v44, %v475_v43  ;;  %1000 = vmatpush.bf16.msrb.mxu1 %v5032_v11  ;;  %v6098_v43 = vld [vmem:[#allocation2 + $0xa4] sm:$0xf]  ;;  %v5001_v44 = vld [vmem:[#allocation2 + $0xb0] sm:$0xf0] }
  0xc5   : > { %v609_v20 = vmul.f32 %v6861_v26, %v577_v14  ;;  %v6109_v14 = vld [vmem:[#allocation2 + $0xf4] sm:$0xf0]  ;;  %1039 = vmatpush.bf16.msrb.mxu2 %v5036_v17 }
  0xc6   : > { %v503_v16 = vpop.permute.xlu1 %502  ;;  %v648_v27 = vmul.f32 0.01, %v636_v21 }
  0xc7   : > { %v535_v19 = vmul.f32 %v6851_v22, %v503_v16 }
  0xc8   : > { %v660_v33 = vmax.f32 %v636_v21, %v648_v27  ;;  %v5015_v21 = vld [vmem:[#allocation2 + $0xc0] sm:$0xf]  ;;  %v6102_v27 = vld [vmem:[#allocation2 + $0xc4] sm:$0xf] }
  0xc9   : > { %v547_v24 = vadd.f32 %v535_v19, %v473_v18  ;;  %v5040_v18 = vor.u32 %v6109_v14, %v5039_v13  ;;  %v6107_v19 = vld [vmem:[#allocation2 + $0xec] sm:$0xf] }
  0xca   : > { %v450_v29 = vpop.permute.xlu2 %449 }
  0xcb   : > { %v621_v25 = vadd.f32 %v609_v20, %v547_v24  ;;  %v476_v5 = vmul.f32 %v6856_v23, %v450_v29  ;;  %v5041_v20 = vld [vmem:[#allocation2 + $0xf8] sm:$0xf0]  ;;  %1078 = vmatpush.bf16.msra.mxu3 %v5040_v18 }
  0xcc   : > { %v581_v36 = vpop.permute.xlu0 %580  ;;  %v5044_v24 = vor.u32 %v6107_v19, %v5041_v20 }
  0xcd   : > { %v637_v28 = vadd.f32 %v6869_v32, %v621_v25  ;;  %v610_v41 = vmul.f32 %v6861_v26, %v581_v36  ;;  %v6104_v25 = vld [vmem:[#allocation2 + $0xcc] sm:$0xf0] }
  0xce   : > { %1117 = vmatpush.bf16.msrb.mxu0 %v5044_v24 }
  0xcf   : > { %v649_v30 = vmul.f32 0.01, %v637_v28  ;;  %v440_v31 = vpop.permute.xlu1 %439 }
  0xd0   : > { %v474_v39 = vmul.f32 %v6856_v23, %v440_v31 }
  0xd1   : > { %v661_v34 = vmax.f32 %v637_v28, %v649_v30  ;;  %v5017_v28 = vld [vmem:[#allocation2 + $0xd0] sm:$0xf0]  ;;  %v5016_v30 = vor.u32 %v6104_v25, %v5015_v21 }
  0xd2   : > { %v5020_v31 = vor.u32 %v6102_v27, %v5017_v28  ;;  %v4967_v27 = vld [vmem:[#allocation2 + $0x60] sm:$0xf] }
  0xd3   : > { %v670_v35 = vpack.c.bf16 %v661_v34, %v660_v33  ;;  %v519_v38 = vpop.permute.xlu2 %518  ;;  %v5023_v33 = vld [vmem:[#allocation2 + $0xc8] sm:$0xf]  ;;  %v6105_v34 = vld [vmem:[#allocation2 + $0xd4] sm:$0xf0]  ;;  %1001 = vmatpush.bf16.msrb.mxu1 %v5016_v30 }
  0xd4   : > { %v539_v48 = vmul.f32 %v6851_v22, %v519_v38  ;;  %v5024_v36 = vor.u32 %v6105_v34, %v5023_v33  ;;  %v4999_v38 = vld [vmem:[#allocation2 + $0xa0] sm:$0xf]  ;;  %1040 = vmatpush.bf16.msrb.mxu2 %v5020_v31  ;;  %v4975_v30 = vld [vmem:[#allocation2 + $0x68] sm:$0xf]  ;;  %v6093_v31 = vld [vmem:[#allocation2 + $0x74] sm:$0xf0] }
  0xd5   : > { %4913 = vmatmul.msk.bf16.vlgmr.msra.gmra.mxu1 %vm710_vm0, %v670_v35  ;;  %v455_v46 = vpop.permute.xlu0 %454  ;;  %v6103_v35 = vld [vmem:[#allocation2 + $0xcc] sm:$0xf]  ;;  %v4976_v34 = vor.u32 %v6093_v31, %v4975_v30 }
  0xd6   : > { %v477_v49 = vmul.f32 %v6856_v23, %v455_v46  ;;  %1079 = vmatpush.bf16.msra.mxu3 %v5024_v36  ;;  %v4977_v36 = vld [vmem:[#allocation2 + $0x78] sm:$0xf0] }
  0xd8   : > { %v507_v37 = vpop.permute.xlu1 %506  ;;  %v551_v55 = vadd.f32 %v539_v48, %v477_v49  ;;  %v6099_v48 = vld [vmem:[#allocation2 + $0xac] sm:$0xf]  ;;  %v5009_v49 = vld [vmem:[#allocation2 + $0xb8] sm:$0xf0] }
  0xd9   : > { %v536_v40 = vmul.f32 %v6851_v22, %v507_v37  ;;  %v5025_v37 = vld [vmem:[#allocation2 + $0xd8] sm:$0xf0] }
  0xdb   : > { %v548_v42 = vadd.f32 %v536_v40, %v474_v39  ;;  %v6100_v39 = vld [vmem:[#allocation2 + $0xac] sm:$0xf0] }
  0xdc   : > { %v593_v53 = vpop.permute.xlu2 %592  ;;  %v5000_v46 = vor.u32 %v6100_v39, %v4999_v38  ;;  %v6088_v38 = vld [vmem:[#allocation2 + $0x4c] sm:$0xf0]  ;;  %v6086_v39 = vld [vmem:[#allocation2 + $0x44] sm:$0xf] }
  0xdd   : > { %v622_v45 = vadd.f32 %v610_v41, %v548_v42  ;;  %v613_v56 = vmul.f32 %v6861_v26, %v593_v53  ;;  %v6911_v3 = vpop.permute.xlu0 %459  ;;  %v5028_v42 = vor.u32 %v6103_v35, %v5025_v37  ;;  %v6091_v35 = vld [vmem:[#allocation2 + $0x6c] sm:$0xf] }
  0xde   : > { %1002 = vmatpush.bf16.msrb.mxu1 %v5000_v46  ;;  %v6087_v46 = vld [vmem:[#allocation2 + $0x4c] sm:$0xf] }
  0xdf   : > { %v638_v51 = vadd.f32 %v6869_v32, %v622_v45  ;;  %v625_v60 = vadd.f32 %v613_v56, %v551_v55  ;;  %v5007_v45 = vld [vmem:[#allocation2 + $0xa8] sm:$0xf]  ;;  %v6096_v55 = vld [vmem:[#allocation2 + $0x8c] sm:$0xf0]  ;;  %1118 = vmatpush.bf16.msrb.mxu0 %v5028_v42 }
  0xe0   : > { %v4959_v42 = vld [vmem:[#allocation2 + $0x48] sm:$0xf] }
  0xe1   : > { %v585_v47 = vpop.permute.xlu1 %584  ;;  %v650_v57 = vmul.f32 0.01, %v638_v51  ;;  %v6907_v1 = vadd.f32 %v6869_v32, %v625_v60  ;;  %v4991_v60 = vld [vmem:[#allocation2 + $0x88] sm:$0xf] }
  0xe2   : > { %v611_v52 = vmul.f32 %v6861_v26, %v585_v47  ;;  %v6101_v47 = vld [vmem:[#allocation2 + $0xb4] sm:$0xf0] }
  0xe3   : > { %v662_v62 = vmax.f32 %v638_v51, %v650_v57  ;;  %v6914_v4 = vmul.f32 0.01, %v6907_v1  ;;  %v5008_v53 = vor.u32 %v6101_v47, %v5007_v45  ;;  %v5012_v57 = vor.u32 %v6099_v48, %v5009_v49  ;;  %v4961_v47 = vld [vmem:[#allocation2 + $0x58] sm:$0xf0]  ;;  %v4935_v49 = vld [vmem:[#allocation2 + $0x20] sm:$0xf] }
  0xe4   : > { %v623_v54 = vadd.f32 %v611_v52, %v549_v50  ;;  %v5004_v52 = vor.u32 %v6098_v43, %v5001_v44  ;;  %v6089_v43 = vld [vmem:[#allocation2 + $0x54] sm:$0xf0]  ;;  %v4964_v48 = vor.u32 %v6087_v46, %v4961_v47  ;;  %v6170_v47 = vld [vmem:[#allocation5 + $0x1dc] sm:$0xf0] }
  0xe5   : > { %v6917_v6 = vpop.permute.xlu2 %522  ;;  %1080 = vmatpush.bf16.msra.mxu3 %v5008_v53  ;;  %1119 = vmatpush.bf16.msrb.mxu0 %v5012_v57  ;;  %v4960_v45 = vor.u32 %v6089_v43, %v4959_v42  ;;  %v4937_v53 = vld [vmem:[#allocation2 + $0x30] sm:$0xf0]  ;;  %v5783_v42 = vld [vmem:[#allocation5 + $0x5c0] sm:$0xf] }
  0xe6   : > { %v639_v58 = vadd.f32 %v6869_v32, %v623_v54  ;;  %v527_v41 = vpop.permute.xlu0 %526  ;;  %v4983_v54 = vld [vmem:[#allocation2 + $0x80] sm:$0xf]  ;;  %1041 = vmatpush.bf16.msrb.mxu2 %v5004_v52 }
  0xe7   : > { %v541_v56 = vmul.f32 %v6851_v22, %v527_v41  ;;  %v4984_v9 = vor.u32 %v6096_v55, %v4983_v54  ;;  %v4953_v41 = vld [vmem:[#allocation2 + $0x50] sm:$0xf0]  ;;  %v4943_v54 = vld [vmem:[#allocation2 + $0x28] sm:$0xf]  ;;  %v6085_v55 = vld [vmem:[#allocation2 + $0x34] sm:$0xf0] }
  0xe8   : > { %v651_v59 = vmul.f32 0.01, %v639_v58  ;;  %v4956_v44 = vor.u32 %v6086_v39, %v4953_v41  ;;  %v4944_v57 = vor.u32 %v6085_v55, %v4943_v54  ;;  %v6298_v43 = vld [vmem:[#allocation5 + $0x5dc] sm:$0xf0] }
  0xe9   : > { %1003 = vmatpush.bf16.msrb.mxu1 %v4984_v9  ;;  %v5784_v46 = vor.u32 %v6298_v43, %v5783_v42 }
  0xea   : > { %v515_v61 = vpop.permute.xlu1 %514  ;;  %v663_v63 = vmax.f32 %v639_v58, %v651_v59  ;;  %v6094_v58 = vld [vmem:[#allocation2 + $0x84] sm:$0xf]  ;;  %v4985_v59 = vld [vmem:[#allocation2 + $0x90] sm:$0xf0] }
  0xeb   : > { %v538_v2 = vmul.f32 %v6851_v22, %v515_v61  ;;  %v4988_v11 = vor.u32 %v6094_v58, %v4985_v59  ;;  %v6083_v58 = vld [vmem:[#allocation2 + $0x2c] sm:$0xf]  ;;  %v4945_v59 = vld [vmem:[#allocation2 + $0x38] sm:$0xf0] }
  0xec   : > { %v671_v0 = vpack.c.bf16 %v663_v63, %v662_v62  ;;  %v665_v63 = vmax.f32 %v6907_v1, %v6914_v4  ;;  %v540_v1 = vmul.f32 %v6851_v22, %v6917_v6  ;;  %v478_v4 = vmul.f32 %v6856_v23, %v6911_v3  ;;  %v6092_v22 = vld [vmem:[#allocation2 + $0x6c] sm:$0xf0]  ;;  %v6090_v6 = vld [vmem:[#allocation2 + $0x64] sm:$0xf] }
  0xed   : > { %v550_v15 = vadd.f32 %v538_v2, %v476_v5  ;;  %v6095_v2 = vld [vmem:[#allocation2 + $0x8c] sm:$0xf]  ;;  %v4993_v5 = vld [vmem:[#allocation2 + $0x98] sm:$0xf0]  ;;  %1042 = vmatpush.bf16.msrb.mxu2 %v4988_v11  ;;  %v4968_v3 = vor.u32 %v6092_v22, %v4967_v27 }
  0xee   : > { %4914 = vmatmul.msk.bf16.gmra.mxu1 %vm710_vm0, %v671_v0  ;;  %v601_v51 = vpop.permute.xlu2 %600  ;;  %v6097_v0 = vld [vmem:[#allocation2 + $0x94] sm:$0xf0]  ;;  %v4996_v14 = vor.u32 %v6095_v2, %v4993_v5  ;;  %v552_v17 = vadd.f32 %v540_v1, %v478_v4  ;;  %v4921_v2 = vld [vmem:[#allocation2 + $0x10] sm:$0xf0]  ;;  %v4927_v5 = vld [vmem:[#allocation2 + $0x8] sm:$0xf] }
  0xef   : > { %v615_v8 = vmul.f32 %v6861_v26, %v601_v51  ;;  %v4992_v12 = vor.u32 %v6097_v0, %v4991_v60  ;;  %1004 = vmatpush.bf16.msrb.mxu1 %v4968_v3  ;;  %v6082_v51 = vld [vmem:[#allocation2 + $0x24] sm:$0xf]  ;;  %v4948_v60 = vor.u32 %v6083_v58, %v4945_v59  ;;  %v4929_v11 = vld [vmem:[#allocation2 + $0x18] sm:$0xf0]  ;;  %v5495_v58 = vld [vmem:[#allocation5 + $0x380] sm:$0xf] }
  0xf0   : > { %1120 = vmatpush.bf16.msrb.mxu0 %v4996_v14  ;;  %v6938_v14 = vld [vmem:[%s7686_s4] ss:$0 sm:$0xff] }
  0xf1   : > { %1081 = vmatpush.bf16.msra.mxu3 %v4992_v12  ;;  %v6226_v59 = vld [vmem:[#allocation5 + $0x39c] sm:$0xf0] }
  0xf3   : > { %v589_v10 = vpop.permute.xlu1 %588 }
  0xf4   : > { %v612_v16 = vmul.f32 %v6861_v26, %v589_v10 }
  0xf5   : > { %1082 = vmatpush.bf16.msra.mxu3 %v4976_v34 }
  0xf6   : > { %v624_v29 = vadd.f32 %v612_v16, %v550_v15 }
  0xf8   : > { %v640_v40 = vadd.f32 %v6869_v32, %v624_v29  ;;  %v4969_v29 = vld [vmem:[#allocation2 + $0x70] sm:$0xf0] }
  0xf9   : > { %v4972_v33 = vor.u32 %v6090_v6, %v4969_v29  ;;  %1083 = vmatpush.bf16.msra.mxu3 %v4960_v45 }
  0xfa   : > { %v652_v50 = vmul.f32 0.01, %v640_v40 }
  0xfb   : > { %1043 = vmatpush.bf16.msrb.mxu2 %v4972_v33 }
  0xfc   : > { %v465_v61 = vpop.permute.xlu1 %464  ;;  %v664_v62 = vmax.f32 %v640_v40, %v652_v50  ;;  %v6084_v50 = vld [vmem:[#allocation2 + $0x2c] sm:$0xf0] }
  0xfd   : > { %v479_v7 = vmul.f32 %v6856_v23, %v465_v61  ;;  %v4936_v52 = vor.u32 %v6084_v50, %v4935_v49  ;;  %1084 = vmatpush.bf16.msra.mxu3 %v4944_v57  ;;  %v4919_v61 = vld [vmem:[#allocation2] sm:$0xf] }
  0xfe   : > { %v672_v10 = vpack.c.bf16 %v665_v63, %v664_v62  ;;  %v6080_v62 = vld [vmem:[#allocation2 + $0xc] sm:$0xf0]  ;;  %v6078_v63 = vld [vmem:[#allocation2 + $0x4] sm:$0xf] }
  0xff   : > { %v553_v13 = vadd.f32 %v541_v56, %v479_v7  ;;  %1044 = vmatpush.bf16.msrb.mxu2 %v4956_v44  ;;  %v4940_v56 = vor.u32 %v6082_v51, %v4937_v53  ;;  %v4920_v0 = vor.u32 %v6080_v62, %v4919_v61  ;;  %v6081_v7 = vld [vmem:[#allocation2 + $0x14] sm:$0xf0]  ;;  %v5271_v44 = vld [vmem:[#allocation5 + $0x1c0] sm:$0xf]  ;;  %v5496_v61 = vor.u32 %v6226_v59, %v5495_v58 }
 0x100   : > { %4915 = vmatmul.msk.bf16.vlgmr.msra.gmra.mxu2 %vm710_vm0, %v672_v10  ;;  %v4928_v9 = vor.u32 %v6081_v7, %v4927_v5  ;;  %v6079_v10 = vld [vmem:[#allocation2 + $0xc] sm:$0xf]  ;;  %v5272_v50 = vor.u32 %v6170_v47, %v5271_v44  ;;  %v6039_v51 = vld [vmem:[#allocation5 + $0x7c0] sm:$0xf] }
 0x101   : > { %v627_v15 = vadd.f32 %v615_v8, %v553_v13  ;;  %v4924_v8 = vor.u32 %v6078_v63, %v4921_v2  ;;  %v4932_v12 = vor.u32 %v6079_v10, %v4929_v11  ;;  %v6290_v62 = vld [vmem:[#allocation5 + $0x59c] sm:$0xf0] }
 0x102   : > { %1085 = vmatpush.bf16.msra.mxu3 %v4928_v9  ;;  %v5239_v63 = vld [vmem:[#allocation5 + $0x180] sm:$0xf] }
 0x103   : > { %v643_v18 = vadd.f32 %v6869_v32, %v627_v15  ;;  %1045 = vmatpush.bf16.msrb.mxu2 %v4940_v56  ;;  %v6354_v9 = vld [vmem:[#allocation5 + $0x79c] sm:$0xf0] }
 0x104   : > { %v5463_v10 = vld [vmem:[#allocation5 + $0x340] sm:$0xf] }
 0x105   : > { %v597_v16 = vpop.permute.xlu1 %596  ;;  %v655_v21 = vmul.f32 0.01, %v643_v18  ;;  %v5879_v58 = vld [vmem:[#allocation5 + $0x680] sm:$0xf] }
 0x106   : > { %v614_v19 = vmul.f32 %v6861_v26, %v597_v16  ;;  %v4980_v26 = vor.u32 %v6091_v35, %v4977_v36  ;;  %2908 = vmatpush.bf16.msrb.mxu3 %v5784_v46  ;;  %v6138_v46 = vld [vmem:[#allocation5 + $0xdc] sm:$0xf0] }
 0x107   : > { %v667_v23 = vmax.f32 %v643_v18, %v655_v21  ;;  %1046 = vmatpush.bf16.msrb.mxu2 %v4924_v8  ;;  %v6007_v8 = vld [vmem:[#allocation5 + $0x780] sm:$0xf] }
 0x108   : > { %v626_v20 = vadd.f32 %v614_v19, %v552_v17  ;;  %1121 = vmatpush.bf16.msrb.mxu0 %v4980_v26  ;;  %v6008_v11 = vor.u32 %v6354_v9, %v6007_v8  ;;  %v6322_v59 = vld [vmem:[#allocation5 + $0x69c] sm:$0xf0] }
 0x109   : > { %v5847_v8 = vld [vmem:[#allocation5 + $0x640] sm:$0xf] }
 0x10a   : > { %v642_v24 = vadd.f32 %v6869_v32, %v626_v20  ;;  %v4951_v32 = vld [vmem:[#allocation2 + $0x40] sm:$0xf] }
 0x10b   : > { %v4952_v40 = vor.u32 %v6088_v38, %v4951_v32  ;;  %v5527_v32 = vld [vmem:[#allocation5 + $0x3c0] sm:$0xf] }
 0x10c   : > { %v654_v25 = vmul.f32 0.01, %v642_v24  ;;  %1122 = vmatpush.bf16.msrb.mxu0 %v4964_v48  ;;  %v6234_v38 = vld [vmem:[#allocation5 + $0x3dc] sm:$0xf0] }
 0x10d   : > { %1005 = vmatpush.bf16.msrb.mxu1 %v4952_v40  ;;  %v5528_v39 = vor.u32 %v6234_v38, %v5527_v32 }
 0x10e   : > { %v666_v28 = vmax.f32 %v642_v24, %v654_v25 }
 0x10f   : > { %2869 = vmatpush.bf16.msra.mxu2 %v5528_v39 }
 0x110   : > { %v673_v37 = vpack.c.bf16 %v667_v23, %v666_v28  ;;  %1123 = vmatpush.bf16.msrb.mxu0 %v4948_v60  ;;  %v5751_v60 = vld [vmem:[#allocation5 + $0x580] sm:$0xf] }
 0x111   : > { %1006 = vmatpush.bf16.msrb.mxu1 %v4936_v52  ;;  %v6362_v52 = vld [vmem:[#allocation5 + $0x7dc] sm:$0xf0]  ;;  %v5752_v2 = vor.u32 %v6290_v62, %v5751_v60 }
 0x112   : > { %4916 = vmatmul.msk.bf16.gmra.mxu2 %vm710_vm0, %v673_v37  ;;  %v6040_v54 = vor.u32 %v6362_v52, %v6039_v51  ;;  %v5655_v62 = vld [vmem:[#allocation5 + $0x4c0] sm:$0xf] }
 0x113   : > { %2870 = vmatpush.bf16.msra.mxu2 %v5496_v61  ;;  %2909 = vmatpush.bf16.msrb.mxu3 %v5752_v2 }
 0x114   : > { %1124 = vmatpush.bf16.msrb.mxu0 %v4932_v12  ;;  %v6218_v12 = vld [vmem:[#allocation5 + $0x35c] sm:$0xf0] }
 0x115   : > { %1007 = vmatpush.bf16.msrb.mxu1 %v4920_v0  ;;  %v6162_v0 = vld [vmem:[#allocation5 + $0x19c] sm:$0xf0] }
 0x116   : > { %v5240_v5 = vor.u32 %v6162_v0, %v5239_v63  ;;  %v6266_v63 = vld [vmem:[#allocation5 + $0x4dc] sm:$0xf0]  ;;  %v5880_v0 = vor.u32 %v6322_v59, %v5879_v58 }
 0x117   : > { %v5656_v2 = vor.u32 %v6266_v63, %v5655_v62 }
 0x118   : > { %2947 = vmatpush.bf16.msra.mxu0 %v6040_v54 }
 0x119   : > { %2830 = vmatpush.bf16.msra.mxu1 %v5272_v50  ;;  %v6330_v50 = vld [vmem:[#allocation5 + $0x6dc] sm:$0xf0] }
 0x11c   : > { %2948 = vmatpush.bf16.msra.mxu0 %v6008_v11  ;;  %v5367_v11 = vld [vmem:[#allocation5 + $0x280] sm:$0xf] }
 0x11d   : > { %2831 = vmatpush.bf16.msra.mxu1 %v5240_v5 }
 0x12e   : > { %v738_v13 = vpop.f32.mrf.mxu0 }
 0x12f   : > { %v739_v1 = vadd.f32 %v6938_v14, %v738_v13  ;;  %v5719_v13 = vld [vmem:[#allocation5 + $0x540] sm:$0xf] }
 0x131   : > { %v768_v15 = vmul.f32 0.01, %v739_v1 }
 0x133   : > { %v780_v18 = vmax.f32 %v739_v1, %v768_v15  ;;  %v6282_v1 = vld [vmem:[#allocation5 + $0x55c] sm:$0xf0] }
 0x134   : > { %v5720_v15 = vor.u32 %v6282_v1, %v5719_v13  ;;  %v5623_v1 = vld [vmem:[#allocation5 + $0x480] sm:$0xf] }
 0x136   : > { %v740_v4 = vpop.f32.mrf.mxu0  ;;  %2910 = vmatpush.bf16.msrb.mxu3 %v5720_v15  ;;  %v6258_v15 = vld [vmem:[#allocation5 + $0x49c] sm:$0xf0] }
 0x137   : > { %v741_v16 = vadd.f32 %v6938_v14, %v740_v4  ;;  %v5464_v4 = vor.u32 %v6218_v12, %v5463_v10  ;;  %v6314_v10 = vld [vmem:[#allocation5 + $0x65c] sm:$0xf0] }
 0x138   : > { %v6194_v12 = vld [vmem:[#allocation5 + $0x29c] sm:$0xf0]  ;;  %v5848_v13 = vor.u32 %v6314_v10, %v5847_v8 }
 0x139   : > { %v769_v17 = vmul.f32 0.01, %v741_v16  ;;  %2871 = vmatpush.bf16.msra.mxu2 %v5464_v4  ;;  %v5368_v4 = vor.u32 %v6194_v12, %v5367_v11 }
 0x13b   : > { %v781_v19 = vmax.f32 %v741_v16, %v769_v17  ;;  %v5207_v16 = vld [vmem:[#allocation5 + $0x140] sm:$0xf] }
 0x13c   : > { %v6154_v17 = vld [vmem:[#allocation5 + $0x15c] sm:$0xf0] }
 0x13d   : > { %v792_v20 = vpack.c.bf16 %v781_v19, %v780_v18  ;;  %v5975_v18 = vld [vmem:[#allocation5 + $0x740] sm:$0xf] }
 0x13f   : > { %v743_v21 = vpop.f32.mrf.mxu0  ;;  %1008 = vmatmul.bf16.vlgmr.msrb.gmra.mxu1 %v792_v20  ;;  %1047 = vmatmul.bf16.vlgmr.msrb.gmra.mxu2 %v792_v20 }
 0x140   : > { %1086 = vmatmul.bf16.vlgmr.msra.gmra.mxu3 %v792_v20  ;;  %1125 = vmatmul.bf16.vlgmr.msrb.gmra.mxu0 %v792_v20  ;;  %v744_v24 = vadd.f32 %v6938_v14, %v743_v21  ;;  %v5208_v20 = vor.u32 %v6154_v17, %v5207_v16  ;;  %v6346_v21 = vld [vmem:[#allocation5 + $0x75c] sm:$0xf0]  ;;  %v5624_v16 = vor.u32 %v6258_v15, %v5623_v1  ;;  %v5529_v1 = vld [vmem:[#allocation5 + $0x3e0] sm:$0xf0] }
 0x141   : > { %v5047_v17 = vld [vmem:[#allocation5] sm:$0xf] }
 0x142   : > { %v770_v27 = vmul.f32 0.01, %v744_v24  ;;  %2832 = vmatpush.bf16.msra.mxu1 %v5208_v20 }
 0x144   : > { %v782_v28 = vmax.f32 %v744_v24, %v770_v27  ;;  %v5431_v24 = vld [vmem:[#allocation5 + $0x300] sm:$0xf]  ;;  %v5976_v27 = vor.u32 %v6346_v21, %v5975_v18 }
 0x145   : > { %v6114_v18 = vld [vmem:[#allocation5 + $0x1c] sm:$0xf0] }
 0x146   : > { %2949 = vmatpush.bf16.msra.mxu0 %v5976_v27  ;;  %v5048_v20 = vor.u32 %v6114_v18, %v5047_v17  ;;  %v6306_v21 = vld [vmem:[#allocation5 + $0x61c] sm:$0xf0]  ;;  %v5785_v17 = vld [vmem:[#allocation5 + $0x5e0] sm:$0xf0] }
 0x147   : > { %v745_v25 = vpop.f32.mrf.mxu0  ;;  %v6186_v27 = vld [vmem:[#allocation5 + $0x25c] sm:$0xf0] }
 0x148   : > { %v746_v22 = vadd.f32 %v6938_v14, %v745_v25  ;;  %v6210_v25 = vld [vmem:[#allocation5 + $0x31c] sm:$0xf0] }
 0x14a   : > { %v771_v6 = vmul.f32 0.01, %v746_v22 }
 0x14c   : > { %v783_v23 = vmax.f32 %v746_v22, %v771_v6  ;;  %v5432_v22 = vor.u32 %v6210_v25, %v5431_v24  ;;  %v5687_v6 = vld [vmem:[#allocation5 + $0x500] sm:$0xf] }
 0x14d   : > { %v5335_v25 = vld [vmem:[#allocation5 + $0x240] sm:$0xf] }
 0x14e   : > { %v793_v3 = vpack.c.bf16 %v783_v23, %v782_v28  ;;  %v6274_v28 = vld [vmem:[#allocation5 + $0x51c] sm:$0xf0]  ;;  %2872 = vmatpush.bf16.msra.mxu2 %v5432_v22 }
 0x14f   : > { %v5175_v23 = vld [vmem:[#allocation5 + $0x100] sm:$0xf] }
 0x150   : > { %1013 = vmatmul.bf16.gmra.mxu1 %v793_v3  ;;  %1052 = vmatmul.bf16.gmra.mxu2 %v793_v3  ;;  %v5591_v22 = vld [vmem:[#allocation5 + $0x440] sm:$0xf] }
 0x151   : > { %1091 = vmatmul.bf16.gmra.mxu3 %v793_v3  ;;  %1130 = vmatmul.bf16.gmra.mxu0 %v793_v3  ;;  %v5688_v3 = vor.u32 %v6274_v28, %v5687_v6  ;;  %v5336_v6 = vor.u32 %v6186_v27, %v5335_v25  ;;  %v6250_v28 = vld [vmem:[#allocation5 + $0x45c] sm:$0xf0] }
 0x152   : > { %v748_v29 = vpop.f32.mrf.mxu1 }
 0x153   : > { %v749_v30 = vadd.f32 %v6938_v14, %v748_v29  ;;  %v6146_v29 = vld [vmem:[#allocation5 + $0x11c] sm:$0xf0]  ;;  %2911 = vmatpush.bf16.msrb.mxu3 %v5688_v3 }
 0x154   : > { %v5303_v3 = vld [vmem:[#allocation5 + $0x200] sm:$0xf] }
 0x155   : > { %v772_v33 = vmul.f32 0.01, %v749_v30 }
 0x157   : > { %v784_v36 = vmax.f32 %v749_v30, %v772_v33  ;;  %v5943_v30 = vld [vmem:[#allocation5 + $0x700] sm:$0xf]  ;;  %2912 = vmatpush.bf16.msrb.mxu3 %v5656_v2 }
 0x15a   : > { %v750_v31 = vpop.f32.mrf.mxu1 }
 0x15b   : > { %v751_v34 = vadd.f32 %v6938_v14, %v750_v31  ;;  %v6338_v31 = vld [vmem:[#allocation5 + $0x71c] sm:$0xf0]  ;;  %2913 = vmatpush.bf16.msrb.mxu3 %v5624_v16  ;;  %v6294_v16 = vld [vmem:[#allocation5 + $0x5c4] sm:$0xf] }
 0x15d   : > { %v773_v35 = vmul.f32 0.01, %v751_v34 }
 0x15f   : > { %v785_v37 = vmax.f32 %v751_v34, %v773_v35  ;;  %v5176_v34 = vor.u32 %v6146_v29, %v5175_v23  ;;  %v5944_v35 = vor.u32 %v6338_v31, %v5943_v30  ;;  %v5592_v23 = vor.u32 %v6250_v28, %v5591_v22  ;;  %v6178_v29 = vld [vmem:[#allocation5 + $0x21c] sm:$0xf0] }
 0x160   : > { %v5559_v30 = vld [vmem:[#allocation5 + $0x400] sm:$0xf]  ;;  %v5304_v31 = vor.u32 %v6178_v29, %v5303_v3  ;;  %v5273_v3 = vld [vmem:[#allocation5 + $0x1e0] sm:$0xf0] }
 0x161   : > { %v794_v26 = vpack.c.bf16 %v785_v37, %v784_v36  ;;  %v5399_v36 = vld [vmem:[#allocation5 + $0x2c0] sm:$0xf]  ;;  %2833 = vmatpush.bf16.msra.mxu1 %v5176_v34  ;;  %2950 = vmatpush.bf16.msra.mxu0 %v5944_v35 }
 0x162   : > { %v6202_v37 = vld [vmem:[#allocation5 + $0x2dc] sm:$0xf0]  ;;  %2914 = vmatpush.bf16.msrb.mxu3 %v5592_v23  ;;  %v6166_v23 = vld [vmem:[#allocation5 + $0x1c4] sm:$0xf] }
 0x163   : > { %1018 = vmatmul.bf16.gmra.mxu1 %v794_v26  ;;  %1057 = vmatmul.bf16.gmra.mxu2 %v794_v26  ;;  %v5400_v38 = vor.u32 %v6202_v37, %v5399_v36  ;;  %v830_v35 = vld [vmem:[%s7688_s6] sm:$0xf] }
 0x164   : > { %1096 = vmatmul.bf16.gmra.mxu3 %v794_v26  ;;  %1135 = vmatmul.bf16.gmra.mxu0 %v794_v26  ;;  %v6955_v37 = vperm.slane %v830_v35, 0 }
 0x165   : > { %2873 = vmatpush.bf16.msra.mxu2 %v5400_v38 }
 0x169   : > { %2874 = vmatpush.bf16.msra.mxu2 %v5368_v4 }
 0x16b   : > { %v753_v40 = vpop.f32.mrf.mxu1 }
 0x16c   : > { %v754_v41 = vadd.f32 %v6938_v14, %v753_v40 }
 0x16d   : > { %2875 = vmatpush.bf16.msra.mxu2 %v5336_v6 }
 0x16e   : > { %v774_v48 = vmul.f32 0.01, %v754_v41 }
 0x170   : > { %v786_v55 = vmax.f32 %v754_v41, %v774_v48 }
 0x171   : > { %2876 = vmatpush.bf16.msra.mxu2 %v5304_v31  ;;  %v5276_v31 = vor.u32 %v6166_v23, %v5273_v3 }
 0x173   : > { %v755_v45 = vpop.f32.mrf.mxu1 }
 0x174   : > { %v756_v49 = vadd.f32 %v6938_v14, %v755_v45  ;;  %v5143_v45 = vld [vmem:[#allocation5 + $0xc0] sm:$0xf] }
 0x175   : > { %v5144_v48 = vor.u32 %v6138_v46, %v5143_v45 }
 0x176   : > { %v775_v53 = vmul.f32 0.01, %v756_v49 }
 0x177   : > { %2834 = vmatpush.bf16.msra.mxu1 %v5144_v48 }
 0x178   : > { %v787_v56 = vmax.f32 %v756_v49, %v775_v53  ;;  %v5911_v49 = vld [vmem:[#allocation5 + $0x6c0] sm:$0xf] }
 0x179   : > { %v5912_v53 = vor.u32 %v6330_v50, %v5911_v49 }
 0x17a   : > { %v795_v57 = vpack.c.bf16 %v787_v56, %v786_v55  ;;  %v5111_v55 = vld [vmem:[#allocation5 + $0x80] sm:$0xf] }
 0x17b   : > { %2951 = vmatpush.bf16.msra.mxu0 %v5912_v53  ;;  %v6130_v56 = vld [vmem:[#allocation5 + $0x9c] sm:$0xf0] }
 0x17c   : > { %1023 = vmatmul.bf16.gmra.mxu1 %v795_v57  ;;  %1062 = vmatmul.bf16.gmra.mxu2 %v795_v57 }
 0x17d   : > { %1101 = vmatmul.bf16.gmra.mxu3 %v795_v57  ;;  %1140 = vmatmul.bf16.gmra.mxu0 %v795_v57  ;;  %v5112_v57 = vor.u32 %v6130_v56, %v5111_v55 }
 0x17f   : > { %2835 = vmatpush.bf16.msra.mxu1 %v5112_v57  ;;  %2952 = vmatpush.bf16.msra.mxu0 %v5880_v0 }
 0x183   : > { %v758_v7 = vpop.f32.mrf.mxu2  ;;  %2953 = vmatpush.bf16.msra.mxu0 %v5848_v13  ;;  %v6230_v13 = vld [vmem:[#allocation5 + $0x3c4] sm:$0xf] }
 0x184   : > { %v759_v19 = vadd.f32 %v6938_v14, %v758_v7  ;;  %v5079_v7 = vld [vmem:[#allocation5 + $0x40] sm:$0xf]  ;;  %v5532_v15 = vor.u32 %v6230_v13, %v5529_v1 }
 0x186   : > { %v776_v26 = vmul.f32 0.01, %v759_v19  ;;  %3025 = vmatpush.bf16.msrb.mxu2 %v5532_v15  ;;  %v6350_v15 = vld [vmem:[#allocation5 + $0x784] sm:$0xf] }
 0x188   : > { %v788_v40 = vmax.f32 %v759_v19, %v776_v26  ;;  %v5815_v19 = vld [vmem:[#allocation5 + $0x600] sm:$0xf] }
 0x189   : > { %v5816_v24 = vor.u32 %v6306_v21, %v5815_v19 }
 0x18b   : > { %v760_v33 = vpop.f32.mrf.mxu2  ;;  %2954 = vmatpush.bf16.msra.mxu0 %v5816_v24 }
 0x18c   : > { %v761_v32 = vadd.f32 %v6938_v14, %v760_v33  ;;  %v6242_v33 = vld [vmem:[#allocation5 + $0x41c] sm:$0xf0] }
 0x18d   : > { %v5560_v34 = vor.u32 %v6242_v33, %v5559_v30  ;;  %v6358_v33 = vld [vmem:[#allocation5 + $0x7c4] sm:$0xf] }
 0x18e   : > { %v777_v39 = vmul.f32 0.01, %v761_v32 }
 0x18f   : > { %2915 = vmatpush.bf16.msrb.mxu3 %v5560_v34  ;;  %v6041_v34 = vld [vmem:[#allocation5 + $0x7e0] sm:$0xf0] }
 0x190   : > { %v789_v41 = vmax.f32 %v761_v32, %v777_v39  ;;  %v6957_v32 = vperm.slane %v830_v35, 3 }
 0x192   : > { %v796_v42 = vpack.c.bf16 %v789_v41, %v788_v40  ;;  %v6961_v41 = vperm.slane %v830_v35, 1 }
 0x194   : > { %1028 = vmatmul.bf16.gmra.mxu1 %v796_v42  ;;  %1067 = vmatmul.bf16.gmra.mxu2 %v796_v42 }
 0x195   : > { %1106 = vmatmul.bf16.gmra.mxu3 %v796_v42  ;;  %1145 = vmatmul.bf16.gmra.mxu0 %v796_v42  ;;  %v763_v43 = vpop.f32.mrf.mxu2 }
 0x196   : > { %v764_v44 = vadd.f32 %v6938_v14, %v763_v43  ;;  %v6963_v43 = vperm.slane %v830_v35, 2 }
 0x198   : > { %v778_v51 = vmul.f32 0.01, %v764_v44 }
 0x19a   : > { %v790_v60 = vmax.f32 %v764_v44, %v778_v51 }
 0x19d   : > { %v765_v47 = vpop.f32.mrf.mxu2 }
 0x19e   : > { %v766_v52 = vadd.f32 %v6938_v14, %v765_v47  ;;  %v6122_v14 = vld [vmem:[#allocation5 + $0x5c] sm:$0xf0] }
 0x19f   : > { %v5080_v9 = vor.u32 %v6122_v14, %v5079_v7 }
 0x1a0   : > { %v779_v54 = vmul.f32 0.01, %v766_v52 }
 0x1a1   : > { %2836 = vmatpush.bf16.msra.mxu1 %v5080_v9 }
 0x1a2   : > { %v791_v61 = vmax.f32 %v766_v52, %v779_v54 }
 0x1a4   : > { %v797_v5 = vpack.c.bf16 %v791_v61, %v790_v60 }
 0x1a5   : > { %2837 = vmatpush.bf16.msra.mxu1 %v5048_v20  ;;  %v5788_v20 = vor.u32 %v6294_v16, %v5785_v17  ;;  %v6009_v16 = vld [vmem:[#allocation5 + $0x7a0] sm:$0xf0] }
 0x1a6   : > { %1033 = vmatmul.bf16.gmra.mxu1 %v797_v5  ;;  %1072 = vmatmul.bf16.gmra.mxu2 %v797_v5 }
 0x1a7   : > { %1111 = vmatmul.bf16.gmra.mxu3 %v797_v5  ;;  %1150 = vmatmul.bf16.gmra.mxu0 %v797_v5 }
 0x1a8   : > { %3064 = vmatpush.bf16.msra.mxu3 %v5788_v20  ;;  %v6012_v20 = vor.u32 %v6350_v15, %v6009_v16 }
 0x1a9   : > { %2986 = vmatpush.bf16.msrb.mxu1 %v5276_v31  ;;  %v6278_v31 = vld [vmem:[#allocation5 + $0x544] sm:$0xf] }
 0x1bc   : > { %v1009_v36 = vpop.f32.mrf.mxu1 }
 0x1bd   : > { %v1126_v26 = vpop.f32.mrf.mxu0  ;;  %v1010_v38 = vadd.f32 %v1009_v36, %v6955_v37 }
 0x1be   : > { %v1127_v39 = vadd.f32 %v1126_v26, %v6957_v32  ;;  %v6044_v26 = vor.u32 %v6358_v33, %v6041_v34  ;;  %v5721_v33 = vld [vmem:[#allocation5 + $0x560] sm:$0xf0] }
 0x1bf   : > { %v1156_v45 = vmul.f32 0.01, %v1010_v38 }
 0x1c0   : > { %v1159_v48 = vmul.f32 0.01, %v1127_v39  ;;  %3103 = vmatpush.bf16.msrb.mxu0 %v6044_v26  ;;  %v5209_v26 = vld [vmem:[#allocation5 + $0x160] sm:$0xf0] }
 0x1c1   : > { %v1204_v54 = vmax.f32 %v1010_v38, %v1156_v45  ;;  %v6222_v38 = vld [vmem:[#allocation5 + $0x384] sm:$0xf] }
 0x1c2   : > { %v1048_v40 = vpop.f32.mrf.mxu2  ;;  %v1207_v56 = vmax.f32 %v1127_v39, %v1159_v48  ;;  %v5497_v39 = vld [vmem:[#allocation5 + $0x3a0] sm:$0xf0] }
 0x1c3   : > { %v1087_v42 = vpop.f32.mrf.mxu3  ;;  %v1049_v50 = vadd.f32 %v1048_v40, %v6961_v41  ;;  %v6286_v45 = vld [vmem:[#allocation5 + $0x584] sm:$0xf] }
 0x1c4   : > { %v1011_v44 = vpop.f32.mrf.mxu1  ;;  %v1088_v52 = vadd.f32 %v1087_v42, %v6963_v43  ;;  %3104 = vmatpush.bf16.msrb.mxu0 %v6012_v20 }
 0x1c5   : > { %v1012_v46 = vadd.f32 %v1011_v44, %v6955_v37  ;;  %v1128_v47 = vpop.f32.mrf.mxu0  ;;  %v1157_v59 = vmul.f32 0.01, %v1049_v50  ;;  %v5500_v44 = vor.u32 %v6222_v38, %v5497_v39 }
 0x1c6   : > { %v1129_v49 = vadd.f32 %v1128_v47, %v6957_v32  ;;  %v1158_v63 = vmul.f32 0.01, %v1088_v52 }
 0x1c7   : > { %v1160_v51 = vmul.f32 0.01, %v1012_v46  ;;  %v1205_v9 = vmax.f32 %v1049_v50, %v1157_v59  ;;  %3026 = vmatpush.bf16.msrb.mxu2 %v5500_v44 }
 0x1c8   : > { %v1163_v53 = vmul.f32 0.01, %v1129_v49  ;;  %v1206_v11 = vmax.f32 %v1088_v52, %v1158_v63  ;;  %v6158_v63 = vld [vmem:[#allocation5 + $0x184] sm:$0xf] }
 0x1c9   : > { %v1208_v55 = vmax.f32 %v1012_v46, %v1160_v51  ;;  %v5753_v46 = vld [vmem:[#allocation5 + $0x5a0] sm:$0xf0] }
 0x1ca   : > { %v1211_v57 = vmax.f32 %v1129_v49, %v1163_v53  ;;  %v1050_v58 = vpop.f32.mrf.mxu2  ;;  %v5756_v49 = vor.u32 %v6286_v45, %v5753_v46 }
 0x1cb   : > { %v6969_v60 = vpack.c.bf16 %v1208_v55, %v1204_v54  ;;  %v1051_v61 = vadd.f32 %v1050_v58, %v6961_v41  ;;  %v1089_v62 = vpop.f32.mrf.mxu3 }
 0x1cc   : > { %v6972_v0 = vpack.c.bf16 %v1211_v57, %v1207_v56  ;;  %v1090_v2 = vadd.f32 %v1089_v62, %v6963_v43  ;;  %3065 = vmatpush.bf16.msra.mxu3 %v5756_v49 }
 0x1cd   : > { %v1161_v5 = vmul.f32 0.01, %v1051_v61  ;;  %v1014_v7 = vpop.f32.mrf.mxu1  ;;  %2838 = vmatmul.bf16.vlgmr.msra.gmra.mxu1 %v6969_v60 }
 0x1ce   : > { %v1162_v14 = vmul.f32 0.01, %v1090_v2  ;;  %v1131_v8 = vpop.f32.mrf.mxu0  ;;  %2955 = vmatmul.bf16.vlgmr.msra.gmra.mxu0 %v6972_v0  ;;  %v1015_v19 = vadd.f32 %v1014_v7, %v6955_v37 }
 0x1cf   : > { %v1209_v10 = vmax.f32 %v1051_v61, %v1161_v5  ;;  %v1132_v21 = vadd.f32 %v1131_v8, %v6957_v32 }
 0x1d0   : > { %v1210_v12 = vmax.f32 %v1090_v2, %v1162_v14  ;;  %v1164_v22 = vmul.f32 0.01, %v1015_v19  ;;  %v5241_v2 = vld [vmem:[#allocation5 + $0x1a0] sm:$0xf0] }
 0x1d1   : > { %v6977_v4 = vpack.c.bf16 %v1209_v10, %v1205_v9  ;;  %v1167_v29 = vmul.f32 0.01, %v1132_v21  ;;  %v5244_v8 = vor.u32 %v6158_v63, %v5241_v2 }
 0x1d2   : > { %v6979_v18 = vpack.c.bf16 %v1210_v12, %v1206_v11  ;;  %v1212_v47 = vmax.f32 %v1015_v19, %v1164_v22 }
 0x1d3   : > { %v1053_v24 = vpop.f32.mrf.mxu2  ;;  %2877 = vmatmul.bf16.vlgmr.msra.gmra.mxu2 %v6977_v4  ;;  %v1215_v50 = vmax.f32 %v1132_v21, %v1167_v29  ;;  %2987 = vmatpush.bf16.msrb.mxu1 %v5244_v8 }
 0x1d4   : > { %v1092_v25 = vpop.f32.mrf.mxu3  ;;  %2916 = vmatmul.bf16.vlgmr.msrb.gmra.mxu3 %v6979_v18  ;;  %v1054_v35 = vadd.f32 %v1053_v24, %v6961_v41 }
 0x1d5   : > { %v1016_v27 = vpop.f32.mrf.mxu1  ;;  %v1093_v40 = vadd.f32 %v1092_v25, %v6963_v43 }
 0x1d6   : > { %v1017_v6 = vadd.f32 %v1016_v27, %v6955_v37  ;;  %v1133_v28 = vpop.f32.mrf.mxu0  ;;  %v1165_v53 = vmul.f32 0.01, %v1054_v35 }
 0x1d7   : > { %v1134_v30 = vadd.f32 %v1133_v28, %v6957_v32  ;;  %v1166_v57 = vmul.f32 0.01, %v1093_v40  ;;  %v5465_v28 = vld [vmem:[#allocation5 + $0x360] sm:$0xf0] }
 0x1d8   : > { %v1168_v36 = vmul.f32 0.01, %v1017_v6  ;;  %v1213_v5 = vmax.f32 %v1054_v35, %v1165_v53  ;;  %v5724_v35 = vor.u32 %v6278_v31, %v5721_v33  ;;  %v5977_v53 = vld [vmem:[#allocation5 + $0x760] sm:$0xf0] }
 0x1d9   : > { %v1171_v42 = vmul.f32 0.01, %v1134_v30  ;;  %v1214_v9 = vmax.f32 %v1093_v40, %v1166_v57  ;;  %v5401_v31 = vld [vmem:[#allocation5 + $0x2e0] sm:$0xf0] }
 0x1da   : > { %v1216_v48 = vmax.f32 %v1017_v6, %v1168_v36  ;;  %v6214_v6 = vld [vmem:[#allocation5 + $0x344] sm:$0xf]  ;;  %3066 = vmatpush.bf16.msra.mxu3 %v5724_v35 }
 0x1db   : > { %v1219_v51 = vmax.f32 %v1134_v30, %v1171_v42  ;;  %v1055_v52 = vpop.f32.mrf.mxu2  ;;  %v5468_v30 = vor.u32 %v6214_v6, %v5465_v28  ;;  %v6150_v36 = vld [vmem:[#allocation5 + $0x144] sm:$0xf] }
 0x1dc   : > { %v6989_v54 = vpack.c.bf16 %v1216_v48, %v1212_v47  ;;  %v1056_v55 = vadd.f32 %v1055_v52, %v6961_v41  ;;  %v1094_v56 = vpop.f32.mrf.mxu3  ;;  %v5212_v40 = vor.u32 %v6150_v36, %v5209_v26  ;;  %v6342_v52 = vld [vmem:[#allocation5 + $0x744] sm:$0xf] }
 0x1dd   : > { %v6992_v58 = vpack.c.bf16 %v1219_v51, %v1215_v50  ;;  %v1095_v59 = vadd.f32 %v1094_v56, %v6963_v43  ;;  %3027 = vmatpush.bf16.msrb.mxu2 %v5468_v30  ;;  %v6198_v30 = vld [vmem:[#allocation5 + $0x2c4] sm:$0xf] }
 0x1de   : > { %v1169_v61 = vmul.f32 0.01, %v1056_v55  ;;  %2843 = vmatmul.bf16.gmra.mxu1 %v6989_v54  ;;  %v6262_v33 = vld [vmem:[#allocation5 + $0x4c4] sm:$0xf]  ;;  %v5404_v26 = vor.u32 %v6198_v30, %v5401_v31 }
 0x1df   : > { %v1170_v62 = vmul.f32 0.01, %v1095_v59  ;;  %2960 = vmatmul.bf16.gmra.mxu0 %v6992_v58  ;;  %2988 = vmatpush.bf16.msrb.mxu1 %v5212_v40  ;;  %v5113_v30 = vld [vmem:[#allocation5 + $0xa0] sm:$0xf0] }
 0x1e0   : > { %v1217_v7 = vmax.f32 %v1056_v55, %v1169_v61  ;;  %v1019_v14 = vpop.f32.mrf.mxu1  ;;  %v6206_v55 = vld [vmem:[#allocation5 + $0x304] sm:$0xf]  ;;  %v5980_v61 = vor.u32 %v6342_v52, %v5977_v53 }
 0x1e1   : > { %v1218_v10 = vmax.f32 %v1095_v59, %v1170_v62  ;;  %v1136_v11 = vpop.f32.mrf.mxu0  ;;  %v1020_v1 = vadd.f32 %v1019_v14, %v6955_v37  ;;  %v5433_v62 = vld [vmem:[#allocation5 + $0x320] sm:$0xf0] }
 0x1e2   : > { %v6997_v12 = vpack.c.bf16 %v1217_v7, %v1213_v5  ;;  %v1137_v17 = vadd.f32 %v1136_v11, %v6957_v32  ;;  %v5436_v2 = vor.u32 %v6206_v55, %v5433_v62  ;;  %v6270_v5 = vld [vmem:[#allocation5 + $0x504] sm:$0xf]  ;;  %3105 = vmatpush.bf16.msrb.mxu0 %v5980_v61 }
 0x1e3   : > { %v6999_v13 = vpack.c.bf16 %v1218_v10, %v1214_v9  ;;  %v1172_v25 = vmul.f32 0.01, %v1020_v1  ;;  %v5689_v7 = vld [vmem:[#allocation5 + $0x520] sm:$0xf0] }
 0x1e4   : > { %2882 = vmatmul.bf16.gmra.mxu2 %v6997_v12  ;;  %v1175_v23 = vmul.f32 0.01, %v1137_v17  ;;  %v5692_v8 = vor.u32 %v6270_v5, %v5689_v7 }
 0x1e5   : > { %2921 = vmatmul.bf16.gmra.mxu3 %v6999_v13  ;;  %v1220_v42 = vmax.f32 %v1020_v1, %v1172_v25  ;;  %3028 = vmatpush.bf16.msrb.mxu2 %v5436_v2  ;;  %v6334_v25 = vld [vmem:[#allocation5 + $0x704] sm:$0xf] }
 0x1e6   : > { %v1058_v19 = vpop.f32.mrf.mxu2  ;;  %v1223_v45 = vmax.f32 %v1137_v17, %v1175_v23  ;;  %3067 = vmatpush.bf16.msra.mxu3 %v5692_v8  ;;  %v6142_v17 = vld [vmem:[#allocation5 + $0x104] sm:$0xf] }
 0x1e7   : > { %v1097_v21 = vpop.f32.mrf.mxu3  ;;  %v1059_v3 = vadd.f32 %v1058_v19, %v6961_v41  ;;  %v5177_v19 = vld [vmem:[#allocation5 + $0x120] sm:$0xf0] }
 0x1e8   : > { %v1021_v24 = vpop.f32.mrf.mxu1  ;;  %v1098_v38 = vadd.f32 %v1097_v21, %v6963_v43  ;;  %v5180_v20 = vor.u32 %v6142_v17, %v5177_v19  ;;  %v6326_v8 = vld [vmem:[#allocation5 + $0x6c4] sm:$0xf] }
 0x1e9   : > { %v1022_v27 = vadd.f32 %v1021_v24, %v6955_v37  ;;  %v1138_v22 = vpop.f32.mrf.mxu0  ;;  %v1173_v46 = vmul.f32 0.01, %v1059_v3  ;;  %3029 = vmatpush.bf16.msrb.mxu2 %v5404_v26  ;;  %v5369_v17 = vld [vmem:[#allocation5 + $0x2a0] sm:$0xf0] }
 0x1ea   : > { %v1139_v29 = vadd.f32 %v1138_v22, %v6957_v32  ;;  %v1174_v56 = vmul.f32 0.01, %v1098_v38  ;;  %2989 = vmatpush.bf16.msrb.mxu1 %v5180_v20  ;;  %v6254_v19 = vld [vmem:[#allocation5 + $0x484] sm:$0xf] }
 0x1eb   : > { %v1176_v34 = vmul.f32 0.01, %v1022_v27  ;;  %v1221_v9 = vmax.f32 %v1059_v3, %v1173_v46 }
 0x1ec   : > { %v1179_v39 = vmul.f32 0.01, %v1139_v29  ;;  %v1222_v11 = vmax.f32 %v1098_v38, %v1174_v56  ;;  %v5657_v38 = vld [vmem:[#allocation5 + $0x4e0] sm:$0xf0] }
 0x1ed   : > { %v1224_v44 = vmax.f32 %v1022_v27, %v1176_v34  ;;  %v5945_v27 = vld [vmem:[#allocation5 + $0x720] sm:$0xf0] }
 0x1ee   : > { %v1227_v47 = vmax.f32 %v1139_v29, %v1179_v39  ;;  %v1060_v48 = vpop.f32.mrf.mxu2  ;;  %v5948_v6 = vor.u32 %v6334_v25, %v5945_v27  ;;  %v6134_v39 = vld [vmem:[#allocation5 + $0xc4] sm:$0xf] }
 0x1ef   : > { %v7009_v49 = vpack.c.bf16 %v1224_v44, %v1220_v42  ;;  %v1061_v50 = vadd.f32 %v1060_v48, %v6961_v41  ;;  %v1099_v51 = vpop.f32.mrf.mxu3  ;;  %v5660_v44 = vor.u32 %v6262_v33, %v5657_v38 }
 0x1f0   : > { %v7012_v57 = vpack.c.bf16 %v1227_v47, %v1223_v45  ;;  %v1100_v59 = vadd.f32 %v1099_v51, %v6963_v43  ;;  %3106 = vmatpush.bf16.msrb.mxu0 %v5948_v6  ;;  %v5145_v45 = vld [vmem:[#allocation5 + $0xe0] sm:$0xf0] }
 0x1f1   : > { %v1177_v63 = vmul.f32 0.01, %v1061_v50  ;;  %2848 = vmatmul.bf16.gmra.mxu1 %v7009_v49  ;;  %3068 = vmatpush.bf16.msra.mxu3 %v5660_v44 }
 0x1f2   : > { %v1178_v14 = vmul.f32 0.01, %v1100_v59  ;;  %2965 = vmatmul.bf16.gmra.mxu0 %v7012_v57 }
 0x1f3   : > { %v1225_v10 = vmax.f32 %v1061_v50, %v1177_v63  ;;  %v5148_v50 = vor.u32 %v6134_v39, %v5145_v45  ;;  %v6182_v45 = vld [vmem:[#allocation5 + $0x244] sm:$0xf] }
 0x1f4   : > { %v1226_v1 = vmax.f32 %v1100_v59, %v1178_v14 }
 0x1f5   : > { %v7017_v15 = vpack.c.bf16 %v1225_v10, %v1221_v9  ;;  %2990 = vmatpush.bf16.msrb.mxu1 %v5148_v50  ;;  %v5913_v9 = vld [vmem:[#allocation5 + $0x6e0] sm:$0xf0] }
 0x1f6   : > { %v7019_v16 = vpack.c.bf16 %v1226_v1, %v1222_v11  ;;  %v6190_v10 = vld [vmem:[#allocation5 + $0x284] sm:$0xf]  ;;  %v5916_v1 = vor.u32 %v6326_v8, %v5913_v9 }
 0x1f7   : > { %2887 = vmatmul.bf16.gmra.mxu2 %v7017_v15  ;;  %v5849_v9 = vld [vmem:[#allocation5 + $0x660] sm:$0xf0] }
 0x1f8   : > { %2926 = vmatmul.bf16.gmra.mxu3 %v7019_v16  ;;  %3107 = vmatpush.bf16.msrb.mxu0 %v5916_v1 }
 0x1f9   : > { %v1024_v21 = vpop.f32.mrf.mxu1 }
 0x1fa   : > { %v1141_v24 = vpop.f32.mrf.mxu0  ;;  %v1025_v22 = vadd.f32 %v1024_v21, %v6955_v37  ;;  %v5372_v21 = vor.u32 %v6190_v10, %v5369_v17  ;;  %v6174_v10 = vld [vmem:[#allocation5 + $0x204] sm:$0xf] }
 0x1fb   : > { %v1142_v28 = vadd.f32 %v1141_v24, %v6957_v32  ;;  %v5625_v24 = vld [vmem:[#allocation5 + $0x4a0] sm:$0xf0] }
 0x1fc   : > { %v1180_v34 = vmul.f32 0.01, %v1025_v22  ;;  %3030 = vmatpush.bf16.msrb.mxu2 %v5372_v21 }
 0x1fd   : > { %v1183_v40 = vmul.f32 0.01, %v1142_v28 }
 0x1fe   : > { %v1228_v52 = vmax.f32 %v1025_v22, %v1180_v34  ;;  %v5628_v22 = vor.u32 %v6254_v19, %v5625_v24  ;;  %v5305_v19 = vld [vmem:[#allocation5 + $0x220] sm:$0xf0] }
 0x1ff   : > { %v1063_v23 = vpop.f32.mrf.mxu2  ;;  %v1231_v55 = vmax.f32 %v1142_v28, %v1183_v40 }
 0x200   : > { %v1102_v3 = vpop.f32.mrf.mxu3  ;;  %v1064_v46 = vadd.f32 %v1063_v23, %v6961_v41  ;;  %3069 = vmatpush.bf16.msra.mxu3 %v5628_v22  ;;  %v6110_v22 = vld [vmem:[#allocation5 + $0x4] sm:$0xf] }
 0x201   : > { %v1026_v29 = vpop.f32.mrf.mxu1  ;;  %v1103_v47 = vadd.f32 %v1102_v3, %v6963_v43 }
 0x202   : > { %v1027_v35 = vadd.f32 %v1026_v29, %v6955_v37  ;;  %v1143_v36 = vpop.f32.mrf.mxu0  ;;  %v1181_v61 = vmul.f32 0.01, %v1064_v46  ;;  %v6126_v29 = vld [vmem:[#allocation5 + $0x84] sm:$0xf] }
 0x203   : > { %v1144_v42 = vadd.f32 %v1143_v36, %v6957_v32  ;;  %v1182_v62 = vmul.f32 0.01, %v1103_v47  ;;  %v5116_v31 = vor.u32 %v6126_v29, %v5113_v30  ;;  %v5881_v36 = vld [vmem:[#allocation5 + $0x6a0] sm:$0xf0] }
 0x204   : > { %v1184_v48 = vmul.f32 0.01, %v1027_v35  ;;  %v1229_v25 = vmax.f32 %v1064_v46, %v1181_v61  ;;  %v5337_v46 = vld [vmem:[#allocation5 + $0x260] sm:$0xf0] }
 0x205   : > { %v1187_v51 = vmul.f32 0.01, %v1144_v42  ;;  %v1230_v6 = vmax.f32 %v1103_v47, %v1182_v62  ;;  %2991 = vmatpush.bf16.msrb.mxu1 %v5116_v31  ;;  %v6246_v47 = vld [vmem:[#allocation5 + $0x444] sm:$0xf] }
 0x206   : > { %v1232_v53 = vmax.f32 %v1027_v35, %v1184_v48  ;;  %v6318_v35 = vld [vmem:[#allocation5 + $0x684] sm:$0xf] }
 0x207   : > { %v1235_v56 = vmax.f32 %v1144_v42, %v1187_v51  ;;  %v1065_v59 = vpop.f32.mrf.mxu2  ;;  %v5884_v26 = vor.u32 %v6318_v35, %v5881_v36  ;;  %v5081_v62 = vld [vmem:[#allocation5 + $0x60] sm:$0xf0] }
 0x208   : > { %v7029_v63 = vpack.c.bf16 %v1232_v53, %v1228_v52  ;;  %v1066_v2 = vadd.f32 %v1065_v59, %v6961_v41  ;;  %v1104_v5 = vpop.f32.mrf.mxu3  ;;  %v5340_v52 = vor.u32 %v6182_v45, %v5337_v46  ;;  %v5593_v53 = vld [vmem:[#allocation5 + $0x460] sm:$0xf0] }
 0x209   : > { %v7032_v7 = vpack.c.bf16 %v1235_v56, %v1231_v55  ;;  %v1105_v14 = vadd.f32 %v1104_v5, %v6963_v43  ;;  %3108 = vmatpush.bf16.msrb.mxu0 %v5884_v26  ;;  %v6118_v55 = vld [vmem:[#allocation5 + $0x44] sm:$0xf]  ;;  %v5596_v61 = vor.u32 %v6246_v47, %v5593_v53 }
 0x20a   : > { %v1185_v11 = vmul.f32 0.01, %v1066_v2  ;;  %2853 = vmatmul.bf16.gmra.mxu1 %v7029_v63  ;;  %3031 = vmatpush.bf16.msrb.mxu2 %v5340_v52  ;;  %v5084_v8 = vor.u32 %v6118_v55, %v5081_v62  ;;  %v5817_v35 = vld [vmem:[#allocation5 + $0x620] sm:$0xf0] }
 0x20b   : > { %v1186_v20 = vmul.f32 0.01, %v1105_v14  ;;  %2970 = vmatmul.bf16.gmra.mxu0 %v7032_v7  ;;  %3070 = vmatpush.bf16.msra.mxu3 %v5596_v61 }
 0x20c   : > { %v1233_v27 = vmax.f32 %v1066_v2, %v1185_v11  ;;  %v6310_v2 = vld [vmem:[#allocation5 + $0x644] sm:$0xf]  ;;  %2992 = vmatpush.bf16.msrb.mxu1 %v5084_v8  ;;  %v5535_v8 = vld [vmem:[#allocation5 + $0x3c8] sm:$0xf] }
 0x20d   : > { %v1234_v28 = vmax.f32 %v1105_v14, %v1186_v20  ;;  %v5852_v17 = vor.u32 %v6310_v2, %v5849_v9  ;;  %v6238_v20 = vld [vmem:[#allocation5 + $0x404] sm:$0xf]  ;;  %v6235_v9 = vld [vmem:[#allocation5 + $0x3e4] sm:$0xf0] }
 0x20e   : > { %v7037_v23 = vpack.c.bf16 %v1233_v27, %v1229_v25  ;;  %v5308_v25 = vor.u32 %v6174_v10, %v5305_v19  ;;  %v5561_v27 = vld [vmem:[#allocation5 + $0x420] sm:$0xf0]  ;;  %v5791_v10 = vld [vmem:[#allocation5 + $0x5c8] sm:$0xf]  ;;  %v5536_v19 = vor.u32 %v6235_v9, %v5535_v8 }
 0x20f   : > { %v7039_v3 = vpack.c.bf16 %v1234_v28, %v1230_v6  ;;  %v5049_v6 = vld [vmem:[#allocation5 + $0x20] sm:$0xf0]  ;;  %3109 = vmatpush.bf16.msrb.mxu0 %v5852_v17  ;;  %v5564_v31 = vor.u32 %v6238_v20, %v5561_v27  ;;  %v6299_v20 = vld [vmem:[#allocation5 + $0x5e4] sm:$0xf0] }
 0x210   : > { %2892 = vmatmul.bf16.gmra.mxu2 %v7037_v23  ;;  %v5792_v27 = vor.u32 %v6299_v20, %v5791_v10  ;;  %v6291_v9 = vld [vmem:[#allocation5 + $0x5a4] sm:$0xf0] }
 0x211   : > { %2931 = vmatmul.bf16.gmra.mxu3 %v7039_v3  ;;  %v1029_v33 = vpop.f32.mrf.mxu1  ;;  %3032 = vmatpush.bf16.msrb.mxu2 %v5308_v25  ;;  %v5247_v10 = vld [vmem:[#allocation5 + $0x188] sm:$0xf] }
 0x212   : > { %v1146_v34 = vpop.f32.mrf.mxu0  ;;  %v1030_v38 = vadd.f32 %v1029_v33, %v6955_v37  ;;  %v5052_v33 = vor.u32 %v6110_v22, %v5049_v6  ;;  %3071 = vmatpush.bf16.msra.mxu3 %v5564_v31  ;;  %v6171_v22 = vld [vmem:[#allocation5 + $0x1e4] sm:$0xf0] }
 0x213   : > { %v1147_v39 = vadd.f32 %v1146_v34, %v6957_v32  ;;  %v6302_v34 = vld [vmem:[#allocation5 + $0x604] sm:$0xf]  ;;  %v6355_v20 = vld [vmem:[#allocation5 + $0x7a4] sm:$0xf0] }
 0x214   : > { %v1188_v48 = vmul.f32 0.01, %v1030_v38  ;;  %2993 = vmatpush.bf16.msrb.mxu1 %v5052_v33 }
 0x215   : > { %v1191_v56 = vmul.f32 0.01, %v1147_v39  ;;  %3181 = vmatpush.bf16.msra.mxu2 %v5536_v19  ;;  %v6015_v19 = vld [vmem:[#allocation5 + $0x788] sm:$0xf] }
 0x216   : > { %v1236_v21 = vmax.f32 %v1030_v38, %v1188_v48  ;;  %3220 = vmatpush.bf16.msrb.mxu3 %v5792_v27  ;;  %v5727_v27 = vld [vmem:[#allocation5 + $0x548] sm:$0xf] }
 0x217   : > { %v1068_v40 = vpop.f32.mrf.mxu2  ;;  %v1239_v28 = vmax.f32 %v1147_v39, %v1191_v56 }
 0x218   : > { %v1107_v42 = vpop.f32.mrf.mxu3  ;;  %v1069_v5 = vadd.f32 %v1068_v40, %v6961_v41 }
 0x219   : > { %v1031_v44 = vpop.f32.mrf.mxu1  ;;  %v1108_v11 = vadd.f32 %v1107_v42, %v6963_v43  ;;  %v5820_v42 = vor.u32 %v6302_v34, %v5817_v35 }
 0x21a   : > { %v1032_v50 = vadd.f32 %v1031_v44, %v6955_v37  ;;  %v1148_v51 = vpop.f32.mrf.mxu0  ;;  %v1189_v36 = vmul.f32 0.01, %v1069_v5 }
 0x21b   : > { %v1149_v59 = vadd.f32 %v1148_v51, %v6957_v32  ;;  %v1190_v44 = vmul.f32 0.01, %v1108_v11  ;;  %3110 = vmatpush.bf16.msrb.mxu0 %v5820_v42 }
 0x21c   : > { %v1192_v14 = vmul.f32 0.01, %v1032_v50 }
 0x21d   : > { %v1195_v1 = vmul.f32 0.01, %v1149_v59  ;;  %v1238_v53 = vmax.f32 %v1108_v11, %v1190_v44 }
 0x21e   : > { %v1240_v24 = vmax.f32 %v1032_v50, %v1192_v14  ;;  %v1237_v50 = vmax.f32 %v1069_v5, %v1189_v36 }
 0x21f   : > { %v1243_v29 = vmax.f32 %v1149_v59, %v1195_v1  ;;  %v1070_v30 = vpop.f32.mrf.mxu2 }
 0x220   : > { %v7049_v26 = vpack.c.bf16 %v1240_v24, %v1236_v21  ;;  %v1071_v40 = vadd.f32 %v1070_v30, %v6961_v41  ;;  %v1109_v38 = vpop.f32.mrf.mxu3  ;;  %v5279_v21 = vld [vmem:[#allocation5 + $0x1c8] sm:$0xf] }
 0x221   : > { %v7052_v45 = vpack.c.bf16 %v1243_v29, %v1239_v28  ;;  %v1110_v39 = vadd.f32 %v1109_v38, %v6963_v43  ;;  %v5280_v29 = vor.u32 %v6171_v22, %v5279_v21  ;;  %v5471_v21 = vld [vmem:[#allocation5 + $0x348] sm:$0xf] }
 0x222   : > { %v1193_v46 = vmul.f32 0.01, %v1071_v40  ;;  %2858 = vmatmul.bf16.gmra.mxu1 %v7049_v26  ;;  %v6283_v22 = vld [vmem:[#allocation5 + $0x564] sm:$0xf0] }
 0x223   : > { %v1194_v47 = vmul.f32 0.01, %v1110_v39  ;;  %2975 = vmatmul.bf16.gmra.mxu0 %v7052_v45  ;;  %v1034_v48 = vpop.f32.mrf.mxu1  ;;  %3142 = vmatpush.bf16.msra.mxu1 %v5280_v29  ;;  %v5215_v29 = vld [vmem:[#allocation5 + $0x148] sm:$0xf] }
 0x224   : > { %v1241_v51 = vmax.f32 %v1071_v40, %v1193_v46  ;;  %v1151_v52 = vpop.f32.mrf.mxu0  ;;  %v1035_v61 = vadd.f32 %v1034_v48, %v6955_v37 }
 0x225   : > { %v1242_v55 = vmax.f32 %v1110_v39, %v1194_v47  ;;  %v1152_v62 = vadd.f32 %v1151_v52, %v6957_v32 }
 0x226   : > { %v7057_v56 = vpack.c.bf16 %v1241_v51, %v1237_v50  ;;  %v1196_v11 = vmul.f32 0.01, %v1035_v61  ;;  %v6047_v50 = vld [vmem:[#allocation5 + $0x7c8] sm:$0xf] }
 0x227   : > { %v7059_v59 = vpack.c.bf16 %v1242_v55, %v1238_v53  ;;  %v1199_v24 = vmul.f32 0.01, %v1152_v62  ;;  %v6363_v51 = vld [vmem:[#allocation5 + $0x7e4] sm:$0xf0] }
 0x228   : > { %2897 = vmatmul.bf16.gmra.mxu2 %v7057_v56  ;;  %v1244_v33 = vmax.f32 %v1035_v61, %v1196_v11  ;;  %v6048_v55 = vor.u32 %v6363_v51, %v6047_v50  ;;  %v6163_v11 = vld [vmem:[#allocation5 + $0x1a4] sm:$0xf0] }
 0x229   : > { %2936 = vmatmul.bf16.gmra.mxu3 %v7059_v59  ;;  %v1073_v2 = vpop.f32.mrf.mxu2  ;;  %v1247_v34 = vmax.f32 %v1152_v62, %v1199_v24  ;;  %v6016_v24 = vor.u32 %v6355_v20, %v6015_v19  ;;  %v5983_v51 = vld [vmem:[#allocation5 + $0x748] sm:$0xf] }
 0x22a   : > { %v1112_v14 = vpop.f32.mrf.mxu3  ;;  %v1074_v6 = vadd.f32 %v1073_v2, %v6961_v41  ;;  %3259 = vmatpush.bf16.msra.mxu0 %v6048_v55 }
 0x22b   : > { %v1036_v5 = vpop.f32.mrf.mxu1  ;;  %v1113_v30 = vadd.f32 %v1112_v14, %v6963_v43  ;;  %v6227_v14 = vld [vmem:[#allocation5 + $0x3a4] sm:$0xf0] }
 0x22c   : > { %v1037_v1 = vadd.f32 %v1036_v5, %v6955_v37  ;;  %v1153_v17 = vpop.f32.mrf.mxu0  ;;  %v1197_v40 = vmul.f32 0.01, %v1074_v6  ;;  %v5759_v5 = vld [vmem:[#allocation5 + $0x588] sm:$0xf] }
 0x22d   : > { %v1154_v25 = vadd.f32 %v1153_v17, %v6957_v32  ;;  %v1198_v44 = vmul.f32 0.01, %v1113_v30  ;;  %v5248_v17 = vor.u32 %v6163_v11, %v5247_v10  ;;  %v5183_v11 = vld [vmem:[#allocation5 + $0x108] sm:$0xf] }
 0x22e   : > { %v1200_v28 = vmul.f32 0.01, %v1037_v1  ;;  %v1245_v52 = vmax.f32 %v1074_v6, %v1197_v40  ;;  %3260 = vmatpush.bf16.msra.mxu0 %v6016_v24 }
 0x22f   : > { %v1203_v31 = vmul.f32 0.01, %v1154_v25  ;;  %v1246_v61 = vmax.f32 %v1113_v30, %v1198_v44  ;;  %3143 = vmatpush.bf16.msra.mxu1 %v5248_v17  ;;  %v6155_v30 = vld [vmem:[#allocation5 + $0x164] sm:$0xf0] }
 0x230   : > { %v1248_v37 = vmax.f32 %v1037_v1, %v1200_v28  ;;  %v5760_v1 = vor.u32 %v6291_v9, %v5759_v5  ;;  %v5728_v28 = vor.u32 %v6283_v22, %v5727_v27  ;;  %v6275_v5 = vld [vmem:[#allocation5 + $0x524] sm:$0xf0] }
 0x231   : > { %v1251_v35 = vmax.f32 %v1154_v25, %v1203_v31  ;;  %v1075_v36 = vpop.f32.mrf.mxu2  ;;  %v6219_v25 = vld [vmem:[#allocation5 + $0x364] sm:$0xf0]  ;;  %v5216_v31 = vor.u32 %v6155_v30, %v5215_v29 }
 0x232   : > { %v7069_v38 = vpack.c.bf16 %v1248_v37, %v1244_v33  ;;  %v1076_v32 = vadd.f32 %v1075_v36, %v6961_v41  ;;  %v1114_v42 = vpop.f32.mrf.mxu3  ;;  %3221 = vmatpush.bf16.msrb.mxu3 %v5760_v1  ;;  %v5472_v6 = vor.u32 %v6219_v25, %v5471_v21  ;;  %v7090_v33 = vld [vmem:[%s7690_s8] sm:$0xff]  ;;  %v6147_v1 = vld [vmem:[#allocation5 + $0x124] sm:$0xf0] }
 0x233   : > { %v7072_v39 = vpack.c.bf16 %v1251_v35, %v1247_v34  ;;  %v1115_v46 = vadd.f32 %v1114_v42, %v6963_v43  ;;  %v5503_v43 = vld [vmem:[#allocation5 + $0x388] sm:$0xf]  ;;  %3144 = vmatpush.bf16.msra.mxu1 %v5216_v31  ;;  %v7093_v34 = vperm.slane %v7090_v33, 0  ;;  %v5184_v20 = vor.u32 %v6147_v1, %v5183_v11 }
 0x234   : > { %v1201_v47 = vmul.f32 0.01, %v1076_v32  ;;  %2863 = vmatmul.bf16.gmra.mxu1 %v7069_v38  ;;  %v5504_v8 = vor.u32 %v6227_v14, %v5503_v43  ;;  %v6211_v43 = vld [vmem:[#allocation5 + $0x324] sm:$0xf0] }
 0x235   : > { %v1202_v48 = vmul.f32 0.01, %v1115_v46  ;;  %2980 = vmatmul.bf16.gmra.mxu0 %v7072_v39  ;;  %v5695_v14 = vld [vmem:[#allocation5 + $0x508] sm:$0xf] }
 0x236   : > { %v1249_v53 = vmax.f32 %v1076_v32, %v1201_v47  ;;  %3182 = vmatpush.bf16.msra.mxu2 %v5504_v8  ;;  %3222 = vmatpush.bf16.msrb.mxu3 %v5728_v28  ;;  %v5696_v10 = vor.u32 %v6275_v5, %v5695_v14  ;;  %v5951_v17 = vld [vmem:[#allocation5 + $0x708] sm:$0xf] }
 0x237   : > { %v1250_v62 = vmax.f32 %v1115_v46, %v1202_v48  ;;  %v6339_v21 = vld [vmem:[#allocation5 + $0x724] sm:$0xf0]  ;;  %3145 = vmatpush.bf16.msra.mxu1 %v5184_v20 }
 0x238   : > { %v7077_v41 = vpack.c.bf16 %v1249_v53, %v1245_v52  ;;  %v6347_v52 = vld [vmem:[#allocation5 + $0x764] sm:$0xf0]  ;;  %v5952_v25 = vor.u32 %v6339_v21, %v5951_v17 }
 0x239   : > { %v7079_v2 = vpack.c.bf16 %v1250_v62, %v1246_v61  ;;  %v5439_v53 = vld [vmem:[#allocation5 + $0x308] sm:$0xf]  ;;  %v5984_v62 = vor.u32 %v6347_v52, %v5983_v51 }
 0x23a   : > { %2902 = vmatmul.bf16.gmra.mxu2 %v7077_v41  ;;  %v5440_v9 = vor.u32 %v6211_v43, %v5439_v53  ;;  %3223 = vmatpush.bf16.msrb.mxu3 %v5696_v10  ;;  %v5407_v22 = vld [vmem:[#allocation5 + $0x2c8] sm:$0xf] }
 0x23b   : > { %2941 = vmatmul.bf16.gmra.mxu3 %v7079_v2  ;;  %3183 = vmatpush.bf16.msra.mxu2 %v5472_v6  ;;  %v6203_v6 = vld [vmem:[#allocation5 + $0x2e4] sm:$0xf0] }
 0x23c   : > { %3261 = vmatpush.bf16.msra.mxu0 %v5984_v62  ;;  %v5408_v29 = vor.u32 %v6203_v6, %v5407_v22  ;;  %v5663_v30 = vld [vmem:[#allocation5 + $0x4c8] sm:$0xf] }
 0x23d   : > { %v6267_v31 = vld [vmem:[#allocation5 + $0x4e4] sm:$0xf0] }
 0x23e   : > { %v5919_v10 = vld [vmem:[#allocation5 + $0x6c8] sm:$0xf] }
 0x23f   : > { %3184 = vmatpush.bf16.msra.mxu2 %v5440_v9  ;;  %v6331_v11 = vld [vmem:[#allocation5 + $0x6e4] sm:$0xf0] }
 0x240   : > { %3262 = vmatpush.bf16.msra.mxu0 %v5952_v25  ;;  %v6131_v21 = vld [vmem:[#allocation5 + $0xa4] sm:$0xf0] }
 0x241   : > { %v6323_v22 = vld [vmem:[#allocation5 + $0x6a4] sm:$0xf0] }
 0x243   : > { %3185 = vmatpush.bf16.msra.mxu2 %v5408_v29  ;;  %v6195_v29 = vld [vmem:[#allocation5 + $0x2a4] sm:$0xf0] }
 0x244   : > { %2994 = vmatmul.bf16.vlgmr.msrb.gmra.mxu1 %v6969_v60 }
 0x245   : > { %3111 = vmatmul.bf16.vlgmr.msrb.gmra.mxu0 %v6972_v0 }
 0x24a   : > { %3033 = vmatmul.bf16.vlgmr.msrb.gmra.mxu2 %v6977_v4  ;;  %v2839_v37 = vpop.f32.mrf.mxu1 }
 0x24b   : > { %3072 = vmatmul.bf16.vlgmr.msra.gmra.mxu3 %v6979_v18  ;;  %v2840_v35 = vadd.f32 %v2839_v37, %v7093_v34  ;;  %v2956_v36 = vpop.f32.mrf.mxu0  ;;  %v5151_v37 = vld [vmem:[#allocation5 + $0xc8] sm:$0xf] }
 0x252   : > { %v2841_v44 = vpop.f32.mrf.mxu1 }
 0x253   : > { %v2842_v48 = vadd.f32 %v2841_v44, %v7093_v34  ;;  %v2958_v8 = vpop.f32.mrf.mxu0 }
 0x254   : > { %2999 = vmatmul.bf16.gmra.mxu1 %v6989_v54 }
 0x255   : > { %3116 = vmatmul.bf16.gmra.mxu0 %v6992_v58 }
 0x256   : > { %v2878_v40 = vpop.f32.mrf.mxu2 }
 0x257   : > { %v2879_v32 = vadd.f32 %v2878_v40, %v2840_v35  ;;  %v2917_v42 = vpop.f32.mrf.mxu3  ;;  %v6139_v40 = vld [vmem:[#allocation5 + $0xe4] sm:$0xf0] }
 0x258   : > { %v5152_v44 = vor.u32 %v6139_v40, %v5151_v37  ;;  %v5343_v40 = vld [vmem:[#allocation5 + $0x248] sm:$0xf] }
 0x259   : > { %v2918_v46 = vadd.f32 %v2917_v42, %v2879_v32 }
 0x25a   : > { %3038 = vmatmul.bf16.gmra.mxu2 %v6997_v12  ;;  %3146 = vmatpush.bf16.msra.mxu1 %v5152_v44 }
 0x25b   : > { %v2957_v47 = vadd.f32 %v2956_v36, %v2918_v46  ;;  %3077 = vmatmul.bf16.gmra.mxu3 %v6999_v13  ;;  %v2844_v24 = vpop.f32.mrf.mxu1  ;;  %v5664_v36 = vor.u32 %v6267_v31, %v5663_v30  ;;  %v5631_v30 = vld [vmem:[#allocation5 + $0x488] sm:$0xf] }
 0x25c   : > { %v2845_v28 = vadd.f32 %v2844_v24, %v7093_v34  ;;  %v5887_v24 = vld [vmem:[#allocation5 + $0x688] sm:$0xf] }
 0x25d   : > { %3224 = vmatpush.bf16.msrb.mxu3 %v5664_v36  ;;  %v5888_v31 = vor.u32 %v6323_v22, %v5887_v24  ;;  %v6259_v36 = vld [vmem:[#allocation5 + $0x4a4] sm:$0xf0] }
 0x25e   : > { %v2880_v50 = vpop.f32.mrf.mxu2 }
 0x25f   : > { %v2881_v55 = vadd.f32 %v2880_v50, %v2842_v48  ;;  %v2919_v61 = vpop.f32.mrf.mxu3  ;;  %v4078_v48 = vmul.f32 0.01, %v2957_v47  ;;  %v2961_v50 = vpop.f32.mrf.mxu0 }
 0x261   : > { %v2920_v19 = vadd.f32 %v2919_v61, %v2881_v55  ;;  %v4174_v61 = vmax.f32 %v2957_v47, %v4078_v48  ;;  %v5119_v47 = vld [vmem:[#allocation5 + $0x88] sm:$0xf] }
 0x262   : > { %v5087_v48 = vld [vmem:[#allocation5 + $0x48] sm:$0xf] }
 0x263   : > { %v2959_v27 = vadd.f32 %v2958_v8, %v2920_v19  ;;  %v2846_v53 = vpop.f32.mrf.mxu1  ;;  %v5920_v19 = vor.u32 %v6331_v11, %v5919_v10  ;;  %v6315_v10 = vld [vmem:[#allocation5 + $0x664] sm:$0xf0] }
 0x264   : > { %3004 = vmatmul.bf16.gmra.mxu1 %v7009_v49  ;;  %v2847_v20 = vadd.f32 %v2846_v53, %v7093_v34 }
 0x265   : > { %3121 = vmatmul.bf16.gmra.mxu0 %v7012_v57  ;;  %v4086_v32 = vmul.f32 0.01, %v2959_v27 }
 0x266   : > { %3263 = vmatpush.bf16.msra.mxu0 %v5920_v19 }
 0x267   : > { %v2883_v35 = vpop.f32.mrf.mxu2  ;;  %v4182_v52 = vmax.f32 %v2959_v27, %v4086_v32  ;;  %v2963_v1 = vpop.f32.mrf.mxu0  ;;  %v5120_v27 = vor.u32 %v6131_v21, %v5119_v47  ;;  %v6187_v32 = vld [vmem:[#allocation5 + $0x264] sm:$0xf0] }
 0x268   : > { %v2884_v42 = vadd.f32 %v2883_v35, %v2845_v28  ;;  %v2922_v46 = vpop.f32.mrf.mxu3  ;;  %v5375_v28 = vld [vmem:[#allocation5 + $0x288] sm:$0xf] }
 0x269   : > { %v4270_v43 = vmax.f32 %v4174_v61, %v4182_v52  ;;  %v5376_v35 = vor.u32 %v6195_v29, %v5375_v28  ;;  %3147 = vmatpush.bf16.msra.mxu1 %v5120_v27  ;;  %v5599_v61 = vld [vmem:[#allocation5 + $0x448] sm:$0xf] }
 0x26a   : > { %v2923_v51 = vadd.f32 %v2922_v46, %v2884_v42  ;;  %3043 = vmatmul.bf16.gmra.mxu2 %v7017_v15  ;;  %v5632_v46 = vor.u32 %v6259_v36, %v5631_v30  ;;  %3264 = vmatpush.bf16.msra.mxu0 %v5888_v31  ;;  %v6115_v47 = vld [vmem:[#allocation5 + $0x24] sm:$0xf0] }
 0x26b   : > { %3082 = vmatmul.bf16.gmra.mxu3 %v7019_v16  ;;  %3186 = vmatpush.bf16.msra.mxu2 %v5376_v35  ;;  %v5823_v21 = vld [vmem:[#allocation5 + $0x608] sm:$0xf] }
 0x26c   : > { %v2962_v55 = vadd.f32 %v2961_v50, %v2923_v51  ;;  %v6123_v50 = vld [vmem:[#allocation5 + $0x64] sm:$0xf0]  ;;  %3225 = vmatpush.bf16.msrb.mxu3 %v5632_v46 }
 0x26d   : > { %v5855_v51 = vld [vmem:[#allocation5 + $0x648] sm:$0xf] }
 0x26e   : > { %v4094_v62 = vmul.f32 0.01, %v2962_v55  ;;  %v2849_v17 = vpop.f32.mrf.mxu1  ;;  %v6179_v35 = vld [vmem:[#allocation5 + $0x224] sm:$0xf0] }
 0x26f   : > { %v2885_v8 = vpop.f32.mrf.mxu2  ;;  %v2850_v6 = vadd.f32 %v2849_v17, %v7093_v34  ;;  %v2966_v52 = vpop.f32.mrf.mxu0  ;;  %v5856_v17 = vor.u32 %v6315_v10, %v5855_v51  ;;  %v5567_v36 = vld [vmem:[#allocation5 + $0x408] sm:$0xf] }
 0x270   : > { %v4190_v14 = vmax.f32 %v2962_v55, %v4094_v62  ;;  %v2924_v9 = vpop.f32.mrf.mxu3  ;;  %v2886_v25 = vadd.f32 %v2885_v8, %v2847_v20  ;;  %v5344_v55 = vor.u32 %v6187_v32, %v5343_v40  ;;  %v6251_v62 = vld [vmem:[#allocation5 + $0x464] sm:$0xf0] }
 0x271   : > { %v5600_v8 = vor.u32 %v6251_v62, %v5599_v61  ;;  %v5055_v20 = vld [vmem:[#allocation5 + $0x8] sm:$0xf]  ;;  %3265 = vmatpush.bf16.msra.mxu0 %v5856_v17  ;;  %v5537_v61 = vld [vmem:[#allocation5 + $0x3e8] sm:$0xf0] }
 0x272   : > { %v7106_v5 = vmax.f32 %v4270_v43, %v4190_v14  ;;  %v2925_v53 = vadd.f32 %v2924_v9, %v2886_v25  ;;  %v5088_v43 = vor.u32 %v6123_v50, %v5087_v48  ;;  %3187 = vmatpush.bf16.msra.mxu2 %v5344_v55  ;;  %v5056_v9 = vor.u32 %v6115_v47, %v5055_v20  ;;  %v6307_v25 = vld [vmem:[#allocation5 + $0x624] sm:$0xf0]  ;;  %v6231_v55 = vld [vmem:[#allocation5 + $0x3cc] sm:$0xf] }
 0x273   : > { %3226 = vmatpush.bf16.msrb.mxu3 %v5600_v8  ;;  %v5824_v22 = vor.u32 %v6307_v25, %v5823_v21  ;;  %v5540_v62 = vor.u32 %v6231_v55, %v5537_v61  ;;  %v6287_v61 = vld [vmem:[#allocation5 + $0x58c] sm:$0xf] }
 0x274   : > { %3009 = vmatmul.bf16.gmra.mxu1 %v7029_v63  ;;  %v2964_v24 = vadd.f32 %v2963_v1, %v2925_v53  ;;  %v5311_v1 = vld [vmem:[#allocation5 + $0x208] sm:$0xf] }
 0x275   : > { %3126 = vmatmul.bf16.gmra.mxu0 %v7032_v7  ;;  %3148 = vmatpush.bf16.msra.mxu1 %v5088_v43  ;;  %v5312_v32 = vor.u32 %v6179_v35, %v5311_v1  ;;  %v6295_v1 = vld [vmem:[#allocation5 + $0x5cc] sm:$0xf] }
 0x276   : > { %v2851_v11 = vpop.f32.mrf.mxu1  ;;  %v4102_v30 = vmul.f32 0.01, %v2964_v24  ;;  %3266 = vmatpush.bf16.msra.mxu0 %v5824_v22  ;;  %v5793_v35 = vld [vmem:[#allocation5 + $0x5e8] sm:$0xf0] }
 0x277   : > { %v2852_v27 = vadd.f32 %v2851_v11, %v7093_v34  ;;  %v2968_v40 = vpop.f32.mrf.mxu0  ;;  %3188 = vmatpush.bf16.msra.mxu2 %v5312_v32  ;;  %v5281_v32 = vld [vmem:[#allocation5 + $0x1e8] sm:$0xf0] }
 0x278   : > { %v4198_v50 = vmax.f32 %v2964_v24, %v4102_v30 }
 0x279   : > { %3149 = vmatpush.bf16.msra.mxu1 %v5056_v9 }
 0x27a   : > { %v2888_v37 = vpop.f32.mrf.mxu2  ;;  %3048 = vmatmul.bf16.gmra.mxu2 %v7037_v23 }
 0x27b   : > { %v2889_v42 = vadd.f32 %v2888_v37, %v2850_v6  ;;  %v2927_v44 = vpop.f32.mrf.mxu3  ;;  %3087 = vmatmul.bf16.gmra.mxu3 %v7039_v3  ;;  %3337 = vmatpush.bf16.msrb.mxu2 %v5540_v62  ;;  %v5761_v62 = vld [vmem:[#allocation5 + $0x5a8] sm:$0xf0] }
 0x27d   : > { %v2928_v14 = vadd.f32 %v2927_v44, %v2889_v42  ;;  %v6243_v42 = vld [vmem:[#allocation5 + $0x424] sm:$0xf0] }
 0x27e   : > { %v5568_v48 = vor.u32 %v6243_v42, %v5567_v36  ;;  %v5796_v36 = vor.u32 %v6295_v1, %v5793_v35  ;;  %v6359_v42 = vld [vmem:[#allocation5 + $0x7cc] sm:$0xf] }
 0x27f   : > { %v2967_v19 = vadd.f32 %v2966_v52, %v2928_v14 }
 0x280   : > { %3227 = vmatpush.bf16.msrb.mxu3 %v5568_v48 }
 0x281   : > { %v4110_v28 = vmul.f32 0.01, %v2967_v19 }
 0x282   : > { %v2890_v6 = vpop.f32.mrf.mxu2 }
 0x283   : > { %v2891_v29 = vadd.f32 %v2890_v6, %v2852_v27  ;;  %v2929_v31 = vpop.f32.mrf.mxu3  ;;  %v4206_v44 = vmax.f32 %v2967_v19, %v4110_v28 }
 0x284   : > { %3014 = vmatmul.bf16.gmra.mxu1 %v7049_v26  ;;  %3376 = vmatpush.bf16.msra.mxu3 %v5796_v36 }
 0x285   : > { %v2930_v37 = vadd.f32 %v2929_v31, %v2891_v29  ;;  %3131 = vmatmul.bf16.gmra.mxu0 %v7052_v45  ;;  %v4334_v52 = vmax.f32 %v4198_v50, %v4206_v44  ;;  %v6049_v50 = vld [vmem:[#allocation5 + $0x7e8] sm:$0xf0] }
 0x287   : > { %v2969_v46 = vadd.f32 %v2968_v40, %v2930_v37  ;;  %v2854_v14 = vpop.f32.mrf.mxu1  ;;  %v6167_v40 = vld [vmem:[#allocation5 + $0x1cc] sm:$0xf] }
 0x288   : > { %v2971_v8 = vpop.f32.mrf.mxu0  ;;  %v2855_v10 = vadd.f32 %v2854_v14, %v7093_v34  ;;  %v5284_v48 = vor.u32 %v6167_v40, %v5281_v32  ;;  %v6159_v14 = vld [vmem:[#allocation5 + $0x18c] sm:$0xf] }
 0x289   : > { %v4118_v51 = vmul.f32 0.01, %v2969_v46 }
 0x28a   : > { %3053 = vmatmul.bf16.gmra.mxu2 %v7057_v56  ;;  %3298 = vmatpush.bf16.msrb.mxu1 %v5284_v48 }
 0x28b   : > { %v4214_v53 = vmax.f32 %v2969_v46, %v4118_v51  ;;  %3092 = vmatmul.bf16.gmra.mxu3 %v7059_v59  ;;  %v6223_v51 = vld [vmem:[#allocation5 + $0x38c] sm:$0xf] }
 0x28d   : > { %v7119_v43 = vmax.f32 %v4334_v52, %v4214_v53  ;;  %v5505_v52 = vld [vmem:[#allocation5 + $0x3a8] sm:$0xf0]  ;;  %v6052_v53 = vor.u32 %v6359_v42, %v6049_v50 }
 0x28e   : > { %v5508_v55 = vor.u32 %v6223_v51, %v5505_v52 }
 0x28f   : > { %v2856_v47 = vpop.f32.mrf.mxu1  ;;  %3415 = vmatpush.bf16.msrb.mxu0 %v6052_v53 }
 0x290   : > { %v2973_v21 = vpop.f32.mrf.mxu0  ;;  %v2857_v9 = vadd.f32 %v2856_v47, %v7093_v34  ;;  %3338 = vmatpush.bf16.msrb.mxu2 %v5508_v55  ;;  %v6215_v47 = vld [vmem:[#allocation5 + $0x34c] sm:$0xf] }
 0x293   : > { %v2893_v11 = vpop.f32.mrf.mxu2 }
 0x294   : > { %v2894_v17 = vadd.f32 %v2893_v11, %v2855_v10  ;;  %v2932_v19 = vpop.f32.mrf.mxu3  ;;  %3019 = vmatmul.bf16.gmra.mxu1 %v7069_v38  ;;  %v5764_v10 = vor.u32 %v6287_v61, %v5761_v62  ;;  %v5249_v11 = vld [vmem:[#allocation5 + $0x1a8] sm:$0xf0] }
 0x295   : > { %3136 = vmatmul.bf16.gmra.mxu0 %v7072_v39 }
 0x296   : > { %v2933_v20 = vadd.f32 %v2932_v19, %v2894_v17  ;;  %v5252_v17 = vor.u32 %v6159_v14, %v5249_v11  ;;  %v6351_v19 = vld [vmem:[#allocation5 + $0x78c] sm:$0xf]  ;;  %3377 = vmatpush.bf16.msra.mxu3 %v5764_v10 }
 0x297   : > { %v6151_v14 = vld [vmem:[#allocation5 + $0x14c] sm:$0xf] }
 0x298   : > { %v2972_v24 = vadd.f32 %v2971_v8, %v2933_v20  ;;  %v6017_v20 = vld [vmem:[#allocation5 + $0x7a8] sm:$0xf0]  ;;  %3299 = vmatpush.bf16.msrb.mxu1 %v5252_v17 }
 0x299   : > { %v5217_v10 = vld [vmem:[#allocation5 + $0x168] sm:$0xf0] }
 0x29a   : > { %3058 = vmatmul.bf16.gmra.mxu2 %v7077_v41  ;;  %v4126_v29 = vmul.f32 0.01, %v2972_v24  ;;  %v5220_v17 = vor.u32 %v6151_v14, %v5217_v10 }
 0x29b   : > { %3097 = vmatmul.bf16.gmra.mxu3 %v7079_v2  ;;  %v2895_v25 = vpop.f32.mrf.mxu2 }
 0x29c   : > { %v2896_v27 = vadd.f32 %v2895_v25, %v2857_v9  ;;  %v2934_v22 = vpop.f32.mrf.mxu3  ;;  %v4222_v44 = vmax.f32 %v2972_v24, %v4126_v29  ;;  %v6020_v24 = vor.u32 %v6351_v19, %v6017_v20  ;;  %v5473_v9 = vld [vmem:[#allocation5 + $0x368] sm:$0xf0]  ;;  %3300 = vmatpush.bf16.msrb.mxu1 %v5220_v17 }
 0x29d   : > { %v6279_v25 = vld [vmem:[#allocation5 + $0x54c] sm:$0xf]  ;;  %v5476_v29 = vor.u32 %v6215_v47, %v5473_v9 }
 0x29e   : > { %v2935_v6 = vadd.f32 %v2934_v22, %v2896_v27  ;;  %v5729_v27 = vld [vmem:[#allocation5 + $0x568] sm:$0xf0]  ;;  %3416 = vmatpush.bf16.msrb.mxu0 %v6020_v24 }
 0x29f   : > { %v2859_v28 = vpop.f32.mrf.mxu1  ;;  %3339 = vmatpush.bf16.msrb.mxu2 %v5476_v29  ;;  %v6343_v19 = vld [vmem:[#allocation5 + $0x74c] sm:$0xf] }
 0x2a0   : > { %v2974_v30 = vadd.f32 %v2973_v21, %v2935_v6  ;;  %v2976_v31 = vpop.f32.mrf.mxu0  ;;  %v2860_v22 = vadd.f32 %v2859_v28, %v7093_v34  ;;  %v5985_v20 = vld [vmem:[#allocation5 + $0x768] sm:$0xf0] }
 0x2a1   : > { %v6207_v47 = vld [vmem:[#allocation5 + $0x30c] sm:$0xf]  ;;  %v5988_v24 = vor.u32 %v6343_v19, %v5985_v20 }
 0x2a2   : > { %v4134_v37 = vmul.f32 0.01, %v2974_v30  ;;  %v5441_v9 = vld [vmem:[#allocation5 + $0x328] sm:$0xf0] }
 0x2a3   : > { %v6143_v29 = vld [vmem:[#allocation5 + $0x10c] sm:$0xf]  ;;  %3417 = vmatpush.bf16.msrb.mxu0 %v5988_v24 }
 0x2a4   : > { %v4230_v46 = vmax.f32 %v2974_v30, %v4134_v37  ;;  %3150 = vmatmul.bf16.vlgmr.msra.gmra.mxu1 %v6969_v60  ;;  %v5732_v30 = vor.u32 %v6279_v25, %v5729_v27  ;;  %v6271_v25 = vld [vmem:[#allocation5 + $0x50c] sm:$0xf] }
 0x2a5   : > { %3267 = vmatmul.bf16.vlgmr.msra.gmra.mxu0 %v6972_v0  ;;  %v5697_v27 = vld [vmem:[#allocation5 + $0x528] sm:$0xf0] }
 0x2a6   : > { %v4398_v8 = vmax.f32 %v4222_v44, %v4230_v46  ;;  %3378 = vmatpush.bf16.msra.mxu3 %v5732_v30  ;;  %v5185_v30 = vld [vmem:[#allocation5 + $0x128] sm:$0xf0] }
 0x2a7   : > { %v2861_v21 = vpop.f32.mrf.mxu1 }
 0x2a8   : > { %v2978_v6 = vpop.f32.mrf.mxu0  ;;  %v2862_v42 = vadd.f32 %v2861_v21, %v7093_v34 }
 0x2aa   : > { %3189 = vmatmul.bf16.vlgmr.msra.gmra.mxu2 %v6977_v4 }
 0x2ab   : > { %3228 = vmatmul.bf16.vlgmr.msrb.gmra.mxu3 %v6979_v18  ;;  %v2898_v37 = vpop.f32.mrf.mxu2 }
 0x2ac   : > { %v2899_v1 = vadd.f32 %v2898_v37, %v2860_v22  ;;  %v2937_v35 = vpop.f32.mrf.mxu3  ;;  %v5444_v22 = vor.u32 %v6207_v47, %v5441_v9 }
 0x2ae   : > { %v2938_v36 = vadd.f32 %v2937_v35, %v2899_v1  ;;  %v5188_v1 = vor.u32 %v6143_v29, %v5185_v30  ;;  %v6335_v35 = vld [vmem:[#allocation5 + $0x70c] sm:$0xf]  ;;  %3340 = vmatpush.bf16.msrb.mxu2 %v5444_v22 }
 0x2b0   : > { %v2977_v40 = vadd.f32 %v2976_v31, %v2938_v36  ;;  %v5953_v36 = vld [vmem:[#allocation5 + $0x728] sm:$0xf0]  ;;  %3301 = vmatpush.bf16.msrb.mxu1 %v5188_v1 }
 0x2b1   : > { %v2864_v32 = vpop.f32.mrf.mxu1 }
 0x2b2   : > { %v4142_v28 = vmul.f32 0.01, %v2977_v40  ;;  %v2981_v44 = vpop.f32.mrf.mxu0  ;;  %v2865_v31 = vadd.f32 %v2864_v32, %v7093_v34  ;;  %v5956_v32 = vor.u32 %v6335_v35, %v5953_v36  ;;  %v5153_v36 = vld [vmem:[#allocation5 + $0xe8] sm:$0xf0] }
 0x2b3   : > { %v2900_v46 = vpop.f32.mrf.mxu2 }
 0x2b4   : > { %v4238_v48 = vmax.f32 %v2977_v40, %v4142_v28  ;;  %v2901_v50 = vadd.f32 %v2900_v46, %v2862_v42  ;;  %3155 = vmatmul.bf16.gmra.mxu1 %v6989_v54  ;;  %v2939_v51 = vpop.f32.mrf.mxu3  ;;  %v6199_v42 = vld [vmem:[#allocation5 + $0x2cc] sm:$0xf]  ;;  %3418 = vmatpush.bf16.msrb.mxu0 %v5956_v32 }
 0x2b5   : > { %3272 = vmatmul.bf16.gmra.mxu0 %v6992_v58  ;;  %v5409_v28 = vld [vmem:[#allocation5 + $0x2e8] sm:$0xf0] }
 0x2b6   : > { %v7135_v52 = vmax.f32 %v4398_v8, %v4238_v48  ;;  %v2940_v53 = vadd.f32 %v2939_v51, %v2901_v50  ;;  %v6263_v46 = vld [vmem:[#allocation5 + $0x4cc] sm:$0xf] }
 0x2b7   : > { %v6327_v32 = vld [vmem:[#allocation5 + $0x6cc] sm:$0xf] }
 0x2b8   : > { %v2979_v55 = vadd.f32 %v2978_v6, %v2940_v53  ;;  %v5700_v6 = vor.u32 %v6271_v25, %v5697_v27  ;;  %v5412_v53 = vor.u32 %v6199_v42, %v5409_v28  ;;  %v5921_v28 = vld [vmem:[#allocation5 + $0x6e8] sm:$0xf0] }
 0x2b9   : > { %v2866_v61 = vpop.f32.mrf.mxu1 }
 0x2ba   : > { %v2983_v62 = vpop.f32.mrf.mxu0  ;;  %3194 = vmatmul.bf16.gmra.mxu2 %v6997_v12  ;;  %3379 = vmatpush.bf16.msra.mxu3 %v5700_v6  ;;  %v4150_v48 = vmul.f32 0.01, %v2979_v55  ;;  %v2867_v10 = vadd.f32 %v2866_v61, %v7093_v34 }
 0x2bb   : > { %3233 = vmatmul.bf16.gmra.mxu3 %v6999_v13  ;;  %3341 = vmatpush.bf16.msrb.mxu2 %v5412_v53 }
 0x2bc   : > { %v4246_v19 = vmax.f32 %v2979_v55, %v4150_v48  ;;  %v5924_v48 = vor.u32 %v6327_v32, %v5921_v28  ;;  %v5089_v32 = vld [vmem:[#allocation5 + $0x68] sm:$0xf0] }
 0x2bd   : > { %v2903_v11 = vpop.f32.mrf.mxu2 }
 0x2be   : > { %v2904_v21 = vadd.f32 %v2903_v11, %v2865_v31  ;;  %v2942_v8 = vpop.f32.mrf.mxu3  ;;  %v5665_v31 = vld [vmem:[#allocation5 + $0x4e8] sm:$0xf0]  ;;  %3419 = vmatpush.bf16.msrb.mxu0 %v5924_v48 }
 0x2bf   : > { %v5668_v14 = vor.u32 %v6263_v46, %v5665_v31  ;;  %v5121_v31 = vld [vmem:[#allocation5 + $0xa8] sm:$0xf0] }
 0x2c0   : > { %v2943_v37 = vadd.f32 %v2942_v8, %v2904_v21  ;;  %v7144_v8 = vperm.slane %v7090_v33, 1  ;;  %v5857_v48 = vld [vmem:[#allocation5 + $0x668] sm:$0xf0] }
 0x2c1   : > { %v2995_v40 = vpop.f32.mrf.mxu1  ;;  %3380 = vmatpush.bf16.msra.mxu3 %v5668_v14  ;;  %v6319_v14 = vld [vmem:[#allocation5 + $0x68c] sm:$0xf] }
 0x2c2   : > { %v2982_v50 = vadd.f32 %v2981_v44, %v2943_v37  ;;  %v3112_v51 = vpop.f32.mrf.mxu0  ;;  %v2996_v25 = vadd.f32 %v2995_v40, %v7144_v8 }
 0x2c4   : > { %v4158_v11 = vmul.f32 0.01, %v2982_v50  ;;  %3160 = vmatmul.bf16.gmra.mxu1 %v7009_v49 }
 0x2c5   : > { %3277 = vmatmul.bf16.gmra.mxu0 %v7012_v57  ;;  %v2905_v17 = vpop.f32.mrf.mxu2 }
 0x2c6   : > { %v4254_v20 = vmax.f32 %v2982_v50, %v4158_v11  ;;  %v2906_v47 = vadd.f32 %v2905_v17, %v2867_v10  ;;  %v2944_v21 = vpop.f32.mrf.mxu3  ;;  %v6191_v11 = vld [vmem:[#allocation5 + $0x28c] sm:$0xf] }
 0x2c7   : > { %v5377_v17 = vld [vmem:[#allocation5 + $0x2a8] sm:$0xf0] }
 0x2c8   : > { %v4462_v44 = vmax.f32 %v4246_v19, %v4254_v20  ;;  %v2945_v24 = vadd.f32 %v2944_v21, %v2906_v47  ;;  %v6255_v19 = vld [vmem:[#allocation5 + $0x48c] sm:$0xf]  ;;  %v5380_v21 = vor.u32 %v6191_v11, %v5377_v17 }
 0x2c9   : > { %v2997_v9 = vpop.f32.mrf.mxu1  ;;  %v6111_v11 = vld [vmem:[#allocation5 + $0xc] sm:$0xf] }
 0x2ca   : > { %v2984_v34 = vadd.f32 %v2983_v62, %v2945_v24  ;;  %v3114_v61 = vpop.f32.mrf.mxu0  ;;  %3199 = vmatmul.bf16.gmra.mxu2 %v7017_v15  ;;  %v6135_v62 = vld [vmem:[#allocation5 + $0xcc] sm:$0xf]  ;;  %v2998_v42 = vadd.f32 %v2997_v9, %v7144_v8 }
 0x2cb   : > { %3238 = vmatmul.bf16.gmra.mxu3 %v7019_v16  ;;  %v5156_v40 = vor.u32 %v6135_v62, %v5153_v36  ;;  %v5889_v24 = vld [vmem:[#allocation5 + $0x6a8] sm:$0xf0]  ;;  %3342 = vmatpush.bf16.msrb.mxu2 %v5380_v21 }
 0x2cc   : > { %v4166_v27 = vmul.f32 0.01, %v2984_v34  ;;  %v6183_v9 = vld [vmem:[#allocation5 + $0x24c] sm:$0xf] }
 0x2cd   : > { %v3034_v55 = vpop.f32.mrf.mxu2  ;;  %3302 = vmatpush.bf16.msrb.mxu1 %v5156_v40  ;;  %v5601_v62 = vld [vmem:[#allocation5 + $0x468] sm:$0xf0] }
 0x2ce   : > { %v4262_v22 = vmax.f32 %v2984_v34, %v4166_v27  ;;  %v3035_v6 = vadd.f32 %v3034_v55, %v2996_v25  ;;  %v3073_v29 = vpop.f32.mrf.mxu3  ;;  %v6119_v36 = vld [vmem:[#allocation5 + $0x4c] sm:$0xf] }
 0x2cf   : > { %v5092_v28 = vor.u32 %v6119_v36, %v5089_v32  ;;  %v5057_v17 = vld [vmem:[#allocation5 + $0x28] sm:$0xf0] }
 0x2d0   : > { %v7149_v30 = vmax.f32 %v4462_v44, %v4262_v22  ;;  %v3074_v37 = vadd.f32 %v3073_v29, %v3035_v6  ;;  %v5633_v44 = vld [vmem:[#allocation5 + $0x4a8] sm:$0xf0]  ;;  %v5892_v29 = vor.u32 %v6319_v14, %v5889_v24  ;;  %v5060_v21 = vor.u32 %v6111_v11, %v5057_v17 }
 0x2d1   : > { %v3000_v33 = vpop.f32.mrf.mxu1  ;;  %v5636_v55 = vor.u32 %v6255_v19, %v5633_v44  ;;  %v5345_v22 = vld [vmem:[#allocation5 + $0x268] sm:$0xf0]  ;;  %v4272_v24 = vrot.slane %v7106_v5, 4 }
 0x2d2   : > { %v7151_v1 = vadd.f32 %v3112_v51, %v3074_v37  ;;  %v7153_v35 = vpop.f32.mrf.mxu0  ;;  %v6127_v51 = vld [vmem:[#allocation5 + $0x8c] sm:$0xf]  ;;  %v5348_v37 = vor.u32 %v6183_v9, %v5345_v22  ;;  %3420 = vmatpush.bf16.msrb.mxu0 %v5892_v29 }
 0x2d3   : > { %v5124_v20 = vor.u32 %v6127_v51, %v5121_v31  ;;  %v6247_v6 = vld [vmem:[#allocation5 + $0x44c] sm:$0xf]  ;;  %3381 = vmatpush.bf16.msra.mxu3 %v5636_v55  ;;  %v4273_v22 = vmax.f32 %v7106_v5, %v4272_v24 }
 0x2d4   : > { %3165 = vmatmul.bf16.gmra.mxu1 %v7029_v63  ;;  %v4079_v34 = vmul.f32 0.01, %v7151_v1  ;;  %3343 = vmatpush.bf16.msrb.mxu2 %v5348_v37  ;;  %v6303_v19 = vld [vmem:[#allocation5 + $0x60c] sm:$0xf] }
 0x2d5   : > { %3282 = vmatmul.bf16.gmra.mxu0 %v7032_v7  ;;  %v3036_v46 = vpop.f32.mrf.mxu2  ;;  %3303 = vmatpush.bf16.msrb.mxu1 %v5124_v20  ;;  %v5825_v44 = vld [vmem:[#allocation5 + $0x628] sm:$0xf0] }
 0x2d6   : > { %v3037_v50 = vadd.f32 %v3036_v46, %v2998_v42  ;;  %v3075_v53 = vpop.f32.mrf.mxu3  ;;  %v3001_v42 = vadd.f32 %v3000_v33, %v7144_v8  ;;  %v6311_v46 = vld [vmem:[#allocation5 + $0x64c] sm:$0xf]  ;;  %v4175_v51 = vmax.f32 %v7151_v1, %v4079_v34  ;;  %v5828_v34 = vor.u32 %v6303_v19, %v5825_v44 }
 0x2d7   : > { %v6175_v29 = vld [vmem:[#allocation5 + $0x20c] sm:$0xf] }
 0x2d8   : > { %v3076_v10 = vadd.f32 %v3075_v53, %v3037_v50  ;;  %v5860_v53 = vor.u32 %v6311_v46, %v5857_v48  ;;  %v5313_v37 = vld [vmem:[#allocation5 + $0x228] sm:$0xf0] }
 0x2d9   : > { %v7158_v47 = vpop.f32.mrf.mxu1  ;;  %3304 = vmatpush.bf16.msrb.mxu1 %v5092_v28  ;;  %v4274_v28 = vrot.slane %v4273_v22, 2 }
 0x2da   : > { %v3115_v25 = vadd.f32 %v3114_v61, %v3076_v10  ;;  %v7161_v27 = vpop.f32.mrf.mxu0  ;;  %3204 = vmatmul.bf16.gmra.mxu2 %v7037_v23  ;;  %v5604_v61 = vor.u32 %v6247_v6, %v5601_v62  ;;  %3421 = vmatpush.bf16.msrb.mxu0 %v5860_v53  ;;  %v6239_v62 = vld [vmem:[#allocation5 + $0x40c] sm:$0xf]  ;;  %v3003_v5 = vadd.f32 %v7158_v47, %v7144_v8 }
 0x2db   : > { %3243 = vmatmul.bf16.gmra.mxu3 %v7039_v3 }
 0x2dc   : > { %v4087_v40 = vmul.f32 0.01, %v3115_v25  ;;  %3382 = vmatpush.bf16.msra.mxu3 %v5604_v61 }
 0x2dd   : > { %v3039_v50 = vpop.f32.mrf.mxu2  ;;  %3305 = vmatpush.bf16.msrb.mxu1 %v5060_v21 }
 0x2de   : > { %v4183_v31 = vmax.f32 %v3115_v25, %v4087_v40  ;;  %v3040_v10 = vadd.f32 %v3039_v50, %v3001_v42  ;;  %v3078_v14 = vpop.f32.mrf.mxu3  ;;  %v5316_v42 = vor.u32 %v6175_v29, %v5313_v37  ;;  %v5569_v40 = vld [vmem:[#allocation5 + $0x428] sm:$0xf0]  ;;  %3422 = vmatpush.bf16.msrb.mxu0 %v5828_v34 }
 0x2e0   : > { %v4278_v33 = vmax.f32 %v4175_v51, %v4183_v31  ;;  %v3079_v20 = vadd.f32 %v3078_v14, %v3040_v10  ;;  %3344 = vmatpush.bf16.msrb.mxu2 %v5316_v42  ;;  %v4275_v10 = vmax.f32 %v4273_v22, %v4274_v28  ;;  %v6236_v22 = vld [vmem:[#allocation5 + $0x3ec] sm:$0xf0] }
 0x2e1   : > { %v3005_v9 = vpop.f32.mrf.mxu1  ;;  %v6300_v42 = vld [vmem:[#allocation5 + $0x5ec] sm:$0xf0] }
 0x2e2   : > { %v3118_v55 = vadd.f32 %v7153_v35, %v3079_v20  ;;  %v3122_v1 = vpop.f32.mrf.mxu0  ;;  %v5572_v35 = vor.u32 %v6239_v62, %v5569_v40  ;;  %v3006_v51 = vadd.f32 %v3005_v9, %v7144_v8  ;;  %v4276_v44 = vrot.slane %v4275_v10, 1  ;;  %v5543_v9 = vld [vmem:[#allocation5 + $0x3d0] sm:$0xf] }
 0x2e4   : > { %v4095_v25 = vmul.f32 0.01, %v3118_v55  ;;  %3170 = vmatmul.bf16.gmra.mxu1 %v7049_v26  ;;  %3383 = vmatpush.bf16.msra.mxu3 %v5572_v35 }
 0x2e5   : > { %3287 = vmatmul.bf16.gmra.mxu0 %v7052_v45  ;;  %v3041_v6 = vpop.f32.mrf.mxu2 }
 0x2e6   : > { %v4191_v36 = vmax.f32 %v3118_v55, %v4095_v25  ;;  %v3080_v32 = vpop.f32.mrf.mxu3  ;;  %v3042_v31 = vadd.f32 %v3041_v6, %v3003_v5  ;;  %v4277_v6 = vmax.f32 %v4275_v10, %v4276_v44 }
 0x2e8   : > { %v4279_v61 = vmax.f32 %v4278_v33, %v4191_v36  ;;  %v3081_v20 = vadd.f32 %v3080_v32, %v3042_v31  ;;  %v5544_v36 = vor.u32 %v6236_v22, %v5543_v9  ;;  %v5799_v32 = vld [vmem:[#allocation5 + $0x5d0] sm:$0xf] }
 0x2e9   : > { %v3007_v46 = vpop.f32.mrf.mxu1  ;;  %v5800_v28 = vor.u32 %v6300_v42, %v5799_v32 }
 0x2ea   : > { %v4280_v48 = vrot.slane %v4279_v61, 4  ;;  %v3124_v50 = vpop.f32.mrf.mxu0  ;;  %3209 = vmatmul.bf16.gmra.mxu2 %v7057_v56  ;;  %v3120_v29 = vadd.f32 %v7161_v27, %v3081_v20  ;;  %v3008_v37 = vadd.f32 %v3007_v46, %v7144_v8 }
 0x2eb   : > { %3248 = vmatmul.bf16.gmra.mxu3 %v7059_v59  ;;  %3493 = vmatpush.bf16.msra.mxu2 %v5544_v36 }
 0x2ec   : > { %v4281_v53 = vmax.f32 %v4279_v61, %v4280_v48  ;;  %v4103_v46 = vmul.f32 0.01, %v3120_v29  ;;  %3532 = vmatpush.bf16.msrb.mxu3 %v5800_v28  ;;  %v4336_v48 = vrot.slane %v7119_v43, 4 }
 0x2ed   : > { %v3044_v14 = vpop.f32.mrf.mxu2 }
 0x2ee   : > { %v4282_v11 = vrot.slane %v4281_v53, 2  ;;  %v3045_v17 = vadd.f32 %v3044_v14, %v3006_v51  ;;  %v3083_v19 = vpop.f32.mrf.mxu3  ;;  %v4199_v14 = vmax.f32 %v3120_v29, %v4103_v46 }
 0x2f0   : > { %v4283_v33 = vmax.f32 %v4281_v53, %v4282_v11  ;;  %v3084_v21 = vadd.f32 %v3083_v19, %v3045_v17  ;;  %v4337_v19 = vmax.f32 %v7119_v43, %v4336_v48 }
 0x2f1   : > { %v3010_v47 = vpop.f32.mrf.mxu1 }
 0x2f2   : > { %v4284_v24 = vrot.slane %v4283_v33, 1  ;;  %v3123_v55 = vadd.f32 %v3122_v1, %v3084_v21  ;;  %v3127_v34 = vpop.f32.mrf.mxu0  ;;  %v3011_v11 = vadd.f32 %v3010_v47, %v7144_v8 }
 0x2f4   : > { %v4285_v25 = vmax.f32 %v4283_v33, %v4284_v24  ;;  %3175 = vmatmul.bf16.gmra.mxu1 %v7069_v38  ;;  %v4111_v1 = vmul.f32 0.01, %v3123_v55 }
 0x2f5   : > { %3292 = vmatmul.bf16.gmra.mxu0 %v7072_v39  ;;  %v3046_v62 = vpop.f32.mrf.mxu2 }
 0x2f6   : > { %v4562_v40 = vrot.slane %v4285_v25, 4  ;;  %v3047_v35 = vadd.f32 %v3046_v62, %v3008_v37  ;;  %v3085_v61 = vpop.f32.mrf.mxu3  ;;  %v4207_v51 = vmax.f32 %v3123_v55, %v4111_v1  ;;  %v4338_v37 = vrot.slane %v4337_v19, 2 }
 0x2f8   : > { %v7182_v27 = vsel %vm4578_vm1, %v4277_v6, %v4562_v40  ;;  %v3086_v5 = vadd.f32 %v3085_v61, %v3047_v35  ;;  %v4342_v20 = vmax.f32 %v4199_v14, %v4207_v51  ;;  %v4339_v47 = vmax.f32 %v4337_v19, %v4338_v37  ;;  %v6055_v51 = vld [vmem:[#allocation5 + $0x7d0] sm:$0xf] }
 0x2f9   : > { %v3012_v53 = vpop.f32.mrf.mxu1  ;;  %v6364_v19 = vld [vmem:[#allocation5 + $0x7ec] sm:$0xf0] }
 0x2fa   : > { %v3125_v31 = vadd.f32 %v3124_v50, %v3086_v5  ;;  %v3129_v10 = vpop.f32.mrf.mxu0  ;;  %3214 = vmatmul.bf16.gmra.mxu2 %v7077_v41  ;;  %v3013_v29 = vadd.f32 %v3012_v53, %v7144_v8  ;;  %v4340_v35 = vrot.slane %v4339_v47, 1  ;;  %v6172_v53 = vld [vmem:[#allocation5 + $0x1ec] sm:$0xf0] }
 0x2fb   : > { %3253 = vmatmul.bf16.gmra.mxu3 %v7079_v2 }
 0x2fc   : > { %v4119_v17 = vmul.f32 0.01, %v3125_v31 }
 0x2fd   : > { %v3049_v33 = vpop.f32.mrf.mxu2 }
 0x2fe   : > { %v4215_v21 = vmax.f32 %v3125_v31, %v4119_v17  ;;  %v3050_v44 = vadd.f32 %v3049_v33, %v3011_v11  ;;  %v3088_v24 = vpop.f32.mrf.mxu3  ;;  %v5511_v33 = vld [vmem:[#allocation5 + $0x390] sm:$0xf] }
 0x300   : > { %v4343_v25 = vmax.f32 %v4342_v20, %v4215_v21  ;;  %v3089_v9 = vadd.f32 %v3088_v24, %v3050_v44  ;;  %v4341_v20 = vmax.f32 %v4339_v47, %v4340_v35  ;;  %v6056_v21 = vor.u32 %v6364_v19, %v6055_v51  ;;  %v6228_v44 = vld [vmem:[#allocation5 + $0x3ac] sm:$0xf0] }
 0x301   : > { %v3015_v55 = vpop.f32.mrf.mxu1  ;;  %v5767_v24 = vld [vmem:[#allocation5 + $0x590] sm:$0xf]  ;;  %v4400_v19 = vrot.slane %v7135_v52, 4 }
 0x302   : > { %v4344_v50 = vrot.slane %v4343_v25, 4  ;;  %v7189_v22 = vpop.f32.mrf.mxu0  ;;  %v7194_v36 = vadd.f32 %v3127_v34, %v3089_v9  ;;  %v5287_v34 = vld [vmem:[#allocation5 + $0x1d0] sm:$0xf]  ;;  %v3016_v14 = vadd.f32 %v3015_v55, %v7144_v8  ;;  %3571 = vmatpush.bf16.msra.mxu0 %v6056_v21 }
 0x303   : > { %v5288_v17 = vor.u32 %v6172_v53, %v5287_v34  ;;  %v5735_v34 = vld [vmem:[#allocation5 + $0x550] sm:$0xf] }
 0x304   : > { %v4345_v6 = vmax.f32 %v4343_v25, %v4344_v50  ;;  %3306 = vmatmul.bf16.vlgmr.msrb.gmra.mxu1 %v6969_v60  ;;  %v7199_v46 = vmul.f32 0.01, %v7194_v36  ;;  %v6292_v25 = vld [vmem:[#allocation5 + $0x5ac] sm:$0xf0] }
 0x305   : > { %3423 = vmatmul.bf16.vlgmr.msrb.gmra.mxu0 %v6972_v0  ;;  %v3051_v43 = vpop.f32.mrf.mxu2  ;;  %3454 = vmatpush.bf16.msra.mxu1 %v5288_v17  ;;  %v5768_v55 = vor.u32 %v6292_v25, %v5767_v24  ;;  %v6284_v53 = vld [vmem:[#allocation5 + $0x56c] sm:$0xf0] }
 0x306   : > { %v4346_v62 = vrot.slane %v4345_v6, 2  ;;  %v3052_v32 = vadd.f32 %v3051_v43, %v3013_v29  ;;  %v3090_v42 = vpop.f32.mrf.mxu3  ;;  %v5255_v29 = vld [vmem:[#allocation5 + $0x190] sm:$0xf]  ;;  %v5736_v17 = vor.u32 %v6284_v53, %v5735_v34  ;;  %v4223_v24 = vmax.f32 %v7194_v36, %v7199_v46 }
 0x307   : > { %v6164_v43 = vld [vmem:[#allocation5 + $0x1ac] sm:$0xf0]  ;;  %3533 = vmatpush.bf16.msrb.mxu3 %v5768_v55 }
 0x308   : > { %v4347_v40 = vmax.f32 %v4345_v6, %v4346_v62  ;;  %v3091_v1 = vadd.f32 %v3090_v42, %v3052_v32  ;;  %v5512_v6 = vor.u32 %v6228_v44, %v5511_v33  ;;  %v5256_v62 = vor.u32 %v6164_v43, %v5255_v29  ;;  %v6023_v32 = vld [vmem:[#allocation5 + $0x790] sm:$0xf] }
 0x309   : > { %v7196_v61 = vpop.f32.mrf.mxu1  ;;  %v6356_v42 = vld [vmem:[#allocation5 + $0x7ac] sm:$0xf0] }
 0x30a   : > { %v4348_v28 = vrot.slane %v4347_v40, 1  ;;  %v7201_v5 = vadd.f32 %v3129_v10, %v3091_v1  ;;  %v7203_v48 = vpop.f32.mrf.mxu0  ;;  %3345 = vmatmul.bf16.vlgmr.msrb.gmra.mxu2 %v6977_v4  ;;  %v6024_v35 = vor.u32 %v6356_v42, %v6023_v32  ;;  %3455 = vmatpush.bf16.msra.mxu1 %v5256_v62  ;;  %v5223_v34 = vld [vmem:[#allocation5 + $0x150] sm:$0xf] }
 0x30b   : > { %3384 = vmatmul.bf16.vlgmr.msra.gmra.mxu3 %v6979_v18  ;;  %3494 = vmatpush.bf16.msra.mxu2 %v5512_v6  ;;  %v6156_v53 = vld [vmem:[#allocation5 + $0x16c] sm:$0xf0] }
 0x30c   : > { %v4349_v31 = vmax.f32 %v4347_v40, %v4348_v28  ;;  %v4135_v11 = vmul.f32 0.01, %v7201_v5  ;;  %v5479_v40 = vld [vmem:[#allocation5 + $0x350] sm:$0xf]  ;;  %3572 = vmatpush.bf16.msra.mxu0 %v6024_v35  ;;  %3534 = vmatpush.bf16.msrb.mxu3 %v5736_v17 }
 0x30d   : > { %v3054_v10 = vpop.f32.mrf.mxu2  ;;  %v6220_v28 = vld [vmem:[#allocation5 + $0x36c] sm:$0xf0] }
 0x30e   : > { %v4566_v37 = vrot.slane %v4349_v31, 4  ;;  %v3055_v50 = vadd.f32 %v3054_v10, %v3016_v14  ;;  %v3093_v9 = vpop.f32.mrf.mxu3  ;;  %v5480_v14 = vor.u32 %v6220_v28, %v5479_v40  ;;  %v4231_v33 = vmax.f32 %v7201_v5, %v4135_v11 }
 0x310   : > { %v4583_v47 = vsel %vm4578_vm1, %v4341_v20, %v4566_v37  ;;  %v3094_v1 = vadd.f32 %v3093_v9, %v3055_v50  ;;  %3495 = vmatpush.bf16.msra.mxu2 %v5480_v14  ;;  %v4406_v11 = vmax.f32 %v4223_v24, %v4231_v33  ;;  %v3018_v9 = vadd.f32 %v7196_v61, %v7144_v8 }
 0x311   : > { %v4595_v51 = vrot.slane %v4583_v47, 7  ;;  %v3020_v31 = vpop.f32.mrf.mxu1 }
 0x312   : > { %v3133_v10 = vadd.f32 %v7189_v22, %v3094_v1  ;;  %v3137_v21 = vpop.f32.mrf.mxu0  ;;  %v4401_v22 = vmax.f32 %v7135_v52, %v4400_v19  ;;  %v3021_v52 = vadd.f32 %v3020_v31, %v7144_v8  ;;  %v5224_v31 = vor.u32 %v6156_v53, %v5223_v34 }
 0x313   : > { %v4597_v20 = vsel %vm4596_vm2, %v4595_v51, %v7182_v27 }
 0x314   : > { %v7216_v44 = vsel %vm4598_vm3, %v4595_v51, %v4597_v20  ;;  %v4143_v25 = vmul.f32 0.01, %v3133_v10  ;;  %3311 = vmatmul.bf16.gmra.mxu1 %v6989_v54  ;;  %v4402_v29 = vrot.slane %v4401_v22, 2  ;;  %v5991_v51 = vld [vmem:[#allocation5 + $0x750] sm:$0xf] }
 0x315   : > { %3428 = vmatmul.bf16.gmra.mxu0 %v6992_v58  ;;  %v3056_v5 = vpop.f32.mrf.mxu2  ;;  %v5447_v20 = vld [vmem:[#allocation5 + $0x310] sm:$0xf]  ;;  %3456 = vmatpush.bf16.msra.mxu1 %v5224_v31 }
 0x316   : > { %v4239_v37 = vmax.f32 %v3133_v10, %v4143_v25  ;;  %v3095_v27 = vpop.f32.mrf.mxu3  ;;  %v3057_v43 = vadd.f32 %v3056_v5, %v3018_v9  ;;  %v4403_v32 = vmax.f32 %v4401_v22, %v4402_v29  ;;  %v6348_v10 = vld [vmem:[#allocation5 + $0x76c] sm:$0xf0] }
 0x317   : > { %v5992_v5 = vor.u32 %v6348_v10, %v5991_v51  ;;  %v6212_v22 = vld [vmem:[#allocation5 + $0x32c] sm:$0xf0]  ;;  %v4464_v10 = vrot.slane %v7149_v30, 4 }
 0x318   : > { %v4407_v50 = vmax.f32 %v4406_v11, %v4239_v37  ;;  %v3096_v1 = vadd.f32 %v3095_v27, %v3057_v43  ;;  %v4404_v14 = vrot.slane %v4403_v32, 1  ;;  %v5703_v11 = vld [vmem:[#allocation5 + $0x510] sm:$0xf] }
 0x319   : > { %v3022_v6 = vpop.f32.mrf.mxu1  ;;  %v6276_v37 = vld [vmem:[#allocation5 + $0x52c] sm:$0xf0]  ;;  %3573 = vmatpush.bf16.msra.mxu0 %v5992_v5 }
 0x31a   : > { %v4408_v36 = vrot.slane %v4407_v50, 4  ;;  %v7225_v46 = vpop.f32.mrf.mxu0  ;;  %3350 = vmatmul.bf16.gmra.mxu2 %v6997_v12  ;;  %v3135_v24 = vadd.f32 %v7203_v48, %v3096_v1  ;;  %v3023_v25 = vadd.f32 %v3022_v6, %v7144_v8  ;;  %v5704_v9 = vor.u32 %v6276_v37, %v5703_v11  ;;  %v5191_v29 = vld [vmem:[#allocation5 + $0x110] sm:$0xf] }
 0x31b   : > { %3389 = vmatmul.bf16.gmra.mxu3 %v6999_v13  ;;  %v6340_v8 = vld [vmem:[#allocation5 + $0x72c] sm:$0xf0] }
 0x31c   : > { %v4409_v55 = vmax.f32 %v4407_v50, %v4408_v36  ;;  %v6148_v36 = vld [vmem:[#allocation5 + $0x12c] sm:$0xf0]  ;;  %3535 = vmatpush.bf16.msrb.mxu3 %v5704_v9 }
 0x31d   : > { %v3059_v62 = vpop.f32.mrf.mxu2  ;;  %v5192_v48 = vor.u32 %v6148_v36, %v5191_v29  ;;  %v5415_v6 = vld [vmem:[#allocation5 + $0x2d0] sm:$0xf] }
 0x31e   : > { %v4410_v42 = vrot.slane %v4409_v55, 2  ;;  %v3060_v40 = vadd.f32 %v3059_v62, %v3021_v52  ;;  %v3098_v47 = vpop.f32.mrf.mxu3  ;;  %v4405_v52 = vmax.f32 %v4403_v32, %v4404_v14  ;;  %v6204_v1 = vld [vmem:[#allocation5 + $0x2ec] sm:$0xf0]  ;;  %v4151_v14 = vmul.f32 0.01, %v3135_v24 }
 0x31f   : > { %v5416_v53 = vor.u32 %v6204_v1, %v5415_v6  ;;  %v6268_v32 = vld [vmem:[#allocation5 + $0x4ec] sm:$0xf0]  ;;  %3457 = vmatpush.bf16.msra.mxu1 %v5192_v48 }
 0x320   : > { %v4411_v61 = vmax.f32 %v4409_v55, %v4410_v42  ;;  %v3099_v35 = vadd.f32 %v3098_v47, %v3060_v40  ;;  %v5959_v55 = vld [vmem:[#allocation5 + $0x710] sm:$0xf] }
 0x321   : > { %v7230_v28 = vpop.f32.mrf.mxu1  ;;  %v5960_v47 = vor.u32 %v6340_v8, %v5959_v55 }
 0x322   : > { %v4412_v17 = vrot.slane %v4411_v61, 1  ;;  %v7232_v19 = vadd.f32 %v3137_v21, %v3099_v35  ;;  %v7234_v33 = vpop.f32.mrf.mxu0  ;;  %v5448_v21 = vor.u32 %v6212_v22, %v5447_v20  ;;  %v7244_v35 = vld [vmem:[%s7690_s8] sm:$0xff] }
 0x323   : > { %v7247_v34 = vperm.slane %v7244_v35, 2  ;;  %3574 = vmatpush.bf16.msra.mxu0 %v5960_v47 }
 0x324   : > { %v4413_v27 = vmax.f32 %v4411_v61, %v4412_v17  ;;  %v4159_v50 = vmul.f32 0.01, %v7232_v19  ;;  %3316 = vmatmul.bf16.gmra.mxu1 %v7009_v49  ;;  %3496 = vmatpush.bf16.msra.mxu2 %v5448_v21  ;;  %v5671_v61 = vld [vmem:[#allocation5 + $0x4d0] sm:$0xf] }
 0x325   : > { %3433 = vmatmul.bf16.gmra.mxu0 %v7012_v57  ;;  %v3061_v43 = vpop.f32.mrf.mxu2  ;;  %v5672_v31 = vor.u32 %v6268_v32, %v5671_v61  ;;  %v3152_v21 = vadd.f32 %v7230_v28, %v7247_v34  ;;  %v6332_v61 = vld [vmem:[#allocation5 + $0x6ec] sm:$0xf0] }
 0x326   : > { %v4570_v62 = vrot.slane %v4413_v27, 4  ;;  %v3062_v42 = vadd.f32 %v3061_v43, %v3023_v25  ;;  %v3100_v40 = vpop.f32.mrf.mxu3  ;;  %v4255_v5 = vmax.f32 %v7232_v19, %v4159_v50  ;;  %v4247_v27 = vmax.f32 %v3135_v24, %v4151_v14 }
 0x327   : > { %3536 = vmatpush.bf16.msrb.mxu3 %v5672_v31  ;;  %v6260_v31 = vld [vmem:[#allocation5 + $0x4ac] sm:$0xf0] }
 0x328   : > { %v4587_v51 = vsel %vm4578_vm1, %v4405_v52, %v4570_v62  ;;  %v3101_v17 = vadd.f32 %v3100_v40, %v3062_v42  ;;  %3497 = vmatpush.bf16.msra.mxu2 %v5416_v53  ;;  %v4470_v29 = vmax.f32 %v4247_v27, %v4255_v5  ;;  %v5159_v62 = vld [vmem:[#allocation5 + $0xd0] sm:$0xf] }
 0x329   : > { %v4600_v20 = vrot.slane %v4587_v51, 6  ;;  %v3153_v25 = vpop.f32.mrf.mxu1  ;;  %v6140_v42 = vld [vmem:[#allocation5 + $0xec] sm:$0xf0] }
 0x32a   : > { %v3140_v22 = vadd.f32 %v7225_v46, %v3101_v17  ;;  %v7253_v11 = vpop.f32.mrf.mxu0  ;;  %3355 = vmatmul.bf16.gmra.mxu2 %v7017_v15  ;;  %v4465_v46 = vmax.f32 %v7149_v30, %v4464_v10  ;;  %v5927_v40 = vld [vmem:[#allocation5 + $0x6d0] sm:$0xf]  ;;  %v3154_v30 = vadd.f32 %v3153_v25, %v7247_v34  ;;  %v5160_v1 = vor.u32 %v6140_v42, %v5159_v62 }
 0x32b   : > { %v4602_v37 = vsel %vm4601_vm4, %v4600_v20, %v7216_v44  ;;  %3394 = vmatmul.bf16.gmra.mxu3 %v7019_v16  ;;  %v5383_v53 = vld [vmem:[#allocation5 + $0x290] sm:$0xf]  ;;  %v5928_v14 = vor.u32 %v6332_v61, %v5927_v40 }
 0x32c   : > { %v4167_v9 = vmul.f32 0.01, %v3140_v22  ;;  %v7262_v19 = vsel %vm4603_vm5, %v4600_v20, %v4602_v37  ;;  %v4466_v8 = vrot.slane %v4465_v46, 2  ;;  %v5639_v17 = vld [vmem:[#allocation5 + $0x490] sm:$0xf]  ;;  %3458 = vmatpush.bf16.msra.mxu1 %v5160_v1 }
 0x32d   : > { %v3190_v50 = vpop.f32.mrf.mxu2  ;;  %v5127_v37 = vld [vmem:[#allocation5 + $0x90] sm:$0xf]  ;;  %3575 = vmatpush.bf16.msra.mxu0 %v5928_v14  ;;  %v5640_v27 = vor.u32 %v6260_v31, %v5639_v17 }
 0x32e   : > { %v4263_v36 = vmax.f32 %v3140_v22, %v4167_v9  ;;  %v3191_v43 = vadd.f32 %v3190_v50, %v3152_v21  ;;  %v3229_v48 = vpop.f32.mrf.mxu3  ;;  %v4467_v32 = vmax.f32 %v4465_v46, %v4466_v8  ;;  %v6132_v25 = vld [vmem:[#allocation5 + $0xac] sm:$0xf0] }
 0x32f   : > { %v5128_v21 = vor.u32 %v6132_v25, %v5127_v37  ;;  %v5895_v9 = vld [vmem:[#allocation5 + $0x690] sm:$0xf]  ;;  %3537 = vmatpush.bf16.msrb.mxu3 %v5640_v27 }
 0x330   : > { %v4471_v44 = vmax.f32 %v4470_v29, %v4263_v36  ;;  %v3230_v55 = vadd.f32 %v3229_v48, %v3191_v43  ;;  %v6324_v50 = vld [vmem:[#allocation5 + $0x6ac] sm:$0xf0] }
 0x331   : > { %v3156_v6 = vpop.f32.mrf.mxu1  ;;  %v5896_v36 = vor.u32 %v6324_v50, %v5895_v9  ;;  %v5351_v43 = vld [vmem:[#allocation5 + $0x250] sm:$0xf]  ;;  %3459 = vmatpush.bf16.msra.mxu1 %v5128_v21 }
 0x332   : > { %v4472_v24 = vrot.slane %v4471_v44, 4  ;;  %v7266_v52 = vadd.f32 %v7234_v33, %v3230_v55  ;;  %v7268_v28 = vpop.f32.mrf.mxu0  ;;  %v6196_v33 = vld [vmem:[#allocation5 + $0x2ac] sm:$0xf0]  ;;  %v4468_v55 = vrot.slane %v4467_v32, 1 }
 0x333   : > { %v5384_v22 = vor.u32 %v6196_v33, %v5383_v53  ;;  %v6188_v48 = vld [vmem:[#allocation5 + $0x26c] sm:$0xf0]  ;;  %3576 = vmatpush.bf16.msra.mxu0 %v5896_v36  ;;  %v3157_v33 = vadd.f32 %v3156_v6, %v7247_v34 }
 0x334   : > { %v4473_v47 = vmax.f32 %v4471_v44, %v4472_v24  ;;  %3321 = vmatmul.bf16.gmra.mxu1 %v7029_v63  ;;  %v5607_v44 = vld [vmem:[#allocation5 + $0x450] sm:$0xf]  ;;  %v5352_v24 = vor.u32 %v6188_v48, %v5351_v43  ;;  %v4080_v40 = vmul.f32 0.01, %v7266_v52 }
 0x335   : > { %3438 = vmatmul.bf16.gmra.mxu0 %v7032_v7  ;;  %v3192_v51 = vpop.f32.mrf.mxu2  ;;  %3498 = vmatpush.bf16.msra.mxu2 %v5384_v22  ;;  %v6252_v62 = vld [vmem:[#allocation5 + $0x46c] sm:$0xf0] }
 0x336   : > { %v4474_v10 = vrot.slane %v4473_v47, 2  ;;  %v3193_v20 = vadd.f32 %v3192_v51, %v3154_v30  ;;  %v3231_v5 = vpop.f32.mrf.mxu3  ;;  %v5095_v61 = vld [vmem:[#allocation5 + $0x50] sm:$0xf]  ;;  %v4176_v37 = vmax.f32 %v7266_v52, %v4080_v40 }
 0x337   : > { %v6124_v53 = vld [vmem:[#allocation5 + $0x6c] sm:$0xf0] }
 0x338   : > { %v4475_v46 = vmax.f32 %v4473_v47, %v4474_v10  ;;  %v3232_v29 = vadd.f32 %v3231_v5, %v3193_v20  ;;  %v5608_v47 = vor.u32 %v6252_v62, %v5607_v44  ;;  %v5863_v51 = vld [vmem:[#allocation5 + $0x650] sm:$0xf]  ;;  %v4469_v10 = vmax.f32 %v4467_v32, %v4468_v55 }
 0x339   : > { %v3158_v8 = vpop.f32.mrf.mxu1  ;;  %3499 = vmatpush.bf16.msra.mxu2 %v5352_v24  ;;  %v6316_v31 = vld [vmem:[#allocation5 + $0x66c] sm:$0xf0] }
 0x33a   : > { %v4476_v42 = vrot.slane %v4475_v46, 1  ;;  %v3271_v30 = vadd.f32 %v7253_v11, %v3232_v29  ;;  %v7275_v1 = vpop.f32.mrf.mxu0  ;;  %3360 = vmatmul.bf16.gmra.mxu2 %v7037_v23  ;;  %v5096_v11 = vor.u32 %v6124_v53, %v5095_v61  ;;  %3538 = vmatpush.bf16.msrb.mxu3 %v5608_v47  ;;  %v5864_v5 = vor.u32 %v6316_v31, %v5863_v51  ;;  %v5063_v6 = vld [vmem:[#allocation5 + $0x10] sm:$0xf] }
 0x33b   : > { %3399 = vmatmul.bf16.gmra.mxu3 %v7039_v3  ;;  %v6116_v9 = vld [vmem:[#allocation5 + $0x2c] sm:$0xf0] }
 0x33c   : > { %v4477_v14 = vmax.f32 %v4475_v46, %v4476_v42  ;;  %v4088_v17 = vmul.f32 0.01, %v3271_v30  ;;  %3460 = vmatpush.bf16.msra.mxu1 %v5096_v11  ;;  %3577 = vmatpush.bf16.msra.mxu0 %v5864_v5  ;;  %v5831_v50 = vld [vmem:[#allocation5 + $0x610] sm:$0xf]  ;;  %v5064_v36 = vor.u32 %v6116_v9, %v5063_v6  ;;  %v3159_v42 = vadd.f32 %v3158_v8, %v7247_v34  ;;  %v6232_v6 = vld [vmem:[#allocation5 + $0x3d4] sm:$0xf] }
 0x33d   : > { %v3195_v20 = vpop.f32.mrf.mxu2  ;;  %v6308_v43 = vld [vmem:[#allocation5 + $0x62c] sm:$0xf0]  ;;  %v5545_v9 = vld [vmem:[#allocation5 + $0x3f0] sm:$0xf0] }
 0x33e   : > { %v4574_v22 = vrot.slane %v4477_v14, 4  ;;  %v4184_v25 = vmax.f32 %v3271_v30, %v4088_v17  ;;  %v3196_v27 = vadd.f32 %v3195_v20, %v3157_v33  ;;  %v3234_v21 = vpop.f32.mrf.mxu3  ;;  %v5832_v55 = vor.u32 %v6308_v43, %v5831_v50  ;;  %v5319_v61 = vld [vmem:[#allocation5 + $0x210] sm:$0xf]  ;;  %v6296_v50 = vld [vmem:[#allocation5 + $0x5d4] sm:$0xf] }
 0x33f   : > { %v6180_v53 = vld [vmem:[#allocation5 + $0x22c] sm:$0xf0] }
 0x340   : > { %v4591_v46 = vsel %vm4578_vm1, %v4469_v10, %v4574_v22  ;;  %v4286_v32 = vmax.f32 %v4176_v37, %v4184_v25  ;;  %v3235_v29 = vadd.f32 %v3234_v21, %v3196_v27  ;;  %3461 = vmatpush.bf16.msra.mxu1 %v5064_v36  ;;  %3578 = vmatpush.bf16.msra.mxu0 %v5832_v55  ;;  %v5575_v51 = vld [vmem:[#allocation5 + $0x410] sm:$0xf] }
 0x341   : > { %v4605_v48 = vrot.slane %v4591_v46, 5  ;;  %v3161_v44 = vpop.f32.mrf.mxu1  ;;  %v5320_v33 = vor.u32 %v6180_v53, %v5319_v61  ;;  %v6244_v8 = vld [vmem:[#allocation5 + $0x42c] sm:$0xf0] }
 0x342   : > { %v3274_v52 = vadd.f32 %v7268_v28, %v3235_v29  ;;  %v3278_v24 = vpop.f32.mrf.mxu0  ;;  %v5576_v17 = vor.u32 %v6244_v8, %v5575_v51  ;;  %v3162_v22 = vadd.f32 %v3161_v44, %v7247_v34  ;;  %v5801_v29 = vld [vmem:[#allocation5 + $0x5f0] sm:$0xf0] }
 0x343   : > { %v4607_v62 = vsel %vm4606_vm6, %v4605_v48, %v7262_v19  ;;  %3500 = vmatpush.bf16.msra.mxu2 %v5320_v33 }
 0x344   : > { %v4096_v40 = vmul.f32 0.01, %v3274_v52  ;;  %3326 = vmatmul.bf16.gmra.mxu1 %v7049_v26  ;;  %v4609_v30 = vsel %vm4608_vm7, %v4605_v48, %v4607_v62  ;;  %3539 = vmatpush.bf16.msrb.mxu3 %v5576_v17  ;;  %v5804_v48 = vor.u32 %v6296_v50, %v5801_v29  ;;  %v6057_v50 = vld [vmem:[#allocation5 + $0x7f0] sm:$0xf0] }
 0x345   : > { %3443 = vmatmul.bf16.gmra.mxu0 %v7052_v45  ;;  %v3197_v47 = vpop.f32.mrf.mxu2  ;;  %4641 = vst [vmem:[%s7292_s23] sm:$0xff] %v4609_v30 }
 0x346   : > { %v4192_v28 = vmax.f32 %v3274_v52, %v4096_v40  ;;  %v3198_v14 = vadd.f32 %v3197_v47, %v3159_v42  ;;  %v3236_v19 = vpop.f32.mrf.mxu3 }
 0x348   : > { %v7295_v11 = vmax.f32 %v4286_v32, %v4192_v28  ;;  %v3237_v31 = vadd.f32 %v3236_v19, %v3198_v14  ;;  %v5548_v32 = vor.u32 %v6232_v6, %v5545_v9  ;;  %3688 = vmatpush.bf16.msra.mxu3 %v5804_v48  ;;  %v6360_v9 = vld [vmem:[#allocation5 + $0x7d4] sm:$0xf] }
 0x349   : > { %v3163_v10 = vpop.f32.mrf.mxu1  ;;  %v6288_v48 = vld [vmem:[#allocation5 + $0x594] sm:$0xf] }
 0x34a   : > { %v3276_v20 = vadd.f32 %v7275_v1, %v3237_v31  ;;  %v3280_v5 = vpop.f32.mrf.mxu0  ;;  %3365 = vmatmul.bf16.gmra.mxu2 %v7057_v56  ;;  %v3164_v55 = vadd.f32 %v3163_v10, %v7247_v34 }
 0x34b   : > { %3404 = vmatmul.bf16.gmra.mxu3 %v7059_v59  ;;  %3649 = vmatpush.bf16.msrb.mxu2 %v5548_v32 }
 0x34c   : > { %v4104_v36 = vmul.f32 0.01, %v3276_v20 }
 0x34d   : > { %v3200_v37 = vpop.f32.mrf.mxu2 }
 0x34e   : > { %v3201_v25 = vadd.f32 %v3200_v37, %v3162_v22  ;;  %v3239_v27 = vpop.f32.mrf.mxu3  ;;  %v4200_v62 = vmax.f32 %v3276_v20, %v4104_v36  ;;  %v6060_v36 = vor.u32 %v6360_v9, %v6057_v50 }
 0x350   : > { %v3240_v21 = vadd.f32 %v3239_v27, %v3201_v25  ;;  %v6168_v25 = vld [vmem:[#allocation5 + $0x1d4] sm:$0xf]  ;;  %3727 = vmatpush.bf16.msrb.mxu0 %v6060_v36 }
 0x351   : > { %v3166_v46 = vpop.f32.mrf.mxu1  ;;  %v5289_v27 = vld [vmem:[#allocation5 + $0x1f0] sm:$0xf0] }
 0x352   : > { %v3279_v43 = vadd.f32 %v3278_v24, %v3240_v21  ;;  %v3283_v1 = vpop.f32.mrf.mxu0  ;;  %v3167_v28 = vadd.f32 %v3166_v46, %v7247_v34  ;;  %v5292_v6 = vor.u32 %v6168_v25, %v5289_v27  ;;  %v6224_v46 = vld [vmem:[#allocation5 + $0x394] sm:$0xf] }
 0x354   : > { %v4112_v52 = vmul.f32 0.01, %v3279_v43  ;;  %3331 = vmatmul.bf16.gmra.mxu1 %v7069_v38 }
 0x355   : > { %3448 = vmatmul.bf16.gmra.mxu0 %v7072_v39  ;;  %v3202_v44 = vpop.f32.mrf.mxu2  ;;  %3610 = vmatpush.bf16.msrb.mxu1 %v5292_v6 }
 0x356   : > { %v4208_v42 = vmax.f32 %v3279_v43, %v4112_v52  ;;  %v3203_v40 = vadd.f32 %v3202_v44, %v3164_v55  ;;  %v3241_v30 = vpop.f32.mrf.mxu3  ;;  %v5513_v43 = vld [vmem:[#allocation5 + $0x3b0] sm:$0xf0] }
 0x357   : > { %v5769_v55 = vld [vmem:[#allocation5 + $0x5b0] sm:$0xf0] }
 0x358   : > { %v4350_v47 = vmax.f32 %v4200_v62, %v4208_v42  ;;  %v3242_v61 = vadd.f32 %v3241_v30, %v3203_v40  ;;  %v6160_v52 = vld [vmem:[#allocation5 + $0x194] sm:$0xf]  ;;  %v5772_v42 = vor.u32 %v6288_v48, %v5769_v55 }
 0x359   : > { %v3168_v53 = vpop.f32.mrf.mxu1  ;;  %v5257_v44 = vld [vmem:[#allocation5 + $0x1b0] sm:$0xf0] }
 0x35a   : > { %v3281_v24 = vadd.f32 %v3280_v5, %v3242_v61  ;;  %v3285_v51 = vpop.f32.mrf.mxu0  ;;  %3370 = vmatmul.bf16.gmra.mxu2 %v7077_v41  ;;  %v3169_v5 = vadd.f32 %v3168_v53, %v7247_v34  ;;  %v5260_v40 = vor.u32 %v6160_v52, %v5257_v44  ;;  %v6352_v30 = vld [vmem:[#allocation5 + $0x794] sm:$0xf]  ;;  %3689 = vmatpush.bf16.msra.mxu3 %v5772_v42 }
 0x35b   : > { %3409 = vmatmul.bf16.gmra.mxu3 %v7079_v2  ;;  %v6216_v61 = vld [vmem:[#allocation5 + $0x354] sm:$0xf] }
 0x35c   : > { %v4120_v14 = vmul.f32 0.01, %v3281_v24  ;;  %3611 = vmatpush.bf16.msrb.mxu1 %v5260_v40 }
 0x35d   : > { %v3205_v19 = vpop.f32.mrf.mxu2 }
 0x35e   : > { %v4216_v33 = vmax.f32 %v3281_v24, %v4120_v14  ;;  %v3206_v8 = vadd.f32 %v3205_v19, %v3167_v28  ;;  %v3244_v17 = vpop.f32.mrf.mxu3  ;;  %v5481_v28 = vld [vmem:[#allocation5 + $0x370] sm:$0xf0] }
 0x35f   : > { %v6280_v14 = vld [vmem:[#allocation5 + $0x554] sm:$0xf] }
 0x360   : > { %v7307_v31 = vmax.f32 %v4350_v47, %v4216_v33  ;;  %v3245_v10 = vadd.f32 %v3244_v17, %v3206_v8  ;;  %v6025_v47 = vld [vmem:[#allocation5 + $0x7b0] sm:$0xf0] }
 0x361   : > { %v3171_v20 = vpop.f32.mrf.mxu1  ;;  %v6028_v24 = vor.u32 %v6352_v30, %v6025_v47  ;;  %v5737_v19 = vld [vmem:[#allocation5 + $0x570] sm:$0xf0] }
 0x362   : > { %v3284_v22 = vadd.f32 %v3283_v1, %v3245_v10  ;;  %v3288_v37 = vpop.f32.mrf.mxu0  ;;  %v5516_v1 = vor.u32 %v6224_v46, %v5513_v43  ;;  %v5484_v10 = vor.u32 %v6216_v61, %v5481_v28  ;;  %v3172_v25 = vadd.f32 %v3171_v20, %v7247_v34  ;;  %v6152_v47 = vld [vmem:[#allocation5 + $0x154] sm:$0xf] }
 0x363   : > { %3728 = vmatpush.bf16.msrb.mxu0 %v6028_v24  ;;  %v5225_v61 = vld [vmem:[#allocation5 + $0x170] sm:$0xf0] }
 0x364   : > { %3462 = vmatmul.bf16.vlgmr.msra.gmra.mxu1 %v6969_v60  ;;  %3650 = vmatpush.bf16.msrb.mxu2 %v5516_v1  ;;  %v4128_v33 = vmul.f32 0.01, %v3284_v22  ;;  %v5228_v24 = vor.u32 %v6152_v47, %v5225_v61  ;;  %v6344_v28 = vld [vmem:[#allocation5 + $0x754] sm:$0xf] }
 0x365   : > { %3579 = vmatmul.bf16.vlgmr.msra.gmra.mxu0 %v6972_v0  ;;  %v3207_v21 = vpop.f32.mrf.mxu2 }
 0x366   : > { %v3208_v32 = vadd.f32 %v3207_v21, %v3169_v5  ;;  %v3246_v29 = vpop.f32.mrf.mxu3  ;;  %v5740_v5 = vor.u32 %v6280_v14, %v5737_v19  ;;  %v4224_v6 = vmax.f32 %v3284_v22, %v4128_v33  ;;  %v5993_v14 = vld [vmem:[#allocation5 + $0x770] sm:$0xf0]  ;;  %3612 = vmatpush.bf16.msrb.mxu1 %v5228_v24 }
 0x367   : > { %v6208_v19 = vld [vmem:[#allocation5 + $0x314] sm:$0xf] }
 0x368   : > { %v3247_v62 = vadd.f32 %v3246_v29, %v3208_v32  ;;  %3651 = vmatpush.bf16.msrb.mxu2 %v5484_v10  ;;  %3690 = vmatpush.bf16.msra.mxu3 %v5740_v5  ;;  %v5996_v10 = vor.u32 %v6344_v28, %v5993_v14  ;;  %v5449_v5 = vld [vmem:[#allocation5 + $0x330] sm:$0xf0] }
 0x369   : > { %v3173_v53 = vpop.f32.mrf.mxu1 }
 0x36a   : > { %v3286_v8 = vadd.f32 %v3285_v51, %v3247_v62  ;;  %v3290_v17 = vpop.f32.mrf.mxu0  ;;  %3501 = vmatmul.bf16.vlgmr.msra.gmra.mxu2 %v6977_v4  ;;  %v3174_v48 = vadd.f32 %v3173_v53, %v7247_v34  ;;  %3729 = vmatpush.bf16.msrb.mxu0 %v5996_v10 }
 0x36b   : > { %3540 = vmatmul.bf16.vlgmr.msrb.gmra.mxu3 %v6979_v18 }
 0x36c   : > { %v4136_v27 = vmul.f32 0.01, %v3286_v8 }
 0x36d   : > { %v3210_v21 = vpop.f32.mrf.mxu2 }
 0x36e   : > { %v4232_v9 = vmax.f32 %v3286_v8, %v4136_v27  ;;  %v3211_v50 = vadd.f32 %v3210_v21, %v3172_v25  ;;  %v3249_v46 = vpop.f32.mrf.mxu3  ;;  %v6272_v25 = vld [vmem:[#allocation5 + $0x514] sm:$0xf] }
 0x36f   : > { %v5705_v27 = vld [vmem:[#allocation5 + $0x530] sm:$0xf0] }
 0x370   : > { %v4414_v51 = vmax.f32 %v4224_v6, %v4232_v9  ;;  %v3250_v32 = vadd.f32 %v3249_v46, %v3211_v50  ;;  %v6144_v21 = vld [vmem:[#allocation5 + $0x114] sm:$0xf]  ;;  %v5708_v50 = vor.u32 %v6272_v25, %v5705_v27 }
 0x371   : > { %v3176_v29 = vpop.f32.mrf.mxu1  ;;  %v5193_v6 = vld [vmem:[#allocation5 + $0x130] sm:$0xf0] }
 0x372   : > { %v3289_v36 = vadd.f32 %v3288_v37, %v3250_v32  ;;  %v3293_v43 = vpop.f32.mrf.mxu0  ;;  %v3177_v37 = vadd.f32 %v3176_v29, %v7247_v34  ;;  %v5196_v46 = vor.u32 %v6144_v21, %v5193_v6  ;;  %v5961_v32 = vld [vmem:[#allocation5 + $0x730] sm:$0xf0]  ;;  %3691 = vmatpush.bf16.msra.mxu3 %v5708_v50 }
 0x373   : > { %v6200_v29 = vld [vmem:[#allocation5 + $0x2d4] sm:$0xf] }
 0x374   : > { %v4144_v1 = vmul.f32 0.01, %v3289_v36  ;;  %3467 = vmatmul.bf16.gmra.mxu1 %v6989_v54 }
 0x375   : > { %3584 = vmatmul.bf16.gmra.mxu0 %v6992_v58  ;;  %v3212_v20 = vpop.f32.mrf.mxu2  ;;  %3613 = vmatpush.bf16.msrb.mxu1 %v5196_v46 }
 0x376   : > { %v4240_v55 = vmax.f32 %v3289_v36, %v4144_v1  ;;  %v3213_v52 = vadd.f32 %v3212_v20, %v3174_v48  ;;  %v3251_v22 = vpop.f32.mrf.mxu3  ;;  %v5417_v1 = vld [vmem:[#allocation5 + $0x2f0] sm:$0xf0] }
 0x377   : > { %v6264_v20 = vld [vmem:[#allocation5 + $0x4d4] sm:$0xf] }
 0x378   : > { %v7318_v44 = vmax.f32 %v4414_v51, %v4240_v55  ;;  %v3252_v62 = vadd.f32 %v3251_v22, %v3213_v52  ;;  %v6336_v51 = vld [vmem:[#allocation5 + $0x714] sm:$0xf] }
 0x379   : > { %v3178_v42 = vpop.f32.mrf.mxu1  ;;  %v5964_v48 = vor.u32 %v6336_v51, %v5961_v32  ;;  %v5673_v55 = vld [vmem:[#allocation5 + $0x4f0] sm:$0xf0] }
 0x37a   : > { %v3291_v40 = vadd.f32 %v3290_v17, %v3252_v62  ;;  %v3295_v30 = vpop.f32.mrf.mxu0  ;;  %3506 = vmatmul.bf16.gmra.mxu2 %v6997_v12  ;;  %v5452_v17 = vor.u32 %v6208_v19, %v5449_v5  ;;  %v5676_v47 = vor.u32 %v6264_v20, %v5673_v55  ;;  %v3179_v61 = vadd.f32 %v3178_v42, %v7247_v34  ;;  %v5161_v32 = vld [vmem:[#allocation5 + $0xf0] sm:$0xf0] }
 0x37b   : > { %3545 = vmatmul.bf16.gmra.mxu3 %v6999_v13  ;;  %3730 = vmatpush.bf16.msrb.mxu0 %v5964_v48 }
 0x37c   : > { %3652 = vmatpush.bf16.msrb.mxu2 %v5452_v17  ;;  %v4152_v52 = vmul.f32 0.01, %v3291_v40  ;;  %3692 = vmatpush.bf16.msra.mxu3 %v5676_v47  ;;  %v6320_v47 = vld [vmem:[#allocation5 + $0x694] sm:$0xf] }
 0x37d   : > { %v3215_v53 = vpop.f32.mrf.mxu2 }
 0x37e   : > { %v3216_v33 = vadd.f32 %v3215_v53, %v3177_v37  ;;  %v3254_v8 = vpop.f32.mrf.mxu3  ;;  %v5420_v37 = vor.u32 %v6200_v29, %v5417_v1  ;;  %v4248_v28 = vmax.f32 %v3291_v40, %v4152_v52  ;;  %v6328_v29 = vld [vmem:[#allocation5 + $0x6d4] sm:$0xf] }
 0x37f   : > { %v5929_v1 = vld [vmem:[#allocation5 + $0x6f0] sm:$0xf0] }
 0x380   : > { %v3255_v9 = vadd.f32 %v3254_v8, %v3216_v33  ;;  %3653 = vmatpush.bf16.msrb.mxu2 %v5420_v37  ;;  %v7327_v8 = vperm.slane %v7244_v35, 3  ;;  %v5932_v55 = vor.u32 %v6328_v29, %v5929_v1  ;;  %v5129_v37 = vld [vmem:[#allocation5 + $0xb0] sm:$0xf0] }
 0x381   : > { %v3307_v36 = vpop.f32.mrf.mxu1  ;;  %v5097_v29 = vld [vmem:[#allocation5 + $0x70] sm:$0xf0] }
 0x382   : > { %v3294_v22 = vadd.f32 %v3293_v43, %v3255_v9  ;;  %v3424_v62 = vpop.f32.mrf.mxu0  ;;  %v3308_v25 = vadd.f32 %v3307_v36, %v7327_v8  ;;  %3731 = vmatpush.bf16.msrb.mxu0 %v5932_v55  ;;  %v5865_v55 = vld [vmem:[#allocation5 + $0x670] sm:$0xf0] }
 0x384   : > { %v4160_v53 = vmul.f32 0.01, %v3294_v22  ;;  %3472 = vmatmul.bf16.gmra.mxu1 %v7009_v49 }
 0x385   : > { %3589 = vmatmul.bf16.gmra.mxu0 %v7012_v57  ;;  %v3217_v24 = vpop.f32.mrf.mxu2 }
 0x386   : > { %v4256_v14 = vmax.f32 %v3294_v22, %v4160_v53  ;;  %v3218_v19 = vadd.f32 %v3217_v24, %v3179_v61  ;;  %v3256_v33 = vpop.f32.mrf.mxu3  ;;  %v6192_v53 = vld [vmem:[#allocation5 + $0x294] sm:$0xf] }
 0x387   : > { %v5385_v24 = vld [vmem:[#allocation5 + $0x2b0] sm:$0xf0] }
 0x388   : > { %v4478_v43 = vmax.f32 %v4248_v28, %v4256_v14  ;;  %v3257_v10 = vadd.f32 %v3256_v33, %v3218_v19  ;;  %v6256_v28 = vld [vmem:[#allocation5 + $0x494] sm:$0xf]  ;;  %v5388_v33 = vor.u32 %v6192_v53, %v5385_v24 }
 0x389   : > { %v3309_v5 = vpop.f32.mrf.mxu1  ;;  %v6112_v53 = vld [vmem:[#allocation5 + $0x14] sm:$0xf] }
 0x38a   : > { %v3296_v34 = vadd.f32 %v3295_v30, %v3257_v10  ;;  %v3426_v42 = vpop.f32.mrf.mxu0  ;;  %3511 = vmatmul.bf16.gmra.mxu2 %v7017_v15  ;;  %v6136_v30 = vld [vmem:[#allocation5 + $0xd4] sm:$0xf]  ;;  %v3310_v48 = vadd.f32 %v3309_v5, %v7327_v8 }
 0x38b   : > { %3550 = vmatmul.bf16.gmra.mxu3 %v7019_v16  ;;  %v5164_v36 = vor.u32 %v6136_v30, %v5161_v32  ;;  %v5897_v10 = vld [vmem:[#allocation5 + $0x6b0] sm:$0xf0]  ;;  %3654 = vmatpush.bf16.msrb.mxu2 %v5388_v33 }
 0x38c   : > { %v4168_v17 = vmul.f32 0.01, %v3296_v34  ;;  %v6184_v5 = vld [vmem:[#allocation5 + $0x254] sm:$0xf] }
 0x38d   : > { %v3346_v40 = vpop.f32.mrf.mxu2  ;;  %3614 = vmatpush.bf16.msrb.mxu1 %v5164_v36  ;;  %v5609_v30 = vld [vmem:[#allocation5 + $0x470] sm:$0xf0] }
 0x38e   : > { %v4264_v27 = vmax.f32 %v3296_v34, %v4168_v17  ;;  %v3347_v21 = vadd.f32 %v3346_v40, %v3308_v25  ;;  %v3385_v6 = vpop.f32.mrf.mxu3  ;;  %v6120_v32 = vld [vmem:[#allocation5 + $0x54] sm:$0xf] }
 0x38f   : > { %v5100_v1 = vor.u32 %v6120_v32, %v5097_v29  ;;  %v5065_v24 = vld [vmem:[#allocation5 + $0x30] sm:$0xf0] }
 0x390   : > { %v7332_v9 = vmax.f32 %v4478_v43, %v4264_v27  ;;  %v3386_v50 = vadd.f32 %v3385_v6, %v3347_v21  ;;  %v5641_v43 = vld [vmem:[#allocation5 + $0x4b0] sm:$0xf0]  ;;  %v5900_v6 = vor.u32 %v6320_v47, %v5897_v10  ;;  %v5068_v33 = vor.u32 %v6112_v53, %v5065_v24 }
 0x391   : > { %v3312_v35 = vpop.f32.mrf.mxu1  ;;  %v5644_v40 = vor.u32 %v6256_v28, %v5641_v43  ;;  %v5353_v27 = vld [vmem:[#allocation5 + $0x270] sm:$0xf0]  ;;  %v4288_v10 = vrot.slane %v7295_v11, 4 }
 0x392   : > { %v7334_v46 = vadd.f32 %v3424_v62, %v3386_v50  ;;  %v7336_v51 = vpop.f32.mrf.mxu0  ;;  %v6128_v62 = vld [vmem:[#allocation5 + $0x94] sm:$0xf]  ;;  %v5356_v50 = vor.u32 %v6184_v5, %v5353_v27  ;;  %3732 = vmatpush.bf16.msrb.mxu0 %v5900_v6 }
 0x393   : > { %v5132_v14 = vor.u32 %v6128_v62, %v5129_v37  ;;  %v6248_v21 = vld [vmem:[#allocation5 + $0x454] sm:$0xf]  ;;  %3693 = vmatpush.bf16.msra.mxu3 %v5644_v40  ;;  %v4289_v27 = vmax.f32 %v7295_v11, %v4288_v10 }
 0x394   : > { %3477 = vmatmul.bf16.gmra.mxu1 %v7029_v63  ;;  %v4081_v34 = vmul.f32 0.01, %v7334_v46  ;;  %3655 = vmatpush.bf16.msrb.mxu2 %v5356_v50  ;;  %v6304_v28 = vld [vmem:[#allocation5 + $0x614] sm:$0xf] }
 0x395   : > { %3594 = vmatmul.bf16.gmra.mxu0 %v7032_v7  ;;  %v3348_v20 = vpop.f32.mrf.mxu2  ;;  %3615 = vmatpush.bf16.msrb.mxu1 %v5132_v14  ;;  %v5833_v43 = vld [vmem:[#allocation5 + $0x630] sm:$0xf0] }
 0x396   : > { %v3349_v52 = vadd.f32 %v3348_v20, %v3310_v48  ;;  %v3387_v22 = vpop.f32.mrf.mxu3  ;;  %v3313_v48 = vadd.f32 %v3312_v35, %v7327_v8  ;;  %v6312_v20 = vld [vmem:[#allocation5 + $0x654] sm:$0xf]  ;;  %v4177_v62 = vmax.f32 %v7334_v46, %v4081_v34  ;;  %v5836_v34 = vor.u32 %v6304_v28, %v5833_v43 }
 0x397   : > { %v6176_v6 = vld [vmem:[#allocation5 + $0x214] sm:$0xf] }
 0x398   : > { %v3388_v61 = vadd.f32 %v3387_v22, %v3349_v52  ;;  %v5868_v22 = vor.u32 %v6312_v20, %v5865_v55  ;;  %v5321_v50 = vld [vmem:[#allocation5 + $0x230] sm:$0xf0] }
 0x399   : > { %v7341_v19 = vpop.f32.mrf.mxu1  ;;  %3616 = vmatpush.bf16.msrb.mxu1 %v5100_v1  ;;  %v4290_v1 = vrot.slane %v4289_v27, 2 }
 0x39a   : > { %v3427_v25 = vadd.f32 %v3426_v42, %v3388_v61  ;;  %v7344_v17 = vpop.f32.mrf.mxu0  ;;  %3516 = vmatmul.bf16.gmra.mxu2 %v7037_v23  ;;  %v5612_v42 = vor.u32 %v6248_v21, %v5609_v30  ;;  %3733 = vmatpush.bf16.msrb.mxu0 %v5868_v22  ;;  %v6240_v30 = vld [vmem:[#allocation5 + $0x414] sm:$0xf]  ;;  %v3315_v11 = vadd.f32 %v7341_v19, %v7327_v8 }
 0x39b   : > { %3555 = vmatmul.bf16.gmra.mxu3 %v7039_v3 }
 0x39c   : > { %v4089_v36 = vmul.f32 0.01, %v3427_v25  ;;  %3694 = vmatpush.bf16.msra.mxu3 %v5612_v42 }
 0x39d   : > { %v3351_v52 = vpop.f32.mrf.mxu2  ;;  %3617 = vmatpush.bf16.msrb.mxu1 %v5068_v33 }
 0x39e   : > { %v4185_v37 = vmax.f32 %v3427_v25, %v4089_v36  ;;  %v3352_v61 = vadd.f32 %v3351_v52, %v3313_v48  ;;  %v3390_v47 = vpop.f32.mrf.mxu3  ;;  %v5324_v48 = vor.u32 %v6176_v6, %v5321_v50  ;;  %v5577_v36 = vld [vmem:[#allocation5 + $0x430] sm:$0xf0]  ;;  %3734 = vmatpush.bf16.msrb.mxu0 %v5836_v34 }
 0x3a0   : > { %v4294_v35 = vmax.f32 %v4177_v62, %v4185_v37  ;;  %v3391_v14 = vadd.f32 %v3390_v47, %v3352_v61  ;;  %3656 = vmatpush.bf16.msrb.mxu2 %v5324_v48  ;;  %v4291_v61 = vmax.f32 %v4289_v27, %v4290_v1  ;;  %v6237_v27 = vld [vmem:[#allocation5 + $0x3f4] sm:$0xf0] }
 0x3a1   : > { %v3317_v5 = vpop.f32.mrf.mxu1  ;;  %v6301_v48 = vld [vmem:[#allocation5 + $0x5f4] sm:$0xf0] }
 0x3a2   : > { %v3430_v40 = vadd.f32 %v7336_v51, %v3391_v14  ;;  %v3434_v46 = vpop.f32.mrf.mxu0  ;;  %v5580_v51 = vor.u32 %v6240_v30, %v5577_v36  ;;  %v3318_v62 = vadd.f32 %v3317_v5, %v7327_v8  ;;  %v4292_v43 = vrot.slane %v4291_v61, 1  ;;  %v5551_v5 = vld [vmem:[#allocation5 + $0x3d8] sm:$0xf] }
 0x3a4   : > { %v4097_v25 = vmul.f32 0.01, %v3430_v40  ;;  %3482 = vmatmul.bf16.gmra.mxu1 %v7049_v26  ;;  %3695 = vmatpush.bf16.msra.mxu3 %v5580_v51 }
 0x3a5   : > { %3599 = vmatmul.bf16.gmra.mxu0 %v7052_v45  ;;  %v3353_v21 = vpop.f32.mrf.mxu2 }
 0x3a6   : > { %v4193_v32 = vmax.f32 %v3430_v40, %v4097_v25  ;;  %v3392_v29 = vpop.f32.mrf.mxu3  ;;  %v3354_v37 = vadd.f32 %v3353_v21, %v3315_v11  ;;  %v4293_v21 = vmax.f32 %v4291_v61, %v4292_v43 }
 0x3a8   : > { %v4295_v42 = vmax.f32 %v4294_v35, %v4193_v32  ;;  %v3393_v14 = vadd.f32 %v3392_v29, %v3354_v37  ;;  %v5552_v32 = vor.u32 %v6237_v27, %v5551_v5  ;;  %v5807_v29 = vld [vmem:[#allocation5 + $0x5d8] sm:$0xf] }
 0x3a9   : > { %v3319_v20 = vpop.f32.mrf.mxu1  ;;  %v5808_v1 = vor.u32 %v6301_v48, %v5807_v29 }
 0x3aa   : > { %v4296_v55 = vrot.slane %v4295_v42, 4  ;;  %v3436_v52 = vpop.f32.mrf.mxu0  ;;  %3521 = vmatmul.bf16.gmra.mxu2 %v7057_v56  ;;  %v3432_v6 = vadd.f32 %v7344_v17, %v3393_v14  ;;  %v3320_v50 = vadd.f32 %v3319_v20, %v7327_v8 }
 0x3ab   : > { %3560 = vmatmul.bf16.gmra.mxu3 %v7059_v59  ;;  %3805 = vmatpush.bf16.msra.mxu2 %v5552_v32 }
 0x3ac   : > { %v4297_v22 = vmax.f32 %v4295_v42, %v4296_v55  ;;  %v4105_v20 = vmul.f32 0.01, %v3432_v6  ;;  %3844 = vmatpush.bf16.msrb.mxu3 %v5808_v1 }
 0x3ad   : > { %v3356_v47 = vpop.f32.mrf.mxu2 }
 0x3ae   : > { %v4298_v53 = vrot.slane %v4297_v22, 2  ;;  %v3357_v24 = vadd.f32 %v3356_v47, %v3318_v62  ;;  %v3395_v28 = vpop.f32.mrf.mxu3  ;;  %v4201_v47 = vmax.f32 %v3432_v6, %v4105_v20 }
 0x3b0   : > { %v4299_v35 = vmax.f32 %v4297_v22, %v4298_v53  ;;  %v3396_v33 = vadd.f32 %v3395_v28, %v3357_v24  ;;  %v4352_v22 = vrot.slane %v7307_v31, 4 }
 0x3b1   : > { %v3322_v19 = vpop.f32.mrf.mxu1 }
 0x3b2   : > { %v4300_v10 = vrot.slane %v4299_v35, 1  ;;  %v3435_v40 = vadd.f32 %v3434_v46, %v3396_v33  ;;  %v3439_v34 = vpop.f32.mrf.mxu0  ;;  %v3323_v53 = vadd.f32 %v3322_v19, %v7327_v8 }
 0x3b4   : > { %v4301_v25 = vmax.f32 %v4299_v35, %v4300_v10  ;;  %3487 = vmatmul.bf16.gmra.mxu1 %v7069_v38  ;;  %v4113_v51 = vmul.f32 0.01, %v3435_v40  ;;  %v4353_v35 = vmax.f32 %v7307_v31, %v4352_v22  ;;  %v5295_v22 = vld [vmem:[#allocation5 + $0x1d8] sm:$0xf] }
 0x3b5   : > { %3604 = vmatmul.bf16.gmra.mxu0 %v7072_v39  ;;  %v3358_v30 = vpop.f32.mrf.mxu2 }
 0x3b6   : > { %v4563_v36 = vrot.slane %v4301_v25, 4  ;;  %v3359_v46 = vadd.f32 %v3358_v30, %v3320_v50  ;;  %v3397_v42 = vpop.f32.mrf.mxu3  ;;  %v4209_v62 = vmax.f32 %v3435_v40, %v4113_v51  ;;  %v4354_v40 = vrot.slane %v4353_v35, 2 }
 0x3b8   : > { %v7365_v17 = vsel %vm4578_vm1, %v4293_v21, %v4563_v36  ;;  %v3398_v11 = vadd.f32 %v3397_v42, %v3359_v46  ;;  %v4358_v14 = vmax.f32 %v4201_v47, %v4209_v62  ;;  %v4355_v31 = vmax.f32 %v4353_v35, %v4354_v40  ;;  %v6063_v62 = vld [vmem:[#allocation5 + $0x7d8] sm:$0xf] }
 0x3b9   : > { %v3324_v55 = vpop.f32.mrf.mxu1  ;;  %v5519_v35 = vld [vmem:[#allocation5 + $0x398] sm:$0xf] }
 0x3ba   : > { %v3437_v37 = vadd.f32 %v3436_v52, %v3398_v11  ;;  %v3441_v61 = vpop.f32.mrf.mxu0  ;;  %3526 = vmatmul.bf16.gmra.mxu2 %v7077_v41  ;;  %v3325_v6 = vadd.f32 %v3324_v55, %v7327_v8  ;;  %v4356_v42 = vrot.slane %v4355_v31, 1 }
 0x3bb   : > { %3565 = vmatmul.bf16.gmra.mxu3 %v7079_v2 }
 0x3bc   : > { %v4121_v24 = vmul.f32 0.01, %v3437_v37 }
 0x3bd   : > { %v3361_v28 = vpop.f32.mrf.mxu2 }
 0x3be   : > { %v4217_v33 = vmax.f32 %v3437_v37, %v4121_v24  ;;  %v3362_v43 = vadd.f32 %v3361_v28, %v3323_v53  ;;  %v3400_v10 = vpop.f32.mrf.mxu3  ;;  %v6365_v28 = vld [vmem:[#allocation5 + $0x7f4] sm:$0xf0] }
 0x3c0   : > { %v4359_v25 = vmax.f32 %v4358_v14, %v4217_v33  ;;  %v3401_v5 = vadd.f32 %v3400_v10, %v3362_v43  ;;  %v6064_v33 = vor.u32 %v6365_v28, %v6063_v62  ;;  %v6229_v43 = vld [vmem:[#allocation5 + $0x3b4] sm:$0xf0]  ;;  %v4416_v28 = vrot.slane %v7318_v44, 4 }
 0x3c1   : > { %v3327_v50 = vpop.f32.mrf.mxu1  ;;  %v6293_v10 = vld [vmem:[#allocation5 + $0x5b4] sm:$0xf0] }
 0x3c2   : > { %v4360_v52 = vrot.slane %v4359_v25, 4  ;;  %v7372_v27 = vpop.f32.mrf.mxu0  ;;  %v7377_v32 = vadd.f32 %v3439_v34, %v3401_v5  ;;  %v6173_v34 = vld [vmem:[#allocation5 + $0x1f4] sm:$0xf0]  ;;  %v3328_v47 = vadd.f32 %v3327_v50, %v7327_v8  ;;  %3883 = vmatpush.bf16.msra.mxu0 %v6064_v33 }
 0x3c3   : > { %v5296_v24 = vor.u32 %v6173_v34, %v5295_v22  ;;  %v6221_v34 = vld [vmem:[#allocation5 + $0x374] sm:$0xf0] }
 0x3c4   : > { %v4361_v21 = vmax.f32 %v4359_v25, %v4360_v52  ;;  %3618 = vmatmul.bf16.vlgmr.msrb.gmra.mxu1 %v6969_v60  ;;  %v4129_v20 = vmul.f32 0.01, %v7377_v32  ;;  %v4357_v25 = vmax.f32 %v4355_v31, %v4356_v42  ;;  %v5743_v31 = vld [vmem:[#allocation5 + $0x558] sm:$0xf] }
 0x3c5   : > { %3735 = vmatmul.bf16.vlgmr.msrb.gmra.mxu0 %v6972_v0  ;;  %v3363_v19 = vpop.f32.mrf.mxu2  ;;  %3766 = vmatpush.bf16.msra.mxu1 %v5296_v24  ;;  %v6285_v42 = vld [vmem:[#allocation5 + $0x574] sm:$0xf0] }
 0x3c6   : > { %v4362_v30 = vrot.slane %v4361_v21, 2  ;;  %v3364_v29 = vadd.f32 %v3363_v19, %v3325_v6  ;;  %v3402_v48 = vpop.f32.mrf.mxu3  ;;  %v5263_v6 = vld [vmem:[#allocation5 + $0x198] sm:$0xf]  ;;  %v5744_v24 = vor.u32 %v6285_v42, %v5743_v31 }
 0x3c7   : > { %v6165_v19 = vld [vmem:[#allocation5 + $0x1b4] sm:$0xf0] }
 0x3c8   : > { %v4363_v36 = vmax.f32 %v4361_v21, %v4362_v30  ;;  %v3403_v51 = vadd.f32 %v3402_v48, %v3364_v29  ;;  %v5520_v21 = vor.u32 %v6229_v43, %v5519_v35  ;;  %v5264_v50 = vor.u32 %v6165_v19, %v5263_v6  ;;  %v6031_v29 = vld [vmem:[#allocation5 + $0x798] sm:$0xf] }
 0x3c9   : > { %v7379_v46 = vpop.f32.mrf.mxu1  ;;  %v6357_v48 = vld [vmem:[#allocation5 + $0x7b4] sm:$0xf0] }
 0x3ca   : > { %v4364_v1 = vrot.slane %v4363_v36, 1  ;;  %v3442_v11 = vadd.f32 %v3441_v61, %v3403_v51  ;;  %v7382_v55 = vpop.f32.mrf.mxu0  ;;  %3657 = vmatmul.bf16.vlgmr.msrb.gmra.mxu2 %v6977_v4  ;;  %v5775_v61 = vld [vmem:[#allocation5 + $0x598] sm:$0xf]  ;;  %v6032_v22 = vor.u32 %v6357_v48, %v6031_v29  ;;  %3767 = vmatpush.bf16.msra.mxu1 %v5264_v50 }
 0x3cb   : > { %3696 = vmatmul.bf16.vlgmr.msra.gmra.mxu3 %v6979_v18  ;;  %v5776_v30 = vor.u32 %v6293_v10, %v5775_v61  ;;  %3806 = vmatpush.bf16.msra.mxu2 %v5520_v21  ;;  %v4225_v10 = vmax.f32 %v7377_v32, %v4129_v20  ;;  %v5231_v31 = vld [vmem:[#allocation5 + $0x158] sm:$0xf] }
 0x3cc   : > { %v4365_v37 = vmax.f32 %v4363_v36, %v4364_v1  ;;  %v4137_v53 = vmul.f32 0.01, %v3442_v11  ;;  %v5487_v36 = vld [vmem:[#allocation5 + $0x358] sm:$0xf]  ;;  %3884 = vmatpush.bf16.msra.mxu0 %v6032_v22 }
 0x3cd   : > { %v3366_v14 = vpop.f32.mrf.mxu2  ;;  %3845 = vmatpush.bf16.msrb.mxu3 %v5776_v30  ;;  %v6157_v42 = vld [vmem:[#allocation5 + $0x174] sm:$0xf0] }
 0x3ce   : > { %v4567_v40 = vrot.slane %v4365_v37, 4  ;;  %v3367_v52 = vadd.f32 %v3366_v14, %v3328_v47  ;;  %v3405_v5 = vpop.f32.mrf.mxu3  ;;  %v5488_v47 = vor.u32 %v6221_v34, %v5487_v36  ;;  %v4233_v35 = vmax.f32 %v3442_v11, %v4137_v53 }
 0x3d0   : > { %v4584_v51 = vsel %vm4578_vm1, %v4357_v25, %v4567_v40  ;;  %v3406_v1 = vadd.f32 %v3405_v5, %v3367_v52  ;;  %3807 = vmatpush.bf16.msra.mxu2 %v5488_v47  ;;  %v4422_v53 = vmax.f32 %v4225_v10, %v4233_v35  ;;  %v3330_v5 = vadd.f32 %v7379_v46, %v7327_v8 }
 0x3d1   : > { %v4610_v62 = vrot.slane %v4584_v51, 7  ;;  %v3332_v37 = vpop.f32.mrf.mxu1  ;;  %3846 = vmatpush.bf16.msrb.mxu3 %v5744_v24 }
 0x3d2   : > { %v3445_v14 = vadd.f32 %v7372_v27, %v3406_v1  ;;  %v3449_v33 = vpop.f32.mrf.mxu0  ;;  %v4417_v27 = vmax.f32 %v7318_v44, %v4416_v28  ;;  %v3333_v44 = vadd.f32 %v3332_v37, %v7327_v8  ;;  %v6349_v37 = vld [vmem:[#allocation5 + $0x774] sm:$0xf0] }
 0x3d3   : > { %v4611_v43 = vsel %vm4596_vm2, %v4610_v62, %v7365_v17 }
 0x3d4   : > { %v7393_v61 = vsel %vm4598_vm3, %v4610_v62, %v4611_v43  ;;  %v4145_v25 = vmul.f32 0.01, %v3445_v14  ;;  %3623 = vmatmul.bf16.gmra.mxu1 %v6989_v54  ;;  %v4418_v6 = vrot.slane %v4417_v27, 2  ;;  %v5999_v62 = vld [vmem:[#allocation5 + $0x758] sm:$0xf] }
 0x3d5   : > { %3740 = vmatmul.bf16.gmra.mxu0 %v6992_v58  ;;  %v3368_v11 = vpop.f32.mrf.mxu2  ;;  %v5455_v43 = vld [vmem:[#allocation5 + $0x318] sm:$0xf] }
 0x3d6   : > { %v4241_v40 = vmax.f32 %v3445_v14, %v4145_v25  ;;  %v3407_v52 = vpop.f32.mrf.mxu3  ;;  %v3369_v19 = vadd.f32 %v3368_v11, %v3330_v5  ;;  %v4419_v29 = vmax.f32 %v4417_v27, %v4418_v6  ;;  %v5232_v14 = vor.u32 %v6157_v42, %v5231_v31  ;;  %v6213_v27 = vld [vmem:[#allocation5 + $0x334] sm:$0xf0] }
 0x3d7   : > { %v6000_v11 = vor.u32 %v6349_v37, %v5999_v62  ;;  %v5199_v6 = vld [vmem:[#allocation5 + $0x118] sm:$0xf]  ;;  %v4480_v37 = vrot.slane %v7332_v9, 4 }
 0x3d8   : > { %v4423_v17 = vmax.f32 %v4422_v53, %v4241_v40  ;;  %v3408_v1 = vadd.f32 %v3407_v52, %v3369_v19  ;;  %v4420_v47 = vrot.slane %v4419_v29, 1  ;;  %v5711_v53 = vld [vmem:[#allocation5 + $0x518] sm:$0xf]  ;;  %3768 = vmatpush.bf16.msra.mxu1 %v5232_v14 }
 0x3d9   : > { %v3334_v21 = vpop.f32.mrf.mxu1  ;;  %v6277_v40 = vld [vmem:[#allocation5 + $0x534] sm:$0xf0]  ;;  %3885 = vmatpush.bf16.msra.mxu0 %v6000_v11 }
 0x3da   : > { %v4424_v32 = vrot.slane %v4423_v17, 4  ;;  %v7401_v20 = vpop.f32.mrf.mxu0  ;;  %3662 = vmatmul.bf16.gmra.mxu2 %v6997_v12  ;;  %v3447_v10 = vadd.f32 %v7382_v55, %v3408_v1  ;;  %v3335_v25 = vadd.f32 %v3334_v21, %v7327_v8  ;;  %v5712_v5 = vor.u32 %v6277_v40, %v5711_v53  ;;  %v6341_v8 = vld [vmem:[#allocation5 + $0x734] sm:$0xf0] }
 0x3db   : > { %3701 = vmatmul.bf16.gmra.mxu3 %v6999_v13  ;;  %v5423_v21 = vld [vmem:[#allocation5 + $0x2d8] sm:$0xf] }
 0x3dc   : > { %v4425_v30 = vmax.f32 %v4423_v17, %v4424_v32  ;;  %v6149_v32 = vld [vmem:[#allocation5 + $0x134] sm:$0xf0]  ;;  %3847 = vmatpush.bf16.msrb.mxu3 %v5712_v5 }
 0x3dd   : > { %v3371_v50 = vpop.f32.mrf.mxu2  ;;  %v5200_v55 = vor.u32 %v6149_v32, %v5199_v6  ;;  %v6205_v1 = vld [vmem:[#allocation5 + $0x2f4] sm:$0xf0] }
 0x3de   : > { %v4426_v48 = vrot.slane %v4425_v30, 2  ;;  %v3372_v36 = vadd.f32 %v3371_v50, %v3333_v44  ;;  %v3410_v51 = vpop.f32.mrf.mxu3  ;;  %v4421_v44 = vmax.f32 %v4419_v29, %v4420_v47  ;;  %v5424_v42 = vor.u32 %v6205_v1, %v5423_v21  ;;  %v6269_v62 = vld [vmem:[#allocation5 + $0x4f4] sm:$0xf0] }
 0x3df   : > { %v4153_v47 = vmul.f32 0.01, %v3447_v10  ;;  %3769 = vmatpush.bf16.msra.mxu1 %v5200_v55 }
 0x3e0   : > { %v4427_v46 = vmax.f32 %v4425_v30, %v4426_v48  ;;  %v3411_v22 = vadd.f32 %v3410_v51, %v3372_v36  ;;  %v5967_v30 = vld [vmem:[#allocation5 + $0x718] sm:$0xf] }
 0x3e1   : > { %v3463_v34 = vpop.f32.mrf.mxu1  ;;  %v5968_v51 = vor.u32 %v6341_v8, %v5967_v30 }
 0x3e2   : > { %v4428_v24 = vrot.slane %v4427_v46, 1  ;;  %v7406_v28 = vadd.f32 %v3449_v33, %v3411_v22  ;;  %v7408_v35 = vpop.f32.mrf.mxu0  ;;  %v5456_v33 = vor.u32 %v6213_v27, %v5455_v43  ;;  %v7418_v22 = vld [vmem:[%s7690_s8] sm:$0xff] }
 0x3e3   : > { %v7421_v31 = vperm.slane %v7418_v22, 4  ;;  %3886 = vmatpush.bf16.msra.mxu0 %v5968_v51 }
 0x3e4   : > { %v4429_v52 = vmax.f32 %v4427_v46, %v4428_v24  ;;  %v4161_v17 = vmul.f32 0.01, %v7406_v28  ;;  %3628 = vmatmul.bf16.gmra.mxu1 %v7009_v49  ;;  %3808 = vmatpush.bf16.msra.mxu2 %v5456_v33  ;;  %v5679_v46 = vld [vmem:[#allocation5 + $0x4d8] sm:$0xf] }
 0x3e5   : > { %3745 = vmatmul.bf16.gmra.mxu0 %v7012_v57  ;;  %v3373_v19 = vpop.f32.mrf.mxu2  ;;  %v5680_v14 = vor.u32 %v6269_v62, %v5679_v46  ;;  %v3464_v33 = vadd.f32 %v3463_v34, %v7421_v31  ;;  %v6333_v46 = vld [vmem:[#allocation5 + $0x6f4] sm:$0xf0] }
 0x3e6   : > { %v4571_v50 = vrot.slane %v4429_v52, 4  ;;  %v3374_v48 = vadd.f32 %v3373_v19, %v3335_v25  ;;  %v3412_v36 = vpop.f32.mrf.mxu3  ;;  %v4257_v11 = vmax.f32 %v7406_v28, %v4161_v17  ;;  %v4249_v52 = vmax.f32 %v3447_v10, %v4153_v47 }
 0x3e7   : > { %3848 = vmatpush.bf16.msrb.mxu3 %v5680_v14  ;;  %v6261_v14 = vld [vmem:[#allocation5 + $0x4b4] sm:$0xf0] }
 0x3e8   : > { %v4588_v29 = vsel %vm4578_vm1, %v4421_v44, %v4571_v50  ;;  %v3413_v24 = vadd.f32 %v3412_v36, %v3374_v48  ;;  %3809 = vmatpush.bf16.msra.mxu2 %v5424_v42  ;;  %v4486_v6 = vmax.f32 %v4249_v52, %v4257_v11  ;;  %v5167_v50 = vld [vmem:[#allocation5 + $0xd8] sm:$0xf] }
 0x3e9   : > { %v4613_v43 = vrot.slane %v4588_v29, 6  ;;  %v3465_v25 = vpop.f32.mrf.mxu1  ;;  %v6141_v48 = vld [vmem:[#allocation5 + $0xf4] sm:$0xf0] }
 0x3ea   : > { %v3452_v27 = vadd.f32 %v7401_v20, %v3413_v24  ;;  %v7427_v53 = vpop.f32.mrf.mxu0  ;;  %3667 = vmatmul.bf16.gmra.mxu2 %v7017_v15  ;;  %v4481_v20 = vmax.f32 %v7332_v9, %v4480_v37  ;;  %v5935_v36 = vld [vmem:[#allocation5 + $0x6d8] sm:$0xf]  ;;  %v3466_v9 = vadd.f32 %v3465_v25, %v7421_v31  ;;  %v5168_v1 = vor.u32 %v6141_v48, %v5167_v50 }
 0x3eb   : > { %v4614_v40 = vsel %vm4601_vm4, %v4613_v43, %v7393_v61  ;;  %3706 = vmatmul.bf16.gmra.mxu3 %v7019_v16  ;;  %v5391_v42 = vld [vmem:[#allocation5 + $0x298] sm:$0xf]  ;;  %v5936_v47 = vor.u32 %v6333_v46, %v5935_v36 }
 0x3ec   : > { %v4169_v5 = vmul.f32 0.01, %v3452_v27  ;;  %v7435_v28 = vsel %vm4603_vm5, %v4613_v43, %v4614_v40  ;;  %v4482_v8 = vrot.slane %v4481_v20, 2  ;;  %v5647_v24 = vld [vmem:[#allocation5 + $0x498] sm:$0xf]  ;;  %3770 = vmatpush.bf16.msra.mxu1 %v5168_v1 }
 0x3ed   : > { %v3502_v17 = vpop.f32.mrf.mxu2  ;;  %v5135_v40 = vld [vmem:[#allocation5 + $0x98] sm:$0xf]  ;;  %3887 = vmatpush.bf16.msra.mxu0 %v5936_v47  ;;  %v5648_v52 = vor.u32 %v6261_v14, %v5647_v24 }
 0x3ee   : > { %v4265_v32 = vmax.f32 %v3452_v27, %v4169_v5  ;;  %v3503_v19 = vadd.f32 %v3502_v17, %v3464_v33  ;;  %v3541_v55 = vpop.f32.mrf.mxu3  ;;  %v4483_v62 = vmax.f32 %v4481_v20, %v4482_v8  ;;  %v6133_v25 = vld [vmem:[#allocation5 + $0xb4] sm:$0xf0] }
 0x3ef   : > { %v5136_v33 = vor.u32 %v6133_v25, %v5135_v40  ;;  %v5903_v5 = vld [vmem:[#allocation5 + $0x698] sm:$0xf]  ;;  %3849 = vmatpush.bf16.msrb.mxu3 %v5648_v52 }
 0x3f0   : > { %v4487_v30 = vmax.f32 %v4486_v6, %v4265_v32  ;;  %v3542_v61 = vadd.f32 %v3541_v55, %v3503_v19  ;;  %v6325_v17 = vld [vmem:[#allocation5 + $0x6b4] sm:$0xf0] }
 0x3f1   : > { %v3468_v21 = vpop.f32.mrf.mxu1  ;;  %v5904_v32 = vor.u32 %v6325_v17, %v5903_v5  ;;  %v5359_v19 = vld [vmem:[#allocation5 + $0x258] sm:$0xf]  ;;  %3771 = vmatpush.bf16.msra.mxu1 %v5136_v33 }
 0x3f2   : > { %v4488_v44 = vrot.slane %v4487_v30, 4  ;;  %v7439_v10 = vadd.f32 %v7408_v35, %v3542_v61  ;;  %v7441_v34 = vpop.f32.mrf.mxu0  ;;  %v6197_v35 = vld [vmem:[#allocation5 + $0x2b4] sm:$0xf0]  ;;  %v4484_v61 = vrot.slane %v4483_v62, 1 }
 0x3f3   : > { %v5392_v27 = vor.u32 %v6197_v35, %v5391_v42  ;;  %v6189_v55 = vld [vmem:[#allocation5 + $0x274] sm:$0xf0]  ;;  %3888 = vmatpush.bf16.msra.mxu0 %v5904_v32  ;;  %v3469_v35 = vadd.f32 %v3468_v21, %v7421_v31 }
 0x3f4   : > { %v4489_v51 = vmax.f32 %v4487_v30, %v4488_v44  ;;  %3633 = vmatmul.bf16.gmra.mxu1 %v7029_v63  ;;  %v5615_v30 = vld [vmem:[#allocation5 + $0x458] sm:$0xf]  ;;  %v5360_v44 = vor.u32 %v6189_v55, %v5359_v19  ;;  %v4082_v36 = vmul.f32 0.01, %v7439_v10 }
 0x3f5   : > { %3750 = vmatmul.bf16.gmra.mxu0 %v7032_v7  ;;  %v3504_v29 = vpop.f32.mrf.mxu2  ;;  %3810 = vmatpush.bf16.msra.mxu2 %v5392_v27  ;;  %v6253_v50 = vld [vmem:[#allocation5 + $0x474] sm:$0xf0] }
 0x3f6   : > { %v4490_v37 = vrot.slane %v4489_v51, 2  ;;  %v3505_v43 = vadd.f32 %v3504_v29, %v3466_v9  ;;  %v3543_v11 = vpop.f32.mrf.mxu3  ;;  %v5103_v46 = vld [vmem:[#allocation5 + $0x58] sm:$0xf]  ;;  %v4178_v40 = vmax.f32 %v7439_v10, %v4082_v36 }
 0x3f7   : > { %v6125_v42 = vld [vmem:[#allocation5 + $0x74] sm:$0xf0] }
 0x3f8   : > { %v4491_v20 = vmax.f32 %v4489_v51, %v4490_v37  ;;  %v3544_v6 = vadd.f32 %v3543_v11, %v3505_v43  ;;  %v5616_v51 = vor.u32 %v6253_v50, %v5615_v30  ;;  %v5871_v29 = vld [vmem:[#allocation5 + $0x658] sm:$0xf]  ;;  %v5104_v14 = vor.u32 %v6125_v42, %v5103_v46 }
 0x3f9   : > { %v3470_v8 = vpop.f32.mrf.mxu1  ;;  %3811 = vmatpush.bf16.msra.mxu2 %v5360_v44  ;;  %v6317_v37 = vld [vmem:[#allocation5 + $0x674] sm:$0xf0] }
 0x3fa   : > { %v4492_v48 = vrot.slane %v4491_v20, 1  ;;  %v3583_v9 = vadd.f32 %v7427_v53, %v3544_v6  ;;  %v7448_v1 = vpop.f32.mrf.mxu0  ;;  %3672 = vmatmul.bf16.gmra.mxu2 %v7037_v23  ;;  %v4485_v53 = vmax.f32 %v4483_v62, %v4484_v61  ;;  %3850 = vmatpush.bf16.msrb.mxu3 %v5616_v51  ;;  %v5872_v11 = vor.u32 %v6317_v37, %v5871_v29  ;;  %v5071_v5 = vld [vmem:[#allocation5 + $0x18] sm:$0xf] }
 0x3fb   : > { %3711 = vmatmul.bf16.gmra.mxu3 %v7039_v3  ;;  %3772 = vmatpush.bf16.msra.mxu1 %v5104_v14  ;;  %v6117_v17 = vld [vmem:[#allocation5 + $0x34] sm:$0xf0] }
 0x3fc   : > { %v4493_v47 = vmax.f32 %v4491_v20, %v4492_v48  ;;  %v4090_v24 = vmul.f32 0.01, %v3583_v9  ;;  %3889 = vmatpush.bf16.msra.mxu0 %v5872_v11  ;;  %v5839_v20 = vld [vmem:[#allocation5 + $0x618] sm:$0xf]  ;;  %v5072_v19 = vor.u32 %v6117_v17, %v5071_v5  ;;  %v3471_v48 = vadd.f32 %v3470_v8, %v7421_v31  ;;  %v6233_v5 = vld [vmem:[#allocation5 + $0x3dc] sm:$0xf] }
 0x3fd   : > { %v3507_v43 = vpop.f32.mrf.mxu2  ;;  %v6309_v62 = vld [vmem:[#allocation5 + $0x634] sm:$0xf0]  ;;  %v5553_v17 = vld [vmem:[#allocation5 + $0x3f8] sm:$0xf0] }
 0x3fe   : > { %v4575_v27 = vrot.slane %v4493_v47, 4  ;;  %v4186_v25 = vmax.f32 %v3583_v9, %v4090_v24  ;;  %v3508_v52 = vadd.f32 %v3507_v43, %v3469_v35  ;;  %v3546_v33 = vpop.f32.mrf.mxu3  ;;  %v5840_v61 = vor.u32 %v6309_v62, %v5839_v20  ;;  %v5327_v46 = vld [vmem:[#allocation5 + $0x218] sm:$0xf]  ;;  %v6297_v20 = vld [vmem:[#allocation5 + $0x5dc] sm:$0xf] }
 0x3ff   : > { %3773 = vmatpush.bf16.msra.mxu1 %v5072_v19  ;;  %v6181_v42 = vld [vmem:[#allocation5 + $0x234] sm:$0xf0] }
 0x400   : > { %v4592_v21 = vsel %vm4578_vm1, %v4485_v53, %v4575_v27  ;;  %v4302_v6 = vmax.f32 %v4178_v40, %v4186_v25  ;;  %v3547_v32 = vadd.f32 %v3546_v33, %v3508_v52  ;;  %3890 = vmatpush.bf16.msra.mxu0 %v5840_v61  ;;  %v5328_v24 = vor.u32 %v6181_v42, %v5327_v46  ;;  %v6245_v14 = vld [vmem:[#allocation5 + $0x434] sm:$0xf0] }
 0x401   : > { %v4616_v55 = vrot.slane %v4592_v21, 5  ;;  %v3473_v30 = vpop.f32.mrf.mxu1 }
 0x402   : > { %v3586_v44 = vadd.f32 %v7441_v34, %v3547_v32  ;;  %v3590_v10 = vpop.f32.mrf.mxu0  ;;  %v5583_v34 = vld [vmem:[#allocation5 + $0x418] sm:$0xf]  ;;  %3812 = vmatpush.bf16.msra.mxu2 %v5328_v24  ;;  %v3474_v27 = vadd.f32 %v3473_v30, %v7421_v31  ;;  %v5809_v32 = vld [vmem:[#allocation5 + $0x5f8] sm:$0xf0] }
 0x403   : > { %v4617_v50 = vsel %vm4606_vm6, %v4616_v55, %v7435_v28  ;;  %v5584_v28 = vor.u32 %v6245_v14, %v5583_v34 }
 0x404   : > { %v4098_v36 = vmul.f32 0.01, %v3586_v44  ;;  %3638 = vmatmul.bf16.gmra.mxu1 %v7049_v26  ;;  %v4618_v9 = vsel %vm4608_vm7, %v4616_v55, %v4617_v50  ;;  %v5812_v55 = vor.u32 %v6297_v20, %v5809_v32  ;;  %v6065_v20 = vld [vmem:[#allocation5 + $0x7f8] sm:$0xf0] }
 0x405   : > { %3755 = vmatmul.bf16.gmra.mxu0 %v7052_v45  ;;  %v3509_v51 = vpop.f32.mrf.mxu2  ;;  %4642 = vst [vmem:[%s7292_s23 + $0x8] sm:$0xff] %v4618_v9  ;;  %3851 = vmatpush.bf16.msrb.mxu3 %v5584_v28 }
 0x406   : > { %v4194_v29 = vmax.f32 %v3586_v44, %v4098_v36  ;;  %v3510_v47 = vadd.f32 %v3509_v51, %v3471_v48  ;;  %v3548_v35 = vpop.f32.mrf.mxu3 }
 0x408   : > { %v7463_v37 = vmax.f32 %v4302_v6, %v4194_v29  ;;  %v3549_v8 = vadd.f32 %v3548_v35, %v3510_v47  ;;  %v5556_v6 = vor.u32 %v6233_v5, %v5553_v17  ;;  %v6361_v17 = vld [vmem:[#allocation5 + $0x7dc] sm:$0xf] }
 0x409   : > { %v3475_v53 = vpop.f32.mrf.mxu1  ;;  %4000 = vmatpush.bf16.msra.mxu3 %v5812_v55  ;;  %v6289_v55 = vld [vmem:[#allocation5 + $0x59c] sm:$0xf] }
 0x40a   : > { %v3588_v43 = vadd.f32 %v7448_v1, %v3549_v8  ;;  %v3592_v11 = vpop.f32.mrf.mxu0  ;;  %3677 = vmatmul.bf16.gmra.mxu2 %v7057_v56  ;;  %v3476_v61 = vadd.f32 %v3475_v53, %v7421_v31 }
 0x40b   : > { %3716 = vmatmul.bf16.gmra.mxu3 %v7059_v59  ;;  %3961 = vmatpush.bf16.msrb.mxu2 %v5556_v6 }
 0x40c   : > { %v4106_v19 = vmul.f32 0.01, %v3588_v43 }
 0x40d   : > { %v3512_v40 = vpop.f32.mrf.mxu2 }
 0x40e   : > { %v3513_v25 = vadd.f32 %v3512_v40, %v3474_v27  ;;  %v3551_v52 = vpop.f32.mrf.mxu3  ;;  %v4202_v50 = vmax.f32 %v3588_v43, %v4106_v19  ;;  %v6068_v19 = vor.u32 %v6361_v17, %v6065_v20 }
 0x410   : > { %v3552_v33 = vadd.f32 %v3551_v52, %v3513_v25  ;;  %v6169_v25 = vld [vmem:[#allocation5 + $0x1dc] sm:$0xf]  ;;  %4039 = vmatpush.bf16.msrb.mxu0 %v6068_v19 }
 0x411   : > { %v3478_v21 = vpop.f32.mrf.mxu1  ;;  %v5297_v52 = vld [vmem:[#allocation5 + $0x1f8] sm:$0xf0] }
 0x412   : > { %v3591_v62 = vadd.f32 %v3590_v10, %v3552_v33  ;;  %v3595_v1 = vpop.f32.mrf.mxu0  ;;  %v3479_v29 = vadd.f32 %v3478_v21, %v7421_v31  ;;  %v5300_v5 = vor.u32 %v6169_v25, %v5297_v52  ;;  %v6225_v21 = vld [vmem:[#allocation5 + $0x39c] sm:$0xf] }
 0x414   : > { %v4114_v44 = vmul.f32 0.01, %v3591_v62  ;;  %3643 = vmatmul.bf16.gmra.mxu1 %v7069_v38 }
 0x415   : > { %3760 = vmatmul.bf16.gmra.mxu0 %v7072_v39  ;;  %v3514_v30 = vpop.f32.mrf.mxu2  ;;  %3922 = vmatpush.bf16.msrb.mxu1 %v5300_v5 }
 0x416   : > { %v4210_v48 = vmax.f32 %v3591_v62, %v4114_v44  ;;  %v3515_v36 = vadd.f32 %v3514_v30, %v3476_v61  ;;  %v3553_v9 = vpop.f32.mrf.mxu3  ;;  %v5521_v62 = vld [vmem:[#allocation5 + $0x3b8] sm:$0xf0] }
 0x417   : > { %v5777_v61 = vld [vmem:[#allocation5 + $0x5b8] sm:$0xf0] }
 0x418   : > { %v4366_v51 = vmax.f32 %v4202_v50, %v4210_v48  ;;  %v3554_v46 = vadd.f32 %v3553_v9, %v3515_v36  ;;  %v6161_v44 = vld [vmem:[#allocation5 + $0x19c] sm:$0xf]  ;;  %v5780_v48 = vor.u32 %v6289_v55, %v5777_v61 }
 0x419   : > { %v3480_v42 = vpop.f32.mrf.mxu1  ;;  %v5265_v30 = vld [vmem:[#allocation5 + $0x1b8] sm:$0xf0] }
 0x41a   : > { %v3593_v10 = vadd.f32 %v3592_v11, %v3554_v46  ;;  %v3597_v34 = vpop.f32.mrf.mxu0  ;;  %3682 = vmatmul.bf16.gmra.mxu2 %v7077_v41  ;;  %v3481_v11 = vadd.f32 %v3480_v42, %v7421_v31  ;;  %v5268_v36 = vor.u32 %v6161_v44, %v5265_v30  ;;  %v6353_v9 = vld [vmem:[#allocation5 + $0x79c] sm:$0xf]  ;;  %4001 = vmatpush.bf16.msra.mxu3 %v5780_v48 }
 0x41b   : > { %3721 = vmatmul.bf16.gmra.mxu3 %v7079_v2  ;;  %v6217_v46 = vld [vmem:[#allocation5 + $0x35c] sm:$0xf] }
 0x41c   : > { %v4122_v47 = vmul.f32 0.01, %v3593_v10  ;;  %3923 = vmatpush.bf16.msrb.mxu1 %v5268_v36 }
 0x41d   : > { %v3517_v35 = vpop.f32.mrf.mxu2 }
 0x41e   : > { %v4218_v24 = vmax.f32 %v3593_v10, %v4122_v47  ;;  %v3518_v14 = vadd.f32 %v3517_v35, %v3479_v29  ;;  %v3556_v28 = vpop.f32.mrf.mxu3  ;;  %v5489_v29 = vld [vmem:[#allocation5 + $0x378] sm:$0xf0] }
 0x41f   : > { %v6281_v47 = vld [vmem:[#allocation5 + $0x55c] sm:$0xf] }
 0x420   : > { %v7475_v8 = vmax.f32 %v4366_v51, %v4218_v24  ;;  %v3557_v53 = vadd.f32 %v3556_v28, %v3518_v14  ;;  %v6033_v51 = vld [vmem:[#allocation5 + $0x7b8] sm:$0xf0] }
 0x421   : > { %v3483_v43 = vpop.f32.mrf.mxu1  ;;  %v6036_v10 = vor.u32 %v6353_v9, %v6033_v51  ;;  %v5745_v35 = vld [vmem:[#allocation5 + $0x578] sm:$0xf0] }
 0x422   : > { %v3596_v27 = vadd.f32 %v3595_v1, %v3557_v53  ;;  %v3600_v40 = vpop.f32.mrf.mxu0  ;;  %v5524_v1 = vor.u32 %v6225_v21, %v5521_v62  ;;  %v5492_v53 = vor.u32 %v6217_v46, %v5489_v29  ;;  %v3484_v25 = vadd.f32 %v3483_v43, %v7421_v31  ;;  %v6153_v51 = vld [vmem:[#allocation5 + $0x15c] sm:$0xf] }
 0x423   : > { %4040 = vmatpush.bf16.msrb.mxu0 %v6036_v10  ;;  %v5233_v46 = vld [vmem:[#allocation5 + $0x178] sm:$0xf0] }
 0x424   : > { %3774 = vmatmul.bf16.vlgmr.msra.gmra.mxu1 %v6969_v60  ;;  %3962 = vmatpush.bf16.msrb.mxu2 %v5524_v1  ;;  %v4130_v24 = vmul.f32 0.01, %v3596_v27  ;;  %v5236_v10 = vor.u32 %v6153_v51, %v5233_v46  ;;  %v6345_v29 = vld [vmem:[#allocation5 + $0x75c] sm:$0xf] }
 0x425   : > { %3891 = vmatmul.bf16.vlgmr.msra.gmra.mxu0 %v6972_v0  ;;  %v3519_v33 = vpop.f32.mrf.mxu2 }
 0x426   : > { %v3520_v6 = vadd.f32 %v3519_v33, %v3481_v11  ;;  %v3558_v32 = vpop.f32.mrf.mxu3  ;;  %v5748_v11 = vor.u32 %v6281_v47, %v5745_v35  ;;  %v4226_v5 = vmax.f32 %v3596_v27, %v4130_v24  ;;  %v6001_v47 = vld [vmem:[#allocation5 + $0x778] sm:$0xf0]  ;;  %3924 = vmatpush.bf16.msrb.mxu1 %v5236_v10 }
 0x427   : > { %v6209_v35 = vld [vmem:[#allocation5 + $0x31c] sm:$0xf] }
 0x428   : > { %v3559_v50 = vadd.f32 %v3558_v32, %v3520_v6  ;;  %3963 = vmatpush.bf16.msrb.mxu2 %v5492_v53  ;;  %4002 = vmatpush.bf16.msra.mxu3 %v5748_v11  ;;  %v6004_v53 = vor.u32 %v6345_v29, %v6001_v47  ;;  %v5457_v11 = vld [vmem:[#allocation5 + $0x338] sm:$0xf0] }
 0x429   : > { %v3485_v42 = vpop.f32.mrf.mxu1 }
 0x42a   : > { %v3598_v14 = vadd.f32 %v3597_v34, %v3559_v50  ;;  %v3602_v28 = vpop.f32.mrf.mxu0  ;;  %3813 = vmatmul.bf16.vlgmr.msra.gmra.mxu2 %v6977_v4  ;;  %v3486_v55 = vadd.f32 %v3485_v42, %v7421_v31  ;;  %4041 = vmatpush.bf16.msrb.mxu0 %v6004_v53 }
 0x42b   : > { %3852 = vmatmul.bf16.vlgmr.msrb.gmra.mxu3 %v6979_v18 }
 0x42c   : > { %v4138_v52 = vmul.f32 0.01, %v3598_v14 }
 0x42d   : > { %v3522_v33 = vpop.f32.mrf.mxu2 }
 0x42e   : > { %v4234_v17 = vmax.f32 %v3598_v14, %v4138_v52  ;;  %v3523_v20 = vadd.f32 %v3522_v33, %v3484_v25  ;;  %v3561_v21 = vpop.f32.mrf.mxu3  ;;  %v6273_v25 = vld [vmem:[#allocation5 + $0x51c] sm:$0xf] }
 0x42f   : > { %v5713_v52 = vld [vmem:[#allocation5 + $0x538] sm:$0xf0] }
 0x430   : > { %v4430_v34 = vmax.f32 %v4226_v5, %v4234_v17  ;;  %v3562_v6 = vadd.f32 %v3561_v21, %v3523_v20  ;;  %v6145_v33 = vld [vmem:[#allocation5 + $0x11c] sm:$0xf]  ;;  %v5716_v20 = vor.u32 %v6273_v25, %v5713_v52 }
 0x431   : > { %v3488_v32 = vpop.f32.mrf.mxu1  ;;  %v5201_v5 = vld [vmem:[#allocation5 + $0x138] sm:$0xf0] }
 0x432   : > { %v3601_v19 = vadd.f32 %v3600_v40, %v3562_v6  ;;  %v3605_v62 = vpop.f32.mrf.mxu0  ;;  %v3489_v40 = vadd.f32 %v3488_v32, %v7421_v31  ;;  %v5204_v21 = vor.u32 %v6145_v33, %v5201_v5  ;;  %v5969_v6 = vld [vmem:[#allocation5 + $0x738] sm:$0xf0]  ;;  %4003 = vmatpush.bf16.msra.mxu3 %v5716_v20 }
 0x433   : > { %v6201_v32 = vld [vmem:[#allocation5 + $0x2dc] sm:$0xf] }
 0x434   : > { %v4146_v1 = vmul.f32 0.01, %v3601_v19  ;;  %3779 = vmatmul.bf16.gmra.mxu1 %v6989_v54 }
 0x435   : > { %3896 = vmatmul.bf16.gmra.mxu0 %v6992_v58  ;;  %v3524_v43 = vpop.f32.mrf.mxu2  ;;  %3925 = vmatpush.bf16.msrb.mxu1 %v5204_v21 }
 0x436   : > { %v4242_v61 = vmax.f32 %v3601_v19, %v4146_v1  ;;  %v3525_v44 = vadd.f32 %v3524_v43, %v3486_v55  ;;  %v3563_v27 = vpop.f32.mrf.mxu3  ;;  %v5425_v1 = vld [vmem:[#allocation5 + $0x2f8] sm:$0xf0] }
 0x437   : > { %v6265_v43 = vld [vmem:[#allocation5 + $0x4dc] sm:$0xf] }
 0x438   : > { %v7486_v30 = vmax.f32 %v4430_v34, %v4242_v61  ;;  %v3564_v50 = vadd.f32 %v3563_v27, %v3525_v44  ;;  %v6337_v34 = vld [vmem:[#allocation5 + $0x71c] sm:$0xf] }
 0x439   : > { %v3490_v48 = vpop.f32.mrf.mxu1  ;;  %v5972_v55 = vor.u32 %v6337_v34, %v5969_v6  ;;  %v5681_v61 = vld [vmem:[#allocation5 + $0x4f8] sm:$0xf0] }
 0x43a   : > { %v3603_v36 = vadd.f32 %v3602_v28, %v3564_v50  ;;  %v3607_v9 = vpop.f32.mrf.mxu0  ;;  %3818 = vmatmul.bf16.gmra.mxu2 %v6997_v12  ;;  %v5460_v28 = vor.u32 %v6209_v35, %v5457_v11  ;;  %v5684_v51 = vor.u32 %v6265_v43, %v5681_v61  ;;  %v3491_v46 = vadd.f32 %v3490_v48, %v7421_v31  ;;  %v5169_v6 = vld [vmem:[#allocation5 + $0xf8] sm:$0xf0] }
 0x43b   : > { %3857 = vmatmul.bf16.gmra.mxu3 %v6999_v13  ;;  %4042 = vmatpush.bf16.msrb.mxu0 %v5972_v55 }
 0x43c   : > { %3964 = vmatpush.bf16.msrb.mxu2 %v5460_v28  ;;  %v4154_v44 = vmul.f32 0.01, %v3603_v36  ;;  %4004 = vmatpush.bf16.msra.mxu3 %v5684_v51  ;;  %v6321_v51 = vld [vmem:[#allocation5 + $0x69c] sm:$0xf] }
 0x43d   : > { %v3527_v42 = vpop.f32.mrf.mxu2 }
 0x43e   : > { %v3528_v24 = vadd.f32 %v3527_v42, %v3489_v40  ;;  %v3566_v14 = vpop.f32.mrf.mxu3  ;;  %v5428_v40 = vor.u32 %v6201_v32, %v5425_v1  ;;  %v4250_v29 = vmax.f32 %v3603_v36, %v4154_v44  ;;  %v6329_v32 = vld [vmem:[#allocation5 + $0x6dc] sm:$0xf] }
 0x43f   : > { %v5937_v1 = vld [vmem:[#allocation5 + $0x6f8] sm:$0xf0] }
 0x440   : > { %v3567_v17 = vadd.f32 %v3566_v14, %v3528_v24  ;;  %3965 = vmatpush.bf16.msrb.mxu2 %v5428_v40  ;;  %v7495_v14 = vperm.slane %v7418_v22, 5  ;;  %v5940_v61 = vor.u32 %v6329_v32, %v5937_v1  ;;  %v5137_v40 = vld [vmem:[#allocation5 + $0xb8] sm:$0xf0] }
 0x441   : > { %v3619_v19 = vpop.f32.mrf.mxu1  ;;  %v5105_v32 = vld [vmem:[#allocation5 + $0x78] sm:$0xf0] }
 0x442   : > { %v3606_v27 = vadd.f32 %v3605_v62, %v3567_v17  ;;  %v3736_v50 = vpop.f32.mrf.mxu0  ;;  %v3620_v25 = vadd.f32 %v3619_v19, %v7495_v14  ;;  %4043 = vmatpush.bf16.msrb.mxu0 %v5940_v61  ;;  %v5873_v61 = vld [vmem:[#allocation5 + $0x678] sm:$0xf0] }
 0x444   : > { %v4162_v42 = vmul.f32 0.01, %v3606_v27  ;;  %3784 = vmatmul.bf16.gmra.mxu1 %v7009_v49 }
 0x445   : > { %3901 = vmatmul.bf16.gmra.mxu0 %v7012_v57  ;;  %v3529_v10 = vpop.f32.mrf.mxu2 }
 0x446   : > { %v4258_v47 = vmax.f32 %v3606_v27, %v4162_v42  ;;  %v3530_v35 = vadd.f32 %v3529_v10, %v3491_v46  ;;  %v3568_v24 = vpop.f32.mrf.mxu3  ;;  %v6193_v42 = vld [vmem:[#allocation5 + $0x29c] sm:$0xf] }
 0x447   : > { %v5393_v10 = vld [vmem:[#allocation5 + $0x2b8] sm:$0xf0] }
 0x448   : > { %v4494_v62 = vmax.f32 %v4250_v29, %v4258_v47  ;;  %v3569_v53 = vadd.f32 %v3568_v24, %v3530_v35  ;;  %v6257_v29 = vld [vmem:[#allocation5 + $0x49c] sm:$0xf]  ;;  %v5396_v24 = vor.u32 %v6193_v42, %v5393_v10 }
 0x449   : > { %v3621_v11 = vpop.f32.mrf.mxu1  ;;  %v6113_v42 = vld [vmem:[#allocation5 + $0x1c] sm:$0xf] }
 0x44a   : > { %v3608_v31 = vadd.f32 %v3607_v9, %v3569_v53  ;;  %v3738_v48 = vpop.f32.mrf.mxu0  ;;  %3823 = vmatmul.bf16.gmra.mxu2 %v7017_v15  ;;  %v6137_v9 = vld [vmem:[#allocation5 + $0xdc] sm:$0xf]  ;;  %v3622_v55 = vadd.f32 %v3621_v11, %v7495_v14 }
 0x44b   : > { %3862 = vmatmul.bf16.gmra.mxu3 %v7019_v16  ;;  %v5172_v19 = vor.u32 %v6137_v9, %v5169_v6  ;;  %v5905_v53 = vld [vmem:[#allocation5 + $0x6b8] sm:$0xf0]  ;;  %3966 = vmatpush.bf16.msrb.mxu2 %v5396_v24 }
 0x44c   : > { %v4170_v28 = vmul.f32 0.01, %v3608_v31  ;;  %v6185_v11 = vld [vmem:[#allocation5 + $0x25c] sm:$0xf] }
 0x44d   : > { %v3658_v36 = vpop.f32.mrf.mxu2  ;;  %3926 = vmatpush.bf16.msrb.mxu1 %v5172_v19  ;;  %v5617_v9 = vld [vmem:[#allocation5 + $0x478] sm:$0xf0] }
 0x44e   : > { %v4266_v52 = vmax.f32 %v3608_v31, %v4170_v28  ;;  %v3659_v33 = vadd.f32 %v3658_v36, %v3620_v25  ;;  %v3697_v5 = vpop.f32.mrf.mxu3  ;;  %v6121_v6 = vld [vmem:[#allocation5 + $0x5c] sm:$0xf] }
 0x44f   : > { %v5108_v1 = vor.u32 %v6121_v6, %v5105_v32  ;;  %v5073_v10 = vld [vmem:[#allocation5 + $0x38] sm:$0xf0] }
 0x450   : > { %v7500_v17 = vmax.f32 %v4494_v62, %v4266_v52  ;;  %v3698_v20 = vadd.f32 %v3697_v5, %v3659_v33  ;;  %v5649_v62 = vld [vmem:[#allocation5 + $0x4b8] sm:$0xf0]  ;;  %v5908_v5 = vor.u32 %v6321_v51, %v5905_v53  ;;  %v5076_v24 = vor.u32 %v6113_v42, %v5073_v10 }
 0x451   : > { %v3624_v22 = vpop.f32.mrf.mxu1  ;;  %v5652_v36 = vor.u32 %v6257_v29, %v5649_v62  ;;  %v5361_v52 = vld [vmem:[#allocation5 + $0x278] sm:$0xf0] }
 0x452   : > { %v7502_v21 = vadd.f32 %v3736_v50, %v3698_v20  ;;  %v7504_v34 = vpop.f32.mrf.mxu0  ;;  %v6129_v50 = vld [vmem:[#allocation5 + $0x9c] sm:$0xf]  ;;  %v5364_v20 = vor.u32 %v6185_v11, %v5361_v52  ;;  %4044 = vmatpush.bf16.msrb.mxu0 %v5908_v5  ;;  %v4304_v11 = vrot.slane %v7463_v37, 4 }
 0x453   : > { %v5140_v47 = vor.u32 %v6129_v50, %v5137_v40  ;;  %v6249_v33 = vld [vmem:[#allocation5 + $0x45c] sm:$0xf]  ;;  %4005 = vmatpush.bf16.msra.mxu3 %v5652_v36 }
 0x454   : > { %3789 = vmatmul.bf16.gmra.mxu1 %v7029_v63  ;;  %v4083_v31 = vmul.f32 0.01, %v7502_v21  ;;  %3967 = vmatpush.bf16.msrb.mxu2 %v5364_v20  ;;  %v6305_v29 = vld [vmem:[#allocation5 + $0x61c] sm:$0xf] }
 0x455   : > { %3906 = vmatmul.bf16.gmra.mxu0 %v7032_v7  ;;  %v3660_v43 = vpop.f32.mrf.mxu2  ;;  %3927 = vmatpush.bf16.msrb.mxu1 %v5140_v47  ;;  %v5841_v62 = vld [vmem:[#allocation5 + $0x638] sm:$0xf0] }
 0x456   : > { %v3661_v44 = vadd.f32 %v3660_v43, %v3622_v55  ;;  %v3699_v27 = vpop.f32.mrf.mxu3  ;;  %v3625_v55 = vadd.f32 %v3624_v22, %v7495_v14  ;;  %v6313_v43 = vld [vmem:[#allocation5 + $0x65c] sm:$0xf]  ;;  %v4179_v50 = vmax.f32 %v7502_v21, %v4083_v31  ;;  %v5844_v31 = vor.u32 %v6305_v29, %v5841_v62 }
 0x457   : > { %v5329_v5 = vld [vmem:[#allocation5 + $0x238] sm:$0xf0] }
 0x458   : > { %v3700_v46 = vadd.f32 %v3699_v27, %v3661_v44  ;;  %v5876_v27 = vor.u32 %v6313_v43, %v5873_v61  ;;  %v6241_v20 = vld [vmem:[#allocation5 + $0x41c] sm:$0xf] }
 0x459   : > { %v7509_v35 = vpop.f32.mrf.mxu1  ;;  %3928 = vmatpush.bf16.msrb.mxu1 %v5108_v1 }
 0x45a   : > { %v3739_v25 = vadd.f32 %v3738_v48, %v3700_v46  ;;  %v7512_v28 = vpop.f32.mrf.mxu0  ;;  %3828 = vmatmul.bf16.gmra.mxu2 %v7037_v23  ;;  %v5620_v48 = vor.u32 %v6249_v33, %v5617_v9  ;;  %4045 = vmatpush.bf16.msrb.mxu0 %v5876_v27  ;;  %v6177_v33 = vld [vmem:[#allocation5 + $0x21c] sm:$0xf]  ;;  %v4305_v9 = vmax.f32 %v7463_v37, %v4304_v11 }
 0x45b   : > { %3867 = vmatmul.bf16.gmra.mxu3 %v7039_v3  ;;  %v3627_v61 = vadd.f32 %v7509_v35, %v7495_v14 }
 0x45c   : > { %v4091_v19 = vmul.f32 0.01, %v3739_v25  ;;  %4006 = vmatpush.bf16.msra.mxu3 %v5620_v48  ;;  %v4306_v43 = vrot.slane %v4305_v9, 2 }
 0x45d   : > { %v3663_v44 = vpop.f32.mrf.mxu2  ;;  %3929 = vmatpush.bf16.msrb.mxu1 %v5076_v24 }
 0x45e   : > { %v4187_v40 = vmax.f32 %v3739_v25, %v4091_v19  ;;  %v3664_v46 = vadd.f32 %v3663_v44, %v3625_v55  ;;  %v3702_v51 = vpop.f32.mrf.mxu3  ;;  %v5332_v55 = vor.u32 %v6177_v33, %v5329_v5  ;;  %v5585_v19 = vld [vmem:[#allocation5 + $0x438] sm:$0xf0]  ;;  %4046 = vmatpush.bf16.msrb.mxu0 %v5844_v31 }
 0x460   : > { %v4310_v22 = vmax.f32 %v4179_v50, %v4187_v40  ;;  %v3703_v47 = vadd.f32 %v3702_v51, %v3664_v46  ;;  %3968 = vmatpush.bf16.msrb.mxu2 %v5332_v55  ;;  %v4307_v51 = vmax.f32 %v4305_v9, %v4306_v43 }
 0x461   : > { %v3629_v53 = vpop.f32.mrf.mxu1 }
 0x462   : > { %v3742_v36 = vadd.f32 %v7504_v34, %v3703_v47  ;;  %v3746_v21 = vpop.f32.mrf.mxu0  ;;  %v5588_v34 = vor.u32 %v6241_v20, %v5585_v19  ;;  %v3630_v50 = vadd.f32 %v3629_v53, %v7495_v14  ;;  %v4308_v35 = vrot.slane %v4307_v51, 1 }
 0x464   : > { %v4099_v25 = vmul.f32 0.01, %v3742_v36  ;;  %3794 = vmatmul.bf16.gmra.mxu1 %v7049_v26  ;;  %4007 = vmatpush.bf16.msra.mxu3 %v5588_v34 }
 0x465   : > { %3911 = vmatmul.bf16.gmra.mxu0 %v7052_v45  ;;  %v3665_v52 = vpop.f32.mrf.mxu2 }
 0x466   : > { %v4195_v6 = vmax.f32 %v3742_v36, %v4099_v25  ;;  %v3704_v32 = vpop.f32.mrf.mxu3  ;;  %v3666_v40 = vadd.f32 %v3665_v52, %v3627_v61  ;;  %v4309_v52 = vmax.f32 %v4307_v51, %v4308_v35 }
 0x468   : > { %v4311_v48 = vmax.f32 %v4310_v22, %v4195_v6  ;;  %v3705_v47 = vadd.f32 %v3704_v32, %v3666_v40 }
 0x469   : > { %v3631_v1 = vpop.f32.mrf.mxu1 }
 0x46a   : > { %v4312_v44 = vrot.slane %v4311_v48, 4  ;;  %v3748_v27 = vpop.f32.mrf.mxu0  ;;  %3833 = vmatmul.bf16.gmra.mxu2 %v7057_v56  ;;  %v3744_v33 = vadd.f32 %v7512_v28, %v3705_v47  ;;  %v3632_v5 = vadd.f32 %v3631_v1, %v7495_v14 }
 0x46b   : > { %3872 = vmatmul.bf16.gmra.mxu3 %v7059_v59 }
 0x46c   : > { %v4313_v37 = vmax.f32 %v4311_v48, %v4312_v44  ;;  %v4107_v19 = vmul.f32 0.01, %v3744_v33  ;;  %v4368_v48 = vrot.slane %v7475_v8, 4 }
 0x46d   : > { %v3668_v46 = vpop.f32.mrf.mxu2 }
 0x46e   : > { %v4314_v42 = vrot.slane %v4313_v37, 2  ;;  %v3669_v10 = vadd.f32 %v3668_v46, %v3630_v50  ;;  %v3707_v29 = vpop.f32.mrf.mxu3  ;;  %v4203_v61 = vmax.f32 %v3744_v33, %v4107_v19  ;;  %v4369_v50 = vmax.f32 %v7475_v8, %v4368_v48 }
 0x470   : > { %v4315_v22 = vmax.f32 %v4313_v37, %v4314_v42  ;;  %v3708_v24 = vadd.f32 %v3707_v29, %v3669_v10  ;;  %v4370_v29 = vrot.slane %v4369_v50, 2 }
 0x471   : > { %v3634_v62 = vpop.f32.mrf.mxu1 }
 0x472   : > { %v4316_v11 = vrot.slane %v4315_v22, 1  ;;  %v3747_v36 = vadd.f32 %v3746_v21, %v3708_v24  ;;  %v3751_v31 = vpop.f32.mrf.mxu0  ;;  %v4371_v8 = vmax.f32 %v4369_v50, %v4370_v29 }
 0x474   : > { %v4317_v25 = vmax.f32 %v4315_v22, %v4316_v11  ;;  %3799 = vmatmul.bf16.gmra.mxu1 %v7069_v38  ;;  %v4115_v9 = vmul.f32 0.01, %v3747_v36  ;;  %v3635_v22 = vadd.f32 %v3634_v62, %v7495_v14  ;;  %v4372_v62 = vrot.slane %v4371_v8, 1 }
 0x475   : > { %3916 = vmatmul.bf16.gmra.mxu0 %v7072_v39  ;;  %v3670_v53 = vpop.f32.mrf.mxu2 }
 0x476   : > { %v4564_v20 = vrot.slane %v4317_v25, 4  ;;  %v3671_v6 = vadd.f32 %v3670_v53, %v3632_v5  ;;  %v3709_v32 = vpop.f32.mrf.mxu3  ;;  %v4211_v28 = vmax.f32 %v3747_v36, %v4115_v9  ;;  %v4373_v48 = vmax.f32 %v4371_v8, %v4372_v62 }
 0x478   : > { %v4581_v55 = vsel %vm4578_vm1, %v4309_v52, %v4564_v20  ;;  %v3710_v21 = vadd.f32 %v3709_v32, %v3671_v6  ;;  %v4374_v40 = vmax.f32 %v4203_v61, %v4211_v28 }
 0x479   : > { %v3636_v34 = vpop.f32.mrf.mxu1 }
 0x47a   : > { %v3749_v43 = vadd.f32 %v3748_v27, %v3710_v21  ;;  %v3753_v1 = vpop.f32.mrf.mxu0  ;;  %3838 = vmatmul.bf16.gmra.mxu2 %v7077_v41  ;;  %v3637_v35 = vadd.f32 %v3636_v34, %v7495_v14 }
 0x47b   : > { %3877 = vmatmul.bf16.gmra.mxu3 %v7079_v2 }
 0x47c   : > { %v4123_v44 = vmul.f32 0.01, %v3749_v43 }
 0x47d   : > { %v3673_v37 = vpop.f32.mrf.mxu2 }
 0x47e   : > { %v4219_v46 = vmax.f32 %v3749_v43, %v4123_v44  ;;  %v3712_v51 = vpop.f32.mrf.mxu3  ;;  %v3674_v11 = vadd.f32 %v3673_v37, %v3635_v22 }
 0x480   : > { %v4375_v42 = vmax.f32 %v4374_v40, %v4219_v46  ;;  %v3713_v52 = vadd.f32 %v3712_v51, %v3674_v11 }
 0x481   : > { %v3639_v10 = vpop.f32.mrf.mxu1 }
 0x482   : > { %v4376_v47 = vrot.slane %v4375_v42, 4  ;;  %v3756_v27 = vpop.f32.mrf.mxu0  ;;  %v3752_v21 = vadd.f32 %v3751_v31, %v3713_v52 }
 0x484   : > { %v4377_v24 = vmax.f32 %v4375_v42, %v4376_v47  ;;  %3930 = vmatmul.bf16.vlgmr.msrb.gmra.mxu1 %v6969_v60  ;;  %v4131_v50 = vmul.f32 0.01, %v3752_v21 }
 0x485   : > { %4047 = vmatmul.bf16.vlgmr.msrb.gmra.mxu0 %v6972_v0  ;;  %v3675_v36 = vpop.f32.mrf.mxu2  ;;  %v3640_v0 = vadd.f32 %v3639_v10, %v7495_v14 }
 0x486   : > { %v4378_v25 = vrot.slane %v4377_v24, 2  ;;  %v3676_v33 = vadd.f32 %v3675_v36, %v3637_v35  ;;  %v3714_v5 = vpop.f32.mrf.mxu3  ;;  %v4227_v29 = vmax.f32 %v3752_v21, %v4131_v50 }
 0x488   : > { %v4379_v53 = vmax.f32 %v4377_v24, %v4378_v25  ;;  %v3715_v20 = vadd.f32 %v3714_v5, %v3676_v33 }
 0x489   : > { %v3641_v9 = vpop.f32.mrf.mxu1 }
 0x48a   : > { %v4380_v6 = vrot.slane %v4379_v53, 1  ;;  %v3754_v32 = vadd.f32 %v3753_v1, %v3715_v20  ;;  %v3758_v19 = vpop.f32.mrf.mxu0  ;;  %3969 = vmatmul.bf16.vlgmr.msrb.gmra.mxu2 %v6977_v4  ;;  %v4432_v4 = vrot.slane %v7486_v30, 4  ;;  %v3642_v33 = vadd.f32 %v3641_v9, %v7495_v14 }
 0x48b   : > { %4008 = vmatmul.bf16.vlgmr.msra.gmra.mxu3 %v6979_v18 }
 0x48c   : > { %v4381_v60 = vmax.f32 %v4379_v53, %v4380_v6  ;;  %v4139_v43 = vmul.f32 0.01, %v3754_v32  ;;  %v4433_v24 = vmax.f32 %v7486_v30, %v4432_v4 }
 0x48d   : > { %v3678_v34 = vpop.f32.mrf.mxu2 }
 0x48e   : > { %v4568_v28 = vrot.slane %v4381_v60, 4  ;;  %v3679_v61 = vadd.f32 %v3678_v34, %v3640_v0  ;;  %v3717_v44 = vpop.f32.mrf.mxu3  ;;  %v4235_v51 = vmax.f32 %v3754_v32, %v4139_v43 }
 0x490   : > { %v4585_v37 = vsel %vm4578_vm1, %v4373_v48, %v4568_v28  ;;  %v3718_v40 = vadd.f32 %v3717_v44, %v3679_v61  ;;  %v4438_v35 = vmax.f32 %v4227_v29, %v4235_v51  ;;  %v7562_v51 = vld [vmem:[%s7690_s8] sm:$0xff] }
 0x491   : > { %v4619_v1 = vrot.slane %v4585_v37, 7  ;;  %v3644_v46 = vpop.f32.mrf.mxu1 }
 0x492   : > { %v3757_v18 = vadd.f32 %v3756_v27, %v3718_v40  ;;  %v3761_v42 = vpop.f32.mrf.mxu0  ;;  %v4434_v27 = vrot.slane %v4433_v24, 2 }
 0x493   : > { %v4620_v31 = vsel %vm4596_vm2, %v4619_v1, %v4581_v55 }
 0x494   : > { %v4621_v10 = vsel %vm4598_vm3, %v4619_v1, %v4620_v31  ;;  %v4147_v22 = vmul.f32 0.01, %v3757_v18  ;;  %3935 = vmatmul.bf16.gmra.mxu1 %v6989_v54  ;;  %v4435_v30 = vmax.f32 %v4433_v24, %v4434_v27 }
 0x495   : > { %4052 = vmatmul.bf16.gmra.mxu0 %v6992_v58  ;;  %v3680_v47 = vpop.f32.mrf.mxu2  ;;  %v3645_v58 = vadd.f32 %v3644_v46, %v7495_v14 }
 0x496   : > { %v4243_v11 = vmax.f32 %v3757_v18, %v4147_v22  ;;  %v3719_v36 = vpop.f32.mrf.mxu3  ;;  %v3681_v53 = vadd.f32 %v3680_v47, %v3642_v33  ;;  %v4436_v9 = vrot.slane %v4435_v30, 1 }
 0x498   : > { %v4439_v8 = vmax.f32 %v4438_v35, %v4243_v11  ;;  %v3720_v60 = vadd.f32 %v3719_v36, %v3681_v53  ;;  %v4437_v44 = vmax.f32 %v4435_v30, %v4436_v9 }
 0x499   : > { %v3646_v25 = vpop.f32.mrf.mxu1 }
 0x49a   : > { %v4440_v55 = vrot.slane %v4439_v8, 4  ;;  %v3763_v5 = vpop.f32.mrf.mxu0  ;;  %3974 = vmatmul.bf16.gmra.mxu2 %v6997_v12  ;;  %v3759_v43 = vadd.f32 %v3758_v19, %v3720_v60 }
 0x49b   : > { %4013 = vmatmul.bf16.gmra.mxu3 %v6999_v13  ;;  %v3647_v13 = vadd.f32 %v3646_v25, %v7495_v14  ;;  %v7565_v14 = vperm.slane %v7562_v51, 6 }
 0x49c   : > { %v4441_v54 = vmax.f32 %v4439_v8, %v4440_v55  ;;  %v4155_v4 = vmul.f32 0.01, %v3759_v43 }
 0x49d   : > { %v3683_v52 = vpop.f32.mrf.mxu2 }
 0x49e   : > { %v4442_v20 = vrot.slane %v4441_v54, 2  ;;  %v3684_v62 = vadd.f32 %v3683_v52, %v3645_v58  ;;  %v3722_v6 = vpop.f32.mrf.mxu3  ;;  %v4251_v47 = vmax.f32 %v3759_v43, %v4155_v4 }
 0x4a0   : > { %v4443_v32 = vmax.f32 %v4441_v54, %v4442_v20  ;;  %v3723_v21 = vadd.f32 %v3722_v6, %v3684_v62 }
 0x4a1   : > { %v3775_v0 = vpop.f32.mrf.mxu1 }
 0x4a2   : > { %v4444_v34 = vrot.slane %v4443_v32, 1  ;;  %v3762_v48 = vadd.f32 %v3761_v42, %v3723_v21  ;;  %v3892_v28 = vpop.f32.mrf.mxu0  ;;  %v3776_v24 = vadd.f32 %v3775_v0, %v7565_v14 }
 0x4a4   : > { %v4445_v12 = vmax.f32 %v4443_v32, %v4444_v34  ;;  %3940 = vmatmul.bf16.gmra.mxu1 %v7009_v49  ;;  %v4163_v50 = vmul.f32 0.01, %v3762_v48 }
 0x4a5   : > { %4057 = vmatmul.bf16.gmra.mxu0 %v7012_v57  ;;  %v3685_v61 = vpop.f32.mrf.mxu2  ;;  %v4496_v57 = vrot.slane %v7500_v17, 4 }
 0x4a6   : > { %v4572_v37 = vrot.slane %v4445_v12, 4  ;;  %v3686_v40 = vadd.f32 %v3685_v61, %v3647_v13  ;;  %v3724_v1 = vpop.f32.mrf.mxu3  ;;  %v4259_v42 = vmax.f32 %v3762_v48, %v4163_v50 }
 0x4a7   : > { %v4497_v36 = vmax.f32 %v7500_v17, %v4496_v57 }
 0x4a8   : > { %v4589_v46 = vsel %vm4578_vm1, %v4437_v44, %v4572_v37  ;;  %v3725_v49 = vadd.f32 %v3724_v1, %v3686_v40  ;;  %v4502_v25 = vmax.f32 %v4251_v47, %v4259_v42 }
 0x4a9   : > { %v4622_v19 = vrot.slane %v4589_v46, 6  ;;  %v3777_v18 = vpop.f32.mrf.mxu1 }
 0x4aa   : > { %v3764_v31 = vadd.f32 %v3763_v5, %v3725_v49  ;;  %v3894_v29 = vpop.f32.mrf.mxu0  ;;  %3979 = vmatmul.bf16.gmra.mxu2 %v7017_v15  ;;  %v4498_v15 = vrot.slane %v4497_v36, 2  ;;  %v3778_v30 = vadd.f32 %v3777_v18, %v7565_v14 }
 0x4ab   : > { %v4623_v22 = vsel %vm4601_vm4, %v4622_v19, %v4621_v10  ;;  %4018 = vmatmul.bf16.gmra.mxu3 %v7019_v16 }
 0x4ac   : > { %v4171_v35 = vmul.f32 0.01, %v3764_v31  ;;  %v4624_v11 = vsel %vm4603_vm5, %v4622_v19, %v4623_v22  ;;  %v4499_v20 = vmax.f32 %v4497_v36, %v4498_v15 }
 0x4ad   : > { %v3814_v8 = vpop.f32.mrf.mxu2 }
 0x4ae   : > { %v4267_v27 = vmax.f32 %v3764_v31, %v4171_v35  ;;  %v3815_v33 = vadd.f32 %v3814_v8, %v3776_v24  ;;  %v3853_v55 = vpop.f32.mrf.mxu3  ;;  %v4500_v0 = vrot.slane %v4499_v20, 1 }
 0x4b0   : > { %v4503_v5 = vmax.f32 %v4502_v25, %v4267_v27  ;;  %v3854_v54 = vadd.f32 %v3853_v55, %v3815_v33  ;;  %v4501_v13 = vmax.f32 %v4499_v20, %v4500_v0 }
 0x4b1   : > { %v3780_v58 = vpop.f32.mrf.mxu1 }
 0x4b2   : > { %v4504_v10 = vrot.slane %v4503_v5, 4  ;;  %v3893_v53 = vadd.f32 %v3892_v28, %v3854_v54  ;;  %v3897_v16 = vpop.f32.mrf.mxu0  ;;  %v3781_v43 = vadd.f32 %v3780_v58, %v7565_v14 }
 0x4b4   : > { %v4505_v52 = vmax.f32 %v4503_v5, %v4504_v10  ;;  %3945 = vmatmul.bf16.gmra.mxu1 %v7029_v63  ;;  %v4084_v48 = vmul.f32 0.01, %v3893_v53 }
 0x4b5   : > { %4062 = vmatmul.bf16.gmra.mxu0 %v7032_v7  ;;  %v3816_v17 = vpop.f32.mrf.mxu2 }
 0x4b6   : > { %v4506_v62 = vrot.slane %v4505_v52, 2  ;;  %v3817_v6 = vadd.f32 %v3816_v17, %v3778_v30  ;;  %v3855_v32 = vpop.f32.mrf.mxu3  ;;  %v4180_v37 = vmax.f32 %v3893_v53, %v4084_v48 }
 0x4b8   : > { %v4507_v60 = vmax.f32 %v4505_v52, %v4506_v62  ;;  %v3856_v21 = vadd.f32 %v3855_v32, %v3817_v6 }
 0x4b9   : > { %v3782_v9 = vpop.f32.mrf.mxu1 }
 0x4ba   : > { %v4508_v34 = vrot.slane %v4507_v60, 1  ;;  %v3895_v28 = vadd.f32 %v3894_v29, %v3856_v21  ;;  %v3899_v12 = vpop.f32.mrf.mxu0  ;;  %3984 = vmatmul.bf16.gmra.mxu2 %v7037_v23  ;;  %v3783_v42 = vadd.f32 %v3782_v9, %v7565_v14 }
 0x4bb   : > { %4023 = vmatmul.bf16.gmra.mxu3 %v7039_v3 }
 0x4bc   : > { %v4509_v63 = vmax.f32 %v4507_v60, %v4508_v34  ;;  %v4092_v7 = vmul.f32 0.01, %v3895_v28 }
 0x4bd   : > { %v3819_v61 = vpop.f32.mrf.mxu2 }
 0x4be   : > { %v4576_v44 = vrot.slane %v4509_v63, 4  ;;  %v4188_v50 = vmax.f32 %v3895_v28, %v4092_v7  ;;  %v3820_v40 = vadd.f32 %v3819_v61, %v3781_v43  ;;  %v3858_v1 = vpop.f32.mrf.mxu3 }
 0x4c0   : > { %v4593_v46 = vsel %vm4578_vm1, %v4501_v13, %v4576_v44  ;;  %v4318_v4 = vmax.f32 %v4180_v37, %v4188_v50  ;;  %v3859_v49 = vadd.f32 %v3858_v1, %v3820_v40 }
 0x4c1   : > { %v4625_v57 = vrot.slane %v4593_v46, 5  ;;  %v3785_v23 = vpop.f32.mrf.mxu1 }
 0x4c2   : > { %v3898_v19 = vadd.f32 %v3897_v16, %v3859_v49  ;;  %v3902_v3 = vpop.f32.mrf.mxu0 }
 0x4c3   : > { %v4626_v18 = vsel %vm4606_vm6, %v4625_v57, %v4624_v11 }
 0x4c4   : > { %v4100_v31 = vmul.f32 0.01, %v3898_v19  ;;  %3950 = vmatmul.bf16.gmra.mxu1 %v7049_v26  ;;  %v4627_v29 = vsel %vm4608_vm7, %v4625_v57, %v4626_v18  ;;  %v3786_v26 = vadd.f32 %v3785_v23, %v7565_v14 }
 0x4c5   : > { %4067 = vmatmul.bf16.gmra.mxu0 %v7052_v45  ;;  %v3821_v22 = vpop.f32.mrf.mxu2  ;;  %4643 = vst [vmem:[%s7292_s23 + $0x10] sm:$0xff] %v4627_v29 }
 0x4c6   : > { %v4196_v47 = vmax.f32 %v3898_v19, %v4100_v31  ;;  %v3822_v24 = vadd.f32 %v3821_v22, %v3783_v42  ;;  %v3860_v35 = vpop.f32.mrf.mxu3 }
 0x4c8   : > { %v7587_v36 = vmax.f32 %v4318_v4, %v4196_v47  ;;  %v3861_v8 = vadd.f32 %v3860_v35, %v3822_v24 }
 0x4c9   : > { %v3787_v25 = vpop.f32.mrf.mxu1 }
 0x4ca   : > { %v3900_v27 = vadd.f32 %v3899_v12, %v3861_v8  ;;  %v3904_v11 = vpop.f32.mrf.mxu0  ;;  %3989 = vmatmul.bf16.gmra.mxu2 %v7057_v56  ;;  %v3788_v53 = vadd.f32 %v3787_v25, %v7565_v14 }
 0x4cb   : > { %4028 = vmatmul.bf16.gmra.mxu3 %v7059_v59 }
 0x4cc   : > { %v4108_v15 = vmul.f32 0.01, %v3900_v27 }
 0x4cd   : > { %v3824_v33 = vpop.f32.mrf.mxu2 }
 0x4ce   : > { %v3825_v55 = vadd.f32 %v3824_v33, %v3786_v26  ;;  %v3863_v45 = vpop.f32.mrf.mxu3  ;;  %v4204_v52 = vmax.f32 %v3900_v27, %v4108_v15 }
 0x4d0   : > { %v3864_v5 = vadd.f32 %v3863_v45, %v3825_v55 }
 0x4d1   : > { %v3790_v54 = vpop.f32.mrf.mxu1 }
 0x4d2   : > { %v3903_v58 = vadd.f32 %v3902_v3, %v3864_v5  ;;  %v3907_v10 = vpop.f32.mrf.mxu0  ;;  %v3791_v21 = vadd.f32 %v3790_v54, %v7565_v14 }
 0x4d4   : > { %v4116_v16 = vmul.f32 0.01, %v3903_v58  ;;  %3955 = vmatmul.bf16.gmra.mxu1 %v7069_v38 }
 0x4d5   : > { %4072 = vmatmul.bf16.gmra.mxu0 %v7072_v39  ;;  %v3826_v56 = vpop.f32.mrf.mxu2 }
 0x4d6   : > { %v4212_v59 = vmax.f32 %v3903_v58, %v4116_v16  ;;  %v3827_v30 = vadd.f32 %v3826_v56, %v3788_v53  ;;  %v3865_v20 = vpop.f32.mrf.mxu3 }
 0x4d8   : > { %v4382_v17 = vmax.f32 %v4204_v52, %v4212_v59  ;;  %v3866_v62 = vadd.f32 %v3865_v20, %v3827_v30 }
 0x4d9   : > { %v3792_v6 = vpop.f32.mrf.mxu1 }
 0x4da   : > { %v3905_v32 = vadd.f32 %v3904_v11, %v3866_v62  ;;  %v3909_v60 = vpop.f32.mrf.mxu0  ;;  %3994 = vmatmul.bf16.gmra.mxu2 %v7077_v41  ;;  %v3793_v7 = vadd.f32 %v3792_v6, %v7565_v14 }
 0x4db   : > { %4033 = vmatmul.bf16.gmra.mxu3 %v7079_v2 }
 0x4dc   : > { %v4124_v0 = vmul.f32 0.01, %v3905_v32 }
 0x4dd   : > { %v3829_v38 = vpop.f32.mrf.mxu2 }
 0x4de   : > { %v4220_v9 = vmax.f32 %v3905_v32, %v4124_v0  ;;  %v3830_v39 = vadd.f32 %v3829_v38, %v3791_v21  ;;  %v3868_v34 = vpop.f32.mrf.mxu3 }
 0x4e0   : > { %v7598_v48 = vmax.f32 %v4382_v17, %v4220_v9  ;;  %v3869_v28 = vadd.f32 %v3868_v34, %v3830_v39 }
 0x4e1   : > { %v3795_v12 = vpop.f32.mrf.mxu1 }
 0x4e2   : > { %v3908_v63 = vadd.f32 %v3907_v10, %v3869_v28  ;;  %v3912_v43 = vpop.f32.mrf.mxu0  ;;  %v3796_v1 = vadd.f32 %v3795_v12, %v7565_v14 }
 0x4e4   : > { %v4132_v37 = vmul.f32 0.01, %v3908_v63 }
 0x4e5   : > { %v3831_v13 = vpop.f32.mrf.mxu2 }
 0x4e6   : > { %v3832_v61 = vadd.f32 %v3831_v13, %v3793_v7  ;;  %v3870_v41 = vpop.f32.mrf.mxu3  ;;  %v4228_v49 = vmax.f32 %v3908_v63, %v4132_v37 }
 0x4e8   : > { %v3871_v44 = vadd.f32 %v3870_v41, %v3832_v61 }
 0x4e9   : > { %v3797_v2 = vpop.f32.mrf.mxu1 }
 0x4ea   : > { %v3910_v50 = vadd.f32 %v3909_v60, %v3871_v44  ;;  %v3914_v40 = vpop.f32.mrf.mxu0  ;;  %v3798_v22 = vadd.f32 %v3797_v2, %v7565_v14  ;;  %v7608_v60 = vperm.slane %v7562_v51, 7 }
 0x4ec   : > { %v4140_v46 = vmul.f32 0.01, %v3910_v50 }
 0x4ed   : > { %v3834_v4 = vpop.f32.mrf.mxu2 }
 0x4ee   : > { %v4236_v57 = vmax.f32 %v3910_v50, %v4140_v46  ;;  %v3835_v23 = vadd.f32 %v3834_v4, %v3796_v1  ;;  %v3873_v19 = vpop.f32.mrf.mxu3 }
 0x4f0   : > { %v4446_v3 = vmax.f32 %v4228_v49, %v4236_v57  ;;  %v3874_v18 = vadd.f32 %v3873_v19, %v3835_v23 }
 0x4f1   : > { %v3800_v42 = vpop.f32.mrf.mxu1 }
 0x4f2   : > { %v3913_v31 = vadd.f32 %v3912_v43, %v3874_v18  ;;  %v3917_v29 = vpop.f32.mrf.mxu0  ;;  %v3801_v45 = vadd.f32 %v3800_v42, %v7565_v14 }
 0x4f4   : > { %v4148_v47 = vmul.f32 0.01, %v3913_v31 }
 0x4f5   : > { %v3836_v24 = vpop.f32.mrf.mxu2 }
 0x4f6   : > { %v4244_v35 = vmax.f32 %v3913_v31, %v4148_v47  ;;  %v3837_v8 = vadd.f32 %v3836_v24, %v3798_v22  ;;  %v3875_v25 = vpop.f32.mrf.mxu3  ;;  %v4320_v47 = vrot.slane %v7587_v36, 4 }
 0x4f8   : > { %v7603_v27 = vmax.f32 %v4446_v3, %v4244_v35  ;;  %v3876_v11 = vadd.f32 %v3875_v25, %v3837_v8 }
 0x4f9   : > { %v3802_v26 = vpop.f32.mrf.mxu1 }
 0x4fa   : > { %v3915_v33 = vadd.f32 %v3914_v40, %v3876_v11  ;;  %v3919_v55 = vpop.f32.mrf.mxu0  ;;  %v3803_v52 = vadd.f32 %v3802_v26, %v7565_v14  ;;  %v4321_v11 = vmax.f32 %v7587_v36, %v4320_v47 }
 0x4fc   : > { %v4156_v53 = vmul.f32 0.01, %v3915_v33 }
 0x4fd   : > { %v3839_v5 = vpop.f32.mrf.mxu2 }
 0x4fe   : > { %v3840_v54 = vadd.f32 %v3839_v5, %v3801_v45  ;;  %v3878_v15 = vpop.f32.mrf.mxu3  ;;  %v4252_v20 = vmax.f32 %v3915_v33, %v4156_v53  ;;  %v4322_v5 = vrot.slane %v4321_v11, 2 }
 0x500   : > { %v3879_v58 = vadd.f32 %v3878_v15, %v3840_v54 }
 0x501   : > { %v3931_v10 = vpop.f32.mrf.mxu1 }
 0x502   : > { %v3918_v16 = vadd.f32 %v3917_v29, %v3879_v58  ;;  %v4048_v56 = vpop.f32.mrf.mxu0  ;;  %v3932_v39 = vadd.f32 %v3931_v10, %v7608_v60 }
 0x504   : > { %v4164_v59 = vmul.f32 0.01, %v3918_v16 }
 0x505   : > { %v3841_v30 = vpop.f32.mrf.mxu2 }
 0x506   : > { %v4260_v17 = vmax.f32 %v3918_v16, %v4164_v59  ;;  %v3842_v62 = vadd.f32 %v3841_v30, %v3803_v52  ;;  %v3880_v6 = vpop.f32.mrf.mxu3  ;;  %v4323_v52 = vmax.f32 %v4321_v11, %v4322_v5 }
 0x508   : > { %v4510_v32 = vmax.f32 %v4252_v20, %v4260_v17  ;;  %v3881_v21 = vadd.f32 %v3880_v6, %v3842_v62 }
 0x509   : > { %v3933_v0 = vpop.f32.mrf.mxu1 }
 0x50a   : > { %v3920_v38 = vadd.f32 %v3919_v55, %v3881_v21  ;;  %v4050_v9 = vpop.f32.mrf.mxu0  ;;  %v3934_v51 = vadd.f32 %v3933_v0, %v7608_v60 }
 0x50c   : > { %v4172_v34 = vmul.f32 0.01, %v3920_v38 }
 0x50d   : > { %v3970_v28 = vpop.f32.mrf.mxu2 }
 0x50e   : > { %v4268_v12 = vmax.f32 %v3920_v38, %v4172_v34  ;;  %v3971_v14 = vadd.f32 %v3970_v28, %v3932_v39  ;;  %v4009_v63 = vpop.f32.mrf.mxu3 }
 0x510   : > { %v7611_v43 = vmax.f32 %v4510_v32, %v4268_v12  ;;  %v4010_v7 = vadd.f32 %v4009_v63, %v3971_v14  ;;  %v4324_v32 = vrot.slane %v4323_v52, 1 }
 0x511   : > { %v3936_v13 = vpop.f32.mrf.mxu1 }
 0x512   : > { %v4049_v61 = vadd.f32 %v4048_v56, %v4010_v7  ;;  %v4053_v41 = vpop.f32.mrf.mxu0  ;;  %v3937_v49 = vadd.f32 %v3936_v13, %v7608_v60  ;;  %v4325_v28 = vmax.f32 %v4323_v52, %v4324_v32 }
 0x514   : > { %v4085_v1 = vmul.f32 0.01, %v4049_v61 }
 0x515   : > { %v3972_v44 = vpop.f32.mrf.mxu2 }
 0x516   : > { %v3973_v2 = vadd.f32 %v3972_v44, %v3934_v51  ;;  %v4011_v37 = vpop.f32.mrf.mxu3  ;;  %v4181_v19 = vmax.f32 %v4049_v61, %v4085_v1 }
 0x518   : > { %v4012_v50 = vadd.f32 %v4011_v37, %v3973_v2  ;;  %v4384_v2 = vrot.slane %v7598_v48, 4 }
 0x519   : > { %v3938_v40 = vpop.f32.mrf.mxu1 }
 0x51a   : > { %v4051_v46 = vadd.f32 %v4050_v9, %v4012_v50  ;;  %v4055_v4 = vpop.f32.mrf.mxu0  ;;  %v3939_v54 = vadd.f32 %v3938_v40, %v7608_v60 }
 0x51c   : > { %v4093_v57 = vmul.f32 0.01, %v4051_v46 }
 0x51d   : > { %v3975_v23 = vpop.f32.mrf.mxu2 }
 0x51e   : > { %v4189_v3 = vmax.f32 %v4051_v46, %v4093_v57  ;;  %v3976_v18 = vadd.f32 %v3975_v23, %v3937_v49  ;;  %v4014_v42 = vpop.f32.mrf.mxu3 }
 0x520   : > { %v4326_v31 = vmax.f32 %v4181_v19, %v4189_v3  ;;  %v4015_v29 = vadd.f32 %v4014_v42, %v3976_v18 }
 0x521   : > { %v3941_v22 = vpop.f32.mrf.mxu1 }
 0x522   : > { %v4054_v24 = vadd.f32 %v4053_v41, %v4015_v29  ;;  %v4058_v35 = vpop.f32.mrf.mxu0  ;;  %v3942_v10 = vadd.f32 %v3941_v22, %v7608_v60 }
 0x524   : > { %v4101_v8 = vmul.f32 0.01, %v4054_v24 }
 0x525   : > { %v3977_v25 = vpop.f32.mrf.mxu2 }
 0x526   : > { %v4197_v26 = vmax.f32 %v4054_v24, %v4101_v8  ;;  %v4016_v33 = vpop.f32.mrf.mxu3  ;;  %v3978_v53 = vadd.f32 %v3977_v25, %v3939_v54 }
 0x528   : > { %v4327_v55 = vmax.f32 %v4326_v31, %v4197_v26  ;;  %v4017_v36 = vadd.f32 %v4016_v33, %v3978_v53 }
 0x529   : > { %v3943_v45 = vpop.f32.mrf.mxu1 }
 0x52a   : > { %v4328_v15 = vrot.slane %v4327_v55, 4  ;;  %v4060_v16 = vpop.f32.mrf.mxu0  ;;  %v4056_v9 = vadd.f32 %v4055_v4, %v4017_v36  ;;  %v3944_v39 = vadd.f32 %v3943_v45, %v7608_v60  ;;  %v4385_v4 = vmax.f32 %v7598_v48, %v4384_v2 }
 0x52c   : > { %v4329_v58 = vmax.f32 %v4327_v55, %v4328_v15  ;;  %v4109_v41 = vmul.f32 0.01, %v4056_v9  ;;  %v4386_v18 = vrot.slane %v4385_v4, 2 }
 0x52d   : > { %v3980_v56 = vpop.f32.mrf.mxu2 }
 0x52e   : > { %v4330_v59 = vrot.slane %v4329_v58, 2  ;;  %v3981_v30 = vadd.f32 %v3980_v56, %v3942_v10  ;;  %v4019_v20 = vpop.f32.mrf.mxu3  ;;  %v4205_v40 = vmax.f32 %v4056_v9, %v4109_v41  ;;  %v4387_v8 = vmax.f32 %v4385_v4, %v4386_v18 }
 0x530   : > { %v4331_v17 = vmax.f32 %v4329_v58, %v4330_v59  ;;  %v4020_v62 = vadd.f32 %v4019_v20, %v3981_v30  ;;  %v4388_v45 = vrot.slane %v4387_v8, 1 }
 0x531   : > { %v3946_v6 = vpop.f32.mrf.mxu1 }
 0x532   : > { %v4332_v21 = vrot.slane %v4331_v17, 1  ;;  %v4059_v0 = vadd.f32 %v4058_v35, %v4020_v62  ;;  %v4063_v13 = vpop.f32.mrf.mxu0  ;;  %v3947_v42 = vadd.f32 %v3946_v6, %v7608_v60  ;;  %v4389_v52 = vmax.f32 %v4387_v8, %v4388_v45 }
 0x534   : > { %v4333_v38 = vmax.f32 %v4331_v17, %v4332_v21  ;;  %v4117_v14 = vmul.f32 0.01, %v4059_v0  ;;  %v4448_v21 = vrot.slane %v7603_v27, 4 }
 0x535   : > { %v3982_v34 = vpop.f32.mrf.mxu2 }
 0x536   : > { %v4565_v12 = vrot.slane %v4333_v38, 4  ;;  %v3983_v63 = vadd.f32 %v3982_v34, %v3944_v39  ;;  %v4021_v7 = vpop.f32.mrf.mxu3  ;;  %v4213_v37 = vmax.f32 %v4059_v0, %v4117_v14 }
 0x538   : > { %v4582_v61 = vsel %vm4578_vm1, %v4325_v28, %v4565_v12  ;;  %v4022_v51 = vadd.f32 %v4021_v7, %v3983_v63  ;;  %v4390_v49 = vmax.f32 %v4205_v40, %v4213_v37  ;;  %v4449_v63 = vmax.f32 %v7603_v27, %v4448_v21 }
 0x539   : > { %v3948_v44 = vpop.f32.mrf.mxu1 }
 0x53a   : > { %v4061_v50 = vadd.f32 %v4060_v16, %v4022_v51  ;;  %v4065_v3 = vpop.f32.mrf.mxu0  ;;  %v3949_v47 = vadd.f32 %v3948_v44, %v7608_v60  ;;  %v4450_v2 = vrot.slane %v4449_v63, 2 }
 0x53c   : > { %v4125_v1 = vmul.f32 0.01, %v4061_v50  ;;  %v4451_v4 = vmax.f32 %v4449_v63, %v4450_v2 }
 0x53d   : > { %v3985_v46 = vpop.f32.mrf.mxu2 }
 0x53e   : > { %v4221_v57 = vmax.f32 %v4061_v50, %v4125_v1  ;;  %v4024_v23 = vpop.f32.mrf.mxu3  ;;  %v3986_v24 = vadd.f32 %v3985_v46, %v3947_v42 }
 0x540   : > { %v4391_v19 = vmax.f32 %v4390_v49, %v4221_v57  ;;  %v4025_v33 = vadd.f32 %v4024_v23, %v3986_v24 }
 0x541   : > { %v3951_v29 = vpop.f32.mrf.mxu1 }
 0x542   : > { %v4392_v31 = vrot.slane %v4391_v19, 4  ;;  %v4068_v15 = vpop.f32.mrf.mxu0  ;;  %v4064_v10 = vadd.f32 %v4063_v13, %v4025_v33  ;;  %v3952_v53 = vadd.f32 %v3951_v29, %v7608_v60 }
 0x544   : > { %v4393_v22 = vmax.f32 %v4391_v19, %v4392_v31  ;;  %v4133_v62 = vmul.f32 0.01, %v4064_v10  ;;  %v4452_v31 = vrot.slane %v4451_v4, 1 }
 0x545   : > { %v3987_v35 = vpop.f32.mrf.mxu2 }
 0x546   : > { %v4394_v25 = vrot.slane %v4393_v22, 2  ;;  %v3988_v11 = vadd.f32 %v3987_v35, %v3949_v47  ;;  %v4026_v26 = vpop.f32.mrf.mxu3  ;;  %v4229_v34 = vmax.f32 %v4064_v10, %v4133_v62 }
 0x548   : > { %v4395_v48 = vmax.f32 %v4393_v22, %v4394_v25  ;;  %v4027_v55 = vadd.f32 %v4026_v26, %v3988_v11  ;;  %v4453_v25 = vmax.f32 %v4451_v4, %v4452_v31 }
 0x549   : > { %v3953_v16 = vpop.f32.mrf.mxu1 }
 0x54a   : > { %v4396_v5 = vrot.slane %v4395_v48, 1  ;;  %v4066_v54 = vadd.f32 %v4065_v3, %v4027_v55  ;;  %v4070_v12 = vpop.f32.mrf.mxu0  ;;  %v3954_v37 = vadd.f32 %v3953_v16, %v7608_v60 }
 0x54c   : > { %v4397_v58 = vmax.f32 %v4395_v48, %v4396_v5  ;;  %v4141_v30 = vmul.f32 0.01, %v4066_v54 }
 0x54d   : > { %v3990_v56 = vpop.f32.mrf.mxu2 }
 0x54e   : > { %v4569_v59 = vrot.slane %v4397_v58, 4  ;;  %v3991_v20 = vadd.f32 %v3990_v56, %v3952_v53  ;;  %v4029_v17 = vpop.f32.mrf.mxu3  ;;  %v4237_v0 = vmax.f32 %v4066_v54, %v4141_v30  ;;  %v4512_v58 = vrot.slane %v7611_v43, 4 }
 0x550   : > { %v4586_v36 = vsel %vm4578_vm1, %v4389_v52, %v4569_v59  ;;  %v4030_v6 = vadd.f32 %v4029_v17, %v3991_v20  ;;  %v4454_v7 = vmax.f32 %v4229_v34, %v4237_v0  ;;  %v4513_v59 = vmax.f32 %v7611_v43, %v4512_v58 }
 0x551   : > { %v4628_v32 = vrot.slane %v4586_v36, 7  ;;  %v3956_v51 = vpop.f32.mrf.mxu1 }
 0x552   : > { %v4069_v38 = vadd.f32 %v4068_v15, %v4030_v6  ;;  %v4073_v19 = vpop.f32.mrf.mxu0  ;;  %v4514_v36 = vrot.slane %v4513_v59, 2 }
 0x553   : > { %v4629_v9 = vsel %vm4596_vm2, %v4628_v32, %v4582_v61  ;;  %v3957_v61 = vadd.f32 %v3956_v51, %v7608_v60 }
 0x554   : > { %v4630_v39 = vsel %vm4598_vm3, %v4628_v32, %v4629_v9  ;;  %v4149_v28 = vmul.f32 0.01, %v4069_v38  ;;  %v4515_v32 = vmax.f32 %v4513_v59, %v4514_v36 }
 0x555   : > { %v3992_v14 = vpop.f32.mrf.mxu2 }
 0x556   : > { %v4245_v13 = vmax.f32 %v4069_v38, %v4149_v28  ;;  %v4031_v41 = vpop.f32.mrf.mxu3  ;;  %v3993_v1 = vadd.f32 %v3992_v14, %v3954_v37  ;;  %v4516_v38 = vrot.slane %v4515_v32, 1 }
 0x558   : > { %v4455_v44 = vmax.f32 %v4454_v7, %v4245_v13  ;;  %v4032_v3 = vadd.f32 %v4031_v41, %v3993_v1  ;;  %v4517_v43 = vmax.f32 %v4515_v32, %v4516_v38 }
 0x559   : > { %v3958_v42 = vpop.f32.mrf.mxu1 }
 0x55a   : > { %v4456_v50 = vrot.slane %v4455_v44, 4  ;;  %v4071_v24 = vadd.f32 %v4070_v12, %v4032_v3  ;;  %v3959_v35 = vadd.f32 %v3958_v42, %v7608_v60  ;;  %v4075_v15 = vpop.f32.mrf.mxu0 }
 0x55c   : > { %v4457_v40 = vmax.f32 %v4455_v44, %v4456_v50  ;;  %v4157_v45 = vmul.f32 0.01, %v4071_v24 }
 0x55d   : > { %v3995_v46 = vpop.f32.mrf.mxu2 }
 0x55e   : > { %v4458_v49 = vrot.slane %v4457_v40, 2  ;;  %v3996_v57 = vadd.f32 %v3995_v46, %v3957_v61  ;;  %v4034_v23 = vpop.f32.mrf.mxu3  ;;  %v4253_v60 = vmax.f32 %v4071_v24, %v4157_v45 }
 0x560   : > { %v4459_v27 = vmax.f32 %v4457_v40, %v4458_v49  ;;  %v4035_v18 = vadd.f32 %v4034_v23, %v3996_v57 }
 0x562   : > { %v4460_v29 = vrot.slane %v4459_v27, 1  ;;  %v4074_v22 = vadd.f32 %v4073_v19, %v4035_v18 }
 0x564   : > { %v4461_v47 = vmax.f32 %v4459_v27, %v4460_v29  ;;  %v4165_v26 = vmul.f32 0.01, %v4074_v22 }
 0x565   : > { %v3997_v8 = vpop.f32.mrf.mxu2 }
 0x566   : > { %v4573_v11 = vrot.slane %v4461_v47, 4  ;;  %v3998_v48 = vadd.f32 %v3997_v8, %v3959_v35  ;;  %v4036_v33 = vpop.f32.mrf.mxu3  ;;  %v4261_v10 = vmax.f32 %v4074_v22, %v4165_v26 }
 0x568   : > { %v4590_v55 = vsel %vm4578_vm1, %v4453_v25, %v4573_v11  ;;  %v4037_v5 = vadd.f32 %v4036_v33, %v3998_v48  ;;  %v4518_v30 = vmax.f32 %v4253_v60, %v4261_v10 }
 0x569   : > { %v4631_v54 = vrot.slane %v4590_v55, 6 }
 0x56a   : > { %v4076_v53 = vadd.f32 %v4075_v15, %v4037_v5 }
 0x56b   : > { %v4632_v16 = vsel %vm4601_vm4, %v4631_v54, %v4630_v39 }
 0x56c   : > { %v4173_v56 = vmul.f32 0.01, %v4076_v53  ;;  %v4633_v52 = vsel %vm4603_vm5, %v4631_v54, %v4632_v16 }
 0x56e   : > { %v4269_v20 = vmax.f32 %v4076_v53, %v4173_v56 }
 0x570   : > { %v4519_v17 = vmax.f32 %v4518_v30, %v4269_v20 }
 0x572   : > { %v4520_v62 = vrot.slane %v4519_v17, 4 }
 0x574   : > { %v4521_v6 = vmax.f32 %v4519_v17, %v4520_v62 }
 0x576   : > { %v4522_v21 = vrot.slane %v4521_v6, 2 }
 0x578   : > { %v4523_v0 = vmax.f32 %v4521_v6, %v4522_v21 }
 0x57a   : > { %v4524_v9 = vrot.slane %v4523_v0, 1 }
 0x57c   : > { %v4525_v39 = vmax.f32 %v4523_v0, %v4524_v9 }
 0x57e   : > { %v4577_v34 = vrot.slane %v4525_v39, 4 }
 0x580   : > { %v4594_v28 = vsel %vm4578_vm1, %v4517_v43, %v4577_v34 }
 0x581   : > { %v4634_v12 = vrot.slane %v4594_v28, 5 }
 0x583   : > { %v4635_v14 = vsel %vm4606_vm6, %v4634_v12, %v4633_v52 }
 0x584   : > { %v4636_v63 = vsel %vm4608_vm7, %v4634_v12, %v4635_v14 }
 0x585   : > { %4644 = vst [vmem:[%s7292_s23 + $0x18] sm:$0xff] %v4636_v63 }
 0x586   : > { %6584 = shalt.err (!%p6581_p9)
}
 0x587   : > { %6384 = dma.vmem_to_hbm [thread:$0]  (%p6744_p4), %s4787_s25, 512, %s4789_s26, %s4773_s12  }
 0x588 PF: > { %p6401_p10 = scmp.ge.s32.totalorder %s6643_s14, 2  ;;  %s4800_s13 = sand.u32 1, %s6623_s30  }
 0x589   : > { %s4801_s23 = scalar_lea.sflag [#allocation4], %s4800_s13 }
 0x58a   : > { %p6394_p11 = pnand %p6401_p10, %p6751_p8 }
 0x58c   : > { %p6395_p12 = pneg %p6394_p11 }
 0x58e   : > { %6618 = dma.done.wait (%p6395_p12), %s4801_s23, 512  }
 0x58f   : > { %6620 = vsyncadd (%p6395_p12), %s4801_s23, 4294966784  ;;  %s24_s14 = sadd.s32 1, %s6643_s14   ;;  %s7702_s12 = sld [smem:[#allocation11_spill]] }
 0x590   : > { %p21_p13 = scmp.ge.s32.totalorder %s24_s14, 4   ;;  %s7703_s13 = sld [smem:[#allocation12_spill]] }
 0x591   : > { %s7704_s30 = smov %s6627_s10  ;;  %s7705_s10 = smov %s6631_s11 }
 0x592   : > { %s7706_s11 = smov %s6757_s22  ;;  %23 = sbr.rel (!%p21_p13) target bundleno = 8 (0x8), region = 108 }
 0x597   :  { %4807 = vsyncpa [#allocation3], 1 }
 0x598   :  { %4809 = vsyncpa [#allocation3 + $0x1], 1 }
 0x599   :  { %4810 = vsyncpa [#allocation6], 1 }
 0x59a   :  { %4811 = vsyncpa [#allocation4], 1 }
 0x59b   :  { %4813 = vsyncpa [#allocation4 + $0x1], 1 }

// kernel: tpu_custom_call.1
= control target key start
LH: loop header
LB: loop body
LE: loop exit
PB: predicated region body
PF: predicated region fallthrough
CT: control target
= control target key end

     0   :  { %s7682_s0 = inlined_call_operand.vmem [shape: f32[2,4,24,3], index: 0, kind: input, shape index: {}]   ;;  %s7683_s1 = inlined_call_operand.vmem [shape: f32[3,64], index: 1, kind: input, shape index: {}]   ;;  %s7684_s2 = inlined_call_operand.vmem [shape: f32[1,64], index: 2, kind: input, shape index: {}]   ;;  %s7685_s3 = inlined_call_operand.vmem [shape: bf16[64,128], index: 3, kind: input, shape index: {}]   ;;  %s7686_s4 = inlined_call_operand.vmem [shape: f32[1,128], index: 4, kind: input, shape index: {}]   ;;  %s7687_s5 = inlined_call_operand.hbm [shape: bf16[128,512], index: 5, kind: input, shape index: {}]   ;;  %s7688_s6 = inlined_call_operand.vmem [shape: f32[1,512], index: 6, kind: input, shape index: {}]   ;;  %s7689_s7 = inlined_call_operand.hbm [shape: bf16[512,1024], index: 7, kind: input, shape index: {}]   ;;  %s7690_s8 = inlined_call_operand.vmem [shape: f32[1,1024], index: 8, kind: input, shape index: {}]   ;;  %s7691_s9 = inlined_call_operand.hbm [shape: f32[2,4,1024], index: 9, kind: output, shape index: {}]  }
   0x1   :  { %7694 = sst [smem:[#allocation13_spill]] %s7687_s5 }
   0x2   :  { %14 = vsyncpa [#allocation3], 0 }
   0x3   :  { %15 = vsyncpa [#allocation6], 0 }
   0x4   :  { %16 = vsyncpa [#allocation4], 0 }
   0x5   :  { %18 = vsyncpa [#allocation4 + $0x1], 0  ;;  %s6704_s30 = smov 0   ;;  %s6706_s10 = smov 0  }
   0x6   :  { %s6708_s11 = smov 0   ;;  %s6710_s12 = smov 0  }
   0x7   :  { %s6712_s13 = smov 0   ;;  %s6714_s14 = smov 0  }
   0x8 LB: > { %7695 = sst [smem:[#allocation11_spill]] %s6639_s13  ;;  %s4884_s15 = sadd.s32 4294967295, %s6643_s14   ;;  %s6643_s14 = sphi %s6714_s14, %s24_s14   ;;  %s6639_s13 = sphi %s6712_s13, %s7703_s13   ;;  %s6635_s12 = sphi %s6710_s12, %s7702_s12   ;;  %s6631_s11 = sphi %s6708_s11, %s7706_s11   ;;  %s6627_s10 = sphi %s6706_s10, %s7705_s10   ;;  %s6623_s30 = sphi %s6704_s30, %s7704_s30  }
   0x9   : > { %s4885_s16 = sadd.s32 4294967294, %s6643_s14   ;;  %s36_s17 = sadd.s32 1, %s6639_s13 }
   0xa   : > { %s239_s18 = sadd.s32 1, %s6631_s11  ;;  %p38_p0 = scmp.ge.s32.totalorder %s36_s17, 2 }
   0xb   : > { %p249_p1 = scmp.ne.s32.totalorder %s6631_s11, %s6627_s10  ;;  %p250_p2 = scmp.eq.s32.totalorder %s4884_s15, 1 }
   0xc   : > { %p255_p3 = scmp.ne.s32.totalorder %s6627_s10, %s6623_s30  ;;  %s7708_s17 = smov (%p38_p0, %s36_s17), 0 }
   0xd   : > { %7696 = sst [smem:[#allocation12_spill]] %s7708_s17  ;;  %p6744_p4 = por %p250_p2, %p249_p1 }
   0xe   : > { %p256_p5 = scmp.eq.s32.totalorder %s4885_s16, 1  ;;  %s236_s20 = ssub.s32 %s6639_s13, %s7708_s17 }
   0xf   : > { %p4886_p6 = scmp.ge.s32.totalorder %s6643_s14, 1  ;;  %p237_p7 = scmp.eq.s32.totalorder %s236_s20, 0 }
  0x10   : > { %p6751_p8 = por %p256_p5, %p255_p3  ;;  %p263_p9 = scmp.lt.s32.totalorder %s6643_s14, 3 }
  0x11   : > { %s6757_s22 = scalar_select %p237_p7, %s6631_s11, %s239_s18  }
  0x12   : > { %p6759_p10 = pnand %p4886_p6, %p263_p9  ;;  %p6763_p11 = scmp.eq.s32.totalorder %s4884_s15, 0 }
  0x13   : > { %s7701_s5 = sld [smem:[#allocation13_spill]]  ;;  %s6645_s28 = smov [#allocation2]  }
  0x14   : > { %p6386_p12 = pneg %p6759_p10  ;;  %s288_s29 = sshll.u32 %s6645_s28, 4  ;;  %s289_s29 = int_to_ptr.vmem [resolvable:$true] %s288_s29 }
  0x15   : > { %s303_s15 = sshll.u32 %s7689_s7, 4  ;;  %s6646_s20 = smov 256   ;;  %s304_s15 = int_to_ptr.hbm [resolvable:$true] %s303_s15 }
  0x16   : > { %p6387_p13 = pnand %p6763_p11, %p6386_p12  ;;  %s6647_s17 = smov 16  }
  0x17   : > { %s6648_s13 = smov [#allocation5]   ;;  %s6649_s26 = smov 512  }
  0x18   : > { %s305_s25 = sshll.u32 %s6648_s13, 4  ;;  %337 = sbr.rel (%p6759_p10) target bundleno = 1416 (0x588), region = 56  ;;  %s306_s25 = int_to_ptr.vmem [resolvable:$true] %s305_s25 }
  0x19   : > { %s286_s27 = sshll.u32 %s7701_s5, 4  ;;  %s6650_s5 = smov 32   ;;  %s287_s27 = int_to_ptr.hbm [resolvable:$true] %s286_s27 }
  0x1a   : > { %6389 = dma.hbm_to_vmem [thread:$0]  (!%p6387_p13), %s287_s27, 4096, %s289_s29, [#allocation3], %s6646_s20, %s6646_s20, %s6647_s17  }
  0x1b   : > { %6392 = dma.hbm_to_vmem [thread:$0]  (!%p6387_p13), %s304_s15, 32768, %s306_s25, [#allocation6], %s6649_s26, %s6649_s26, %s6650_s5  }
  0x1d   : > { %6610 = dma.done.wait (%p6763_p11), [#allocation3], 4096  }
  0x1e   : > { %6612 = vsyncadd (%p6763_p11), [#allocation3], 4294963200 }
  0x1f   : > { %6614 = dma.done.wait (%p6763_p11), [#allocation6], 32768  }
  0x20   : > { %6616 = vsyncadd (%p6763_p11), [#allocation6], 4294934528  ;;  %p384_p0 = scmp.lt.s32.totalorder %s6635_s12, 1  ;;  %v6651_v0 = vmov 1   ;;  %v6652_v1 = vmov 0   ;;  %v6653_v2 = vmov 2  }
  0x21   : > { %6460 = vset.pattern.permute.xlu1 %v6651_v0  ;;  %6459 = vset.pattern.permute.xlu0 %v6652_v1  ;;  %v6077_v15 = vld [vmem:[%s7685_s3 + $0x18] sm:$0xff]  ;;  %v6076_v17 = vld [vmem:[%s7685_s3 + $0x10] sm:$0xff]  ;;  %v6075_v18 = vld [vmem:[%s7685_s3 + $0x8] sm:$0xff]  ;;  %vm710_vm0 = vcmask 523264   ;;  %vm4578_vm1 = vcmask 1043456   ;;  %vm4596_vm2 = vcmask 1041409  }
  0x22   : > { %s385_s5 = scalar_select %p384_p0, %s6635_s12, 1  ;;  %6461 = vset.pattern.permute.xlu2 %v6653_v2  ;;  %733 = vmatpush.bf16.msra.mxu0 %v6077_v15  ;;  %v6074_v20 = vld [vmem:[%s7685_s3] sm:$0xff]  ;;  %vm4598_vm3 = vcmask 1045509   ;;  %vm4601_vm4 = vcmask 1042434   ;;  %vm4603_vm5 = vcmask 1046534   ;;  %vm4606_vm6 = vcmask 1043459  }
  0x23   : > { %6367 = vmatpush.bf16.msra.mxu1 %v6077_v15  ;;  %6368 = vmatpush.bf16.msra.mxu2 %v6077_v15  ;;  %v6851_v22 = vld [vmem:[%s7683_s1 + $0x1] ss:$0 sm:$0xff]  ;;  %v6856_v23 = vld [vmem:[%s7683_s1] ss:$0 sm:$0xff]  ;;  %v6861_v26 = vld [vmem:[%s7683_s1 + $0x2] ss:$0 sm:$0xff] }
  0x24   : > { %s6375_s13 = smul.u32 96, %s385_s5  ;;  %v6869_v32 = vld [vmem:[%s7684_s2] ss:$0 sm:$0xff]  ;;  %vm4608_vm7 = vcmask 1047559   ;;  %s6366_s16 = sshll.u32 %s6635_s12, 5 }
  0x25   : > { %s4784_s20 = scalar_lea.hbm %s7691_s9, %s6366_s16  ;;  %s6577_s28 = scalar_lea.hbm %s7691_s9, 64 }
  0x26   : > { %s6795_s27 = scalar_lea.vmem %s7682_s0, %s6375_s13  ;;  %734 = vmatpush.bf16.msra.mxu0 %v6076_v17  ;;  %s380_s13 = sand.u32 1, %s6627_s10  }
  0x27   : > { %v394_v3 = vld [vmem:[%s6795_s27] sm:$0xff]  ;;  %v395_v4 = vld [vmem:[%s6795_s27 + $0x8] sm:$0xff]  ;;  %v396_v5 = vld [vmem:[%s6795_s27 + $0x10] sm:$0xff]  ;;  %6369 = vmatpush.bf16.msra.mxu1 %v6076_v17  ;;  %6370 = vmatpush.bf16.msra.mxu2 %v6076_v17  ;;  %s4893_s17 = sshll.u32 %s380_s13, 5  ;;  %s4788_s26 = sshll.u32 %s4784_s20, 4  ;;  %s4789_s26 = int_to_ptr.hbm [resolvable:$true] %s4788_s26 }
  0x28   : > { %482 = vperm.xlu1 %6460, %v394_v3   ;;  %409 = vperm.xlu0 %6459, %v394_v3   ;;  %v397_v6 = vld [vmem:[%s6795_s27 + $0x18] sm:$0xff]  ;;  %v398_v7 = vld [vmem:[%s6795_s27 + $0x20] sm:$0xff]  ;;  %v399_v8 = vld [vmem:[%s6795_s27 + $0x28] sm:$0xff]  ;;  %s7292_s23 = scalar_lea.vmem [#allocation7], %s4893_s17  ;;  %s4773_s12 = scalar_lea.sflag [#allocation4], %s380_s13 }
  0x29   : > { %556 = vperm.xlu2 %6461, %v394_v3   ;;  %v400_v9 = vld [vmem:[%s6795_s27 + $0x30] sm:$0xff]  ;;  %v401_v10 = vld [vmem:[%s6795_s27 + $0x38] sm:$0xff]  ;;  %v403_v11 = vld [vmem:[%s6795_s27 + $0x48] sm:$0xff]  ;;  %s4786_s25 = sshll.u32 %s7292_s23, 4  ;;  %s6571_s5 = sshra.s32 %s4789_s26, 4  ;;  %s4787_s25 = int_to_ptr.vmem [resolvable:$true] %s4786_s25  ;;  %s6572_s5 = int_to_ptr.hbm [resolvable:$true] %s6571_s5 }
  0x2a   : > { %v404_v12 = vld [vmem:[%s6795_s27 + $0x50] sm:$0xff]  ;;  %v402_v13 = vld [vmem:[%s6795_s27 + $0x40] sm:$0xff]  ;;  %v405_v14 = vld [vmem:[%s6795_s27 + $0x58] sm:$0xff]  ;;  %735 = vmatpush.bf16.msra.mxu0 %v6075_v18  ;;  %s6573_s17 = scalar_lea.hbm %s6572_s5, 32  ;;  %p6578_p5 = scmp.lt.s32.totalorder %s6572_s5, %s7691_s9 }
  0x2b   : > { %6371 = vmatpush.bf16.msra.mxu1 %v6075_v18  ;;  %6372 = vmatpush.bf16.msra.mxu2 %v6075_v18  ;;  %p6574_p1 = scmp.ne.s32.totalorder %s6572_s5, %s6573_s17  ;;  %p6579_p6 = scmp.lt.s32.totalorder %s6577_s28, %s6573_s17 }
  0x2d   : > { %p6575_p2 = pnand %p6574_p1, %p6744_p4  ;;  %p6580_p7 = por %p6579_p6, %p6578_p5 }
  0x2e   : > { %736 = vmatpush.bf16.msra.mxu0 %v6074_v20 }
  0x2f   : > { %6373 = vmatpush.bf16.msra.mxu1 %v6074_v20  ;;  %6374 = vmatpush.bf16.msra.mxu2 %v6074_v20  ;;  %p6576_p3 = pneg %p6575_p2 }
  0x30   : > { %486 = vperm.xlu1 %6460, %v395_v4   ;;  %414 = vperm.xlu0 %6459, %v395_v4  }
  0x31   : > { %560 = vperm.xlu2 %6461, %v395_v4   ;;  %p6581_p9 = pnand %p6580_p7, %p6576_p3 }
  0x38   : > { %6462 = vset.pattern.permute.xlu1 %v6652_v1  ;;  %419 = vperm.xlu0 %6459, %v396_v5  }
  0x39   : > { %424 = vperm.xlu1 %6462, %v397_v6   ;;  %6463 = vset.pattern.permute.xlu2 %v6651_v0 }
  0x3a   : > { %490 = vperm.xlu2 %6463, %v396_v5  }
  0x40   : > { %6464 = vset.pattern.permute.xlu0 %v6651_v0 }
  0x41   : > { %6465 = vset.pattern.permute.xlu1 %v6653_v2  ;;  %494 = vperm.xlu0 %6464, %v397_v6  }
  0x42   : > { %564 = vperm.xlu1 %6465, %v396_v5   ;;  %6466 = vset.pattern.permute.xlu2 %v6653_v2 }
  0x43   : > { %568 = vperm.xlu2 %6466, %v397_v6  }
  0x49   : > { %498 = vperm.xlu0 %6464, %v398_v7  }
  0x4a   : > { %6467 = vset.pattern.permute.xlu1 %v6652_v1 }
  0x4b   : > { %429 = vperm.xlu1 %6467, %v398_v7   ;;  %6468 = vset.pattern.permute.xlu2 %v6652_v1 }
  0x4c   : > { %434 = vperm.xlu2 %6468, %v399_v8  }
  0x51   : > { %6471 = vset.pattern.permute.xlu0 %v6653_v2 }
  0x52   : > { %576 = vperm.xlu0 %6471, %v399_v8  }
  0x53   : > { %6469 = vset.pattern.permute.xlu1 %v6651_v0 }
  0x54   : > { %502 = vperm.xlu1 %6469, %v399_v8   ;;  %6470 = vset.pattern.permute.xlu2 %v6653_v2 }
  0x55   : > { %572 = vperm.xlu2 %6470, %v398_v7  }
  0x5a   : > { %580 = vperm.xlu0 %6471, %v400_v9  }
  0x5c   : > { %6472 = vset.pattern.permute.xlu1 %v6652_v1 }
  0x5d   : > { %439 = vperm.xlu1 %6472, %v400_v9   ;;  %6473 = vset.pattern.permute.xlu2 %v6652_v1 }
  0x5e   : > { %444 = vperm.xlu2 %6473, %v401_v10  }
  0x62   : > { %6478 = vset.pattern.permute.xlu0 %v6652_v1 }
  0x63   : > { %454 = vperm.xlu0 %6478, %v403_v11  }
  0x65   : > { %6474 = vset.pattern.permute.xlu1 %v6651_v0 }
  0x66   : > { %506 = vperm.xlu1 %6474, %v400_v9   ;;  %6475 = vset.pattern.permute.xlu2 %v6651_v0 }
  0x67   : > { %510 = vperm.xlu2 %6475, %v401_v10  }
  0x6b   : > { %459 = vperm.xlu0 %6478, %v404_v12  }
  0x6e   : > { %6476 = vset.pattern.permute.xlu1 %v6653_v2 }
  0x6f   : > { %584 = vperm.xlu1 %6476, %v401_v10   ;;  %6477 = vset.pattern.permute.xlu2 %v6652_v1 }
  0x70   : > { %449 = vperm.xlu2 %6477, %v402_v13  }
  0x73   : > { %6485 = vset.pattern.permute.xlu0 %v6651_v0 }
  0x74   : > { %526 = vperm.xlu0 %6485, %v405_v14  }
  0x77   : > { %6479 = vset.pattern.permute.xlu1 %v6651_v0 }
  0x78   : > { %514 = vperm.xlu1 %6479, %v402_v13   ;;  %6480 = vset.pattern.permute.xlu2 %v6651_v0 }
  0x79   : > { %518 = vperm.xlu2 %6480, %v403_v11  }
  0x7c   : > { %6488 = vset.pattern.permute.xlu0 %v6653_v2 }
  0x80   : > { %6481 = vset.pattern.permute.xlu1 %v6653_v2 }
  0x81   : > { %588 = vperm.xlu1 %6481, %v402_v13   ;;  %6482 = vset.pattern.permute.xlu2 %v6653_v2 }
  0x82   : > { %592 = vperm.xlu2 %6482, %v403_v11  }
  0x83   : > { %v557_v16 = vpop.permute.xlu2 %556 }
  0x84   : > { %v604_v31 = vmul.f32 %v6861_v26, %v557_v16 }
  0x89   : > { %6483 = vset.pattern.permute.xlu1 %v6652_v1 }
  0x8a   : > { %464 = vperm.xlu1 %6483, %v405_v14   ;;  %6484 = vset.pattern.permute.xlu2 %v6651_v0 }
  0x8b   : > { %522 = vperm.xlu2 %6484, %v404_v12   ;;  %v561_v19 = vpop.permute.xlu2 %560 }
  0x8c   : > { %v605_v38 = vmul.f32 %v6861_v26, %v561_v19 }
  0x92   : > { %6486 = vset.pattern.permute.xlu1 %v6653_v2 }
  0x93   : > { %596 = vperm.xlu1 %6486, %v404_v12   ;;  %6487 = vset.pattern.permute.xlu2 %v6653_v2 }
  0x94   : > { %600 = vperm.xlu2 %6487, %v405_v14   ;;  %v491_v21 = vpop.permute.xlu2 %490 }
  0x95   : > { %v532_v51 = vmul.f32 %v6851_v22, %v491_v21 }
  0x9a   : > { %v483_v24 = vpop.permute.xlu1 %482  ;;  %v410_v25 = vpop.permute.xlu0 %409 }
  0x9b   : > { %v530_v27 = vmul.f32 %v6851_v22, %v483_v24  ;;  %v468_v28 = vmul.f32 %v6856_v23, %v410_v25 }
  0x9d   : > { %v542_v29 = vadd.f32 %v530_v27, %v468_v28  ;;  %v569_v30 = vpop.permute.xlu2 %568 }
  0x9e   : > { %v607_v56 = vmul.f32 %v6861_v26, %v569_v30 }
  0x9f   : > { %v616_v33 = vadd.f32 %v604_v31, %v542_v29 }
  0xa1   : > { %v632_v39 = vadd.f32 %v6869_v32, %v616_v33 }
  0xa2   : > { %v487_v34 = vpop.permute.xlu1 %486  ;;  %v415_v35 = vpop.permute.xlu0 %414 }
  0xa3   : > { %v531_v36 = vmul.f32 %v6851_v22, %v487_v34  ;;  %v469_v37 = vmul.f32 %v6856_v23, %v415_v35  ;;  %v644_v44 = vmul.f32 0.01, %v632_v39 }
  0xa5   : > { %v543_v40 = vadd.f32 %v531_v36, %v469_v37  ;;  %v656_v48 = vmax.f32 %v632_v39, %v644_v44 }
  0xa6   : > { %v435_v42 = vpop.permute.xlu2 %434 }
  0xa7   : > { %v617_v41 = vadd.f32 %v605_v38, %v543_v40  ;;  %v473_v18 = vmul.f32 %v6856_v23, %v435_v42 }
  0xa9   : > { %v633_v43 = vadd.f32 %v6869_v32, %v617_v41 }
  0xaa   : > { %v420_v45 = vpop.permute.xlu0 %419 }
  0xab   : > { %v425_v46 = vpop.permute.xlu1 %424  ;;  %v645_v47 = vmul.f32 0.01, %v633_v43  ;;  %v470_v52 = vmul.f32 %v6856_v23, %v420_v45 }
  0xac   : > { %v471_v55 = vmul.f32 %v6856_v23, %v425_v46 }
  0xad   : > { %v657_v49 = vmax.f32 %v633_v43, %v645_v47  ;;  %v544_v59 = vadd.f32 %v532_v51, %v470_v52 }
  0xaf   : > { %v668_v50 = vpack.c.bf16 %v657_v49, %v656_v48  ;;  %v573_v53 = vpop.permute.xlu2 %572 }
  0xb0   : > { %v608_v13 = vmul.f32 %v6861_v26, %v573_v53 }
  0xb1   : > { %4911 = vmatmul.msk.bf16.vlgmr.msra.gmra.mxu0 %vm710_vm0, %v668_v50 }
  0xb3   : > { %v495_v54 = vpop.permute.xlu0 %494 }
  0xb4   : > { %v533_v57 = vmul.f32 %v6851_v22, %v495_v54  ;;  %v565_v58 = vpop.permute.xlu1 %564 }
  0xb5   : > { %v606_v60 = vmul.f32 %v6861_v26, %v565_v58 }
  0xb6   : > { %v545_v61 = vadd.f32 %v533_v57, %v471_v55 }
  0xb7   : > { %v618_v62 = vadd.f32 %v606_v60, %v544_v59 }
  0xb8   : > { %v619_v63 = vadd.f32 %v607_v56, %v545_v61  ;;  %v445_v5 = vpop.permute.xlu2 %444 }
  0xb9   : > { %v634_v0 = vadd.f32 %v6869_v32, %v618_v62  ;;  %v475_v43 = vmul.f32 %v6856_v23, %v445_v5 }
  0xba   : > { %v635_v1 = vadd.f32 %v6869_v32, %v619_v63 }
  0xbb   : > { %v646_v2 = vmul.f32 0.01, %v634_v0  ;;  %v499_v3 = vpop.permute.xlu0 %498 }
  0xbc   : > { %v647_v4 = vmul.f32 0.01, %v635_v1  ;;  %v534_v7 = vmul.f32 %v6851_v22, %v499_v3 }
  0xbd   : > { %v430_v6 = vpop.permute.xlu1 %429  ;;  %v658_v8 = vmax.f32 %v634_v0, %v646_v2 }
  0xbe   : > { %v472_v9 = vmul.f32 %v6856_v23, %v430_v6  ;;  %v659_v10 = vmax.f32 %v635_v1, %v647_v4 }
  0xc0   : > { %v669_v11 = vpack.c.bf16 %v659_v10, %v658_v8  ;;  %v546_v12 = vadd.f32 %v534_v7, %v472_v9  ;;  %v5031_v7 = vld [vmem:[#allocation2 + $0xe0] sm:$0xf]  ;;  %v6108_v8 = vld [vmem:[#allocation2 + $0xec] sm:$0xf0]  ;;  %v6106_v9 = vld [vmem:[#allocation2 + $0xe4] sm:$0xf] }
  0xc1   : > { %v511_v17 = vpop.permute.xlu2 %510 }
  0xc2   : > { %4912 = vmatmul.msk.bf16.gmra.mxu0 %vm710_vm0, %v669_v11  ;;  %v620_v15 = vadd.f32 %v608_v13, %v546_v12  ;;  %v537_v44 = vmul.f32 %v6851_v22, %v511_v17  ;;  %v5032_v11 = vor.u32 %v6108_v8, %v5031_v7  ;;  %v5033_v12 = vld [vmem:[#allocation2 + $0xf0] sm:$0xf0]  ;;  %v5039_v13 = vld [vmem:[#allocation2 + $0xe8] sm:$0xf] }
  0xc3   : > { %v5036_v17 = vor.u32 %v6106_v9, %v5033_v12 }
  0xc4   : > { %v577_v14 = vpop.permute.xlu0 %576  ;;  %v636_v21 = vadd.f32 %v6869_v32, %v620_v15  ;;  %v549_v50 = vadd.f32 %v537_v44, %v475_v43  ;;  %1000 = vmatpush.bf16.msrb.mxu1 %v5032_v11  ;;  %v6098_v43 = vld [vmem:[#allocation2 + $0xa4] sm:$0xf]  ;;  %v5001_v44 = vld [vmem:[#allocation2 + $0xb0] sm:$0xf0] }
  0xc5   : > { %v609_v20 = vmul.f32 %v6861_v26, %v577_v14  ;;  %v6109_v14 = vld [vmem:[#allocation2 + $0xf4] sm:$0xf0]  ;;  %1039 = vmatpush.bf16.msrb.mxu2 %v5036_v17 }
  0xc6   : > { %v503_v16 = vpop.permute.xlu1 %502  ;;  %v648_v27 = vmul.f32 0.01, %v636_v21 }
  0xc7   : > { %v535_v19 = vmul.f32 %v6851_v22, %v503_v16 }
  0xc8   : > { %v660_v33 = vmax.f32 %v636_v21, %v648_v27  ;;  %v5015_v21 = vld [vmem:[#allocation2 + $0xc0] sm:$0xf]  ;;  %v6102_v27 = vld [vmem:[#allocation2 + $0xc4] sm:$0xf] }
  0xc9   : > { %v547_v24 = vadd.f32 %v535_v19, %v473_v18  ;;  %v5040_v18 = vor.u32 %v6109_v14, %v5039_v13  ;;  %v6107_v19 = vld [vmem:[#allocation2 + $0xec] sm:$0xf] }
  0xca   : > { %v450_v29 = vpop.permute.xlu2 %449 }
  0xcb   : > { %v621_v25 = vadd.f32 %v609_v20, %v547_v24  ;;  %v476_v5 = vmul.f32 %v6856_v23, %v450_v29  ;;  %v5041_v20 = vld [vmem:[#allocation2 + $0xf8] sm:$0xf0]  ;;  %1078 = vmatpush.bf16.msra.mxu3 %v5040_v18 }
  0xcc   : > { %v581_v36 = vpop.permute.xlu0 %580  ;;  %v5044_v24 = vor.u32 %v6107_v19, %v5041_v20 }
  0xcd   : > { %v637_v28 = vadd.f32 %v6869_v32, %v621_v25  ;;  %v610_v41 = vmul.f32 %v6861_v26, %v581_v36  ;;  %v6104_v25 = vld [vmem:[#allocation2 + $0xcc] sm:$0xf0] }
  0xce   : > { %1117 = vmatpush.bf16.msrb.mxu0 %v5044_v24 }
  0xcf   : > { %v649_v30 = vmul.f32 0.01, %v637_v28  ;;  %v440_v31 = vpop.permute.xlu1 %439 }
  0xd0   : > { %v474_v39 = vmul.f32 %v6856_v23, %v440_v31 }
  0xd1   : > { %v661_v34 = vmax.f32 %v637_v28, %v649_v30  ;;  %v5017_v28 = vld [vmem:[#allocation2 + $0xd0] sm:$0xf0]  ;;  %v5016_v30 = vor.u32 %v6104_v25, %v5015_v21 }
  0xd2   : > { %v5020_v31 = vor.u32 %v6102_v27, %v5017_v28  ;;  %v4967_v27 = vld [vmem:[#allocation2 + $0x60] sm:$0xf] }
  0xd3   : > { %v670_v35 = vpack.c.bf16 %v661_v34, %v660_v33  ;;  %v519_v38 = vpop.permute.xlu2 %518  ;;  %v5023_v33 = vld [vmem:[#allocation2 + $0xc8] sm:$0xf]  ;;  %v6105_v34 = vld [vmem:[#allocation2 + $0xd4] sm:$0xf0]  ;;  %1001 = vmatpush.bf16.msrb.mxu1 %v5016_v30 }
  0xd4   : > { %v539_v48 = vmul.f32 %v6851_v22, %v519_v38  ;;  %v5024_v36 = vor.u32 %v6105_v34, %v5023_v33  ;;  %v4999_v38 = vld [vmem:[#allocation2 + $0xa0] sm:$0xf]  ;;  %1040 = vmatpush.bf16.msrb.mxu2 %v5020_v31  ;;  %v4975_v30 = vld [vmem:[#allocation2 + $0x68] sm:$0xf]  ;;  %v6093_v31 = vld [vmem:[#allocation2 + $0x74] sm:$0xf0] }
  0xd5   : > { %4913 = vmatmul.msk.bf16.vlgmr.msra.gmra.mxu1 %vm710_vm0, %v670_v35  ;;  %v455_v46 = vpop.permute.xlu0 %454  ;;  %v6103_v35 = vld [vmem:[#allocation2 + $0xcc] sm:$0xf]  ;;  %v4976_v34 = vor.u32 %v6093_v31, %v4975_v30 }
  0xd6   : > { %v477_v49 = vmul.f32 %v6856_v23, %v455_v46  ;;  %1079 = vmatpush.bf16.msra.mxu3 %v5024_v36  ;;  %v4977_v36 = vld [vmem:[#allocation2 + $0x78] sm:$0xf0] }
  0xd8   : > { %v507_v37 = vpop.permute.xlu1 %506  ;;  %v551_v55 = vadd.f32 %v539_v48, %v477_v49  ;;  %v6099_v48 = vld [vmem:[#allocation2 + $0xac] sm:$0xf]  ;;  %v5009_v49 = vld [vmem:[#allocation2 + $0xb8] sm:$0xf0] }
  0xd9   : > { %v536_v40 = vmul.f32 %v6851_v22, %v507_v37  ;;  %v5025_v37 = vld [vmem:[#allocation2 + $0xd8] sm:$0xf0] }
  0xdb   : > { %v548_v42 = vadd.f32 %v536_v40, %v474_v39  ;;  %v6100_v39 = vld [vmem:[#allocation2 + $0xac] sm:$0xf0] }
  0xdc   : > { %v593_v53 = vpop.permute.xlu2 %592  ;;  %v5000_v46 = vor.u32 %v6100_v39, %v4999_v38  ;;  %v6088_v38 = vld [vmem:[#allocation2 + $0x4c] sm:$0xf0]  ;;  %v6086_v39 = vld [vmem:[#allocation2 + $0x44] sm:$0xf] }
  0xdd   : > { %v622_v45 = vadd.f32 %v610_v41, %v548_v42  ;;  %v613_v56 = vmul.f32 %v6861_v26, %v593_v53  ;;  %v6911_v3 = vpop.permute.xlu0 %459  ;;  %v5028_v42 = vor.u32 %v6103_v35, %v5025_v37  ;;  %v6091_v35 = vld [vmem:[#allocation2 + $0x6c] sm:$0xf] }
  0xde   : > { %1002 = vmatpush.bf16.msrb.mxu1 %v5000_v46  ;;  %v6087_v46 = vld [vmem:[#allocation2 + $0x4c] sm:$0xf] }
  0xdf   : > { %v638_v51 = vadd.f32 %v6869_v32, %v622_v45  ;;  %v625_v60 = vadd.f32 %v613_v56, %v551_v55  ;;  %v5007_v45 = vld [vmem:[#allocation2 + $0xa8] sm:$0xf]  ;;  %v6096_v55 = vld [vmem:[#allocation2 + $0x8c] sm:$0xf0]  ;;  %1118 = vmatpush.bf16.msrb.mxu0 %v5028_v42 }
  0xe0   : > { %v4959_v42 = vld [vmem:[#allocation2 + $0x48] sm:$0xf] }
  0xe1   : > { %v585_v47 = vpop.permute.xlu1 %584  ;;  %v650_v57 = vmul.f32 0.01, %v638_v51  ;;  %v6907_v1 = vadd.f32 %v6869_v32, %v625_v60  ;;  %v4991_v60 = vld [vmem:[#allocation2 + $0x88] sm:$0xf] }
  0xe2   : > { %v611_v52 = vmul.f32 %v6861_v26, %v585_v47  ;;  %v6101_v47 = vld [vmem:[#allocation2 + $0xb4] sm:$0xf0] }
  0xe3   : > { %v662_v62 = vmax.f32 %v638_v51, %v650_v57  ;;  %v6914_v4 = vmul.f32 0.01, %v6907_v1  ;;  %v5008_v53 = vor.u32 %v6101_v47, %v5007_v45  ;;  %v5012_v57 = vor.u32 %v6099_v48, %v5009_v49  ;;  %v4961_v47 = vld [vmem:[#allocation2 + $0x58] sm:$0xf0]  ;;  %v4935_v49 = vld [vmem:[#allocation2 + $0x20] sm:$0xf] }
  0xe4   : > { %v623_v54 = vadd.f32 %v611_v52, %v549_v50  ;;  %v5004_v52 = vor.u32 %v6098_v43, %v5001_v44  ;;  %v6089_v43 = vld [vmem:[#allocation2 + $0x54] sm:$0xf0]  ;;  %v4964_v48 = vor.u32 %v6087_v46, %v4961_v47  ;;  %v6170_v47 = vld [vmem:[#allocation5 + $0x1dc] sm:$0xf0] }
  0xe5   : > { %v6917_v6 = vpop.permute.xlu2 %522  ;;  %1080 = vmatpush.bf16.msra.mxu3 %v5008_v53  ;;  %1119 = vmatpush.bf16.msrb.mxu0 %v5012_v57  ;;  %v4960_v45 = vor.u32 %v6089_v43, %v4959_v42  ;;  %v4937_v53 = vld [vmem:[#allocation2 + $0x30] sm:$0xf0]  ;;  %v5783_v42 = vld [vmem:[#allocation5 + $0x5c0] sm:$0xf] }
  0xe6   : > { %v639_v58 = vadd.f32 %v6869_v32, %v623_v54  ;;  %v527_v41 = vpop.permute.xlu0 %526  ;;  %v4983_v54 = vld [vmem:[#allocation2 + $0x80] sm:$0xf]  ;;  %1041 = vmatpush.bf16.msrb.mxu2 %v5004_v52 }
  0xe7   : > { %v541_v56 = vmul.f32 %v6851_v22, %v527_v41  ;;  %v4984_v9 = vor.u32 %v6096_v55, %v4983_v54  ;;  %v4953_v41 = vld [vmem:[#allocation2 + $0x50] sm:$0xf0]  ;;  %v4943_v54 = vld [vmem:[#allocation2 + $0x28] sm:$0xf]  ;;  %v6085_v55 = vld [vmem:[#allocation2 + $0x34] sm:$0xf0] }
  0xe8   : > { %v651_v59 = vmul.f32 0.01, %v639_v58  ;;  %v4956_v44 = vor.u32 %v6086_v39, %v4953_v41  ;;  %v4944_v57 = vor.u32 %v6085_v55, %v4943_v54  ;;  %v6298_v43 = vld [vmem:[#allocation5 + $0x5dc] sm:$0xf0] }
  0xe9   : > { %1003 = vmatpush.bf16.msrb.mxu1 %v4984_v9  ;;  %v5784_v46 = vor.u32 %v6298_v43, %v5783_v42 }
  0xea   : > { %v515_v61 = vpop.permute.xlu1 %514  ;;  %v663_v63 = vmax.f32 %v639_v58, %v651_v59  ;;  %v6094_v58 = vld [vmem:[#allocation2 + $0x84] sm:$0xf]  ;;  %v4985_v59 = vld [vmem:[#allocation2 + $0x90] sm:$0xf0] }
  0xeb   : > { %v538_v2 = vmul.f32 %v6851_v22, %v515_v61  ;;  %v4988_v11 = vor.u32 %v6094_v58, %v4985_v59  ;;  %v6083_v58 = vld [vmem:[#allocation2 + $0x2c] sm:$0xf]  ;;  %v4945_v59 = vld [vmem:[#allocation2 + $0x38] sm:$0xf0] }
  0xec   : > { %v671_v0 = vpack.c.bf16 %v663_v63, %v662_v62  ;;  %v665_v63 = vmax.f32 %v6907_v1, %v6914_v4  ;;  %v540_v1 = vmul.f32 %v6851_v22, %v6917_v6  ;;  %v478_v4 = vmul.f32 %v6856_v23, %v6911_v3  ;;  %v6092_v22 = vld [vmem:[#allocation2 + $0x6c] sm:$0xf0]  ;;  %v6090_v6 = vld [vmem:[#allocation2 + $0x64] sm:$0xf] }
  0xed   : > { %v550_v15 = vadd.f32 %v538_v2, %v476_v5  ;;  %v6095_v2 = vld [vmem:[#allocation2 + $0x8c] sm:$0xf]  ;;  %v4993_v5 = vld [vmem:[#allocation2 + $0x98] sm:$0xf0]  ;;  %1042 = vmatpush.bf16.msrb.mxu2 %v4988_v11  ;;  %v4968_v3 = vor.u32 %v6092_v22, %v4967_v27 }
  0xee   : > { %4914 = vmatmul.msk.bf16.gmra.mxu1 %vm710_vm0, %v671_v0  ;;  %v601_v51 = vpop.permute.xlu2 %600  ;;  %v6097_v0 = vld [vmem:[#allocation2 + $0x94] sm:$0xf0]  ;;  %v4996_v14 = vor.u32 %v6095_v2, %v4993_v5  ;;  %v552_v17 = vadd.f32 %v540_v1, %v478_v4  ;;  %v4921_v2 = vld [vmem:[#allocation2 + $0x10] sm:$0xf0]  ;;  %v4927_v5 = vld [vmem:[#allocation2 + $0x8] sm:$0xf] }
  0xef   : > { %v615_v8 = vmul.f32 %v6861_v26, %v601_v51  ;;  %v4992_v12 = vor.u32 %v6097_v0, %v4991_v60  ;;  %1004 = vmatpush.bf16.msrb.mxu1 %v4968_v3  ;;  %v6082_v51 = vld [vmem:[#allocation2 + $0x24] sm:$0xf]  ;;  %v4948_v60 = vor.u32 %v6083_v58, %v4945_v59  ;;  %v4929_v11 = vld [vmem:[#allocation2 + $0x18] sm:$0xf0]  ;;  %v5495_v58 = vld [vmem:[#allocation5 + $0x380] sm:$0xf] }
  0xf0   : > { %1120 = vmatpush.bf16.msrb.mxu0 %v4996_v14  ;;  %v6938_v14 = vld [vmem:[%s7686_s4] ss:$0 sm:$0xff] }
  0xf1   : > { %1081 = vmatpush.bf16.msra.mxu3 %v4992_v12  ;;  %v6226_v59 = vld [vmem:[#allocation5 + $0x39c] sm:$0xf0] }
  0xf3   : > { %v589_v10 = vpop.permute.xlu1 %588 }
  0xf4   : > { %v612_v16 = vmul.f32 %v6861_v26, %v589_v10 }
  0xf5   : > { %1082 = vmatpush.bf16.msra.mxu3 %v4976_v34 }
  0xf6   : > { %v624_v29 = vadd.f32 %v612_v16, %v550_v15 }
  0xf8   : > { %v640_v40 = vadd.f32 %v6869_v32, %v624_v29  ;;  %v4969_v29 = vld [vmem:[#allocation2 + $0x70] sm:$0xf0] }
  0xf9   : > { %v4972_v33 = vor.u32 %v6090_v6, %v4969_v29  ;;  %1083 = vmatpush.bf16.msra.mxu3 %v4960_v45 }
  0xfa   : > { %v652_v50 = vmul.f32 0.01, %v640_v40 }
  0xfb   : > { %1043 = vmatpush.bf16.msrb.mxu2 %v4972_v33 }
  0xfc   : > { %v465_v61 = vpop.permute.xlu1 %464  ;;  %v664_v62 = vmax.f32 %v640_v40, %v652_v50  ;;  %v6084_v50 = vld [vmem:[#allocation2 + $0x2c] sm:$0xf0] }
  0xfd   : > { %v479_v7 = vmul.f32 %v6856_v23, %v465_v61  ;;  %v4936_v52 = vor.u32 %v6084_v50, %v4935_v49  ;;  %1084 = vmatpush.bf16.msra.mxu3 %v4944_v57  ;;  %v4919_v61 = vld [vmem:[#allocation2] sm:$0xf] }
  0xfe   : > { %v672_v10 = vpack.c.bf16 %v665_v63, %v664_v62  ;;  %v6080_v62 = vld [vmem:[#allocation2 + $0xc] sm:$0xf0]  ;;  %v6078_v63 = vld [vmem:[#allocation2 + $0x4] sm:$0xf] }
  0xff   : > { %v553_v13 = vadd.f32 %v541_v56, %v479_v7  ;;  %1044 = vmatpush.bf16.msrb.mxu2 %v4956_v44  ;;  %v4940_v56 = vor.u32 %v6082_v51, %v4937_v53  ;;  %v4920_v0 = vor.u32 %v6080_v62, %v4919_v61  ;;  %v6081_v7 = vld [vmem:[#allocation2 + $0x14] sm:$0xf0]  ;;  %v5271_v44 = vld [vmem:[#allocation5 + $0x1c0] sm:$0xf]  ;;  %v5496_v61 = vor.u32 %v6226_v59, %v5495_v58 }
 0x100   : > { %4915 = vmatmul.msk.bf16.vlgmr.msra.gmra.mxu2 %vm710_vm0, %v672_v10  ;;  %v4928_v9 = vor.u32 %v6081_v7, %v4927_v5  ;;  %v6079_v10 = vld [vmem:[#allocation2 + $0xc] sm:$0xf]  ;;  %v5272_v50 = vor.u32 %v6170_v47, %v5271_v44  ;;  %v6039_v51 = vld [vmem:[#allocation5 + $0x7c0] sm:$0xf] }
 0x101   : > { %v627_v15 = vadd.f32 %v615_v8, %v553_v13  ;;  %v4924_v8 = vor.u32 %v6078_v63, %v4921_v2  ;;  %v4932_v12 = vor.u32 %v6079_v10, %v4929_v11  ;;  %v6290_v62 = vld [vmem:[#allocation5 + $0x59c] sm:$0xf0] }
 0x102   : > { %1085 = vmatpush.bf16.msra.mxu3 %v4928_v9  ;;  %v5239_v63 = vld [vmem:[#allocation5 + $0x180] sm:$0xf] }
 0x103   : > { %v643_v18 = vadd.f32 %v6869_v32, %v627_v15  ;;  %1045 = vmatpush.bf16.msrb.mxu2 %v4940_v56  ;;  %v6354_v9 = vld [vmem:[#allocation5 + $0x79c] sm:$0xf0] }
 0x104   : > { %v5463_v10 = vld [vmem:[#allocation5 + $0x340] sm:$0xf] }
 0x105   : > { %v597_v16 = vpop.permute.xlu1 %596  ;;  %v655_v21 = vmul.f32 0.01, %v643_v18  ;;  %v5879_v58 = vld [vmem:[#allocation5 + $0x680] sm:$0xf] }
 0x106   : > { %v614_v19 = vmul.f32 %v6861_v26, %v597_v16  ;;  %v4980_v26 = vor.u32 %v6091_v35, %v4977_v36  ;;  %2908 = vmatpush.bf16.msrb.mxu3 %v5784_v46  ;;  %v6138_v46 = vld [vmem:[#allocation5 + $0xdc] sm:$0xf0] }
 0x107   : > { %v667_v23 = vmax.f32 %v643_v18, %v655_v21  ;;  %1046 = vmatpush.bf16.msrb.mxu2 %v4924_v8  ;;  %v6007_v8 = vld [vmem:[#allocation5 + $0x780] sm:$0xf] }
 0x108   : > { %v626_v20 = vadd.f32 %v614_v19, %v552_v17  ;;  %1121 = vmatpush.bf16.msrb.mxu0 %v4980_v26  ;;  %v6008_v11 = vor.u32 %v6354_v9, %v6007_v8  ;;  %v6322_v59 = vld [vmem:[#allocation5 + $0x69c] sm:$0xf0] }
 0x109   : > { %v5847_v8 = vld [vmem:[#allocation5 + $0x640] sm:$0xf] }
 0x10a   : > { %v642_v24 = vadd.f32 %v6869_v32, %v626_v20  ;;  %v4951_v32 = vld [vmem:[#allocation2 + $0x40] sm:$0xf] }
 0x10b   : > { %v4952_v40 = vor.u32 %v6088_v38, %v4951_v32  ;;  %v5527_v32 = vld [vmem:[#allocation5 + $0x3c0] sm:$0xf] }
 0x10c   : > { %v654_v25 = vmul.f32 0.01, %v642_v24  ;;  %1122 = vmatpush.bf16.msrb.mxu0 %v4964_v48  ;;  %v6234_v38 = vld [vmem:[#allocation5 + $0x3dc] sm:$0xf0] }
 0x10d   : > { %1005 = vmatpush.bf16.msrb.mxu1 %v4952_v40  ;;  %v5528_v39 = vor.u32 %v6234_v38, %v5527_v32 }
 0x10e   : > { %v666_v28 = vmax.f32 %v642_v24, %v654_v25 }
 0x10f   : > { %2869 = vmatpush.bf16.msra.mxu2 %v5528_v39 }
 0x110   : > { %v673_v37 = vpack.c.bf16 %v667_v23, %v666_v28  ;;  %1123 = vmatpush.bf16.msrb.mxu0 %v4948_v60  ;;  %v5751_v60 = vld [vmem:[#allocation5 + $0x580] sm:$0xf] }
 0x111   : > { %1006 = vmatpush.bf16.msrb.mxu1 %v4936_v52  ;;  %v6362_v52 = vld [vmem:[#allocation5 + $0x7dc] sm:$0xf0]  ;;  %v5752_v2 = vor.u32 %v6290_v62, %v5751_v60 }
 0x112   : > { %4916 = vmatmul.msk.bf16.gmra.mxu2 %vm710_vm0, %v673_v37  ;;  %v6040_v54 = vor.u32 %v6362_v52, %v6039_v51  ;;  %v5655_v62 = vld [vmem:[#allocation5 + $0x4c0] sm:$0xf] }
 0x113   : > { %2870 = vmatpush.bf16.msra.mxu2 %v5496_v61  ;;  %2909 = vmatpush.bf16.msrb.mxu3 %v5752_v2 }
 0x114   : > { %1124 = vmatpush.bf16.msrb.mxu0 %v4932_v12  ;;  %v6218_v12 = vld [vmem:[#allocation5 + $0x35c] sm:$0xf0] }
 0x115   : > { %1007 = vmatpush.bf16.msrb.mxu1 %v4920_v0  ;;  %v6162_v0 = vld [vmem:[#allocation5 + $0x19c] sm:$0xf0] }
 0x116   : > { %v5240_v5 = vor.u32 %v6162_v0, %v5239_v63  ;;  %v6266_v63 = vld [vmem:[#allocation5 + $0x4dc] sm:$0xf0]  ;;  %v5880_v0 = vor.u32 %v6322_v59, %v5879_v58 }
 0x117   : > { %v5656_v2 = vor.u32 %v6266_v63, %v5655_v62 }
 0x118   : > { %2947 = vmatpush.bf16.msra.mxu0 %v6040_v54 }
 0x119   : > { %2830 = vmatpush.bf16.msra.mxu1 %v5272_v50  ;;  %v6330_v50 = vld [vmem:[#allocation5 + $0x6dc] sm:$0xf0] }
 0x11c   : > { %2948 = vmatpush.bf16.msra.mxu0 %v6008_v11  ;;  %v5367_v11 = vld [vmem:[#allocation5 + $0x280] sm:$0xf] }
 0x11d   : > { %2831 = vmatpush.bf16.msra.mxu1 %v5240_v5 }
 0x12e   : > { %v738_v13 = vpop.f32.mrf.mxu0 }
 0x12f   : > { %v739_v1 = vadd.f32 %v6938_v14, %v738_v13  ;;  %v5719_v13 = vld [vmem:[#allocation5 + $0x540] sm:$0xf] }
 0x131   : > { %v768_v15 = vmul.f32 0.01, %v739_v1 }
 0x133   : > { %v780_v18 = vmax.f32 %v739_v1, %v768_v15  ;;  %v6282_v1 = vld [vmem:[#allocation5 + $0x55c] sm:$0xf0] }
 0x134   : > { %v5720_v15 = vor.u32 %v6282_v1, %v5719_v13  ;;  %v5623_v1 = vld [vmem:[#allocation5 + $0x480] sm:$0xf] }
 0x136   : > { %v740_v4 = vpop.f32.mrf.mxu0  ;;  %2910 = vmatpush.bf16.msrb.mxu3 %v5720_v15  ;;  %v6258_v15 = vld [vmem:[#allocation5 + $0x49c] sm:$0xf0] }
 0x137   : > { %v741_v16 = vadd.f32 %v6938_v14, %v740_v4  ;;  %v5464_v4 = vor.u32 %v6218_v12, %v5463_v10  ;;  %v6314_v10 = vld [vmem:[#allocation5 + $0x65c] sm:$0xf0] }
 0x138   : > { %v6194_v12 = vld [vmem:[#allocation5 + $0x29c] sm:$0xf0]  ;;  %v5848_v13 = vor.u32 %v6314_v10, %v5847_v8 }
 0x139   : > { %v769_v17 = vmul.f32 0.01, %v741_v16  ;;  %2871 = vmatpush.bf16.msra.mxu2 %v5464_v4  ;;  %v5368_v4 = vor.u32 %v6194_v12, %v5367_v11 }
 0x13b   : > { %v781_v19 = vmax.f32 %v741_v16, %v769_v17  ;;  %v5207_v16 = vld [vmem:[#allocation5 + $0x140] sm:$0xf] }
 0x13c   : > { %v6154_v17 = vld [vmem:[#allocation5 + $0x15c] sm:$0xf0] }
 0x13d   : > { %v792_v20 = vpack.c.bf16 %v781_v19, %v780_v18  ;;  %v5975_v18 = vld [vmem:[#allocation5 + $0x740] sm:$0xf] }
 0x13f   : > { %v743_v21 = vpop.f32.mrf.mxu0  ;;  %1008 = vmatmul.bf16.vlgmr.msrb.gmra.mxu1 %v792_v20  ;;  %1047 = vmatmul.bf16.vlgmr.msrb.gmra.mxu2 %v792_v20 }
 0x140   : > { %1086 = vmatmul.bf16.vlgmr.msra.gmra.mxu3 %v792_v20  ;;  %1125 = vmatmul.bf16.vlgmr.msrb.gmra.mxu0 %v792_v20  ;;  %v744_v24 = vadd.f32 %v6938_v14, %v743_v21  ;;  %v5208_v20 = vor.u32 %v6154_v17, %v5207_v16  ;;  %v6346_v21 = vld [vmem:[#allocation5 + $0x75c] sm:$0xf0]  ;;  %v5624_v16 = vor.u32 %v6258_v15, %v5623_v1  ;;  %v5529_v1 = vld [vmem:[#allocation5 + $0x3e0] sm:$0xf0] }
 0x141   : > { %v5047_v17 = vld [vmem:[#allocation5] sm:$0xf] }
 0x142   : > { %v770_v27 = vmul.f32 0.01, %v744_v24  ;;  %2832 = vmatpush.bf16.msra.mxu1 %v5208_v20 }
 0x144   : > { %v782_v28 = vmax.f32 %v744_v24, %v770_v27  ;;  %v5431_v24 = vld [vmem:[#allocation5 + $0x300] sm:$0xf]  ;;  %v5976_v27 = vor.u32 %v6346_v21, %v5975_v18 }
 0x145   : > { %v6114_v18 = vld [vmem:[#allocation5 + $0x1c] sm:$0xf0] }
 0x146   : > { %2949 = vmatpush.bf16.msra.mxu0 %v5976_v27  ;;  %v5048_v20 = vor.u32 %v6114_v18, %v5047_v17  ;;  %v6306_v21 = vld [vmem:[#allocation5 + $0x61c] sm:$0xf0]  ;;  %v5785_v17 = vld [vmem:[#allocation5 + $0x5e0] sm:$0xf0] }
 0x147   : > { %v745_v25 = vpop.f32.mrf.mxu0  ;;  %v6186_v27 = vld [vmem:[#allocation5 + $0x25c] sm:$0xf0] }
 0x148   : > { %v746_v22 = vadd.f32 %v6938_v14, %v745_v25  ;;  %v6210_v25 = vld [vmem:[#allocation5 + $0x31c] sm:$0xf0] }
 0x14a   : > { %v771_v6 = vmul.f32 0.01, %v746_v22 }
 0x14c   : > { %v783_v23 = vmax.f32 %v746_v22, %v771_v6  ;;  %v5432_v22 = vor.u32 %v6210_v25, %v5431_v24  ;;  %v5687_v6 = vld [vmem:[#allocation5 + $0x500] sm:$0xf] }
 0x14d   : > { %v5335_v25 = vld [vmem:[#allocation5 + $0x240] sm:$0xf] }
 0x14e   : > { %v793_v3 = vpack.c.bf16 %v783_v23, %v782_v28  ;;  %v6274_v28 = vld [vmem:[#allocation5 + $0x51c] sm:$0xf0]  ;;  %2872 = vmatpush.bf16.msra.mxu2 %v5432_v22 }
 0x14f   : > { %v5175_v23 = vld [vmem:[#allocation5 + $0x100] sm:$0xf] }
 0x150   : > { %1013 = vmatmul.bf16.gmra.mxu1 %v793_v3  ;;  %1052 = vmatmul.bf16.gmra.mxu2 %v793_v3  ;;  %v5591_v22 = vld [vmem:[#allocation5 + $0x440] sm:$0xf] }
 0x151   : > { %1091 = vmatmul.bf16.gmra.mxu3 %v793_v3  ;;  %1130 = vmatmul.bf16.gmra.mxu0 %v793_v3  ;;  %v5688_v3 = vor.u32 %v6274_v28, %v5687_v6  ;;  %v5336_v6 = vor.u32 %v6186_v27, %v5335_v25  ;;  %v6250_v28 = vld [vmem:[#allocation5 + $0x45c] sm:$0xf0] }
 0x152   : > { %v748_v29 = vpop.f32.mrf.mxu1 }
 0x153   : > { %v749_v30 = vadd.f32 %v6938_v14, %v748_v29  ;;  %v6146_v29 = vld [vmem:[#allocation5 + $0x11c] sm:$0xf0]  ;;  %2911 = vmatpush.bf16.msrb.mxu3 %v5688_v3 }
 0x154   : > { %v5303_v3 = vld [vmem:[#allocation5 + $0x200] sm:$0xf] }
 0x155   : > { %v772_v33 = vmul.f32 0.01, %v749_v30 }
 0x157   : > { %v784_v36 = vmax.f32 %v749_v30, %v772_v33  ;;  %v5943_v30 = vld [vmem:[#allocation5 + $0x700] sm:$0xf]  ;;  %2912 = vmatpush.bf16.msrb.mxu3 %v5656_v2 }
 0x15a   : > { %v750_v31 = vpop.f32.mrf.mxu1 }
 0x15b   : > { %v751_v34 = vadd.f32 %v6938_v14, %v750_v31  ;;  %v6338_v31 = vld [vmem:[#allocation5 + $0x71c] sm:$0xf0]  ;;  %2913 = vmatpush.bf16.msrb.mxu3 %v5624_v16  ;;  %v6294_v16 = vld [vmem:[#allocation5 + $0x5c4] sm:$0xf] }
 0x15d   : > { %v773_v35 = vmul.f32 0.01, %v751_v34 }
 0x15f   : > { %v785_v37 = vmax.f32 %v751_v34, %v773_v35  ;;  %v5176_v34 = vor.u32 %v6146_v29, %v5175_v23  ;;  %v5944_v35 = vor.u32 %v6338_v31, %v5943_v30  ;;  %v5592_v23 = vor.u32 %v6250_v28, %v5591_v22  ;;  %v6178_v29 = vld [vmem:[#allocation5 + $0x21c] sm:$0xf0] }
 0x160   : > { %v5559_v30 = vld [vmem:[#allocation5 + $0x400] sm:$0xf]  ;;  %v5304_v31 = vor.u32 %v6178_v29, %v5303_v3  ;;  %v5273_v3 = vld [vmem:[#allocation5 + $0x1e0] sm:$0xf0] }
 0x161   : > { %v794_v26 = vpack.c.bf16 %v785_v37, %v784_v36  ;;  %v5399_v36 = vld [vmem:[#allocation5 + $0x2c0] sm:$0xf]  ;;  %2833 = vmatpush.bf16.msra.mxu1 %v5176_v34  ;;  %2950 = vmatpush.bf16.msra.mxu0 %v5944_v35 }
 0x162   : > { %v6202_v37 = vld [vmem:[#allocation5 + $0x2dc] sm:$0xf0]  ;;  %2914 = vmatpush.bf16.msrb.mxu3 %v5592_v23  ;;  %v6166_v23 = vld [vmem:[#allocation5 + $0x1c4] sm:$0xf] }
 0x163   : > { %1018 = vmatmul.bf16.gmra.mxu1 %v794_v26  ;;  %1057 = vmatmul.bf16.gmra.mxu2 %v794_v26  ;;  %v5400_v38 = vor.u32 %v6202_v37, %v5399_v36  ;;  %v830_v35 = vld [vmem:[%s7688_s6] sm:$0xf] }
 0x164   : > { %1096 = vmatmul.bf16.gmra.mxu3 %v794_v26  ;;  %1135 = vmatmul.bf16.gmra.mxu0 %v794_v26  ;;  %v6955_v37 = vperm.slane %v830_v35, 0 }
 0x165   : > { %2873 = vmatpush.bf16.msra.mxu2 %v5400_v38 }
 0x169   : > { %2874 = vmatpush.bf16.msra.mxu2 %v5368_v4 }
 0x16b   : > { %v753_v40 = vpop.f32.mrf.mxu1 }
 0x16c   : > { %v754_v41 = vadd.f32 %v6938_v14, %v753_v40 }
 0x16d   : > { %2875 = vmatpush.bf16.msra.mxu2 %v5336_v6 }
 0x16e   : > { %v774_v48 = vmul.f32 0.01, %v754_v41 }
 0x170   : > { %v786_v55 = vmax.f32 %v754_v41, %v774_v48 }
 0x171   : > { %2876 = vmatpush.bf16.msra.mxu2 %v5304_v31  ;;  %v5276_v31 = vor.u32 %v6166_v23, %v5273_v3 }
 0x173   : > { %v755_v45 = vpop.f32.mrf.mxu1 }
 0x174   : > { %v756_v49 = vadd.f32 %v6938_v14, %v755_v45  ;;  %v5143_v45 = vld [vmem:[#allocation5 + $0xc0] sm:$0xf] }
 0x175   : > { %v5144_v48 = vor.u32 %v6138_v46, %v5143_v45 }
 0x176   : > { %v775_v53 = vmul.f32 0.01, %v756_v49 }
 0x177   : > { %2834 = vmatpush.bf16.msra.mxu1 %v5144_v48 }
 0x178   : > { %v787_v56 = vmax.f32 %v756_v49, %v775_v53  ;;  %v5911_v49 = vld [vmem:[#allocation5 + $0x6c0] sm:$0xf] }
 0x179   : > { %v5912_v53 = vor.u32 %v6330_v50, %v5911_v49 }
 0x17a   : > { %v795_v57 = vpack.c.bf16 %v787_v56, %v786_v55  ;;  %v5111_v55 = vld [vmem:[#allocation5 + $0x80] sm:$0xf] }
 0x17b   : > { %2951 = vmatpush.bf16.msra.mxu0 %v5912_v53  ;;  %v6130_v56 = vld [vmem:[#allocation5 + $0x9c] sm:$0xf0] }
 0x17c   : > { %1023 = vmatmul.bf16.gmra.mxu1 %v795_v57  ;;  %1062 = vmatmul.bf16.gmra.mxu2 %v795_v57 }
 0x17d   : > { %1101 = vmatmul.bf16.gmra.mxu3 %v795_v57  ;;  %1140 = vmatmul.bf16.gmra.mxu0 %v795_v57  ;;  %v5112_v57 = vor.u32 %v6130_v56, %v5111_v55 }
 0x17f   : > { %2835 = vmatpush.bf16.msra.mxu1 %v5112_v57  ;;  %2952 = vmatpush.bf16.msra.mxu0 %v5880_v0 }
 0x183   : > { %v758_v7 = vpop.f32.mrf.mxu2  ;;  %2953 = vmatpush.bf16.msra.mxu0 %v5848_v13  ;;  %v6230_v13 = vld [vmem:[#allocation5 + $0x3c4] sm:$0xf] }
 0x184   : > { %v759_v19 = vadd.f32 %v6938_v14, %v758_v7  ;;  %v5079_v7 = vld [vmem:[#allocation5 + $0x40] sm:$0xf]  ;;  %v5532_v15 = vor.u32 %v6230_v13, %v5529_v1 }
 0x186   : > { %v776_v26 = vmul.f32 0.01, %v759_v19  ;;  %3025 = vmatpush.bf16.msrb.mxu2 %v5532_v15  ;;  %v6350_v15 = vld [vmem:[#allocation5 + $0x784] sm:$0xf] }
 0x188   : > { %v788_v40 = vmax.f32 %v759_v19, %v776_v26  ;;  %v5815_v19 = vld [vmem:[#allocation5 + $0x600] sm:$0xf] }
 0x189   : > { %v5816_v24 = vor.u32 %v6306_v21, %v5815_v19 }
 0x18b   : > { %v760_v33 = vpop.f32.mrf.mxu2  ;;  %2954 = vmatpush.bf16.msra.mxu0 %v5816_v24 }
 0x18c   : > { %v761_v32 = vadd.f32 %v6938_v14, %v760_v33  ;;  %v6242_v33 = vld [vmem:[#allocation5 + $0x41c] sm:$0xf0] }
 0x18d   : > { %v5560_v34 = vor.u32 %v6242_v33, %v5559_v30  ;;  %v6358_v33 = vld [vmem:[#allocation5 + $0x7c4] sm:$0xf] }
 0x18e   : > { %v777_v39 = vmul.f32 0.01, %v761_v32 }
 0x18f   : > { %2915 = vmatpush.bf16.msrb.mxu3 %v5560_v34  ;;  %v6041_v34 = vld [vmem:[#allocation5 + $0x7e0] sm:$0xf0] }
 0x190   : > { %v789_v41 = vmax.f32 %v761_v32, %v777_v39  ;;  %v6957_v32 = vperm.slane %v830_v35, 3 }
 0x192   : > { %v796_v42 = vpack.c.bf16 %v789_v41, %v788_v40  ;;  %v6961_v41 = vperm.slane %v830_v35, 1 }
 0x194   : > { %1028 = vmatmul.bf16.gmra.mxu1 %v796_v42  ;;  %1067 = vmatmul.bf16.gmra.mxu2 %v796_v42 }
 0x195   : > { %1106 = vmatmul.bf16.gmra.mxu3 %v796_v42  ;;  %1145 = vmatmul.bf16.gmra.mxu0 %v796_v42  ;;  %v763_v43 = vpop.f32.mrf.mxu2 }
 0x196   : > { %v764_v44 = vadd.f32 %v6938_v14, %v763_v43  ;;  %v6963_v43 = vperm.slane %v830_v35, 2 }
 0x198   : > { %v778_v51 = vmul.f32 0.01, %v764_v44 }
 0x19a   : > { %v790_v60 = vmax.f32 %v764_v44, %v778_v51 }
 0x19d   : > { %v765_v47 = vpop.f32.mrf.mxu2 }
 0x19e   : > { %v766_v52 = vadd.f32 %v6938_v14, %v765_v47  ;;  %v6122_v14 = vld [vmem:[#allocation5 + $0x5c] sm:$0xf0] }
 0x19f   : > { %v5080_v9 = vor.u32 %v6122_v14, %v5079_v7 }
 0x1a0   : > { %v779_v54 = vmul.f32 0.01, %v766_v52 }
 0x1a1   : > { %2836 = vmatpush.bf16.msra.mxu1 %v5080_v9 }
 0x1a2   : > { %v791_v61 = vmax.f32 %v766_v52, %v779_v54 }
 0x1a4   : > { %v797_v5 = vpack.c.bf16 %v791_v61, %v790_v60 }
 0x1a5   : > { %2837 = vmatpush.bf16.msra.mxu1 %v5048_v20  ;;  %v5788_v20 = vor.u32 %v6294_v16, %v5785_v17  ;;  %v6009_v16 = vld [vmem:[#allocation5 + $0x7a0] sm:$0xf0] }
 0x1a6   : > { %1033 = vmatmul.bf16.gmra.mxu1 %v797_v5  ;;  %1072 = vmatmul.bf16.gmra.mxu2 %v797_v5 }
 0x1a7   : > { %1111 = vmatmul.bf16.gmra.mxu3 %v797_v5  ;;  %1150 = vmatmul.bf16.gmra.mxu0 %v797_v5 }
 0x1a8   : > { %3064 = vmatpush.bf16.msra.mxu3 %v5788_v20  ;;  %v6012_v20 = vor.u32 %v6350_v15, %v6009_v16 }
 0x1a9   : > { %2986 = vmatpush.bf16.msrb.mxu1 %v5276_v31  ;;  %v6278_v31 = vld [vmem:[#allocation5 + $0x544] sm:$0xf] }
 0x1bc   : > { %v1009_v36 = vpop.f32.mrf.mxu1 }
 0x1bd   : > { %v1126_v26 = vpop.f32.mrf.mxu0  ;;  %v1010_v38 = vadd.f32 %v1009_v36, %v6955_v37 }
 0x1be   : > { %v1127_v39 = vadd.f32 %v1126_v26, %v6957_v32  ;;  %v6044_v26 = vor.u32 %v6358_v33, %v6041_v34  ;;  %v5721_v33 = vld [vmem:[#allocation5 + $0x560] sm:$0xf0] }
 0x1bf   : > { %v1156_v45 = vmul.f32 0.01, %v1010_v38 }
 0x1c0   : > { %v1159_v48 = vmul.f32 0.01, %v1127_v39  ;;  %3103 = vmatpush.bf16.msrb.mxu0 %v6044_v26  ;;  %v5209_v26 = vld [vmem:[#allocation5 + $0x160] sm:$0xf0] }
 0x1c1   : > { %v1204_v54 = vmax.f32 %v1010_v38, %v1156_v45  ;;  %v6222_v38 = vld [vmem:[#allocation5 + $0x384] sm:$0xf] }
 0x1c2   : > { %v1048_v40 = vpop.f32.mrf.mxu2  ;;  %v1207_v56 = vmax.f32 %v1127_v39, %v1159_v48  ;;  %v5497_v39 = vld [vmem:[#allocation5 + $0x3a0] sm:$0xf0] }
 0x1c3   : > { %v1087_v42 = vpop.f32.mrf.mxu3  ;;  %v1049_v50 = vadd.f32 %v1048_v40, %v6961_v41  ;;  %v6286_v45 = vld [vmem:[#allocation5 + $0x584] sm:$0xf] }
 0x1c4   : > { %v1011_v44 = vpop.f32.mrf.mxu1  ;;  %v1088_v52 = vadd.f32 %v1087_v42, %v6963_v43  ;;  %3104 = vmatpush.bf16.msrb.mxu0 %v6012_v20 }
 0x1c5   : > { %v1012_v46 = vadd.f32 %v1011_v44, %v6955_v37  ;;  %v1128_v47 = vpop.f32.mrf.mxu0  ;;  %v1157_v59 = vmul.f32 0.01, %v1049_v50  ;;  %v5500_v44 = vor.u32 %v6222_v38, %v5497_v39 }
 0x1c6   : > { %v1129_v49 = vadd.f32 %v1128_v47, %v6957_v32  ;;  %v1158_v63 = vmul.f32 0.01, %v1088_v52 }
 0x1c7   : > { %v1160_v51 = vmul.f32 0.01, %v1012_v46  ;;  %v1205_v9 = vmax.f32 %v1049_v50, %v1157_v59  ;;  %3026 = vmatpush.bf16.msrb.mxu2 %v5500_v44 }
 0x1c8   : > { %v1163_v53 = vmul.f32 0.01, %v1129_v49  ;;  %v1206_v11 = vmax.f32 %v1088_v52, %v1158_v63  ;;  %v6158_v63 = vld [vmem:[#allocation5 + $0x184] sm:$0xf] }
 0x1c9   : > { %v1208_v55 = vmax.f32 %v1012_v46, %v1160_v51  ;;  %v5753_v46 = vld [vmem:[#allocation5 + $0x5a0] sm:$0xf0] }
 0x1ca   : > { %v1211_v57 = vmax.f32 %v1129_v49, %v1163_v53  ;;  %v1050_v58 = vpop.f32.mrf.mxu2  ;;  %v5756_v49 = vor.u32 %v6286_v45, %v5753_v46 }
 0x1cb   : > { %v6969_v60 = vpack.c.bf16 %v1208_v55, %v1204_v54  ;;  %v1051_v61 = vadd.f32 %v1050_v58, %v6961_v41  ;;  %v1089_v62 = vpop.f32.mrf.mxu3 }
 0x1cc   : > { %v6972_v0 = vpack.c.bf16 %v1211_v57, %v1207_v56  ;;  %v1090_v2 = vadd.f32 %v1089_v62, %v6963_v43  ;;  %3065 = vmatpush.bf16.msra.mxu3 %v5756_v49 }
 0x1cd   : > { %v1161_v5 = vmul.f32 0.01, %v1051_v61  ;;  %v1014_v7 = vpop.f32.mrf.mxu1  ;;  %2838 = vmatmul.bf16.vlgmr.msra.gmra.mxu1 %v6969_v60 }
 0x1ce   : > { %v1162_v14 = vmul.f32 0.01, %v1090_v2  ;;  %v1131_v8 = vpop.f32.mrf.mxu0  ;;  %2955 = vmatmul.bf16.vlgmr.msra.gmra.mxu0 %v6972_v0  ;;  %v1015_v19 = vadd.f32 %v1014_v7, %v6955_v37 }
 0x1cf   : > { %v1209_v10 = vmax.f32 %v1051_v61, %v1161_v5  ;;  %v1132_v21 = vadd.f32 %v1131_v8, %v6957_v32 }
 0x1d0   : > { %v1210_v12 = vmax.f32 %v1090_v2, %v1162_v14  ;;  %v1164_v22 = vmul.f32 0.01, %v1015_v19  ;;  %v5241_v2 = vld [vmem:[#allocation5 + $0x1a0] sm:$0xf0] }
 0x1d1   : > { %v6977_v4 = vpack.c.bf16 %v1209_v10, %v1205_v9  ;;  %v1167_v29 = vmul.f32 0.01, %v1132_v21  ;;  %v5244_v8 = vor.u32 %v6158_v63, %v5241_v2 }
 0x1d2   : > { %v6979_v18 = vpack.c.bf16 %v1210_v12, %v1206_v11  ;;  %v1212_v47 = vmax.f32 %v1015_v19, %v1164_v22 }
 0x1d3   : > { %v1053_v24 = vpop.f32.mrf.mxu2  ;;  %2877 = vmatmul.bf16.vlgmr.msra.gmra.mxu2 %v6977_v4  ;;  %v1215_v50 = vmax.f32 %v1132_v21, %v1167_v29  ;;  %2987 = vmatpush.bf16.msrb.mxu1 %v5244_v8 }
 0x1d4   : > { %v1092_v25 = vpop.f32.mrf.mxu3  ;;  %2916 = vmatmul.bf16.vlgmr.msrb.gmra.mxu3 %v6979_v18  ;;  %v1054_v35 = vadd.f32 %v1053_v24, %v6961_v41 }
 0x1d5   : > { %v1016_v27 = vpop.f32.mrf.mxu1  ;;  %v1093_v40 = vadd.f32 %v1092_v25, %v6963_v43 }
 0x1d6   : > { %v1017_v6 = vadd.f32 %v1016_v27, %v6955_v37  ;;  %v1133_v28 = vpop.f32.mrf.mxu0  ;;  %v1165_v53 = vmul.f32 0.01, %v1054_v35 }
 0x1d7   : > { %v1134_v30 = vadd.f32 %v1133_v28, %v6957_v32  ;;  %v1166_v57 = vmul.f32 0.01, %v1093_v40  ;;  %v5465_v28 = vld [vmem:[#allocation5 + $0x360] sm:$0xf0] }
 0x1d8   : > { %v1168_v36 = vmul.f32 0.01, %v1017_v6  ;;  %v1213_v5 = vmax.f32 %v1054_v35, %v1165_v53  ;;  %v5724_v35 = vor.u32 %v6278_v31, %v5721_v33  ;;  %v5977_v53 = vld [vmem:[#allocation5 + $0x760] sm:$0xf0] }
 0x1d9   : > { %v1171_v42 = vmul.f32 0.01, %v1134_v30  ;;  %v1214_v9 = vmax.f32 %v1093_v40, %v1166_v57  ;;  %v5401_v31 = vld [vmem:[#allocation5 + $0x2e0] sm:$0xf0] }
 0x1da   : > { %v1216_v48 = vmax.f32 %v1017_v6, %v1168_v36  ;;  %v6214_v6 = vld [vmem:[#allocation5 + $0x344] sm:$0xf]  ;;  %3066 = vmatpush.bf16.msra.mxu3 %v5724_v35 }
 0x1db   : > { %v1219_v51 = vmax.f32 %v1134_v30, %v1171_v42  ;;  %v1055_v52 = vpop.f32.mrf.mxu2  ;;  %v5468_v30 = vor.u32 %v6214_v6, %v5465_v28  ;;  %v6150_v36 = vld [vmem:[#allocation5 + $0x144] sm:$0xf] }
 0x1dc   : > { %v6989_v54 = vpack.c.bf16 %v1216_v48, %v1212_v47  ;;  %v1056_v55 = vadd.f32 %v1055_v52, %v6961_v41  ;;  %v1094_v56 = vpop.f32.mrf.mxu3  ;;  %v5212_v40 = vor.u32 %v6150_v36, %v5209_v26  ;;  %v6342_v52 = vld [vmem:[#allocation5 + $0x744] sm:$0xf] }
 0x1dd   : > { %v6992_v58 = vpack.c.bf16 %v1219_v51, %v1215_v50  ;;  %v1095_v59 = vadd.f32 %v1094_v56, %v6963_v43  ;;  %3027 = vmatpush.bf16.msrb.mxu2 %v5468_v30  ;;  %v6198_v30 = vld [vmem:[#allocation5 + $0x2c4] sm:$0xf] }
 0x1de   : > { %v1169_v61 = vmul.f32 0.01, %v1056_v55  ;;  %2843 = vmatmul.bf16.gmra.mxu1 %v6989_v54  ;;  %v6262_v33 = vld [vmem:[#allocation5 + $0x4c4] sm:$0xf]  ;;  %v5404_v26 = vor.u32 %v6198_v30, %v5401_v31 }
 0x1df   : > { %v1170_v62 = vmul.f32 0.01, %v1095_v59  ;;  %2960 = vmatmul.bf16.gmra.mxu0 %v6992_v58  ;;  %2988 = vmatpush.bf16.msrb.mxu1 %v5212_v40  ;;  %v5113_v30 = vld [vmem:[#allocation5 + $0xa0] sm:$0xf0] }
 0x1e0   : > { %v1217_v7 = vmax.f32 %v1056_v55, %v1169_v61  ;;  %v1019_v14 = vpop.f32.mrf.mxu1  ;;  %v6206_v55 = vld [vmem:[#allocation5 + $0x304] sm:$0xf]  ;;  %v5980_v61 = vor.u32 %v6342_v52, %v5977_v53 }
 0x1e1   : > { %v1218_v10 = vmax.f32 %v1095_v59, %v1170_v62  ;;  %v1136_v11 = vpop.f32.mrf.mxu0  ;;  %v1020_v1 = vadd.f32 %v1019_v14, %v6955_v37  ;;  %v5433_v62 = vld [vmem:[#allocation5 + $0x320] sm:$0xf0] }
 0x1e2   : > { %v6997_v12 = vpack.c.bf16 %v1217_v7, %v1213_v5  ;;  %v1137_v17 = vadd.f32 %v1136_v11, %v6957_v32  ;;  %v5436_v2 = vor.u32 %v6206_v55, %v5433_v62  ;;  %v6270_v5 = vld [vmem:[#allocation5 + $0x504] sm:$0xf]  ;;  %3105 = vmatpush.bf16.msrb.mxu0 %v5980_v61 }
 0x1e3   : > { %v6999_v13 = vpack.c.bf16 %v1218_v10, %v1214_v9  ;;  %v1172_v25 = vmul.f32 0.01, %v1020_v1  ;;  %v5689_v7 = vld [vmem:[#allocation5 + $0x520] sm:$0xf0] }
 0x1e4   : > { %2882 = vmatmul.bf16.gmra.mxu2 %v6997_v12  ;;  %v1175_v23 = vmul.f32 0.01, %v1137_v17  ;;  %v5692_v8 = vor.u32 %v6270_v5, %v5689_v7 }
 0x1e5   : > { %2921 = vmatmul.bf16.gmra.mxu3 %v6999_v13  ;;  %v1220_v42 = vmax.f32 %v1020_v1, %v1172_v25  ;;  %3028 = vmatpush.bf16.msrb.mxu2 %v5436_v2  ;;  %v6334_v25 = vld [vmem:[#allocation5 + $0x704] sm:$0xf] }
 0x1e6   : > { %v1058_v19 = vpop.f32.mrf.mxu2  ;;  %v1223_v45 = vmax.f32 %v1137_v17, %v1175_v23  ;;  %3067 = vmatpush.bf16.msra.mxu3 %v5692_v8  ;;  %v6142_v17 = vld [vmem:[#allocation5 + $0x104] sm:$0xf] }
 0x1e7   : > { %v1097_v21 = vpop.f32.mrf.mxu3  ;;  %v1059_v3 = vadd.f32 %v1058_v19, %v6961_v41  ;;  %v5177_v19 = vld [vmem:[#allocation5 + $0x120] sm:$0xf0] }
 0x1e8   : > { %v1021_v24 = vpop.f32.mrf.mxu1  ;;  %v1098_v38 = vadd.f32 %v1097_v21, %v6963_v43  ;;  %v5180_v20 = vor.u32 %v6142_v17, %v5177_v19  ;;  %v6326_v8 = vld [vmem:[#allocation5 + $0x6c4] sm:$0xf] }
 0x1e9   : > { %v1022_v27 = vadd.f32 %v1021_v24, %v6955_v37  ;;  %v1138_v22 = vpop.f32.mrf.mxu0  ;;  %v1173_v46 = vmul.f32 0.01, %v1059_v3  ;;  %3029 = vmatpush.bf16.msrb.mxu2 %v5404_v26  ;;  %v5369_v17 = vld [vmem:[#allocation5 + $0x2a0] sm:$0xf0] }
 0x1ea   : > { %v1139_v29 = vadd.f32 %v1138_v22, %v6957_v32  ;;  %v1174_v56 = vmul.f32 0.01, %v1098_v38  ;;  %2989 = vmatpush.bf16.msrb.mxu1 %v5180_v20  ;;  %v6254_v19 = vld [vmem:[#allocation5 + $0x484] sm:$0xf] }
 0x1eb   : > { %v1176_v34 = vmul.f32 0.01, %v1022_v27  ;;  %v1221_v9 = vmax.f32 %v1059_v3, %v1173_v46 }
 0x1ec   : > { %v1179_v39 = vmul.f32 0.01, %v1139_v29  ;;  %v1222_v11 = vmax.f32 %v1098_v38, %v1174_v56  ;;  %v5657_v38 = vld [vmem:[#allocation5 + $0x4e0] sm:$0xf0] }
 0x1ed   : > { %v1224_v44 = vmax.f32 %v1022_v27, %v1176_v34  ;;  %v5945_v27 = vld [vmem:[#allocation5 + $0x720] sm:$0xf0] }
 0x1ee   : > { %v1227_v47 = vmax.f32 %v1139_v29, %v1179_v39  ;;  %v1060_v48 = vpop.f32.mrf.mxu2  ;;  %v5948_v6 = vor.u32 %v6334_v25, %v5945_v27  ;;  %v6134_v39 = vld [vmem:[#allocation5 + $0xc4] sm:$0xf] }
 0x1ef   : > { %v7009_v49 = vpack.c.bf16 %v1224_v44, %v1220_v42  ;;  %v1061_v50 = vadd.f32 %v1060_v48, %v6961_v41  ;;  %v1099_v51 = vpop.f32.mrf.mxu3  ;;  %v5660_v44 = vor.u32 %v6262_v33, %v5657_v38 }
 0x1f0   : > { %v7012_v57 = vpack.c.bf16 %v1227_v47, %v1223_v45  ;;  %v1100_v59 = vadd.f32 %v1099_v51, %v6963_v43  ;;  %3106 = vmatpush.bf16.msrb.mxu0 %v5948_v6  ;;  %v5145_v45 = vld [vmem:[#allocation5 + $0xe0] sm:$0xf0] }
 0x1f1   : > { %v1177_v63 = vmul.f32 0.01, %v1061_v50  ;;  %2848 = vmatmul.bf16.gmra.mxu1 %v7009_v49  ;;  %3068 = vmatpush.bf16.msra.mxu3 %v5660_v44 }
 0x1f2   : > { %v1178_v14 = vmul.f32 0.01, %v1100_v59  ;;  %2965 = vmatmul.bf16.gmra.mxu0 %v7012_v57 }
 0x1f3   : > { %v1225_v10 = vmax.f32 %v1061_v50, %v1177_v63  ;;  %v5148_v50 = vor.u32 %v6134_v39, %v5145_v45  ;;  %v6182_v45 = vld [vmem:[#allocation5 + $0x244] sm:$0xf] }
 0x1f4   : > { %v1226_v1 = vmax.f32 %v1100_v59, %v1178_v14 }
 0x1f5   : > { %v7017_v15 = vpack.c.bf16 %v1225_v10, %v1221_v9  ;;  %2990 = vmatpush.bf16.msrb.mxu1 %v5148_v50  ;;  %v5913_v9 = vld [vmem:[#allocation5 + $0x6e0] sm:$0xf0] }
 0x1f6   : > { %v7019_v16 = vpack.c.bf16 %v1226_v1, %v1222_v11  ;;  %v6190_v10 = vld [vmem:[#allocation5 + $0x284] sm:$0xf]  ;;  %v5916_v1 = vor.u32 %v6326_v8, %v5913_v9 }
 0x1f7   : > { %2887 = vmatmul.bf16.gmra.mxu2 %v7017_v15  ;;  %v5849_v9 = vld [vmem:[#allocation5 + $0x660] sm:$0xf0] }
 0x1f8   : > { %2926 = vmatmul.bf16.gmra.mxu3 %v7019_v16  ;;  %3107 = vmatpush.bf16.msrb.mxu0 %v5916_v1 }
 0x1f9   : > { %v1024_v21 = vpop.f32.mrf.mxu1 }
 0x1fa   : > { %v1141_v24 = vpop.f32.mrf.mxu0  ;;  %v1025_v22 = vadd.f32 %v1024_v21, %v6955_v37  ;;  %v5372_v21 = vor.u32 %v6190_v10, %v5369_v17  ;;  %v6174_v10 = vld [vmem:[#allocation5 + $0x204] sm:$0xf] }
 0x1fb   : > { %v1142_v28 = vadd.f32 %v1141_v24, %v6957_v32  ;;  %v5625_v24 = vld [vmem:[#allocation5 + $0x4a0] sm:$0xf0] }
 0x1fc   : > { %v1180_v34 = vmul.f32 0.01, %v1025_v22  ;;  %3030 = vmatpush.bf16.msrb.mxu2 %v5372_v21 }
 0x1fd   : > { %v1183_v40 = vmul.f32 0.01, %v1142_v28 }
 0x1fe   : > { %v1228_v52 = vmax.f32 %v1025_v22, %v1180_v34  ;;  %v5628_v22 = vor.u32 %v6254_v19, %v5625_v24  ;;  %v5305_v19 = vld [vmem:[#allocation5 + $0x220] sm:$0xf0] }
 0x1ff   : > { %v1063_v23 = vpop.f32.mrf.mxu2  ;;  %v1231_v55 = vmax.f32 %v1142_v28, %v1183_v40 }
 0x200   : > { %v1102_v3 = vpop.f32.mrf.mxu3  ;;  %v1064_v46 = vadd.f32 %v1063_v23, %v6961_v41  ;;  %3069 = vmatpush.bf16.msra.mxu3 %v5628_v22  ;;  %v6110_v22 = vld [vmem:[#allocation5 + $0x4] sm:$0xf] }
 0x201   : > { %v1026_v29 = vpop.f32.mrf.mxu1  ;;  %v1103_v47 = vadd.f32 %v1102_v3, %v6963_v43 }
 0x202   : > { %v1027_v35 = vadd.f32 %v1026_v29, %v6955_v37  ;;  %v1143_v36 = vpop.f32.mrf.mxu0  ;;  %v1181_v61 = vmul.f32 0.01, %v1064_v46  ;;  %v6126_v29 = vld [vmem:[#allocation5 + $0x84] sm:$0xf] }
 0x203   : > { %v1144_v42 = vadd.f32 %v1143_v36, %v6957_v32  ;;  %v1182_v62 = vmul.f32 0.01, %v1103_v47  ;;  %v5116_v31 = vor.u32 %v6126_v29, %v5113_v30  ;;  %v5881_v36 = vld [vmem:[#allocation5 + $0x6a0] sm:$0xf0] }
 0x204   : > { %v1184_v48 = vmul.f32 0.01, %v1027_v35  ;;  %v1229_v25 = vmax.f32 %v1064_v46, %v1181_v61  ;;  %v5337_v46 = vld [vmem:[#allocation5 + $0x260] sm:$0xf0] }
 0x205   : > { %v1187_v51 = vmul.f32 0.01, %v1144_v42  ;;  %v1230_v6 = vmax.f32 %v1103_v47, %v1182_v62  ;;  %2991 = vmatpush.bf16.msrb.mxu1 %v5116_v31  ;;  %v6246_v47 = vld [vmem:[#allocation5 + $0x444] sm:$0xf] }
 0x206   : > { %v1232_v53 = vmax.f32 %v1027_v35, %v1184_v48  ;;  %v6318_v35 = vld [vmem:[#allocation5 + $0x684] sm:$0xf] }
 0x207   : > { %v1235_v56 = vmax.f32 %v1144_v42, %v1187_v51  ;;  %v1065_v59 = vpop.f32.mrf.mxu2  ;;  %v5884_v26 = vor.u32 %v6318_v35, %v5881_v36  ;;  %v5081_v62 = vld [vmem:[#allocation5 + $0x60] sm:$0xf0] }
 0x208   : > { %v7029_v63 = vpack.c.bf16 %v1232_v53, %v1228_v52  ;;  %v1066_v2 = vadd.f32 %v1065_v59, %v6961_v41  ;;  %v1104_v5 = vpop.f32.mrf.mxu3  ;;  %v5340_v52 = vor.u32 %v6182_v45, %v5337_v46  ;;  %v5593_v53 = vld [vmem:[#allocation5 + $0x460] sm:$0xf0] }
 0x209   : > { %v7032_v7 = vpack.c.bf16 %v1235_v56, %v1231_v55  ;;  %v1105_v14 = vadd.f32 %v1104_v5, %v6963_v43  ;;  %3108 = vmatpush.bf16.msrb.mxu0 %v5884_v26  ;;  %v6118_v55 = vld [vmem:[#allocation5 + $0x44] sm:$0xf]  ;;  %v5596_v61 = vor.u32 %v6246_v47, %v5593_v53 }
 0x20a   : > { %v1185_v11 = vmul.f32 0.01, %v1066_v2  ;;  %2853 = vmatmul.bf16.gmra.mxu1 %v7029_v63  ;;  %3031 = vmatpush.bf16.msrb.mxu2 %v5340_v52  ;;  %v5084_v8 = vor.u32 %v6118_v55, %v5081_v62  ;;  %v5817_v35 = vld [vmem:[#allocation5 + $0x620] sm:$0xf0] }
 0x20b   : > { %v1186_v20 = vmul.f32 0.01, %v1105_v14  ;;  %2970 = vmatmul.bf16.gmra.mxu0 %v7032_v7  ;;  %3070 = vmatpush.bf16.msra.mxu3 %v5596_v61 }
 0x20c   : > { %v1233_v27 = vmax.f32 %v1066_v2, %v1185_v11  ;;  %v6310_v2 = vld [vmem:[#allocation5 + $0x644] sm:$0xf]  ;;  %2992 = vmatpush.bf16.msrb.mxu1 %v5084_v8  ;;  %v5535_v8 = vld [vmem:[#allocation5 + $0x3c8] sm:$0xf] }
 0x20d   : > { %v1234_v28 = vmax.f32 %v1105_v14, %v1186_v20  ;;  %v5852_v17 = vor.u32 %v6310_v2, %v5849_v9  ;;  %v6238_v20 = vld [vmem:[#allocation5 + $0x404] sm:$0xf]  ;;  %v6235_v9 = vld [vmem:[#allocation5 + $0x3e4] sm:$0xf0] }
 0x20e   : > { %v7037_v23 = vpack.c.bf16 %v1233_v27, %v1229_v25  ;;  %v5308_v25 = vor.u32 %v6174_v10, %v5305_v19  ;;  %v5561_v27 = vld [vmem:[#allocation5 + $0x420] sm:$0xf0]  ;;  %v5791_v10 = vld [vmem:[#allocation5 + $0x5c8] sm:$0xf]  ;;  %v5536_v19 = vor.u32 %v6235_v9, %v5535_v8 }
 0x20f   : > { %v7039_v3 = vpack.c.bf16 %v1234_v28, %v1230_v6  ;;  %v5049_v6 = vld [vmem:[#allocation5 + $0x20] sm:$0xf0]  ;;  %3109 = vmatpush.bf16.msrb.mxu0 %v5852_v17  ;;  %v5564_v31 = vor.u32 %v6238_v20, %v5561_v27  ;;  %v6299_v20 = vld [vmem:[#allocation5 + $0x5e4] sm:$0xf0] }
 0x210   : > { %2892 = vmatmul.bf16.gmra.mxu2 %v7037_v23  ;;  %v5792_v27 = vor.u32 %v6299_v20, %v5791_v10  ;;  %v6291_v9 = vld [vmem:[#allocation5 + $0x5a4] sm:$0xf0] }
 0x211   : > { %2931 = vmatmul.bf16.gmra.mxu3 %v7039_v3  ;;  %v1029_v33 = vpop.f32.mrf.mxu1  ;;  %3032 = vmatpush.bf16.msrb.mxu2 %v5308_v25  ;;  %v5247_v10 = vld [vmem:[#allocation5 + $0x188] sm:$0xf] }
 0x212   : > { %v1146_v34 = vpop.f32.mrf.mxu0  ;;  %v1030_v38 = vadd.f32 %v1029_v33, %v6955_v37  ;;  %v5052_v33 = vor.u32 %v6110_v22, %v5049_v6  ;;  %3071 = vmatpush.bf16.msra.mxu3 %v5564_v31  ;;  %v6171_v22 = vld [vmem:[#allocation5 + $0x1e4] sm:$0xf0] }
 0x213   : > { %v1147_v39 = vadd.f32 %v1146_v34, %v6957_v32  ;;  %v6302_v34 = vld [vmem:[#allocation5 + $0x604] sm:$0xf]  ;;  %v6355_v20 = vld [vmem:[#allocation5 + $0x7a4] sm:$0xf0] }
 0x214   : > { %v1188_v48 = vmul.f32 0.01, %v1030_v38  ;;  %2993 = vmatpush.bf16.msrb.mxu1 %v5052_v33 }
 0x215   : > { %v1191_v56 = vmul.f32 0.01, %v1147_v39  ;;  %3181 = vmatpush.bf16.msra.mxu2 %v5536_v19  ;;  %v6015_v19 = vld [vmem:[#allocation5 + $0x788] sm:$0xf] }
 0x216   : > { %v1236_v21 = vmax.f32 %v1030_v38, %v1188_v48  ;;  %3220 = vmatpush.bf16.msrb.mxu3 %v5792_v27  ;;  %v5727_v27 = vld [vmem:[#allocation5 + $0x548] sm:$0xf] }
 0x217   : > { %v1068_v40 = vpop.f32.mrf.mxu2  ;;  %v1239_v28 = vmax.f32 %v1147_v39, %v1191_v56 }
 0x218   : > { %v1107_v42 = vpop.f32.mrf.mxu3  ;;  %v1069_v5 = vadd.f32 %v1068_v40, %v6961_v41 }
 0x219   : > { %v1031_v44 = vpop.f32.mrf.mxu1  ;;  %v1108_v11 = vadd.f32 %v1107_v42, %v6963_v43  ;;  %v5820_v42 = vor.u32 %v6302_v34, %v5817_v35 }
 0x21a   : > { %v1032_v50 = vadd.f32 %v1031_v44, %v6955_v37  ;;  %v1148_v51 = vpop.f32.mrf.mxu0  ;;  %v1189_v36 = vmul.f32 0.01, %v1069_v5 }
 0x21b   : > { %v1149_v59 = vadd.f32 %v1148_v51, %v6957_v32  ;;  %v1190_v44 = vmul.f32 0.01, %v1108_v11  ;;  %3110 = vmatpush.bf16.msrb.mxu0 %v5820_v42 }
 0x21c   : > { %v1192_v14 = vmul.f32 0.01, %v1032_v50 }
 0x21d   : > { %v1195_v1 = vmul.f32 0.01, %v1149_v59  ;;  %v1238_v53 = vmax.f32 %v1108_v11, %v1190_v44 }
 0x21e   : > { %v1240_v24 = vmax.f32 %v1032_v50, %v1192_v14  ;;  %v1237_v50 = vmax.f32 %v1069_v5, %v1189_v36 }
 0x21f   : > { %v1243_v29 = vmax.f32 %v1149_v59, %v1195_v1  ;;  %v1070_v30 = vpop.f32.mrf.mxu2 }
 0x220   : > { %v7049_v26 = vpack.c.bf16 %v1240_v24, %v1236_v21  ;;  %v1071_v40 = vadd.f32 %v1070_v30, %v6961_v41  ;;  %v1109_v38 = vpop.f32.mrf.mxu3  ;;  %v5279_v21 = vld [vmem:[#allocation5 + $0x1c8] sm:$0xf] }
 0x221   : > { %v7052_v45 = vpack.c.bf16 %v1243_v29, %v1239_v28  ;;  %v1110_v39 = vadd.f32 %v1109_v38, %v6963_v43  ;;  %v5280_v29 = vor.u32 %v6171_v22, %v5279_v21  ;;  %v5471_v21 = vld [vmem:[#allocation5 + $0x348] sm:$0xf] }
 0x222   : > { %v1193_v46 = vmul.f32 0.01, %v1071_v40  ;;  %2858 = vmatmul.bf16.gmra.mxu1 %v7049_v26  ;;  %v6283_v22 = vld [vmem:[#allocation5 + $0x564] sm:$0xf0] }
 0x223   : > { %v1194_v47 = vmul.f32 0.01, %v1110_v39  ;;  %2975 = vmatmul.bf16.gmra.mxu0 %v7052_v45  ;;  %v1034_v48 = vpop.f32.mrf.mxu1  ;;  %3142 = vmatpush.bf16.msra.mxu1 %v5280_v29  ;;  %v5215_v29 = vld [vmem:[#allocation5 + $0x148] sm:$0xf] }
 0x224   : > { %v1241_v51 = vmax.f32 %v1071_v40, %v1193_v46  ;;  %v1151_v52 = vpop.f32.mrf.mxu0  ;;  %v1035_v61 = vadd.f32 %v1034_v48, %v6955_v37 }
 0x225   : > { %v1242_v55 = vmax.f32 %v1110_v39, %v1194_v47  ;;  %v1152_v62 = vadd.f32 %v1151_v52, %v6957_v32 }
 0x226   : > { %v7057_v56 = vpack.c.bf16 %v1241_v51, %v1237_v50  ;;  %v1196_v11 = vmul.f32 0.01, %v1035_v61  ;;  %v6047_v50 = vld [vmem:[#allocation5 + $0x7c8] sm:$0xf] }
 0x227   : > { %v7059_v59 = vpack.c.bf16 %v1242_v55, %v1238_v53  ;;  %v1199_v24 = vmul.f32 0.01, %v1152_v62  ;;  %v6363_v51 = vld [vmem:[#allocation5 + $0x7e4] sm:$0xf0] }
 0x228   : > { %2897 = vmatmul.bf16.gmra.mxu2 %v7057_v56  ;;  %v1244_v33 = vmax.f32 %v1035_v61, %v1196_v11  ;;  %v6048_v55 = vor.u32 %v6363_v51, %v6047_v50  ;;  %v6163_v11 = vld [vmem:[#allocation5 + $0x1a4] sm:$0xf0] }
 0x229   : > { %2936 = vmatmul.bf16.gmra.mxu3 %v7059_v59  ;;  %v1073_v2 = vpop.f32.mrf.mxu2  ;;  %v1247_v34 = vmax.f32 %v1152_v62, %v1199_v24  ;;  %v6016_v24 = vor.u32 %v6355_v20, %v6015_v19  ;;  %v5983_v51 = vld [vmem:[#allocation5 + $0x748] sm:$0xf] }
 0x22a   : > { %v1112_v14 = vpop.f32.mrf.mxu3  ;;  %v1074_v6 = vadd.f32 %v1073_v2, %v6961_v41  ;;  %3259 = vmatpush.bf16.msra.mxu0 %v6048_v55 }
 0x22b   : > { %v1036_v5 = vpop.f32.mrf.mxu1  ;;  %v1113_v30 = vadd.f32 %v1112_v14, %v6963_v43  ;;  %v6227_v14 = vld [vmem:[#allocation5 + $0x3a4] sm:$0xf0] }
 0x22c   : > { %v1037_v1 = vadd.f32 %v1036_v5, %v6955_v37  ;;  %v1153_v17 = vpop.f32.mrf.mxu0  ;;  %v1197_v40 = vmul.f32 0.01, %v1074_v6  ;;  %v5759_v5 = vld [vmem:[#allocation5 + $0x588] sm:$0xf] }
 0x22d   : > { %v1154_v25 = vadd.f32 %v1153_v17, %v6957_v32  ;;  %v1198_v44 = vmul.f32 0.01, %v1113_v30  ;;  %v5248_v17 = vor.u32 %v6163_v11, %v5247_v10  ;;  %v5183_v11 = vld [vmem:[#allocation5 + $0x108] sm:$0xf] }
 0x22e   : > { %v1200_v28 = vmul.f32 0.01, %v1037_v1  ;;  %v1245_v52 = vmax.f32 %v1074_v6, %v1197_v40  ;;  %3260 = vmatpush.bf16.msra.mxu0 %v6016_v24 }
 0x22f   : > { %v1203_v31 = vmul.f32 0.01, %v1154_v25  ;;  %v1246_v61 = vmax.f32 %v1113_v30, %v1198_v44  ;;  %3143 = vmatpush.bf16.msra.mxu1 %v5248_v17  ;;  %v6155_v30 = vld [vmem:[#allocation5 + $0x164] sm:$0xf0] }
 0x230   : > { %v1248_v37 = vmax.f32 %v1037_v1, %v1200_v28  ;;  %v5760_v1 = vor.u32 %v6291_v9, %v5759_v5  ;;  %v5728_v28 = vor.u32 %v6283_v22, %v5727_v27  ;;  %v6275_v5 = vld [vmem:[#allocation5 + $0x524] sm:$0xf0] }
 0x231   : > { %v1251_v35 = vmax.f32 %v1154_v25, %v1203_v31  ;;  %v1075_v36 = vpop.f32.mrf.mxu2  ;;  %v6219_v25 = vld [vmem:[#allocation5 + $0x364] sm:$0xf0]  ;;  %v5216_v31 = vor.u32 %v6155_v30, %v5215_v29 }
 0x232   : > { %v7069_v38 = vpack.c.bf16 %v1248_v37, %v1244_v33  ;;  %v1076_v32 = vadd.f32 %v1075_v36, %v6961_v41  ;;  %v1114_v42 = vpop.f32.mrf.mxu3  ;;  %3221 = vmatpush.bf16.msrb.mxu3 %v5760_v1  ;;  %v5472_v6 = vor.u32 %v6219_v25, %v5471_v21  ;;  %v7090_v33 = vld [vmem:[%s7690_s8] sm:$0xff]  ;;  %v6147_v1 = vld [vmem:[#allocation5 + $0x124] sm:$0xf0] }
 0x233   : > { %v7072_v39 = vpack.c.bf16 %v1251_v35, %v1247_v34  ;;  %v1115_v46 = vadd.f32 %v1114_v42, %v6963_v43  ;;  %v5503_v43 = vld [vmem:[#allocation5 + $0x388] sm:$0xf]  ;;  %3144 = vmatpush.bf16.msra.mxu1 %v5216_v31  ;;  %v7093_v34 = vperm.slane %v7090_v33, 0  ;;  %v5184_v20 = vor.u32 %v6147_v1, %v5183_v11 }
 0x234   : > { %v1201_v47 = vmul.f32 0.01, %v1076_v32  ;;  %2863 = vmatmul.bf16.gmra.mxu1 %v7069_v38  ;;  %v5504_v8 = vor.u32 %v6227_v14, %v5503_v43  ;;  %v6211_v43 = vld [vmem:[#allocation5 + $0x324] sm:$0xf0] }
 0x235   : > { %v1202_v48 = vmul.f32 0.01, %v1115_v46  ;;  %2980 = vmatmul.bf16.gmra.mxu0 %v7072_v39  ;;  %v5695_v14 = vld [vmem:[#allocation5 + $0x508] sm:$0xf] }
 0x236   : > { %v1249_v53 = vmax.f32 %v1076_v32, %v1201_v47  ;;  %3182 = vmatpush.bf16.msra.mxu2 %v5504_v8  ;;  %3222 = vmatpush.bf16.msrb.mxu3 %v5728_v28  ;;  %v5696_v10 = vor.u32 %v6275_v5, %v5695_v14  ;;  %v5951_v17 = vld [vmem:[#allocation5 + $0x708] sm:$0xf] }
 0x237   : > { %v1250_v62 = vmax.f32 %v1115_v46, %v1202_v48  ;;  %v6339_v21 = vld [vmem:[#allocation5 + $0x724] sm:$0xf0]  ;;  %3145 = vmatpush.bf16.msra.mxu1 %v5184_v20 }
 0x238   : > { %v7077_v41 = vpack.c.bf16 %v1249_v53, %v1245_v52  ;;  %v6347_v52 = vld [vmem:[#allocation5 + $0x764] sm:$0xf0]  ;;  %v5952_v25 = vor.u32 %v6339_v21, %v5951_v17 }
 0x239   : > { %v7079_v2 = vpack.c.bf16 %v1250_v62, %v1246_v61  ;;  %v5439_v53 = vld [vmem:[#allocation5 + $0x308] sm:$0xf]  ;;  %v5984_v62 = vor.u32 %v6347_v52, %v5983_v51 }
 0x23a   : > { %2902 = vmatmul.bf16.gmra.mxu2 %v7077_v41  ;;  %v5440_v9 = vor.u32 %v6211_v43, %v5439_v53  ;;  %3223 = vmatpush.bf16.msrb.mxu3 %v5696_v10  ;;  %v5407_v22 = vld [vmem:[#allocation5 + $0x2c8] sm:$0xf] }
 0x23b   : > { %2941 = vmatmul.bf16.gmra.mxu3 %v7079_v2  ;;  %3183 = vmatpush.bf16.msra.mxu2 %v5472_v6  ;;  %v6203_v6 = vld [vmem:[#allocation5 + $0x2e4] sm:$0xf0] }
 0x23c   : > { %3261 = vmatpush.bf16.msra.mxu0 %v5984_v62  ;;  %v5408_v29 = vor.u32 %v6203_v6, %v5407_v22  ;;  %v5663_v30 = vld [vmem:[#allocation5 + $0x4c8] sm:$0xf] }
 0x23d   : > { %v6267_v31 = vld [vmem:[#allocation5 + $0x4e4] sm:$0xf0] }
 0x23e   : > { %v5919_v10 = vld [vmem:[#allocation5 + $0x6c8] sm:$0xf] }
 0x23f   : > { %3184 = vmatpush.bf16.msra.mxu2 %v5440_v9  ;;  %v6331_v11 = vld [vmem:[#allocation5 + $0x6e4] sm:$0xf0] }
 0x240   : > { %3262 = vmatpush.bf16.msra.mxu0 %v5952_v25  ;;  %v6131_v21 = vld [vmem:[#allocation5 + $0xa4] sm:$0xf0] }
 0x241   : > { %v6323_v22 = vld [vmem:[#allocation5 + $0x6a4] sm:$0xf0] }
 0x243   : > { %3185 = vmatpush.bf16.msra.mxu2 %v5408_v29  ;;  %v6195_v29 = vld [vmem:[#allocation5 + $0x2a4] sm:$0xf0] }
 0x244   : > { %2994 = vmatmul.bf16.vlgmr.msrb.gmra.mxu1 %v6969_v60 }
 0x245   : > { %3111 = vmatmul.bf16.vlgmr.msrb.gmra.mxu0 %v6972_v0 }
 0x24a   : > { %3033 = vmatmul.bf16.vlgmr.msrb.gmra.mxu2 %v6977_v4  ;;  %v2839_v37 = vpop.f32.mrf.mxu1 }
 0x24b   : > { %3072 = vmatmul.bf16.vlgmr.msra.gmra.mxu3 %v6979_v18  ;;  %v2840_v35 = vadd.f32 %v2839_v37, %v7093_v34  ;;  %v2956_v36 = vpop.f32.mrf.mxu0  ;;  %v5151_v37 = vld [vmem:[#allocation5 + $0xc8] sm:$0xf] }
 0x252   : > { %v2841_v44 = vpop.f32.mrf.mxu1 }
 0x253   : > { %v2842_v48 = vadd.f32 %v2841_v44, %v7093_v34  ;;  %v2958_v8 = vpop.f32.mrf.mxu0 }
 0x254   : > { %2999 = vmatmul.bf16.gmra.mxu1 %v6989_v54 }
 0x255   : > { %3116 = vmatmul.bf16.gmra.mxu0 %v6992_v58 }
 0x256   : > { %v2878_v40 = vpop.f32.mrf.mxu2 }
 0x257   : > { %v2879_v32 = vadd.f32 %v2878_v40, %v2840_v35  ;;  %v2917_v42 = vpop.f32.mrf.mxu3  ;;  %v6139_v40 = vld [vmem:[#allocation5 + $0xe4] sm:$0xf0] }
 0x258   : > { %v5152_v44 = vor.u32 %v6139_v40, %v5151_v37  ;;  %v5343_v40 = vld [vmem:[#allocation5 + $0x248] sm:$0xf] }
 0x259   : > { %v2918_v46 = vadd.f32 %v2917_v42, %v2879_v32 }
 0x25a   : > { %3038 = vmatmul.bf16.gmra.mxu2 %v6997_v12  ;;  %3146 = vmatpush.bf16.msra.mxu1 %v5152_v44 }
 0x25b   : > { %v2957_v47 = vadd.f32 %v2956_v36, %v2918_v46  ;;  %3077 = vmatmul.bf16.gmra.mxu3 %v6999_v13  ;;  %v2844_v24 = vpop.f32.mrf.mxu1  ;;  %v5664_v36 = vor.u32 %v6267_v31, %v5663_v30  ;;  %v5631_v30 = vld [vmem:[#allocation5 + $0x488] sm:$0xf] }
 0x25c   : > { %v2845_v28 = vadd.f32 %v2844_v24, %v7093_v34  ;;  %v5887_v24 = vld [vmem:[#allocation5 + $0x688] sm:$0xf] }
 0x25d   : > { %3224 = vmatpush.bf16.msrb.mxu3 %v5664_v36  ;;  %v5888_v31 = vor.u32 %v6323_v22, %v5887_v24  ;;  %v6259_v36 = vld [vmem:[#allocation5 + $0x4a4] sm:$0xf0] }
 0x25e   : > { %v2880_v50 = vpop.f32.mrf.mxu2 }
 0x25f   : > { %v2881_v55 = vadd.f32 %v2880_v50, %v2842_v48  ;;  %v2919_v61 = vpop.f32.mrf.mxu3  ;;  %v4078_v48 = vmul.f32 0.01, %v2957_v47  ;;  %v2961_v50 = vpop.f32.mrf.mxu0 }
 0x261   : > { %v2920_v19 = vadd.f32 %v2919_v61, %v2881_v55  ;;  %v4174_v61 = vmax.f32 %v2957_v47, %v4078_v48  ;;  %v5119_v47 = vld [vmem:[#allocation5 + $0x88] sm:$0xf] }
 0x262   : > { %v5087_v48 = vld [vmem:[#allocation5 + $0x48] sm:$0xf] }
 0x263   : > { %v2959_v27 = vadd.f32 %v2958_v8, %v2920_v19  ;;  %v2846_v53 = vpop.f32.mrf.mxu1  ;;  %v5920_v19 = vor.u32 %v6331_v11, %v5919_v10  ;;  %v6315_v10 = vld [vmem:[#allocation5 + $0x664] sm:$0xf0] }
 0x264   : > { %3004 = vmatmul.bf16.gmra.mxu1 %v7009_v49  ;;  %v2847_v20 = vadd.f32 %v2846_v53, %v7093_v34 }
 0x265   : > { %3121 = vmatmul.bf16.gmra.mxu0 %v7012_v57  ;;  %v4086_v32 = vmul.f32 0.01, %v2959_v27 }
 0x266   : > { %3263 = vmatpush.bf16.msra.mxu0 %v5920_v19 }
 0x267   : > { %v2883_v35 = vpop.f32.mrf.mxu2  ;;  %v4182_v52 = vmax.f32 %v2959_v27, %v4086_v32  ;;  %v2963_v1 = vpop.f32.mrf.mxu0  ;;  %v5120_v27 = vor.u32 %v6131_v21, %v5119_v47  ;;  %v6187_v32 = vld [vmem:[#allocation5 + $0x264] sm:$0xf0] }
 0x268   : > { %v2884_v42 = vadd.f32 %v2883_v35, %v2845_v28  ;;  %v2922_v46 = vpop.f32.mrf.mxu3  ;;  %v5375_v28 = vld [vmem:[#allocation5 + $0x288] sm:$0xf] }
 0x269   : > { %v4270_v43 = vmax.f32 %v4174_v61, %v4182_v52  ;;  %v5376_v35 = vor.u32 %v6195_v29, %v5375_v28  ;;  %3147 = vmatpush.bf16.msra.mxu1 %v5120_v27  ;;  %v5599_v61 = vld [vmem:[#allocation5 + $0x448] sm:$0xf] }
 0x26a   : > { %v2923_v51 = vadd.f32 %v2922_v46, %v2884_v42  ;;  %3043 = vmatmul.bf16.gmra.mxu2 %v7017_v15  ;;  %v5632_v46 = vor.u32 %v6259_v36, %v5631_v30  ;;  %3264 = vmatpush.bf16.msra.mxu0 %v5888_v31  ;;  %v6115_v47 = vld [vmem:[#allocation5 + $0x24] sm:$0xf0] }
 0x26b   : > { %3082 = vmatmul.bf16.gmra.mxu3 %v7019_v16  ;;  %3186 = vmatpush.bf16.msra.mxu2 %v5376_v35  ;;  %v5823_v21 = vld [vmem:[#allocation5 + $0x608] sm:$0xf] }
 0x26c   : > { %v2962_v55 = vadd.f32 %v2961_v50, %v2923_v51  ;;  %v6123_v50 = vld [vmem:[#allocation5 + $0x64] sm:$0xf0]  ;;  %3225 = vmatpush.bf16.msrb.mxu3 %v5632_v46 }
 0x26d   : > { %v5855_v51 = vld [vmem:[#allocation5 + $0x648] sm:$0xf] }
 0x26e   : > { %v4094_v62 = vmul.f32 0.01, %v2962_v55  ;;  %v2849_v17 = vpop.f32.mrf.mxu1  ;;  %v6179_v35 = vld [vmem:[#allocation5 + $0x224] sm:$0xf0] }
 0x26f   : > { %v2885_v8 = vpop.f32.mrf.mxu2  ;;  %v2850_v6 = vadd.f32 %v2849_v17, %v7093_v34  ;;  %v2966_v52 = vpop.f32.mrf.mxu0  ;;  %v5856_v17 = vor.u32 %v6315_v10, %v5855_v51  ;;  %v5567_v36 = vld [vmem:[#allocation5 + $0x408] sm:$0xf] }
 0x270   : > { %v4190_v14 = vmax.f32 %v2962_v55, %v4094_v62  ;;  %v2924_v9 = vpop.f32.mrf.mxu3  ;;  %v2886_v25 = vadd.f32 %v2885_v8, %v2847_v20  ;;  %v5344_v55 = vor.u32 %v6187_v32, %v5343_v40  ;;  %v6251_v62 = vld [vmem:[#allocation5 + $0x464] sm:$0xf0] }
 0x271   : > { %v5600_v8 = vor.u32 %v6251_v62, %v5599_v61  ;;  %v5055_v20 = vld [vmem:[#allocation5 + $0x8] sm:$0xf]  ;;  %3265 = vmatpush.bf16.msra.mxu0 %v5856_v17  ;;  %v5537_v61 = vld [vmem:[#allocation5 + $0x3e8] sm:$0xf0] }
 0x272   : > { %v7106_v5 = vmax.f32 %v4270_v43, %v4190_v14  ;;  %v2925_v53 = vadd.f32 %v2924_v9, %v2886_v25  ;;  %v5088_v43 = vor.u32 %v6123_v50, %v5087_v48  ;;  %3187 = vmatpush.bf16.msra.mxu2 %v5344_v55  ;;  %v5056_v9 = vor.u32 %v6115_v47, %v5055_v20  ;;  %v6307_v25 = vld [vmem:[#allocation5 + $0x624] sm:$0xf0]  ;;  %v6231_v55 = vld [vmem:[#allocation5 + $0x3cc] sm:$0xf] }
 0x273   : > { %3226 = vmatpush.bf16.msrb.mxu3 %v5600_v8  ;;  %v5824_v22 = vor.u32 %v6307_v25, %v5823_v21  ;;  %v5540_v62 = vor.u32 %v6231_v55, %v5537_v61  ;;  %v6287_v61 = vld [vmem:[#allocation5 + $0x58c] sm:$0xf] }
 0x274   : > { %3009 = vmatmul.bf16.gmra.mxu1 %v7029_v63  ;;  %v2964_v24 = vadd.f32 %v2963_v1, %v2925_v53  ;;  %v5311_v1 = vld [vmem:[#allocation5 + $0x208] sm:$0xf] }
 0x275   : > { %3126 = vmatmul.bf16.gmra.mxu0 %v7032_v7  ;;  %3148 = vmatpush.bf16.msra.mxu1 %v5088_v43  ;;  %v5312_v32 = vor.u32 %v6179_v35, %v5311_v1  ;;  %v6295_v1 = vld [vmem:[#allocation5 + $0x5cc] sm:$0xf] }
 0x276   : > { %v2851_v11 = vpop.f32.mrf.mxu1  ;;  %v4102_v30 = vmul.f32 0.01, %v2964_v24  ;;  %3266 = vmatpush.bf16.msra.mxu0 %v5824_v22  ;;  %v5793_v35 = vld [vmem:[#allocation5 + $0x5e8] sm:$0xf0] }
 0x277   : > { %v2852_v27 = vadd.f32 %v2851_v11, %v7093_v34  ;;  %v2968_v40 = vpop.f32.mrf.mxu0  ;;  %3188 = vmatpush.bf16.msra.mxu2 %v5312_v32  ;;  %v5281_v32 = vld [vmem:[#allocation5 + $0x1e8] sm:$0xf0] }
 0x278   : > { %v4198_v50 = vmax.f32 %v2964_v24, %v4102_v30 }
 0x279   : > { %3149 = vmatpush.bf16.msra.mxu1 %v5056_v9 }
 0x27a   : > { %v2888_v37 = vpop.f32.mrf.mxu2  ;;  %3048 = vmatmul.bf16.gmra.mxu2 %v7037_v23 }
 0x27b   : > { %v2889_v42 = vadd.f32 %v2888_v37, %v2850_v6  ;;  %v2927_v44 = vpop.f32.mrf.mxu3  ;;  %3087 = vmatmul.bf16.gmra.mxu3 %v7039_v3  ;;  %3337 = vmatpush.bf16.msrb.mxu2 %v5540_v62  ;;  %v5761_v62 = vld [vmem:[#allocation5 + $0x5a8] sm:$0xf0] }
 0x27d   : > { %v2928_v14 = vadd.f32 %v2927_v44, %v2889_v42  ;;  %v6243_v42 = vld [vmem:[#allocation5 + $0x424] sm:$0xf0] }
 0x27e   : > { %v5568_v48 = vor.u32 %v6243_v42, %v5567_v36  ;;  %v5796_v36 = vor.u32 %v6295_v1, %v5793_v35  ;;  %v6359_v42 = vld [vmem:[#allocation5 + $0x7cc] sm:$0xf] }
 0x27f   : > { %v2967_v19 = vadd.f32 %v2966_v52, %v2928_v14 }
 0x280   : > { %3227 = vmatpush.bf16.msrb.mxu3 %v5568_v48 }
 0x281   : > { %v4110_v28 = vmul.f32 0.01, %v2967_v19 }
 0x282   : > { %v2890_v6 = vpop.f32.mrf.mxu2 }
 0x283   : > { %v2891_v29 = vadd.f32 %v2890_v6, %v2852_v27  ;;  %v2929_v31 = vpop.f32.mrf.mxu3  ;;  %v4206_v44 = vmax.f32 %v2967_v19, %v4110_v28 }
 0x284   : > { %3014 = vmatmul.bf16.gmra.mxu1 %v7049_v26  ;;  %3376 = vmatpush.bf16.msra.mxu3 %v5796_v36 }
 0x285   : > { %v2930_v37 = vadd.f32 %v2929_v31, %v2891_v29  ;;  %3131 = vmatmul.bf16.gmra.mxu0 %v7052_v45  ;;  %v4334_v52 = vmax.f32 %v4198_v50, %v4206_v44  ;;  %v6049_v50 = vld [vmem:[#allocation5 + $0x7e8] sm:$0xf0] }
 0x287   : > { %v2969_v46 = vadd.f32 %v2968_v40, %v2930_v37  ;;  %v2854_v14 = vpop.f32.mrf.mxu1  ;;  %v6167_v40 = vld [vmem:[#allocation5 + $0x1cc] sm:$0xf] }
 0x288   : > { %v2971_v8 = vpop.f32.mrf.mxu0  ;;  %v2855_v10 = vadd.f32 %v2854_v14, %v7093_v34  ;;  %v5284_v48 = vor.u32 %v6167_v40, %v5281_v32  ;;  %v6159_v14 = vld [vmem:[#allocation5 + $0x18c] sm:$0xf] }
 0x289   : > { %v4118_v51 = vmul.f32 0.01, %v2969_v46 }
 0x28a   : > { %3053 = vmatmul.bf16.gmra.mxu2 %v7057_v56  ;;  %3298 = vmatpush.bf16.msrb.mxu1 %v5284_v48 }
 0x28b   : > { %v4214_v53 = vmax.f32 %v2969_v46, %v4118_v51  ;;  %3092 = vmatmul.bf16.gmra.mxu3 %v7059_v59  ;;  %v6223_v51 = vld [vmem:[#allocation5 + $0x38c] sm:$0xf] }
 0x28d   : > { %v7119_v43 = vmax.f32 %v4334_v52, %v4214_v53  ;;  %v5505_v52 = vld [vmem:[#allocation5 + $0x3a8] sm:$0xf0]  ;;  %v6052_v53 = vor.u32 %v6359_v42, %v6049_v50 }
 0x28e   : > { %v5508_v55 = vor.u32 %v6223_v51, %v5505_v52 }
 0x28f   : > { %v2856_v47 = vpop.f32.mrf.mxu1  ;;  %3415 = vmatpush.bf16.msrb.mxu0 %v6052_v53 }
 0x290   : > { %v2973_v21 = vpop.f32.mrf.mxu0  ;;  %v2857_v9 = vadd.f32 %v2856_v47, %v7093_v34  ;;  %3338 = vmatpush.bf16.msrb.mxu2 %v5508_v55  ;;  %v6215_v47 = vld [vmem:[#allocation5 + $0x34c] sm:$0xf] }
 0x293   : > { %v2893_v11 = vpop.f32.mrf.mxu2 }
 0x294   : > { %v2894_v17 = vadd.f32 %v2893_v11, %v2855_v10  ;;  %v2932_v19 = vpop.f32.mrf.mxu3  ;;  %3019 = vmatmul.bf16.gmra.mxu1 %v7069_v38  ;;  %v5764_v10 = vor.u32 %v6287_v61, %v5761_v62  ;;  %v5249_v11 = vld [vmem:[#allocation5 + $0x1a8] sm:$0xf0] }
 0x295   : > { %3136 = vmatmul.bf16.gmra.mxu0 %v7072_v39 }
 0x296   : > { %v2933_v20 = vadd.f32 %v2932_v19, %v2894_v17  ;;  %v5252_v17 = vor.u32 %v6159_v14, %v5249_v11  ;;  %v6351_v19 = vld [vmem:[#allocation5 + $0x78c] sm:$0xf]  ;;  %3377 = vmatpush.bf16.msra.mxu3 %v5764_v10 }
 0x297   : > { %v6151_v14 = vld [vmem:[#allocation5 + $0x14c] sm:$0xf] }
 0x298   : > { %v2972_v24 = vadd.f32 %v2971_v8, %v2933_v20  ;;  %v6017_v20 = vld [vmem:[#allocation5 + $0x7a8] sm:$0xf0]  ;;  %3299 = vmatpush.bf16.msrb.mxu1 %v5252_v17 }
 0x299   : > { %v5217_v10 = vld [vmem:[#allocation5 + $0x168] sm:$0xf0] }
 0x29a   : > { %3058 = vmatmul.bf16.gmra.mxu2 %v7077_v41  ;;  %v4126_v29 = vmul.f32 0.01, %v2972_v24  ;;  %v5220_v17 = vor.u32 %v6151_v14, %v5217_v10 }
 0x29b   : > { %3097 = vmatmul.bf16.gmra.mxu3 %v7079_v2  ;;  %v2895_v25 = vpop.f32.mrf.mxu2 }
 0x29c   : > { %v2896_v27 = vadd.f32 %v2895_v25, %v2857_v9  ;;  %v2934_v22 = vpop.f32.mrf.mxu3  ;;  %v4222_v44 = vmax.f32 %v2972_v24, %v4126_v29  ;;  %v6020_v24 = vor.u32 %v6351_v19, %v6017_v20  ;;  %v5473_v9 = vld [vmem:[#allocation5 + $0x368] sm:$0xf0]  ;;  %3300 = vmatpush.bf16.msrb.mxu1 %v5220_v17 }
 0x29d   : > { %v6279_v25 = vld [vmem:[#allocation5 + $0x54c] sm:$0xf]  ;;  %v5476_v29 = vor.u32 %v6215_v47, %v5473_v9 }
 0x29e   : > { %v2935_v6 = vadd.f32 %v2934_v22, %v2896_v27  ;;  %v5729_v27 = vld [vmem:[#allocation5 + $0x568] sm:$0xf0]  ;;  %3416 = vmatpush.bf16.msrb.mxu0 %v6020_v24 }
 0x29f   : > { %v2859_v28 = vpop.f32.mrf.mxu1  ;;  %3339 = vmatpush.bf16.msrb.mxu2 %v5476_v29  ;;  %v6343_v19 = vld [vmem:[#allocation5 + $0x74c] sm:$0xf] }
 0x2a0   : > { %v2974_v30 = vadd.f32 %v2973_v21, %v2935_v6  ;;  %v2976_v31 = vpop.f32.mrf.mxu0  ;;  %v2860_v22 = vadd.f32 %v2859_v28, %v7093_v34  ;;  %v5985_v20 = vld [vmem:[#allocation5 + $0x768] sm:$0xf0] }
 0x2a1   : > { %v6207_v47 = vld [vmem:[#allocation5 + $0x30c] sm:$0xf]  ;;  %v5988_v24 = vor.u32 %v6343_v19, %v5985_v20 }
 0x2a2   : > { %v4134_v37 = vmul.f32 0.01, %v2974_v30  ;;  %v5441_v9 = vld [vmem:[#allocation5 + $0x328] sm:$0xf0] }
 0x2a3   : > { %v6143_v29 = vld [vmem:[#allocation5 + $0x10c] sm:$0xf]  ;;  %3417 = vmatpush.bf16.msrb.mxu0 %v5988_v24 }
 0x2a4   : > { %v4230_v46 = vmax.f32 %v2974_v30, %v4134_v37  ;;  %3150 = vmatmul.bf16.vlgmr.msra.gmra.mxu1 %v6969_v60  ;;  %v5732_v30 = vor.u32 %v6279_v25, %v5729_v27  ;;  %v6271_v25 = vld [vmem:[#allocation5 + $0x50c] sm:$0xf] }
 0x2a5   : > { %3267 = vmatmul.bf16.vlgmr.msra.gmra.mxu0 %v6972_v0  ;;  %v5697_v27 = vld [vmem:[#allocation5 + $0x528] sm:$0xf0] }
 0x2a6   : > { %v4398_v8 = vmax.f32 %v4222_v44, %v4230_v46  ;;  %3378 = vmatpush.bf16.msra.mxu3 %v5732_v30  ;;  %v5185_v30 = vld [vmem:[#allocation5 + $0x128] sm:$0xf0] }
 0x2a7   : > { %v2861_v21 = vpop.f32.mrf.mxu1 }
 0x2a8   : > { %v2978_v6 = vpop.f32.mrf.mxu0  ;;  %v2862_v42 = vadd.f32 %v2861_v21, %v7093_v34 }
 0x2aa   : > { %3189 = vmatmul.bf16.vlgmr.msra.gmra.mxu2 %v6977_v4 }
 0x2ab   : > { %3228 = vmatmul.bf16.vlgmr.msrb.gmra.mxu3 %v6979_v18  ;;  %v2898_v37 = vpop.f32.mrf.mxu2 }
 0x2ac   : > { %v2899_v1 = vadd.f32 %v2898_v37, %v2860_v22  ;;  %v2937_v35 = vpop.f32.mrf.mxu3  ;;  %v5444_v22 = vor.u32 %v6207_v47, %v5441_v9 }
 0x2ae   : > { %v2938_v36 = vadd.f32 %v2937_v35, %v2899_v1  ;;  %v5188_v1 = vor.u32 %v6143_v29, %v5185_v30  ;;  %v6335_v35 = vld [vmem:[#allocation5 + $0x70c] sm:$0xf]  ;;  %3340 = vmatpush.bf16.msrb.mxu2 %v5444_v22 }
 0x2b0   : > { %v2977_v40 = vadd.f32 %v2976_v31, %v2938_v36  ;;  %v5953_v36 = vld [vmem:[#allocation5 + $0x728] sm:$0xf0]  ;;  %3301 = vmatpush.bf16.msrb.mxu1 %v5188_v1 }
 0x2b1   : > { %v2864_v32 = vpop.f32.mrf.mxu1 }
 0x2b2   : > { %v4142_v28 = vmul.f32 0.01, %v2977_v40  ;;  %v2981_v44 = vpop.f32.mrf.mxu0  ;;  %v2865_v31 = vadd.f32 %v2864_v32, %v7093_v34  ;;  %v5956_v32 = vor.u32 %v6335_v35, %v5953_v36  ;;  %v5153_v36 = vld [vmem:[#allocation5 + $0xe8] sm:$0xf0] }
 0x2b3   : > { %v2900_v46 = vpop.f32.mrf.mxu2 }
 0x2b4   : > { %v4238_v48 = vmax.f32 %v2977_v40, %v4142_v28  ;;  %v2901_v50 = vadd.f32 %v2900_v46, %v2862_v42  ;;  %3155 = vmatmul.bf16.gmra.mxu1 %v6989_v54  ;;  %v2939_v51 = vpop.f32.mrf.mxu3  ;;  %v6199_v42 = vld [vmem:[#allocation5 + $0x2cc] sm:$0xf]  ;;  %3418 = vmatpush.bf16.msrb.mxu0 %v5956_v32 }
 0x2b5   : > { %3272 = vmatmul.bf16.gmra.mxu0 %v6992_v58  ;;  %v5409_v28 = vld [vmem:[#allocation5 + $0x2e8] sm:$0xf0] }
 0x2b6   : > { %v7135_v52 = vmax.f32 %v4398_v8, %v4238_v48  ;;  %v2940_v53 = vadd.f32 %v2939_v51, %v2901_v50  ;;  %v6263_v46 = vld [vmem:[#allocation5 + $0x4cc] sm:$0xf] }
 0x2b7   : > { %v6327_v32 = vld [vmem:[#allocation5 + $0x6cc] sm:$0xf] }
 0x2b8   : > { %v2979_v55 = vadd.f32 %v2978_v6, %v2940_v53  ;;  %v5700_v6 = vor.u32 %v6271_v25, %v5697_v27  ;;  %v5412_v53 = vor.u32 %v6199_v42, %v5409_v28  ;;  %v5921_v28 = vld [vmem:[#allocation5 + $0x6e8] sm:$0xf0] }
 0x2b9   : > { %v2866_v61 = vpop.f32.mrf.mxu1 }
 0x2ba   : > { %v2983_v62 = vpop.f32.mrf.mxu0  ;;  %3194 = vmatmul.bf16.gmra.mxu2 %v6997_v12  ;;  %3379 = vmatpush.bf16.msra.mxu3 %v5700_v6  ;;  %v4150_v48 = vmul.f32 0.01, %v2979_v55  ;;  %v2867_v10 = vadd.f32 %v2866_v61, %v7093_v34 }
 0x2bb   : > { %3233 = vmatmul.bf16.gmra.mxu3 %v6999_v13  ;;  %3341 = vmatpush.bf16.msrb.mxu2 %v5412_v53 }
 0x2bc   : > { %v4246_v19 = vmax.f32 %v2979_v55, %v4150_v48  ;;  %v5924_v48 = vor.u32 %v6327_v32, %v5921_v28  ;;  %v5089_v32 = vld [vmem:[#allocation5 + $0x68] sm:$0xf0] }
 0x2bd   : > { %v2903_v11 = vpop.f32.mrf.mxu2 }
 0x2be   : > { %v2904_v21 = vadd.f32 %v2903_v11, %v2865_v31  ;;  %v2942_v8 = vpop.f32.mrf.mxu3  ;;  %v5665_v31 = vld [vmem:[#allocation5 + $0x4e8] sm:$0xf0]  ;;  %3419 = vmatpush.bf16.msrb.mxu0 %v5924_v48 }
 0x2bf   : > { %v5668_v14 = vor.u32 %v6263_v46, %v5665_v31  ;;  %v5121_v31 = vld [vmem:[#allocation5 + $0xa8] sm:$0xf0] }
 0x2c0   : > { %v2943_v37 = vadd.f32 %v2942_v8, %v2904_v21  ;;  %v7144_v8 = vperm.slane %v7090_v33, 1  ;;  %v5857_v48 = vld [vmem:[#allocation5 + $0x668] sm:$0xf0] }
 0x2c1   : > { %v2995_v40 = vpop.f32.mrf.mxu1  ;;  %3380 = vmatpush.bf16.msra.mxu3 %v5668_v14  ;;  %v6319_v14 = vld [vmem:[#allocation5 + $0x68c] sm:$0xf] }
 0x2c2   : > { %v2982_v50 = vadd.f32 %v2981_v44, %v2943_v37  ;;  %v3112_v51 = vpop.f32.mrf.mxu0  ;;  %v2996_v25 = vadd.f32 %v2995_v40, %v7144_v8 }
 0x2c4   : > { %v4158_v11 = vmul.f32 0.01, %v2982_v50  ;;  %3160 = vmatmul.bf16.gmra.mxu1 %v7009_v49 }
 0x2c5   : > { %3277 = vmatmul.bf16.gmra.mxu0 %v7012_v57  ;;  %v2905_v17 = vpop.f32.mrf.mxu2 }
 0x2c6   : > { %v4254_v20 = vmax.f32 %v2982_v50, %v4158_v11  ;;  %v2906_v47 = vadd.f32 %v2905_v17, %v2867_v10  ;;  %v2944_v21 = vpop.f32.mrf.mxu3  ;;  %v6191_v11 = vld [vmem:[#allocation5 + $0x28c] sm:$0xf] }
 0x2c7   : > { %v5377_v17 = vld [vmem:[#allocation5 + $0x2a8] sm:$0xf0] }
 0x2c8   : > { %v4462_v44 = vmax.f32 %v4246_v19, %v4254_v20  ;;  %v2945_v24 = vadd.f32 %v2944_v21, %v2906_v47  ;;  %v6255_v19 = vld [vmem:[#allocation5 + $0x48c] sm:$0xf]  ;;  %v5380_v21 = vor.u32 %v6191_v11, %v5377_v17 }
 0x2c9   : > { %v2997_v9 = vpop.f32.mrf.mxu1  ;;  %v6111_v11 = vld [vmem:[#allocation5 + $0xc] sm:$0xf] }
 0x2ca   : > { %v2984_v34 = vadd.f32 %v2983_v62, %v2945_v24  ;;  %v3114_v61 = vpop.f32.mrf.mxu0  ;;  %3199 = vmatmul.bf16.gmra.mxu2 %v7017_v15  ;;  %v6135_v62 = vld [vmem:[#allocation5 + $0xcc] sm:$0xf]  ;;  %v2998_v42 = vadd.f32 %v2997_v9, %v7144_v8 }
 0x2cb   : > { %3238 = vmatmul.bf16.gmra.mxu3 %v7019_v16  ;;  %v5156_v40 = vor.u32 %v6135_v62, %v5153_v36  ;;  %v5889_v24 = vld [vmem:[#allocation5 + $0x6a8] sm:$0xf0]  ;;  %3342 = vmatpush.bf16.msrb.mxu2 %v5380_v21 }
 0x2cc   : > { %v4166_v27 = vmul.f32 0.01, %v2984_v34  ;;  %v6183_v9 = vld [vmem:[#allocation5 + $0x24c] sm:$0xf] }
 0x2cd   : > { %v3034_v55 = vpop.f32.mrf.mxu2  ;;  %3302 = vmatpush.bf16.msrb.mxu1 %v5156_v40  ;;  %v5601_v62 = vld [vmem:[#allocation5 + $0x468] sm:$0xf0] }
 0x2ce   : > { %v4262_v22 = vmax.f32 %v2984_v34, %v4166_v27  ;;  %v3035_v6 = vadd.f32 %v3034_v55, %v2996_v25  ;;  %v3073_v29 = vpop.f32.mrf.mxu3  ;;  %v6119_v36 = vld [vmem:[#allocation5 + $0x4c] sm:$0xf] }
 0x2cf   : > { %v5092_v28 = vor.u32 %v6119_v36, %v5089_v32  ;;  %v5057_v17 = vld [vmem:[#allocation5 + $0x28] sm:$0xf0] }
 0x2d0   : > { %v7149_v30 = vmax.f32 %v4462_v44, %v4262_v22  ;;  %v3074_v37 = vadd.f32 %v3073_v29, %v3035_v6  ;;  %v5633_v44 = vld [vmem:[#allocation5 + $0x4a8] sm:$0xf0]  ;;  %v5892_v29 = vor.u32 %v6319_v14, %v5889_v24  ;;  %v5060_v21 = vor.u32 %v6111_v11, %v5057_v17 }
 0x2d1   : > { %v3000_v33 = vpop.f32.mrf.mxu1  ;;  %v5636_v55 = vor.u32 %v6255_v19, %v5633_v44  ;;  %v5345_v22 = vld [vmem:[#allocation5 + $0x268] sm:$0xf0]  ;;  %v4272_v24 = vrot.slane %v7106_v5, 4 }
 0x2d2   : > { %v7151_v1 = vadd.f32 %v3112_v51, %v3074_v37  ;;  %v7153_v35 = vpop.f32.mrf.mxu0  ;;  %v6127_v51 = vld [vmem:[#allocation5 + $0x8c] sm:$0xf]  ;;  %v5348_v37 = vor.u32 %v6183_v9, %v5345_v22  ;;  %3420 = vmatpush.bf16.msrb.mxu0 %v5892_v29 }
 0x2d3   : > { %v5124_v20 = vor.u32 %v6127_v51, %v5121_v31  ;;  %v6247_v6 = vld [vmem:[#allocation5 + $0x44c] sm:$0xf]  ;;  %3381 = vmatpush.bf16.msra.mxu3 %v5636_v55  ;;  %v4273_v22 = vmax.f32 %v7106_v5, %v4272_v24 }
 0x2d4   : > { %3165 = vmatmul.bf16.gmra.mxu1 %v7029_v63  ;;  %v4079_v34 = vmul.f32 0.01, %v7151_v1  ;;  %3343 = vmatpush.bf16.msrb.mxu2 %v5348_v37  ;;  %v6303_v19 = vld [vmem:[#allocation5 + $0x60c] sm:$0xf] }
 0x2d5   : > { %3282 = vmatmul.bf16.gmra.mxu0 %v7032_v7  ;;  %v3036_v46 = vpop.f32.mrf.mxu2  ;;  %3303 = vmatpush.bf16.msrb.mxu1 %v5124_v20  ;;  %v5825_v44 = vld [vmem:[#allocation5 + $0x628] sm:$0xf0] }
 0x2d6   : > { %v3037_v50 = vadd.f32 %v3036_v46, %v2998_v42  ;;  %v3075_v53 = vpop.f32.mrf.mxu3  ;;  %v3001_v42 = vadd.f32 %v3000_v33, %v7144_v8  ;;  %v6311_v46 = vld [vmem:[#allocation5 + $0x64c] sm:$0xf]  ;;  %v4175_v51 = vmax.f32 %v7151_v1, %v4079_v34  ;;  %v5828_v34 = vor.u32 %v6303_v19, %v5825_v44 }
 0x2d7   : > { %v6175_v29 = vld [vmem:[#allocation5 + $0x20c] sm:$0xf] }
 0x2d8   : > { %v3076_v10 = vadd.f32 %v3075_v53, %v3037_v50  ;;  %v5860_v53 = vor.u32 %v6311_v46, %v5857_v48  ;;  %v5313_v37 = vld [vmem:[#allocation5 + $0x228] sm:$0xf0] }
 0x2d9   : > { %v7158_v47 = vpop.f32.mrf.mxu1  ;;  %3304 = vmatpush.bf16.msrb.mxu1 %v5092_v28  ;;  %v4274_v28 = vrot.slane %v4273_v22, 2 }
 0x2da   : > { %v3115_v25 = vadd.f32 %v3114_v61, %v3076_v10  ;;  %v7161_v27 = vpop.f32.mrf.mxu0  ;;  %3204 = vmatmul.bf16.gmra.mxu2 %v7037_v23  ;;  %v5604_v61 = vor.u32 %v6247_v6, %v5601_v62  ;;  %3421 = vmatpush.bf16.msrb.mxu0 %v5860_v53  ;;  %v6239_v62 = vld [vmem:[#allocation5 + $0x40c] sm:$0xf]  ;;  %v3003_v5 = vadd.f32 %v7158_v47, %v7144_v8 }
 0x2db   : > { %3243 = vmatmul.bf16.gmra.mxu3 %v7039_v3 }
 0x2dc   : > { %v4087_v40 = vmul.f32 0.01, %v3115_v25  ;;  %3382 = vmatpush.bf16.msra.mxu3 %v5604_v61 }
 0x2dd   : > { %v3039_v50 = vpop.f32.mrf.mxu2  ;;  %3305 = vmatpush.bf16.msrb.mxu1 %v5060_v21 }
 0x2de   : > { %v4183_v31 = vmax.f32 %v3115_v25, %v4087_v40  ;;  %v3040_v10 = vadd.f32 %v3039_v50, %v3001_v42  ;;  %v3078_v14 = vpop.f32.mrf.mxu3  ;;  %v5316_v42 = vor.u32 %v6175_v29, %v5313_v37  ;;  %v5569_v40 = vld [vmem:[#allocation5 + $0x428] sm:$0xf0]  ;;  %3422 = vmatpush.bf16.msrb.mxu0 %v5828_v34 }
 0x2e0   : > { %v4278_v33 = vmax.f32 %v4175_v51, %v4183_v31  ;;  %v3079_v20 = vadd.f32 %v3078_v14, %v3040_v10  ;;  %3344 = vmatpush.bf16.msrb.mxu2 %v5316_v42  ;;  %v4275_v10 = vmax.f32 %v4273_v22, %v4274_v28  ;;  %v6236_v22 = vld [vmem:[#allocation5 + $0x3ec] sm:$0xf0] }
 0x2e1   : > { %v3005_v9 = vpop.f32.mrf.mxu1  ;;  %v6300_v42 = vld [vmem:[#allocation5 + $0x5ec] sm:$0xf0] }
 0x2e2   : > { %v3118_v55 = vadd.f32 %v7153_v35, %v3079_v20  ;;  %v3122_v1 = vpop.f32.mrf.mxu0  ;;  %v5572_v35 = vor.u32 %v6239_v62, %v5569_v40  ;;  %v3006_v51 = vadd.f32 %v3005_v9, %v7144_v8  ;;  %v4276_v44 = vrot.slane %v4275_v10, 1  ;;  %v5543_v9 = vld [vmem:[#allocation5 + $0x3d0] sm:$0xf] }
 0x2e4   : > { %v4095_v25 = vmul.f32 0.01, %v3118_v55  ;;  %3170 = vmatmul.bf16.gmra.mxu1 %v7049_v26  ;;  %3383 = vmatpush.bf16.msra.mxu3 %v5572_v35 }
 0x2e5   : > { %3287 = vmatmul.bf16.gmra.mxu0 %v7052_v45  ;;  %v3041_v6 = vpop.f32.mrf.mxu2 }
 0x2e6   : > { %v4191_v36 = vmax.f32 %v3118_v55, %v4095_v25  ;;  %v3080_v32 = vpop.f32.mrf.mxu3  ;;  %v3042_v31 = vadd.f32 %v3041_v6, %v3003_v5  ;;  %v4277_v6 = vmax.f32 %v4275_v10, %v4276_v44 }
 0x2e8   : > { %v4279_v61 = vmax.f32 %v4278_v33, %v4191_v36  ;;  %v3081_v20 = vadd.f32 %v3080_v32, %v3042_v31  ;;  %v5544_v36 = vor.u32 %v6236_v22, %v5543_v9  ;;  %v5799_v32 = vld [vmem:[#allocation5 + $0x5d0] sm:$0xf] }
 0x2e9   : > { %v3007_v46 = vpop.f32.mrf.mxu1  ;;  %v5800_v28 = vor.u32 %v6300_v42, %v5799_v32 }
 0x2ea   : > { %v4280_v48 = vrot.slane %v4279_v61, 4  ;;  %v3124_v50 = vpop.f32.mrf.mxu0  ;;  %3209 = vmatmul.bf16.gmra.mxu2 %v7057_v56  ;;  %v3120_v29 = vadd.f32 %v7161_v27, %v3081_v20  ;;  %v3008_v37 = vadd.f32 %v3007_v46, %v7144_v8 }
 0x2eb   : > { %3248 = vmatmul.bf16.gmra.mxu3 %v7059_v59  ;;  %3493 = vmatpush.bf16.msra.mxu2 %v5544_v36 }
 0x2ec   : > { %v4281_v53 = vmax.f32 %v4279_v61, %v4280_v48  ;;  %v4103_v46 = vmul.f32 0.01, %v3120_v29  ;;  %3532 = vmatpush.bf16.msrb.mxu3 %v5800_v28  ;;  %v4336_v48 = vrot.slane %v7119_v43, 4 }
 0x2ed   : > { %v3044_v14 = vpop.f32.mrf.mxu2 }
 0x2ee   : > { %v4282_v11 = vrot.slane %v4281_v53, 2  ;;  %v3045_v17 = vadd.f32 %v3044_v14, %v3006_v51  ;;  %v3083_v19 = vpop.f32.mrf.mxu3  ;;  %v4199_v14 = vmax.f32 %v3120_v29, %v4103_v46 }
 0x2f0   : > { %v4283_v33 = vmax.f32 %v4281_v53, %v4282_v11  ;;  %v3084_v21 = vadd.f32 %v3083_v19, %v3045_v17  ;;  %v4337_v19 = vmax.f32 %v7119_v43, %v4336_v48 }
 0x2f1   : > { %v3010_v47 = vpop.f32.mrf.mxu1 }
 0x2f2   : > { %v4284_v24 = vrot.slane %v4283_v33, 1  ;;  %v3123_v55 = vadd.f32 %v3122_v1, %v3084_v21  ;;  %v3127_v34 = vpop.f32.mrf.mxu0  ;;  %v3011_v11 = vadd.f32 %v3010_v47, %v7144_v8 }
 0x2f4   : > { %v4285_v25 = vmax.f32 %v4283_v33, %v4284_v24  ;;  %3175 = vmatmul.bf16.gmra.mxu1 %v7069_v38  ;;  %v4111_v1 = vmul.f32 0.01, %v3123_v55 }
 0x2f5   : > { %3292 = vmatmul.bf16.gmra.mxu0 %v7072_v39  ;;  %v3046_v62 = vpop.f32.mrf.mxu2 }
 0x2f6   : > { %v4562_v40 = vrot.slane %v4285_v25, 4  ;;  %v3047_v35 = vadd.f32 %v3046_v62, %v3008_v37  ;;  %v3085_v61 = vpop.f32.mrf.mxu3  ;;  %v4207_v51 = vmax.f32 %v3123_v55, %v4111_v1  ;;  %v4338_v37 = vrot.slane %v4337_v19, 2 }
 0x2f8   : > { %v7182_v27 = vsel %vm4578_vm1, %v4277_v6, %v4562_v40  ;;  %v3086_v5 = vadd.f32 %v3085_v61, %v3047_v35  ;;  %v4342_v20 = vmax.f32 %v4199_v14, %v4207_v51  ;;  %v4339_v47 = vmax.f32 %v4337_v19, %v4338_v37  ;;  %v6055_v51 = vld [vmem:[#allocation5 + $0x7d0] sm:$0xf] }
 0x2f9   : > { %v3012_v53 = vpop.f32.mrf.mxu1  ;;  %v6364_v19 = vld [vmem:[#allocation5 + $0x7ec] sm:$0xf0] }
 0x2fa   : > { %v3125_v31 = vadd.f32 %v3124_v50, %v3086_v5  ;;  %v3129_v10 = vpop.f32.mrf.mxu0  ;;  %3214 = vmatmul.bf16.gmra.mxu2 %v7077_v41  ;;  %v3013_v29 = vadd.f32 %v3012_v53, %v7144_v8  ;;  %v4340_v35 = vrot.slane %v4339_v47, 1  ;;  %v6172_v53 = vld [vmem:[#allocation5 + $0x1ec] sm:$0xf0] }
 0x2fb   : > { %3253 = vmatmul.bf16.gmra.mxu3 %v7079_v2 }
 0x2fc   : > { %v4119_v17 = vmul.f32 0.01, %v3125_v31 }
 0x2fd   : > { %v3049_v33 = vpop.f32.mrf.mxu2 }
 0x2fe   : > { %v4215_v21 = vmax.f32 %v3125_v31, %v4119_v17  ;;  %v3050_v44 = vadd.f32 %v3049_v33, %v3011_v11  ;;  %v3088_v24 = vpop.f32.mrf.mxu3  ;;  %v5511_v33 = vld [vmem:[#allocation5 + $0x390] sm:$0xf] }
 0x300   : > { %v4343_v25 = vmax.f32 %v4342_v20, %v4215_v21  ;;  %v3089_v9 = vadd.f32 %v3088_v24, %v3050_v44  ;;  %v4341_v20 = vmax.f32 %v4339_v47, %v4340_v35  ;;  %v6056_v21 = vor.u32 %v6364_v19, %v6055_v51  ;;  %v6228_v44 = vld [vmem:[#allocation5 + $0x3ac] sm:$0xf0] }
 0x301   : > { %v3015_v55 = vpop.f32.mrf.mxu1  ;;  %v5767_v24 = vld [vmem:[#allocation5 + $0x590] sm:$0xf]  ;;  %v4400_v19 = vrot.slane %v7135_v52, 4 }
 0x302   : > { %v4344_v50 = vrot.slane %v4343_v25, 4  ;;  %v7189_v22 = vpop.f32.mrf.mxu0  ;;  %v7194_v36 = vadd.f32 %v3127_v34, %v3089_v9  ;;  %v5287_v34 = vld [vmem:[#allocation5 + $0x1d0] sm:$0xf]  ;;  %v3016_v14 = vadd.f32 %v3015_v55, %v7144_v8  ;;  %3571 = vmatpush.bf16.msra.mxu0 %v6056_v21 }
 0x303   : > { %v5288_v17 = vor.u32 %v6172_v53, %v5287_v34  ;;  %v5735_v34 = vld [vmem:[#allocation5 + $0x550] sm:$0xf] }
 0x304   : > { %v4345_v6 = vmax.f32 %v4343_v25, %v4344_v50  ;;  %3306 = vmatmul.bf16.vlgmr.msrb.gmra.mxu1 %v6969_v60  ;;  %v7199_v46 = vmul.f32 0.01, %v7194_v36  ;;  %v6292_v25 = vld [vmem:[#allocation5 + $0x5ac] sm:$0xf0] }
 0x305   : > { %3423 = vmatmul.bf16.vlgmr.msrb.gmra.mxu0 %v6972_v0  ;;  %v3051_v43 = vpop.f32.mrf.mxu2  ;;  %3454 = vmatpush.bf16.msra.mxu1 %v5288_v17  ;;  %v5768_v55 = vor.u32 %v6292_v25, %v5767_v24  ;;  %v6284_v53 = vld [vmem:[#allocation5 + $0x56c] sm:$0xf0] }
 0x306   : > { %v4346_v62 = vrot.slane %v4345_v6, 2  ;;  %v3052_v32 = vadd.f32 %v3051_v43, %v3013_v29  ;;  %v3090_v42 = vpop.f32.mrf.mxu3  ;;  %v5255_v29 = vld [vmem:[#allocation5 + $0x190] sm:$0xf]  ;;  %v5736_v17 = vor.u32 %v6284_v53, %v5735_v34  ;;  %v4223_v24 = vmax.f32 %v7194_v36, %v7199_v46 }
 0x307   : > { %v6164_v43 = vld [vmem:[#allocation5 + $0x1ac] sm:$0xf0]  ;;  %3533 = vmatpush.bf16.msrb.mxu3 %v5768_v55 }
 0x308   : > { %v4347_v40 = vmax.f32 %v4345_v6, %v4346_v62  ;;  %v3091_v1 = vadd.f32 %v3090_v42, %v3052_v32  ;;  %v5512_v6 = vor.u32 %v6228_v44, %v5511_v33  ;;  %v5256_v62 = vor.u32 %v6164_v43, %v5255_v29  ;;  %v6023_v32 = vld [vmem:[#allocation5 + $0x790] sm:$0xf] }
 0x309   : > { %v7196_v61 = vpop.f32.mrf.mxu1  ;;  %v6356_v42 = vld [vmem:[#allocation5 + $0x7ac] sm:$0xf0] }
 0x30a   : > { %v4348_v28 = vrot.slane %v4347_v40, 1  ;;  %v7201_v5 = vadd.f32 %v3129_v10, %v3091_v1  ;;  %v7203_v48 = vpop.f32.mrf.mxu0  ;;  %3345 = vmatmul.bf16.vlgmr.msrb.gmra.mxu2 %v6977_v4  ;;  %v6024_v35 = vor.u32 %v6356_v42, %v6023_v32  ;;  %3455 = vmatpush.bf16.msra.mxu1 %v5256_v62  ;;  %v5223_v34 = vld [vmem:[#allocation5 + $0x150] sm:$0xf] }
 0x30b   : > { %3384 = vmatmul.bf16.vlgmr.msra.gmra.mxu3 %v6979_v18  ;;  %3494 = vmatpush.bf16.msra.mxu2 %v5512_v6  ;;  %v6156_v53 = vld [vmem:[#allocation5 + $0x16c] sm:$0xf0] }
 0x30c   : > { %v4349_v31 = vmax.f32 %v4347_v40, %v4348_v28  ;;  %v4135_v11 = vmul.f32 0.01, %v7201_v5  ;;  %v5479_v40 = vld [vmem:[#allocation5 + $0x350] sm:$0xf]  ;;  %3572 = vmatpush.bf16.msra.mxu0 %v6024_v35  ;;  %3534 = vmatpush.bf16.msrb.mxu3 %v5736_v17 }
 0x30d   : > { %v3054_v10 = vpop.f32.mrf.mxu2  ;;  %v6220_v28 = vld [vmem:[#allocation5 + $0x36c] sm:$0xf0] }
 0x30e   : > { %v4566_v37 = vrot.slane %v4349_v31, 4  ;;  %v3055_v50 = vadd.f32 %v3054_v10, %v3016_v14  ;;  %v3093_v9 = vpop.f32.mrf.mxu3  ;;  %v5480_v14 = vor.u32 %v6220_v28, %v5479_v40  ;;  %v4231_v33 = vmax.f32 %v7201_v5, %v4135_v11 }
 0x310   : > { %v4583_v47 = vsel %vm4578_vm1, %v4341_v20, %v4566_v37  ;;  %v3094_v1 = vadd.f32 %v3093_v9, %v3055_v50  ;;  %3495 = vmatpush.bf16.msra.mxu2 %v5480_v14  ;;  %v4406_v11 = vmax.f32 %v4223_v24, %v4231_v33  ;;  %v3018_v9 = vadd.f32 %v7196_v61, %v7144_v8 }
 0x311   : > { %v4595_v51 = vrot.slane %v4583_v47, 7  ;;  %v3020_v31 = vpop.f32.mrf.mxu1 }
 0x312   : > { %v3133_v10 = vadd.f32 %v7189_v22, %v3094_v1  ;;  %v3137_v21 = vpop.f32.mrf.mxu0  ;;  %v4401_v22 = vmax.f32 %v7135_v52, %v4400_v19  ;;  %v3021_v52 = vadd.f32 %v3020_v31, %v7144_v8  ;;  %v5224_v31 = vor.u32 %v6156_v53, %v5223_v34 }
 0x313   : > { %v4597_v20 = vsel %vm4596_vm2, %v4595_v51, %v7182_v27 }
 0x314   : > { %v7216_v44 = vsel %vm4598_vm3, %v4595_v51, %v4597_v20  ;;  %v4143_v25 = vmul.f32 0.01, %v3133_v10  ;;  %3311 = vmatmul.bf16.gmra.mxu1 %v6989_v54  ;;  %v4402_v29 = vrot.slane %v4401_v22, 2  ;;  %v5991_v51 = vld [vmem:[#allocation5 + $0x750] sm:$0xf] }
 0x315   : > { %3428 = vmatmul.bf16.gmra.mxu0 %v6992_v58  ;;  %v3056_v5 = vpop.f32.mrf.mxu2  ;;  %v5447_v20 = vld [vmem:[#allocation5 + $0x310] sm:$0xf]  ;;  %3456 = vmatpush.bf16.msra.mxu1 %v5224_v31 }
 0x316   : > { %v4239_v37 = vmax.f32 %v3133_v10, %v4143_v25  ;;  %v3095_v27 = vpop.f32.mrf.mxu3  ;;  %v3057_v43 = vadd.f32 %v3056_v5, %v3018_v9  ;;  %v4403_v32 = vmax.f32 %v4401_v22, %v4402_v29  ;;  %v6348_v10 = vld [vmem:[#allocation5 + $0x76c] sm:$0xf0] }
 0x317   : > { %v5992_v5 = vor.u32 %v6348_v10, %v5991_v51  ;;  %v6212_v22 = vld [vmem:[#allocation5 + $0x32c] sm:$0xf0]  ;;  %v4464_v10 = vrot.slane %v7149_v30, 4 }
 0x318   : > { %v4407_v50 = vmax.f32 %v4406_v11, %v4239_v37  ;;  %v3096_v1 = vadd.f32 %v3095_v27, %v3057_v43  ;;  %v4404_v14 = vrot.slane %v4403_v32, 1  ;;  %v5703_v11 = vld [vmem:[#allocation5 + $0x510] sm:$0xf] }
 0x319   : > { %v3022_v6 = vpop.f32.mrf.mxu1  ;;  %v6276_v37 = vld [vmem:[#allocation5 + $0x52c] sm:$0xf0]  ;;  %3573 = vmatpush.bf16.msra.mxu0 %v5992_v5 }
 0x31a   : > { %v4408_v36 = vrot.slane %v4407_v50, 4  ;;  %v7225_v46 = vpop.f32.mrf.mxu0  ;;  %3350 = vmatmul.bf16.gmra.mxu2 %v6997_v12  ;;  %v3135_v24 = vadd.f32 %v7203_v48, %v3096_v1  ;;  %v3023_v25 = vadd.f32 %v3022_v6, %v7144_v8  ;;  %v5704_v9 = vor.u32 %v6276_v37, %v5703_v11  ;;  %v5191_v29 = vld [vmem:[#allocation5 + $0x110] sm:$0xf] }
 0x31b   : > { %3389 = vmatmul.bf16.gmra.mxu3 %v6999_v13  ;;  %v6340_v8 = vld [vmem:[#allocation5 + $0x72c] sm:$0xf0] }
 0x31c   : > { %v4409_v55 = vmax.f32 %v4407_v50, %v4408_v36  ;;  %v6148_v36 = vld [vmem:[#allocation5 + $0x12c] sm:$0xf0]  ;;  %3535 = vmatpush.bf16.msrb.mxu3 %v5704_v9 }
 0x31d   : > { %v3059_v62 = vpop.f32.mrf.mxu2  ;;  %v5192_v48 = vor.u32 %v6148_v36, %v5191_v29  ;;  %v5415_v6 = vld [vmem:[#allocation5 + $0x2d0] sm:$0xf] }
 0x31e   : > { %v4410_v42 = vrot.slane %v4409_v55, 2  ;;  %v3060_v40 = vadd.f32 %v3059_v62, %v3021_v52  ;;  %v3098_v47 = vpop.f32.mrf.mxu3  ;;  %v4405_v52 = vmax.f32 %v4403_v32, %v4404_v14  ;;  %v6204_v1 = vld [vmem:[#allocation5 + $0x2ec] sm:$0xf0]  ;;  %v4151_v14 = vmul.f32 0.01, %v3135_v24 }
 0x31f   : > { %v5416_v53 = vor.u32 %v6204_v1, %v5415_v6  ;;  %v6268_v32 = vld [vmem:[#allocation5 + $0x4ec] sm:$0xf0]  ;;  %3457 = vmatpush.bf16.msra.mxu1 %v5192_v48 }
 0x320   : > { %v4411_v61 = vmax.f32 %v4409_v55, %v4410_v42  ;;  %v3099_v35 = vadd.f32 %v3098_v47, %v3060_v40  ;;  %v5959_v55 = vld [vmem:[#allocation5 + $0x710] sm:$0xf] }
 0x321   : > { %v7230_v28 = vpop.f32.mrf.mxu1  ;;  %v5960_v47 = vor.u32 %v6340_v8, %v5959_v55 }
 0x322   : > { %v4412_v17 = vrot.slane %v4411_v61, 1  ;;  %v7232_v19 = vadd.f32 %v3137_v21, %v3099_v35  ;;  %v7234_v33 = vpop.f32.mrf.mxu0  ;;  %v5448_v21 = vor.u32 %v6212_v22, %v5447_v20  ;;  %v7244_v35 = vld [vmem:[%s7690_s8] sm:$0xff] }
 0x323   : > { %v7247_v34 = vperm.slane %v7244_v35, 2  ;;  %3574 = vmatpush.bf16.msra.mxu0 %v5960_v47 }
 0x324   : > { %v4413_v27 = vmax.f32 %v4411_v61, %v4412_v17  ;;  %v4159_v50 = vmul.f32 0.01, %v7232_v19  ;;  %3316 = vmatmul.bf16.gmra.mxu1 %v7009_v49  ;;  %3496 = vmatpush.bf16.msra.mxu2 %v5448_v21  ;;  %v5671_v61 = vld [vmem:[#allocation5 + $0x4d0] sm:$0xf] }
 0x325   : > { %3433 = vmatmul.bf16.gmra.mxu0 %v7012_v57  ;;  %v3061_v43 = vpop.f32.mrf.mxu2  ;;  %v5672_v31 = vor.u32 %v6268_v32, %v5671_v61  ;;  %v3152_v21 = vadd.f32 %v7230_v28, %v7247_v34  ;;  %v6332_v61 = vld [vmem:[#allocation5 + $0x6ec] sm:$0xf0] }
 0x326   : > { %v4570_v62 = vrot.slane %v4413_v27, 4  ;;  %v3062_v42 = vadd.f32 %v3061_v43, %v3023_v25  ;;  %v3100_v40 = vpop.f32.mrf.mxu3  ;;  %v4255_v5 = vmax.f32 %v7232_v19, %v4159_v50  ;;  %v4247_v27 = vmax.f32 %v3135_v24, %v4151_v14 }
 0x327   : > { %3536 = vmatpush.bf16.msrb.mxu3 %v5672_v31  ;;  %v6260_v31 = vld [vmem:[#allocation5 + $0x4ac] sm:$0xf0] }
 0x328   : > { %v4587_v51 = vsel %vm4578_vm1, %v4405_v52, %v4570_v62  ;;  %v3101_v17 = vadd.f32 %v3100_v40, %v3062_v42  ;;  %3497 = vmatpush.bf16.msra.mxu2 %v5416_v53  ;;  %v4470_v29 = vmax.f32 %v4247_v27, %v4255_v5  ;;  %v5159_v62 = vld [vmem:[#allocation5 + $0xd0] sm:$0xf] }
 0x329   : > { %v4600_v20 = vrot.slane %v4587_v51, 6  ;;  %v3153_v25 = vpop.f32.mrf.mxu1  ;;  %v6140_v42 = vld [vmem:[#allocation5 + $0xec] sm:$0xf0] }
 0x32a   : > { %v3140_v22 = vadd.f32 %v7225_v46, %v3101_v17  ;;  %v7253_v11 = vpop.f32.mrf.mxu0  ;;  %3355 = vmatmul.bf16.gmra.mxu2 %v7017_v15  ;;  %v4465_v46 = vmax.f32 %v7149_v30, %v4464_v10  ;;  %v5927_v40 = vld [vmem:[#allocation5 + $0x6d0] sm:$0xf]  ;;  %v3154_v30 = vadd.f32 %v3153_v25, %v7247_v34  ;;  %v5160_v1 = vor.u32 %v6140_v42, %v5159_v62 }
 0x32b   : > { %v4602_v37 = vsel %vm4601_vm4, %v4600_v20, %v7216_v44  ;;  %3394 = vmatmul.bf16.gmra.mxu3 %v7019_v16  ;;  %v5383_v53 = vld [vmem:[#allocation5 + $0x290] sm:$0xf]  ;;  %v5928_v14 = vor.u32 %v6332_v61, %v5927_v40 }
 0x32c   : > { %v4167_v9 = vmul.f32 0.01, %v3140_v22  ;;  %v7262_v19 = vsel %vm4603_vm5, %v4600_v20, %v4602_v37  ;;  %v4466_v8 = vrot.slane %v4465_v46, 2  ;;  %v5639_v17 = vld [vmem:[#allocation5 + $0x490] sm:$0xf]  ;;  %3458 = vmatpush.bf16.msra.mxu1 %v5160_v1 }
 0x32d   : > { %v3190_v50 = vpop.f32.mrf.mxu2  ;;  %v5127_v37 = vld [vmem:[#allocation5 + $0x90] sm:$0xf]  ;;  %3575 = vmatpush.bf16.msra.mxu0 %v5928_v14  ;;  %v5640_v27 = vor.u32 %v6260_v31, %v5639_v17 }
 0x32e   : > { %v4263_v36 = vmax.f32 %v3140_v22, %v4167_v9  ;;  %v3191_v43 = vadd.f32 %v3190_v50, %v3152_v21  ;;  %v3229_v48 = vpop.f32.mrf.mxu3  ;;  %v4467_v32 = vmax.f32 %v4465_v46, %v4466_v8  ;;  %v6132_v25 = vld [vmem:[#allocation5 + $0xac] sm:$0xf0] }
 0x32f   : > { %v5128_v21 = vor.u32 %v6132_v25, %v5127_v37  ;;  %v5895_v9 = vld [vmem:[#allocation5 + $0x690] sm:$0xf]  ;;  %3537 = vmatpush.bf16.msrb.mxu3 %v5640_v27 }
 0x330   : > { %v4471_v44 = vmax.f32 %v4470_v29, %v4263_v36  ;;  %v3230_v55 = vadd.f32 %v3229_v48, %v3191_v43  ;;  %v6324_v50 = vld [vmem:[#allocation5 + $0x6ac] sm:$0xf0] }
 0x331   : > { %v3156_v6 = vpop.f32.mrf.mxu1  ;;  %v5896_v36 = vor.u32 %v6324_v50, %v5895_v9  ;;  %v5351_v43 = vld [vmem:[#allocation5 + $0x250] sm:$0xf]  ;;  %3459 = vmatpush.bf16.msra.mxu1 %v5128_v21 }
 0x332   : > { %v4472_v24 = vrot.slane %v4471_v44, 4  ;;  %v7266_v52 = vadd.f32 %v7234_v33, %v3230_v55  ;;  %v7268_v28 = vpop.f32.mrf.mxu0  ;;  %v6196_v33 = vld [vmem:[#allocation5 + $0x2ac] sm:$0xf0]  ;;  %v4468_v55 = vrot.slane %v4467_v32, 1 }
 0x333   : > { %v5384_v22 = vor.u32 %v6196_v33, %v5383_v53  ;;  %v6188_v48 = vld [vmem:[#allocation5 + $0x26c] sm:$0xf0]  ;;  %3576 = vmatpush.bf16.msra.mxu0 %v5896_v36  ;;  %v3157_v33 = vadd.f32 %v3156_v6, %v7247_v34 }
 0x334   : > { %v4473_v47 = vmax.f32 %v4471_v44, %v4472_v24  ;;  %3321 = vmatmul.bf16.gmra.mxu1 %v7029_v63  ;;  %v5607_v44 = vld [vmem:[#allocation5 + $0x450] sm:$0xf]  ;;  %v5352_v24 = vor.u32 %v6188_v48, %v5351_v43  ;;  %v4080_v40 = vmul.f32 0.01, %v7266_v52 }
 0x335   : > { %3438 = vmatmul.bf16.gmra.mxu0 %v7032_v7  ;;  %v3192_v51 = vpop.f32.mrf.mxu2  ;;  %3498 = vmatpush.bf16.msra.mxu2 %v5384_v22  ;;  %v6252_v62 = vld [vmem:[#allocation5 + $0x46c] sm:$0xf0] }
 0x336   : > { %v4474_v10 = vrot.slane %v4473_v47, 2  ;;  %v3193_v20 = vadd.f32 %v3192_v51, %v3154_v30  ;;  %v3231_v5 = vpop.f32.mrf.mxu3  ;;  %v5095_v61 = vld [vmem:[#allocation5 + $0x50] sm:$0xf]  ;;  %v4176_v37 = vmax.f32 %v7266_v52, %v4080_v40 }
 0x337   : > { %v6124_v53 = vld [vmem:[#allocation5 + $0x6c] sm:$0xf0] }
 0x338   : > { %v4475_v46 = vmax.f32 %v4473_v47, %v4474_v10  ;;  %v3232_v29 = vadd.f32 %v3231_v5, %v3193_v20  ;;  %v5608_v47 = vor.u32 %v6252_v62, %v5607_v44  ;;  %v5863_v51 = vld [vmem:[#allocation5 + $0x650] sm:$0xf]  ;;  %v4469_v10 = vmax.f32 %v4467_v32, %v4468_v55 }
 0x339   : > { %v3158_v8 = vpop.f32.mrf.mxu1  ;;  %3499 = vmatpush.bf16.msra.mxu2 %v5352_v24  ;;  %v6316_v31 = vld [vmem:[#allocation5 + $0x66c] sm:$0xf0] }
 0x33a   : > { %v4476_v42 = vrot.slane %v4475_v46, 1  ;;  %v3271_v30 = vadd.f32 %v7253_v11, %v3232_v29  ;;  %v7275_v1 = vpop.f32.mrf.mxu0  ;;  %3360 = vmatmul.bf16.gmra.mxu2 %v7037_v23  ;;  %v5096_v11 = vor.u32 %v6124_v53, %v5095_v61  ;;  %3538 = vmatpush.bf16.msrb.mxu3 %v5608_v47  ;;  %v5864_v5 = vor.u32 %v6316_v31, %v5863_v51  ;;  %v5063_v6 = vld [vmem:[#allocation5 + $0x10] sm:$0xf] }
 0x33b   : > { %3399 = vmatmul.bf16.gmra.mxu3 %v7039_v3  ;;  %v6116_v9 = vld [vmem:[#allocation5 + $0x2c] sm:$0xf0] }
 0x33c   : > { %v4477_v14 = vmax.f32 %v4475_v46, %v4476_v42  ;;  %v4088_v17 = vmul.f32 0.01, %v3271_v30  ;;  %3460 = vmatpush.bf16.msra.mxu1 %v5096_v11  ;;  %3577 = vmatpush.bf16.msra.mxu0 %v5864_v5  ;;  %v5831_v50 = vld [vmem:[#allocation5 + $0x610] sm:$0xf]  ;;  %v5064_v36 = vor.u32 %v6116_v9, %v5063_v6  ;;  %v3159_v42 = vadd.f32 %v3158_v8, %v7247_v34  ;;  %v6232_v6 = vld [vmem:[#allocation5 + $0x3d4] sm:$0xf] }
 0x33d   : > { %v3195_v20 = vpop.f32.mrf.mxu2  ;;  %v6308_v43 = vld [vmem:[#allocation5 + $0x62c] sm:$0xf0]  ;;  %v5545_v9 = vld [vmem:[#allocation5 + $0x3f0] sm:$0xf0] }
 0x33e   : > { %v4574_v22 = vrot.slane %v4477_v14, 4  ;;  %v4184_v25 = vmax.f32 %v3271_v30, %v4088_v17  ;;  %v3196_v27 = vadd.f32 %v3195_v20, %v3157_v33  ;;  %v3234_v21 = vpop.f32.mrf.mxu3  ;;  %v5832_v55 = vor.u32 %v6308_v43, %v5831_v50  ;;  %v5319_v61 = vld [vmem:[#allocation5 + $0x210] sm:$0xf]  ;;  %v6296_v50 = vld [vmem:[#allocation5 + $0x5d4] sm:$0xf] }
 0x33f   : > { %v6180_v53 = vld [vmem:[#allocation5 + $0x22c] sm:$0xf0] }
 0x340   : > { %v4591_v46 = vsel %vm4578_vm1, %v4469_v10, %v4574_v22  ;;  %v4286_v32 = vmax.f32 %v4176_v37, %v4184_v25  ;;  %v3235_v29 = vadd.f32 %v3234_v21, %v3196_v27  ;;  %3461 = vmatpush.bf16.msra.mxu1 %v5064_v36  ;;  %3578 = vmatpush.bf16.msra.mxu0 %v5832_v55  ;;  %v5575_v51 = vld [vmem:[#allocation5 + $0x410] sm:$0xf] }
 0x341   : > { %v4605_v48 = vrot.slane %v4591_v46, 5  ;;  %v3161_v44 = vpop.f32.mrf.mxu1  ;;  %v5320_v33 = vor.u32 %v6180_v53, %v5319_v61  ;;  %v6244_v8 = vld [vmem:[#allocation5 + $0x42c] sm:$0xf0] }
 0x342   : > { %v3274_v52 = vadd.f32 %v7268_v28, %v3235_v29  ;;  %v3278_v24 = vpop.f32.mrf.mxu0  ;;  %v5576_v17 = vor.u32 %v6244_v8, %v5575_v51  ;;  %v3162_v22 = vadd.f32 %v3161_v44, %v7247_v34  ;;  %v5801_v29 = vld [vmem:[#allocation5 + $0x5f0] sm:$0xf0] }
 0x343   : > { %v4607_v62 = vsel %vm4606_vm6, %v4605_v48, %v7262_v19  ;;  %3500 = vmatpush.bf16.msra.mxu2 %v5320_v33 }
 0x344   : > { %v4096_v40 = vmul.f32 0.01, %v3274_v52  ;;  %3326 = vmatmul.bf16.gmra.mxu1 %v7049_v26  ;;  %v4609_v30 = vsel %vm4608_vm7, %v4605_v48, %v4607_v62  ;;  %3539 = vmatpush.bf16.msrb.mxu3 %v5576_v17  ;;  %v5804_v48 = vor.u32 %v6296_v50, %v5801_v29  ;;  %v6057_v50 = vld [vmem:[#allocation5 + $0x7f0] sm:$0xf0] }
 0x345   : > { %3443 = vmatmul.bf16.gmra.mxu0 %v7052_v45  ;;  %v3197_v47 = vpop.f32.mrf.mxu2  ;;  %4641 = vst [vmem:[%s7292_s23] sm:$0xff] %v4609_v30 }
 0x346   : > { %v4192_v28 = vmax.f32 %v3274_v52, %v4096_v40  ;;  %v3198_v14 = vadd.f32 %v3197_v47, %v3159_v42  ;;  %v3236_v19 = vpop.f32.mrf.mxu3 }
 0x348   : > { %v7295_v11 = vmax.f32 %v4286_v32, %v4192_v28  ;;  %v3237_v31 = vadd.f32 %v3236_v19, %v3198_v14  ;;  %v5548_v32 = vor.u32 %v6232_v6, %v5545_v9  ;;  %3688 = vmatpush.bf16.msra.mxu3 %v5804_v48  ;;  %v6360_v9 = vld [vmem:[#allocation5 + $0x7d4] sm:$0xf] }
 0x349   : > { %v3163_v10 = vpop.f32.mrf.mxu1  ;;  %v6288_v48 = vld [vmem:[#allocation5 + $0x594] sm:$0xf] }
 0x34a   : > { %v3276_v20 = vadd.f32 %v7275_v1, %v3237_v31  ;;  %v3280_v5 = vpop.f32.mrf.mxu0  ;;  %3365 = vmatmul.bf16.gmra.mxu2 %v7057_v56  ;;  %v3164_v55 = vadd.f32 %v3163_v10, %v7247_v34 }
 0x34b   : > { %3404 = vmatmul.bf16.gmra.mxu3 %v7059_v59  ;;  %3649 = vmatpush.bf16.msrb.mxu2 %v5548_v32 }
 0x34c   : > { %v4104_v36 = vmul.f32 0.01, %v3276_v20 }
 0x34d   : > { %v3200_v37 = vpop.f32.mrf.mxu2 }
 0x34e   : > { %v3201_v25 = vadd.f32 %v3200_v37, %v3162_v22  ;;  %v3239_v27 = vpop.f32.mrf.mxu3  ;;  %v4200_v62 = vmax.f32 %v3276_v20, %v4104_v36  ;;  %v6060_v36 = vor.u32 %v6360_v9, %v6057_v50 }
 0x350   : > { %v3240_v21 = vadd.f32 %v3239_v27, %v3201_v25  ;;  %v6168_v25 = vld [vmem:[#allocation5 + $0x1d4] sm:$0xf]  ;;  %3727 = vmatpush.bf16.msrb.mxu0 %v6060_v36 }
 0x351   : > { %v3166_v46 = vpop.f32.mrf.mxu1  ;;  %v5289_v27 = vld [vmem:[#allocation5 + $0x1f0] sm:$0xf0] }
 0x352   : > { %v3279_v43 = vadd.f32 %v3278_v24, %v3240_v21  ;;  %v3283_v1 = vpop.f32.mrf.mxu0  ;;  %v3167_v28 = vadd.f32 %v3166_v46, %v7247_v34  ;;  %v5292_v6 = vor.u32 %v6168_v25, %v5289_v27  ;;  %v6224_v46 = vld [vmem:[#allocation5 + $0x394] sm:$0xf] }
 0x354   : > { %v4112_v52 = vmul.f32 0.01, %v3279_v43  ;;  %3331 = vmatmul.bf16.gmra.mxu1 %v7069_v38 }
 0x355   : > { %3448 = vmatmul.bf16.gmra.mxu0 %v7072_v39  ;;  %v3202_v44 = vpop.f32.mrf.mxu2  ;;  %3610 = vmatpush.bf16.msrb.mxu1 %v5292_v6 }
 0x356   : > { %v4208_v42 = vmax.f32 %v3279_v43, %v4112_v52  ;;  %v3203_v40 = vadd.f32 %v3202_v44, %v3164_v55  ;;  %v3241_v30 = vpop.f32.mrf.mxu3  ;;  %v5513_v43 = vld [vmem:[#allocation5 + $0x3b0] sm:$0xf0] }
 0x357   : > { %v5769_v55 = vld [vmem:[#allocation5 + $0x5b0] sm:$0xf0] }
 0x358   : > { %v4350_v47 = vmax.f32 %v4200_v62, %v4208_v42  ;;  %v3242_v61 = vadd.f32 %v3241_v30, %v3203_v40  ;;  %v6160_v52 = vld [vmem:[#allocation5 + $0x194] sm:$0xf]  ;;  %v5772_v42 = vor.u32 %v6288_v48, %v5769_v55 }
 0x359   : > { %v3168_v53 = vpop.f32.mrf.mxu1  ;;  %v5257_v44 = vld [vmem:[#allocation5 + $0x1b0] sm:$0xf0] }
 0x35a   : > { %v3281_v24 = vadd.f32 %v3280_v5, %v3242_v61  ;;  %v3285_v51 = vpop.f32.mrf.mxu0  ;;  %3370 = vmatmul.bf16.gmra.mxu2 %v7077_v41  ;;  %v3169_v5 = vadd.f32 %v3168_v53, %v7247_v34  ;;  %v5260_v40 = vor.u32 %v6160_v52, %v5257_v44  ;;  %v6352_v30 = vld [vmem:[#allocation5 + $0x794] sm:$0xf]  ;;  %3689 = vmatpush.bf16.msra.mxu3 %v5772_v42 }
 0x35b   : > { %3409 = vmatmul.bf16.gmra.mxu3 %v7079_v2  ;;  %v6216_v61 = vld [vmem:[#allocation5 + $0x354] sm:$0xf] }
 0x35c   : > { %v4120_v14 = vmul.f32 0.01, %v3281_v24  ;;  %3611 = vmatpush.bf16.msrb.mxu1 %v5260_v40 }
 0x35d   : > { %v3205_v19 = vpop.f32.mrf.mxu2 }
 0x35e   : > { %v4216_v33 = vmax.f32 %v3281_v24, %v4120_v14  ;;  %v3206_v8 = vadd.f32 %v3205_v19, %v3167_v28  ;;  %v3244_v17 = vpop.f32.mrf.mxu3  ;;  %v5481_v28 = vld [vmem:[#allocation5 + $0x370] sm:$0xf0] }
 0x35f   : > { %v6280_v14 = vld [vmem:[#allocation5 + $0x554] sm:$0xf] }
 0x360   : > { %v7307_v31 = vmax.f32 %v4350_v47, %v4216_v33  ;;  %v3245_v10 = vadd.f32 %v3244_v17, %v3206_v8  ;;  %v6025_v47 = vld [vmem:[#allocation5 + $0x7b0] sm:$0xf0] }
 0x361   : > { %v3171_v20 = vpop.f32.mrf.mxu1  ;;  %v6028_v24 = vor.u32 %v6352_v30, %v6025_v47  ;;  %v5737_v19 = vld [vmem:[#allocation5 + $0x570] sm:$0xf0] }
 0x362   : > { %v3284_v22 = vadd.f32 %v3283_v1, %v3245_v10  ;;  %v3288_v37 = vpop.f32.mrf.mxu0  ;;  %v5516_v1 = vor.u32 %v6224_v46, %v5513_v43  ;;  %v5484_v10 = vor.u32 %v6216_v61, %v5481_v28  ;;  %v3172_v25 = vadd.f32 %v3171_v20, %v7247_v34  ;;  %v6152_v47 = vld [vmem:[#allocation5 + $0x154] sm:$0xf] }
 0x363   : > { %3728 = vmatpush.bf16.msrb.mxu0 %v6028_v24  ;;  %v5225_v61 = vld [vmem:[#allocation5 + $0x170] sm:$0xf0] }
 0x364   : > { %3462 = vmatmul.bf16.vlgmr.msra.gmra.mxu1 %v6969_v60  ;;  %3650 = vmatpush.bf16.msrb.mxu2 %v5516_v1  ;;  %v4128_v33 = vmul.f32 0.01, %v3284_v22  ;;  %v5228_v24 = vor.u32 %v6152_v47, %v5225_v61  ;;  %v6344_v28 = vld [vmem:[#allocation5 + $0x754] sm:$0xf] }
 0x365   : > { %3579 = vmatmul.bf16.vlgmr.msra.gmra.mxu0 %v6972_v0  ;;  %v3207_v21 = vpop.f32.mrf.mxu2 }
 0x366   : > { %v3208_v32 = vadd.f32 %v3207_v21, %v3169_v5  ;;  %v3246_v29 = vpop.f32.mrf.mxu3  ;;  %v5740_v5 = vor.u32 %v6280_v14, %v5737_v19  ;;  %v4224_v6 = vmax.f32 %v3284_v22, %v4128_v33  ;;  %v5993_v14 = vld [vmem:[#allocation5 + $0x770] sm:$0xf0]  ;;  %3612 = vmatpush.bf16.msrb.mxu1 %v5228_v24 }
 0x367   : > { %v6208_v19 = vld [vmem:[#allocation5 + $0x314] sm:$0xf] }
 0x368   : > { %v3247_v62 = vadd.f32 %v3246_v29, %v3208_v32  ;;  %3651 = vmatpush.bf16.msrb.mxu2 %v5484_v10  ;;  %3690 = vmatpush.bf16.msra.mxu3 %v5740_v5  ;;  %v5996_v10 = vor.u32 %v6344_v28, %v5993_v14  ;;  %v5449_v5 = vld [vmem:[#allocation5 + $0x330] sm:$0xf0] }
 0x369   : > { %v3173_v53 = vpop.f32.mrf.mxu1 }
 0x36a   : > { %v3286_v8 = vadd.f32 %v3285_v51, %v3247_v62  ;;  %v3290_v17 = vpop.f32.mrf.mxu0  ;;  %3501 = vmatmul.bf16.vlgmr.msra.gmra.mxu2 %v6977_v4  ;;  %v3174_v48 = vadd.f32 %v3173_v53, %v7247_v34  ;;  %3729 = vmatpush.bf16.msrb.mxu0 %v5996_v10 }
 0x36b   : > { %3540 = vmatmul.bf16.vlgmr.msrb.gmra.mxu3 %v6979_v18 }
 0x36c   : > { %v4136_v27 = vmul.f32 0.01, %v3286_v8 }
 0x36d   : > { %v3210_v21 = vpop.f32.mrf.mxu2 }
 0x36e   : > { %v4232_v9 = vmax.f32 %v3286_v8, %v4136_v27  ;;  %v3211_v50 = vadd.f32 %v3210_v21, %v3172_v25  ;;  %v3249_v46 = vpop.f32.mrf.mxu3  ;;  %v6272_v25 = vld [vmem:[#allocation5 + $0x514] sm:$0xf] }
 0x36f   : > { %v5705_v27 = vld [vmem:[#allocation5 + $0x530] sm:$0xf0] }
 0x370   : > { %v4414_v51 = vmax.f32 %v4224_v6, %v4232_v9  ;;  %v3250_v32 = vadd.f32 %v3249_v46, %v3211_v50  ;;  %v6144_v21 = vld [vmem:[#allocation5 + $0x114] sm:$0xf]  ;;  %v5708_v50 = vor.u32 %v6272_v25, %v5705_v27 }
 0x371   : > { %v3176_v29 = vpop.f32.mrf.mxu1  ;;  %v5193_v6 = vld [vmem:[#allocation5 + $0x130] sm:$0xf0] }
 0x372   : > { %v3289_v36 = vadd.f32 %v3288_v37, %v3250_v32  ;;  %v3293_v43 = vpop.f32.mrf.mxu0  ;;  %v3177_v37 = vadd.f32 %v3176_v29, %v7247_v34  ;;  %v5196_v46 = vor.u32 %v6144_v21, %v5193_v6  ;;  %v5961_v32 = vld [vmem:[#allocation5 + $0x730] sm:$0xf0]  ;;  %3691 = vmatpush.bf16.msra.mxu3 %v5708_v50 }
 0x373   : > { %v6200_v29 = vld [vmem:[#allocation5 + $0x2d4] sm:$0xf] }
 0x374   : > { %v4144_v1 = vmul.f32 0.01, %v3289_v36  ;;  %3467 = vmatmul.bf16.gmra.mxu1 %v6989_v54 }
 0x375   : > { %3584 = vmatmul.bf16.gmra.mxu0 %v6992_v58  ;;  %v3212_v20 = vpop.f32.mrf.mxu2  ;;  %3613 = vmatpush.bf16.msrb.mxu1 %v5196_v46 }
 0x376   : > { %v4240_v55 = vmax.f32 %v3289_v36, %v4144_v1  ;;  %v3213_v52 = vadd.f32 %v3212_v20, %v3174_v48  ;;  %v3251_v22 = vpop.f32.mrf.mxu3  ;;  %v5417_v1 = vld [vmem:[#allocation5 + $0x2f0] sm:$0xf0] }
 0x377   : > { %v6264_v20 = vld [vmem:[#allocation5 + $0x4d4] sm:$0xf] }
 0x378   : > { %v7318_v44 = vmax.f32 %v4414_v51, %v4240_v55  ;;  %v3252_v62 = vadd.f32 %v3251_v22, %v3213_v52  ;;  %v6336_v51 = vld [vmem:[#allocation5 + $0x714] sm:$0xf] }
 0x379   : > { %v3178_v42 = vpop.f32.mrf.mxu1  ;;  %v5964_v48 = vor.u32 %v6336_v51, %v5961_v32  ;;  %v5673_v55 = vld [vmem:[#allocation5 + $0x4f0] sm:$0xf0] }
 0x37a   : > { %v3291_v40 = vadd.f32 %v3290_v17, %v3252_v62  ;;  %v3295_v30 = vpop.f32.mrf.mxu0  ;;  %3506 = vmatmul.bf16.gmra.mxu2 %v6997_v12  ;;  %v5452_v17 = vor.u32 %v6208_v19, %v5449_v5  ;;  %v5676_v47 = vor.u32 %v6264_v20, %v5673_v55  ;;  %v3179_v61 = vadd.f32 %v3178_v42, %v7247_v34  ;;  %v5161_v32 = vld [vmem:[#allocation5 + $0xf0] sm:$0xf0] }
 0x37b   : > { %3545 = vmatmul.bf16.gmra.mxu3 %v6999_v13  ;;  %3730 = vmatpush.bf16.msrb.mxu0 %v5964_v48 }
 0x37c   : > { %3652 = vmatpush.bf16.msrb.mxu2 %v5452_v17  ;;  %v4152_v52 = vmul.f32 0.01, %v3291_v40  ;;  %3692 = vmatpush.bf16.msra.mxu3 %v5676_v47  ;;  %v6320_v47 = vld [vmem:[#allocation5 + $0x694] sm:$0xf] }
 0x37d   : > { %v3215_v53 = vpop.f32.mrf.mxu2 }
 0x37e   : > { %v3216_v33 = vadd.f32 %v3215_v53, %v3177_v37  ;;  %v3254_v8 = vpop.f32.mrf.mxu3  ;;  %v5420_v37 = vor.u32 %v6200_v29, %v5417_v1  ;;  %v4248_v28 = vmax.f32 %v3291_v40, %v4152_v52  ;;  %v6328_v29 = vld [vmem:[#allocation5 + $0x6d4] sm:$0xf] }
 0x37f   : > { %v5929_v1 = vld [vmem:[#allocation5 + $0x6f0] sm:$0xf0] }
 0x380   : > { %v3255_v9 = vadd.f32 %v3254_v8, %v3216_v33  ;;  %3653 = vmatpush.bf16.msrb.mxu2 %v5420_v37  ;;  %v7327_v8 = vperm.slane %v7244_v35, 3  ;;  %v5932_v55 = vor.u32 %v6328_v29, %v5929_v1  ;;  %v5129_v37 = vld [vmem:[#allocation5 + $0xb0] sm:$0xf0] }
 0x381   : > { %v3307_v36 = vpop.f32.mrf.mxu1  ;;  %v5097_v29 = vld [vmem:[#allocation5 + $0x70] sm:$0xf0] }
 0x382   : > { %v3294_v22 = vadd.f32 %v3293_v43, %v3255_v9  ;;  %v3424_v62 = vpop.f32.mrf.mxu0  ;;  %v3308_v25 = vadd.f32 %v3307_v36, %v7327_v8  ;;  %3731 = vmatpush.bf16.msrb.mxu0 %v5932_v55  ;;  %v5865_v55 = vld [vmem:[#allocation5 + $0x670] sm:$0xf0] }
 0x384   : > { %v4160_v53 = vmul.f32 0.01, %v3294_v22  ;;  %3472 = vmatmul.bf16.gmra.mxu1 %v7009_v49 }
 0x385   : > { %3589 = vmatmul.bf16.gmra.mxu0 %v7012_v57  ;;  %v3217_v24 = vpop.f32.mrf.mxu2 }
 0x386   : > { %v4256_v14 = vmax.f32 %v3294_v22, %v4160_v53  ;;  %v3218_v19 = vadd.f32 %v3217_v24, %v3179_v61  ;;  %v3256_v33 = vpop.f32.mrf.mxu3  ;;  %v6192_v53 = vld [vmem:[#allocation5 + $0x294] sm:$0xf] }
 0x387   : > { %v5385_v24 = vld [vmem:[#allocation5 + $0x2b0] sm:$0xf0] }
 0x388   : > { %v4478_v43 = vmax.f32 %v4248_v28, %v4256_v14  ;;  %v3257_v10 = vadd.f32 %v3256_v33, %v3218_v19  ;;  %v6256_v28 = vld [vmem:[#allocation5 + $0x494] sm:$0xf]  ;;  %v5388_v33 = vor.u32 %v6192_v53, %v5385_v24 }
 0x389   : > { %v3309_v5 = vpop.f32.mrf.mxu1  ;;  %v6112_v53 = vld [vmem:[#allocation5 + $0x14] sm:$0xf] }
 0x38a   : > { %v3296_v34 = vadd.f32 %v3295_v30, %v3257_v10  ;;  %v3426_v42 = vpop.f32.mrf.mxu0  ;;  %3511 = vmatmul.bf16.gmra.mxu2 %v7017_v15  ;;  %v6136_v30 = vld [vmem:[#allocation5 + $0xd4] sm:$0xf]  ;;  %v3310_v48 = vadd.f32 %v3309_v5, %v7327_v8 }
 0x38b   : > { %3550 = vmatmul.bf16.gmra.mxu3 %v7019_v16  ;;  %v5164_v36 = vor.u32 %v6136_v30, %v5161_v32  ;;  %v5897_v10 = vld [vmem:[#allocation5 + $0x6b0] sm:$0xf0]  ;;  %3654 = vmatpush.bf16.msrb.mxu2 %v5388_v33 }
 0x38c   : > { %v4168_v17 = vmul.f32 0.01, %v3296_v34  ;;  %v6184_v5 = vld [vmem:[#allocation5 + $0x254] sm:$0xf] }
 0x38d   : > { %v3346_v40 = vpop.f32.mrf.mxu2  ;;  %3614 = vmatpush.bf16.msrb.mxu1 %v5164_v36  ;;  %v5609_v30 = vld [vmem:[#allocation5 + $0x470] sm:$0xf0] }
 0x38e   : > { %v4264_v27 = vmax.f32 %v3296_v34, %v4168_v17  ;;  %v3347_v21 = vadd.f32 %v3346_v40, %v3308_v25  ;;  %v3385_v6 = vpop.f32.mrf.mxu3  ;;  %v6120_v32 = vld [vmem:[#allocation5 + $0x54] sm:$0xf] }
 0x38f   : > { %v5100_v1 = vor.u32 %v6120_v32, %v5097_v29  ;;  %v5065_v24 = vld [vmem:[#allocation5 + $0x30] sm:$0xf0] }
 0x390   : > { %v7332_v9 = vmax.f32 %v4478_v43, %v4264_v27  ;;  %v3386_v50 = vadd.f32 %v3385_v6, %v3347_v21  ;;  %v5641_v43 = vld [vmem:[#allocation5 + $0x4b0] sm:$0xf0]  ;;  %v5900_v6 = vor.u32 %v6320_v47, %v5897_v10  ;;  %v5068_v33 = vor.u32 %v6112_v53, %v5065_v24 }
 0x391   : > { %v3312_v35 = vpop.f32.mrf.mxu1  ;;  %v5644_v40 = vor.u32 %v6256_v28, %v5641_v43  ;;  %v5353_v27 = vld [vmem:[#allocation5 + $0x270] sm:$0xf0]  ;;  %v4288_v10 = vrot.slane %v7295_v11, 4 }
 0x392   : > { %v7334_v46 = vadd.f32 %v3424_v62, %v3386_v50  ;;  %v7336_v51 = vpop.f32.mrf.mxu0  ;;  %v6128_v62 = vld [vmem:[#allocation5 + $0x94] sm:$0xf]  ;;  %v5356_v50 = vor.u32 %v6184_v5, %v5353_v27  ;;  %3732 = vmatpush.bf16.msrb.mxu0 %v5900_v6 }
 0x393   : > { %v5132_v14 = vor.u32 %v6128_v62, %v5129_v37  ;;  %v6248_v21 = vld [vmem:[#allocation5 + $0x454] sm:$0xf]  ;;  %3693 = vmatpush.bf16.msra.mxu3 %v5644_v40  ;;  %v4289_v27 = vmax.f32 %v7295_v11, %v4288_v10 }
 0x394   : > { %3477 = vmatmul.bf16.gmra.mxu1 %v7029_v63  ;;  %v4081_v34 = vmul.f32 0.01, %v7334_v46  ;;  %3655 = vmatpush.bf16.msrb.mxu2 %v5356_v50  ;;  %v6304_v28 = vld [vmem:[#allocation5 + $0x614] sm:$0xf] }
 0x395   : > { %3594 = vmatmul.bf16.gmra.mxu0 %v7032_v7  ;;  %v3348_v20 = vpop.f32.mrf.mxu2  ;;  %3615 = vmatpush.bf16.msrb.mxu1 %v5132_v14  ;;  %v5833_v43 = vld [vmem:[#allocation5 + $0x630] sm:$0xf0] }
 0x396   : > { %v3349_v52 = vadd.f32 %v3348_v20, %v3310_v48  ;;  %v3387_v22 = vpop.f32.mrf.mxu3  ;;  %v3313_v48 = vadd.f32 %v3312_v35, %v7327_v8  ;;  %v6312_v20 = vld [vmem:[#allocation5 + $0x654] sm:$0xf]  ;;  %v4177_v62 = vmax.f32 %v7334_v46, %v4081_v34  ;;  %v5836_v34 = vor.u32 %v6304_v28, %v5833_v43 }
 0x397   : > { %v6176_v6 = vld [vmem:[#allocation5 + $0x214] sm:$0xf] }
 0x398   : > { %v3388_v61 = vadd.f32 %v3387_v22, %v3349_v52  ;;  %v5868_v22 = vor.u32 %v6312_v20, %v5865_v55  ;;  %v5321_v50 = vld [vmem:[#allocation5 + $0x230] sm:$0xf0] }
 0x399   : > { %v7341_v19 = vpop.f32.mrf.mxu1  ;;  %3616 = vmatpush.bf16.msrb.mxu1 %v5100_v1  ;;  %v4290_v1 = vrot.slane %v4289_v27, 2 }
 0x39a   : > { %v3427_v25 = vadd.f32 %v3426_v42, %v3388_v61  ;;  %v7344_v17 = vpop.f32.mrf.mxu0  ;;  %3516 = vmatmul.bf16.gmra.mxu2 %v7037_v23  ;;  %v5612_v42 = vor.u32 %v6248_v21, %v5609_v30  ;;  %3733 = vmatpush.bf16.msrb.mxu0 %v5868_v22  ;;  %v6240_v30 = vld [vmem:[#allocation5 + $0x414] sm:$0xf]  ;;  %v3315_v11 = vadd.f32 %v7341_v19, %v7327_v8 }
 0x39b   : > { %3555 = vmatmul.bf16.gmra.mxu3 %v7039_v3 }
 0x39c   : > { %v4089_v36 = vmul.f32 0.01, %v3427_v25  ;;  %3694 = vmatpush.bf16.msra.mxu3 %v5612_v42 }
 0x39d   : > { %v3351_v52 = vpop.f32.mrf.mxu2  ;;  %3617 = vmatpush.bf16.msrb.mxu1 %v5068_v33 }
 0x39e   : > { %v4185_v37 = vmax.f32 %v3427_v25, %v4089_v36  ;;  %v3352_v61 = vadd.f32 %v3351_v52, %v3313_v48  ;;  %v3390_v47 = vpop.f32.mrf.mxu3  ;;  %v5324_v48 = vor.u32 %v6176_v6, %v5321_v50  ;;  %v5577_v36 = vld [vmem:[#allocation5 + $0x430] sm:$0xf0]  ;;  %3734 = vmatpush.bf16.msrb.mxu0 %v5836_v34 }
 0x3a0   : > { %v4294_v35 = vmax.f32 %v4177_v62, %v4185_v37  ;;  %v3391_v14 = vadd.f32 %v3390_v47, %v3352_v61  ;;  %3656 = vmatpush.bf16.msrb.mxu2 %v5324_v48  ;;  %v4291_v61 = vmax.f32 %v4289_v27, %v4290_v1  ;;  %v6237_v27 = vld [vmem:[#allocation5 + $0x3f4] sm:$0xf0] }
 0x3a1   : > { %v3317_v5 = vpop.f32.mrf.mxu1  ;;  %v6301_v48 = vld [vmem:[#allocation5 + $0x5f4] sm:$0xf0] }
 0x3a2   : > { %v3430_v40 = vadd.f32 %v7336_v51, %v3391_v14  ;;  %v3434_v46 = vpop.f32.mrf.mxu0  ;;  %v5580_v51 = vor.u32 %v6240_v30, %v5577_v36  ;;  %v3318_v62 = vadd.f32 %v3317_v5, %v7327_v8  ;;  %v4292_v43 = vrot.slane %v4291_v61, 1  ;;  %v5551_v5 = vld [vmem:[#allocation5 + $0x3d8] sm:$0xf] }
 0x3a4   : > { %v4097_v25 = vmul.f32 0.01, %v3430_v40  ;;  %3482 = vmatmul.bf16.gmra.mxu1 %v7049_v26  ;;  %3695 = vmatpush.bf16.msra.mxu3 %v5580_v51 }
 0x3a5   : > { %3599 = vmatmul.bf16.gmra.mxu0 %v7052_v45  ;;  %v3353_v21 = vpop.f32.mrf.mxu2 }
 0x3a6   : > { %v4193_v32 = vmax.f32 %v3430_v40, %v4097_v25  ;;  %v3392_v29 = vpop.f32.mrf.mxu3  ;;  %v3354_v37 = vadd.f32 %v3353_v21, %v3315_v11  ;;  %v4293_v21 = vmax.f32 %v4291_v61, %v4292_v43 }
 0x3a8   : > { %v4295_v42 = vmax.f32 %v4294_v35, %v4193_v32  ;;  %v3393_v14 = vadd.f32 %v3392_v29, %v3354_v37  ;;  %v5552_v32 = vor.u32 %v6237_v27, %v5551_v5  ;;  %v5807_v29 = vld [vmem:[#allocation5 + $0x5d8] sm:$0xf] }
 0x3a9   : > { %v3319_v20 = vpop.f32.mrf.mxu1  ;;  %v5808_v1 = vor.u32 %v6301_v48, %v5807_v29 }
 0x3aa   : > { %v4296_v55 = vrot.slane %v4295_v42, 4  ;;  %v3436_v52 = vpop.f32.mrf.mxu0  ;;  %3521 = vmatmul.bf16.gmra.mxu2 %v7057_v56  ;;  %v3432_v6 = vadd.f32 %v7344_v17, %v3393_v14  ;;  %v3320_v50 = vadd.f32 %v3319_v20, %v7327_v8 }
 0x3ab   : > { %3560 = vmatmul.bf16.gmra.mxu3 %v7059_v59  ;;  %3805 = vmatpush.bf16.msra.mxu2 %v5552_v32 }
 0x3ac   : > { %v4297_v22 = vmax.f32 %v4295_v42, %v4296_v55  ;;  %v4105_v20 = vmul.f32 0.01, %v3432_v6  ;;  %3844 = vmatpush.bf16.msrb.mxu3 %v5808_v1 }
 0x3ad   : > { %v3356_v47 = vpop.f32.mrf.mxu2 }
 0x3ae   : > { %v4298_v53 = vrot.slane %v4297_v22, 2  ;;  %v3357_v24 = vadd.f32 %v3356_v47, %v3318_v62  ;;  %v3395_v28 = vpop.f32.mrf.mxu3  ;;  %v4201_v47 = vmax.f32 %v3432_v6, %v4105_v20 }
 0x3b0   : > { %v4299_v35 = vmax.f32 %v4297_v22, %v4298_v53  ;;  %v3396_v33 = vadd.f32 %v3395_v28, %v3357_v24  ;;  %v4352_v22 = vrot.slane %v7307_v31, 4 }
 0x3b1   : > { %v3322_v19 = vpop.f32.mrf.mxu1 }
 0x3b2   : > { %v4300_v10 = vrot.slane %v4299_v35, 1  ;;  %v3435_v40 = vadd.f32 %v3434_v46, %v3396_v33  ;;  %v3439_v34 = vpop.f32.mrf.mxu0  ;;  %v3323_v53 = vadd.f32 %v3322_v19, %v7327_v8 }
 0x3b4   : > { %v4301_v25 = vmax.f32 %v4299_v35, %v4300_v10  ;;  %3487 = vmatmul.bf16.gmra.mxu1 %v7069_v38  ;;  %v4113_v51 = vmul.f32 0.01, %v3435_v40  ;;  %v4353_v35 = vmax.f32 %v7307_v31, %v4352_v22  ;;  %v5295_v22 = vld [vmem:[#allocation5 + $0x1d8] sm:$0xf] }
 0x3b5   : > { %3604 = vmatmul.bf16.gmra.mxu0 %v7072_v39  ;;  %v3358_v30 = vpop.f32.mrf.mxu2 }
 0x3b6   : > { %v4563_v36 = vrot.slane %v4301_v25, 4  ;;  %v3359_v46 = vadd.f32 %v3358_v30, %v3320_v50  ;;  %v3397_v42 = vpop.f32.mrf.mxu3  ;;  %v4209_v62 = vmax.f32 %v3435_v40, %v4113_v51  ;;  %v4354_v40 = vrot.slane %v4353_v35, 2 }
 0x3b8   : > { %v7365_v17 = vsel %vm4578_vm1, %v4293_v21, %v4563_v36  ;;  %v3398_v11 = vadd.f32 %v3397_v42, %v3359_v46  ;;  %v4358_v14 = vmax.f32 %v4201_v47, %v4209_v62  ;;  %v4355_v31 = vmax.f32 %v4353_v35, %v4354_v40  ;;  %v6063_v62 = vld [vmem:[#allocation5 + $0x7d8] sm:$0xf] }
 0x3b9   : > { %v3324_v55 = vpop.f32.mrf.mxu1  ;;  %v5519_v35 = vld [vmem:[#allocation5 + $0x398] sm:$0xf] }
 0x3ba   : > { %v3437_v37 = vadd.f32 %v3436_v52, %v3398_v11  ;;  %v3441_v61 = vpop.f32.mrf.mxu0  ;;  %3526 = vmatmul.bf16.gmra.mxu2 %v7077_v41  ;;  %v3325_v6 = vadd.f32 %v3324_v55, %v7327_v8  ;;  %v4356_v42 = vrot.slane %v4355_v31, 1 }
 0x3bb   : > { %3565 = vmatmul.bf16.gmra.mxu3 %v7079_v2 }
 0x3bc   : > { %v4121_v24 = vmul.f32 0.01, %v3437_v37 }
 0x3bd   : > { %v3361_v28 = vpop.f32.mrf.mxu2 }
 0x3be   : > { %v4217_v33 = vmax.f32 %v3437_v37, %v4121_v24  ;;  %v3362_v43 = vadd.f32 %v3361_v28, %v3323_v53  ;;  %v3400_v10 = vpop.f32.mrf.mxu3  ;;  %v6365_v28 = vld [vmem:[#allocation5 + $0x7f4] sm:$0xf0] }
 0x3c0   : > { %v4359_v25 = vmax.f32 %v4358_v14, %v4217_v33  ;;  %v3401_v5 = vadd.f32 %v3400_v10, %v3362_v43  ;;  %v6064_v33 = vor.u32 %v6365_v28, %v6063_v62  ;;  %v6229_v43 = vld [vmem:[#allocation5 + $0x3b4] sm:$0xf0]  ;;  %v4416_v28 = vrot.slane %v7318_v44, 4 }
 0x3c1   : > { %v3327_v50 = vpop.f32.mrf.mxu1  ;;  %v6293_v10 = vld [vmem:[#allocation5 + $0x5b4] sm:$0xf0] }
 0x3c2   : > { %v4360_v52 = vrot.slane %v4359_v25, 4  ;;  %v7372_v27 = vpop.f32.mrf.mxu0  ;;  %v7377_v32 = vadd.f32 %v3439_v34, %v3401_v5  ;;  %v6173_v34 = vld [vmem:[#allocation5 + $0x1f4] sm:$0xf0]  ;;  %v3328_v47 = vadd.f32 %v3327_v50, %v7327_v8  ;;  %3883 = vmatpush.bf16.msra.mxu0 %v6064_v33 }
 0x3c3   : > { %v5296_v24 = vor.u32 %v6173_v34, %v5295_v22  ;;  %v6221_v34 = vld [vmem:[#allocation5 + $0x374] sm:$0xf0] }
 0x3c4   : > { %v4361_v21 = vmax.f32 %v4359_v25, %v4360_v52  ;;  %3618 = vmatmul.bf16.vlgmr.msrb.gmra.mxu1 %v6969_v60  ;;  %v4129_v20 = vmul.f32 0.01, %v7377_v32  ;;  %v4357_v25 = vmax.f32 %v4355_v31, %v4356_v42  ;;  %v5743_v31 = vld [vmem:[#allocation5 + $0x558] sm:$0xf] }
 0x3c5   : > { %3735 = vmatmul.bf16.vlgmr.msrb.gmra.mxu0 %v6972_v0  ;;  %v3363_v19 = vpop.f32.mrf.mxu2  ;;  %3766 = vmatpush.bf16.msra.mxu1 %v5296_v24  ;;  %v6285_v42 = vld [vmem:[#allocation5 + $0x574] sm:$0xf0] }
 0x3c6   : > { %v4362_v30 = vrot.slane %v4361_v21, 2  ;;  %v3364_v29 = vadd.f32 %v3363_v19, %v3325_v6  ;;  %v3402_v48 = vpop.f32.mrf.mxu3  ;;  %v5263_v6 = vld [vmem:[#allocation5 + $0x198] sm:$0xf]  ;;  %v5744_v24 = vor.u32 %v6285_v42, %v5743_v31 }
 0x3c7   : > { %v6165_v19 = vld [vmem:[#allocation5 + $0x1b4] sm:$0xf0] }
 0x3c8   : > { %v4363_v36 = vmax.f32 %v4361_v21, %v4362_v30  ;;  %v3403_v51 = vadd.f32 %v3402_v48, %v3364_v29  ;;  %v5520_v21 = vor.u32 %v6229_v43, %v5519_v35  ;;  %v5264_v50 = vor.u32 %v6165_v19, %v5263_v6  ;;  %v6031_v29 = vld [vmem:[#allocation5 + $0x798] sm:$0xf] }
 0x3c9   : > { %v7379_v46 = vpop.f32.mrf.mxu1  ;;  %v6357_v48 = vld [vmem:[#allocation5 + $0x7b4] sm:$0xf0] }
 0x3ca   : > { %v4364_v1 = vrot.slane %v4363_v36, 1  ;;  %v3442_v11 = vadd.f32 %v3441_v61, %v3403_v51  ;;  %v7382_v55 = vpop.f32.mrf.mxu0  ;;  %3657 = vmatmul.bf16.vlgmr.msrb.gmra.mxu2 %v6977_v4  ;;  %v5775_v61 = vld [vmem:[#allocation5 + $0x598] sm:$0xf]  ;;  %v6032_v22 = vor.u32 %v6357_v48, %v6031_v29  ;;  %3767 = vmatpush.bf16.msra.mxu1 %v5264_v50 }
 0x3cb   : > { %3696 = vmatmul.bf16.vlgmr.msra.gmra.mxu3 %v6979_v18  ;;  %v5776_v30 = vor.u32 %v6293_v10, %v5775_v61  ;;  %3806 = vmatpush.bf16.msra.mxu2 %v5520_v21  ;;  %v4225_v10 = vmax.f32 %v7377_v32, %v4129_v20  ;;  %v5231_v31 = vld [vmem:[#allocation5 + $0x158] sm:$0xf] }
 0x3cc   : > { %v4365_v37 = vmax.f32 %v4363_v36, %v4364_v1  ;;  %v4137_v53 = vmul.f32 0.01, %v3442_v11  ;;  %v5487_v36 = vld [vmem:[#allocation5 + $0x358] sm:$0xf]  ;;  %3884 = vmatpush.bf16.msra.mxu0 %v6032_v22 }
 0x3cd   : > { %v3366_v14 = vpop.f32.mrf.mxu2  ;;  %3845 = vmatpush.bf16.msrb.mxu3 %v5776_v30  ;;  %v6157_v42 = vld [vmem:[#allocation5 + $0x174] sm:$0xf0] }
 0x3ce   : > { %v4567_v40 = vrot.slane %v4365_v37, 4  ;;  %v3367_v52 = vadd.f32 %v3366_v14, %v3328_v47  ;;  %v3405_v5 = vpop.f32.mrf.mxu3  ;;  %v5488_v47 = vor.u32 %v6221_v34, %v5487_v36  ;;  %v4233_v35 = vmax.f32 %v3442_v11, %v4137_v53 }
 0x3d0   : > { %v4584_v51 = vsel %vm4578_vm1, %v4357_v25, %v4567_v40  ;;  %v3406_v1 = vadd.f32 %v3405_v5, %v3367_v52  ;;  %3807 = vmatpush.bf16.msra.mxu2 %v5488_v47  ;;  %v4422_v53 = vmax.f32 %v4225_v10, %v4233_v35  ;;  %v3330_v5 = vadd.f32 %v7379_v46, %v7327_v8 }
 0x3d1   : > { %v4610_v62 = vrot.slane %v4584_v51, 7  ;;  %v3332_v37 = vpop.f32.mrf.mxu1  ;;  %3846 = vmatpush.bf16.msrb.mxu3 %v5744_v24 }
 0x3d2   : > { %v3445_v14 = vadd.f32 %v7372_v27, %v3406_v1  ;;  %v3449_v33 = vpop.f32.mrf.mxu0  ;;  %v4417_v27 = vmax.f32 %v7318_v44, %v4416_v28  ;;  %v3333_v44 = vadd.f32 %v3332_v37, %v7327_v8  ;;  %v6349_v37 = vld [vmem:[#allocation5 + $0x774] sm:$0xf0] }
 0x3d3   : > { %v4611_v43 = vsel %vm4596_vm2, %v4610_v62, %v7365_v17 }
 0x3d4   : > { %v7393_v61 = vsel %vm4598_vm3, %v4610_v62, %v4611_v43  ;;  %v4145_v25 = vmul.f32 0.01, %v3445_v14  ;;  %3623 = vmatmul.bf16.gmra.mxu1 %v6989_v54  ;;  %v4418_v6 = vrot.slane %v4417_v27, 2  ;;  %v5999_v62 = vld [vmem:[#allocation5 + $0x758] sm:$0xf] }
 0x3d5   : > { %3740 = vmatmul.bf16.gmra.mxu0 %v6992_v58  ;;  %v3368_v11 = vpop.f32.mrf.mxu2  ;;  %v5455_v43 = vld [vmem:[#allocation5 + $0x318] sm:$0xf] }
 0x3d6   : > { %v4241_v40 = vmax.f32 %v3445_v14, %v4145_v25  ;;  %v3407_v52 = vpop.f32.mrf.mxu3  ;;  %v3369_v19 = vadd.f32 %v3368_v11, %v3330_v5  ;;  %v4419_v29 = vmax.f32 %v4417_v27, %v4418_v6  ;;  %v5232_v14 = vor.u32 %v6157_v42, %v5231_v31  ;;  %v6213_v27 = vld [vmem:[#allocation5 + $0x334] sm:$0xf0] }
 0x3d7   : > { %v6000_v11 = vor.u32 %v6349_v37, %v5999_v62  ;;  %v5199_v6 = vld [vmem:[#allocation5 + $0x118] sm:$0xf]  ;;  %v4480_v37 = vrot.slane %v7332_v9, 4 }
 0x3d8   : > { %v4423_v17 = vmax.f32 %v4422_v53, %v4241_v40  ;;  %v3408_v1 = vadd.f32 %v3407_v52, %v3369_v19  ;;  %v4420_v47 = vrot.slane %v4419_v29, 1  ;;  %v5711_v53 = vld [vmem:[#allocation5 + $0x518] sm:$0xf]  ;;  %3768 = vmatpush.bf16.msra.mxu1 %v5232_v14 }
 0x3d9   : > { %v3334_v21 = vpop.f32.mrf.mxu1  ;;  %v6277_v40 = vld [vmem:[#allocation5 + $0x534] sm:$0xf0]  ;;  %3885 = vmatpush.bf16.msra.mxu0 %v6000_v11 }
 0x3da   : > { %v4424_v32 = vrot.slane %v4423_v17, 4  ;;  %v7401_v20 = vpop.f32.mrf.mxu0  ;;  %3662 = vmatmul.bf16.gmra.mxu2 %v6997_v12  ;;  %v3447_v10 = vadd.f32 %v7382_v55, %v3408_v1  ;;  %v3335_v25 = vadd.f32 %v3334_v21, %v7327_v8  ;;  %v5712_v5 = vor.u32 %v6277_v40, %v5711_v53  ;;  %v6341_v8 = vld [vmem:[#allocation5 + $0x734] sm:$0xf0] }
 0x3db   : > { %3701 = vmatmul.bf16.gmra.mxu3 %v6999_v13  ;;  %v5423_v21 = vld [vmem:[#allocation5 + $0x2d8] sm:$0xf] }
 0x3dc   : > { %v4425_v30 = vmax.f32 %v4423_v17, %v4424_v32  ;;  %v6149_v32 = vld [vmem:[#allocation5 + $0x134] sm:$0xf0]  ;;  %3847 = vmatpush.bf16.msrb.mxu3 %v5712_v5 }
 0x3dd   : > { %v3371_v50 = vpop.f32.mrf.mxu2  ;;  %v5200_v55 = vor.u32 %v6149_v32, %v5199_v6  ;;  %v6205_v1 = vld [vmem:[#allocation5 + $0x2f4] sm:$0xf0] }
 0x3de   : > { %v4426_v48 = vrot.slane %v4425_v30, 2  ;;  %v3372_v36 = vadd.f32 %v3371_v50, %v3333_v44  ;;  %v3410_v51 = vpop.f32.mrf.mxu3  ;;  %v4421_v44 = vmax.f32 %v4419_v29, %v4420_v47  ;;  %v5424_v42 = vor.u32 %v6205_v1, %v5423_v21  ;;  %v6269_v62 = vld [vmem:[#allocation5 + $0x4f4] sm:$0xf0] }
 0x3df   : > { %v4153_v47 = vmul.f32 0.01, %v3447_v10  ;;  %3769 = vmatpush.bf16.msra.mxu1 %v5200_v55 }
 0x3e0   : > { %v4427_v46 = vmax.f32 %v4425_v30, %v4426_v48  ;;  %v3411_v22 = vadd.f32 %v3410_v51, %v3372_v36  ;;  %v5967_v30 = vld [vmem:[#allocation5 + $0x718] sm:$0xf] }
 0x3e1   : > { %v3463_v34 = vpop.f32.mrf.mxu1  ;;  %v5968_v51 = vor.u32 %v6341_v8, %v5967_v30 }
 0x3e2   : > { %v4428_v24 = vrot.slane %v4427_v46, 1  ;;  %v7406_v28 = vadd.f32 %v3449_v33, %v3411_v22  ;;  %v7408_v35 = vpop.f32.mrf.mxu0  ;;  %v5456_v33 = vor.u32 %v6213_v27, %v5455_v43  ;;  %v7418_v22 = vld [vmem:[%s7690_s8] sm:$0xff] }
 0x3e3   : > { %v7421_v31 = vperm.slane %v7418_v22, 4  ;;  %3886 = vmatpush.bf16.msra.mxu0 %v5968_v51 }
 0x3e4   : > { %v4429_v52 = vmax.f32 %v4427_v46, %v4428_v24  ;;  %v4161_v17 = vmul.f32 0.01, %v7406_v28  ;;  %3628 = vmatmul.bf16.gmra.mxu1 %v7009_v49  ;;  %3808 = vmatpush.bf16.msra.mxu2 %v5456_v33  ;;  %v5679_v46 = vld [vmem:[#allocation5 + $0x4d8] sm:$0xf] }
 0x3e5   : > { %3745 = vmatmul.bf16.gmra.mxu0 %v7012_v57  ;;  %v3373_v19 = vpop.f32.mrf.mxu2  ;;  %v5680_v14 = vor.u32 %v6269_v62, %v5679_v46  ;;  %v3464_v33 = vadd.f32 %v3463_v34, %v7421_v31  ;;  %v6333_v46 = vld [vmem:[#allocation5 + $0x6f4] sm:$0xf0] }
 0x3e6   : > { %v4571_v50 = vrot.slane %v4429_v52, 4  ;;  %v3374_v48 = vadd.f32 %v3373_v19, %v3335_v25  ;;  %v3412_v36 = vpop.f32.mrf.mxu3  ;;  %v4257_v11 = vmax.f32 %v7406_v28, %v4161_v17  ;;  %v4249_v52 = vmax.f32 %v3447_v10, %v4153_v47 }
 0x3e7   : > { %3848 = vmatpush.bf16.msrb.mxu3 %v5680_v14  ;;  %v6261_v14 = vld [vmem:[#allocation5 + $0x4b4] sm:$0xf0] }
 0x3e8   : > { %v4588_v29 = vsel %vm4578_vm1, %v4421_v44, %v4571_v50  ;;  %v3413_v24 = vadd.f32 %v3412_v36, %v3374_v48  ;;  %3809 = vmatpush.bf16.msra.mxu2 %v5424_v42  ;;  %v4486_v6 = vmax.f32 %v4249_v52, %v4257_v11  ;;  %v5167_v50 = vld [vmem:[#allocation5 + $0xd8] sm:$0xf] }
 0x3e9   : > { %v4613_v43 = vrot.slane %v4588_v29, 6  ;;  %v3465_v25 = vpop.f32.mrf.mxu1  ;;  %v6141_v48 = vld [vmem:[#allocation5 + $0xf4] sm:$0xf0] }
 0x3ea   : > { %v3452_v27 = vadd.f32 %v7401_v20, %v3413_v24  ;;  %v7427_v53 = vpop.f32.mrf.mxu0  ;;  %3667 = vmatmul.bf16.gmra.mxu2 %v7017_v15  ;;  %v4481_v20 = vmax.f32 %v7332_v9, %v4480_v37  ;;  %v5935_v36 = vld [vmem:[#allocation5 + $0x6d8] sm:$0xf]  ;;  %v3466_v9 = vadd.f32 %v3465_v25, %v7421_v31  ;;  %v5168_v1 = vor.u32 %v6141_v48, %v5167_v50 }
 0x3eb   : > { %v4614_v40 = vsel %vm4601_vm4, %v4613_v43, %v7393_v61  ;;  %3706 = vmatmul.bf16.gmra.mxu3 %v7019_v16  ;;  %v5391_v42 = vld [vmem:[#allocation5 + $0x298] sm:$0xf]  ;;  %v5936_v47 = vor.u32 %v6333_v46, %v5935_v36 }
 0x3ec   : > { %v4169_v5 = vmul.f32 0.01, %v3452_v27  ;;  %v7435_v28 = vsel %vm4603_vm5, %v4613_v43, %v4614_v40  ;;  %v4482_v8 = vrot.slane %v4481_v20, 2  ;;  %v5647_v24 = vld [vmem:[#allocation5 + $0x498] sm:$0xf]  ;;  %3770 = vmatpush.bf16.msra.mxu1 %v5168_v1 }
 0x3ed   : > { %v3502_v17 = vpop.f32.mrf.mxu2  ;;  %v5135_v40 = vld [vmem:[#allocation5 + $0x98] sm:$0xf]  ;;  %3887 = vmatpush.bf16.msra.mxu0 %v5936_v47  ;;  %v5648_v52 = vor.u32 %v6261_v14, %v5647_v24 }
 0x3ee   : > { %v4265_v32 = vmax.f32 %v3452_v27, %v4169_v5  ;;  %v3503_v19 = vadd.f32 %v3502_v17, %v3464_v33  ;;  %v3541_v55 = vpop.f32.mrf.mxu3  ;;  %v4483_v62 = vmax.f32 %v4481_v20, %v4482_v8  ;;  %v6133_v25 = vld [vmem:[#allocation5 + $0xb4] sm:$0xf0] }
 0x3ef   : > { %v5136_v33 = vor.u32 %v6133_v25, %v5135_v40  ;;  %v5903_v5 = vld [vmem:[#allocation5 + $0x698] sm:$0xf]  ;;  %3849 = vmatpush.bf16.msrb.mxu3 %v5648_v52 }
 0x3f0   : > { %v4487_v30 = vmax.f32 %v4486_v6, %v4265_v32  ;;  %v3542_v61 = vadd.f32 %v3541_v55, %v3503_v19  ;;  %v6325_v17 = vld [vmem:[#allocation5 + $0x6b4] sm:$0xf0] }
 0x3f1   : > { %v3468_v21 = vpop.f32.mrf.mxu1  ;;  %v5904_v32 = vor.u32 %v6325_v17, %v5903_v5  ;;  %v5359_v19 = vld [vmem:[#allocation5 + $0x258] sm:$0xf]  ;;  %3771 = vmatpush.bf16.msra.mxu1 %v5136_v33 }
 0x3f2   : > { %v4488_v44 = vrot.slane %v4487_v30, 4  ;;  %v7439_v10 = vadd.f32 %v7408_v35, %v3542_v61  ;;  %v7441_v34 = vpop.f32.mrf.mxu0  ;;  %v6197_v35 = vld [vmem:[#allocation5 + $0x2b4] sm:$0xf0]  ;;  %v4484_v61 = vrot.slane %v4483_v62, 1 }
 0x3f3   : > { %v5392_v27 = vor.u32 %v6197_v35, %v5391_v42  ;;  %v6189_v55 = vld [vmem:[#allocation5 + $0x274] sm:$0xf0]  ;;  %3888 = vmatpush.bf16.msra.mxu0 %v5904_v32  ;;  %v3469_v35 = vadd.f32 %v3468_v21, %v7421_v31 }
 0x3f4   : > { %v4489_v51 = vmax.f32 %v4487_v30, %v4488_v44  ;;  %3633 = vmatmul.bf16.gmra.mxu1 %v7029_v63  ;;  %v5615_v30 = vld [vmem:[#allocation5 + $0x458] sm:$0xf]  ;;  %v5360_v44 = vor.u32 %v6189_v55, %v5359_v19  ;;  %v4082_v36 = vmul.f32 0.01, %v7439_v10 }
 0x3f5   : > { %3750 = vmatmul.bf16.gmra.mxu0 %v7032_v7  ;;  %v3504_v29 = vpop.f32.mrf.mxu2  ;;  %3810 = vmatpush.bf16.msra.mxu2 %v5392_v27  ;;  %v6253_v50 = vld [vmem:[#allocation5 + $0x474] sm:$0xf0] }
 0x3f6   : > { %v4490_v37 = vrot.slane %v4489_v51, 2  ;;  %v3505_v43 = vadd.f32 %v3504_v29, %v3466_v9  ;;  %v3543_v11 = vpop.f32.mrf.mxu3  ;;  %v5103_v46 = vld [vmem:[#allocation5 + $0x58] sm:$0xf]  ;;  %v4178_v40 = vmax.f32 %v7439_v10, %v4082_v36 }
 0x3f7   : > { %v6125_v42 = vld [vmem:[#allocation5 + $0x74] sm:$0xf0] }
 0x3f8   : > { %v4491_v20 = vmax.f32 %v4489_v51, %v4490_v37  ;;  %v3544_v6 = vadd.f32 %v3543_v11, %v3505_v43  ;;  %v5616_v51 = vor.u32 %v6253_v50, %v5615_v30  ;;  %v5871_v29 = vld [vmem:[#allocation5 + $0x658] sm:$0xf]  ;;  %v5104_v14 = vor.u32 %v6125_v42, %v5103_v46 }
 0x3f9   : > { %v3470_v8 = vpop.f32.mrf.mxu1  ;;  %3811 = vmatpush.bf16.msra.mxu2 %v5360_v44  ;;  %v6317_v37 = vld [vmem:[#allocation5 + $0x674] sm:$0xf0] }
 0x3fa   : > { %v4492_v48 = vrot.slane %v4491_v20, 1  ;;  %v3583_v9 = vadd.f32 %v7427_v53, %v3544_v6  ;;  %v7448_v1 = vpop.f32.mrf.mxu0  ;;  %3672 = vmatmul.bf16.gmra.mxu2 %v7037_v23  ;;  %v4485_v53 = vmax.f32 %v4483_v62, %v4484_v61  ;;  %3850 = vmatpush.bf16.msrb.mxu3 %v5616_v51  ;;  %v5872_v11 = vor.u32 %v6317_v37, %v5871_v29  ;;  %v5071_v5 = vld [vmem:[#allocation5 + $0x18] sm:$0xf] }
 0x3fb   : > { %3711 = vmatmul.bf16.gmra.mxu3 %v7039_v3  ;;  %3772 = vmatpush.bf16.msra.mxu1 %v5104_v14  ;;  %v6117_v17 = vld [vmem:[#allocation5 + $0x34] sm:$0xf0] }
 0x3fc   : > { %v4493_v47 = vmax.f32 %v4491_v20, %v4492_v48  ;;  %v4090_v24 = vmul.f32 0.01, %v3583_v9  ;;  %3889 = vmatpush.bf16.msra.mxu0 %v5872_v11  ;;  %v5839_v20 = vld [vmem:[#allocation5 + $0x618] sm:$0xf]  ;;  %v5072_v19 = vor.u32 %v6117_v17, %v5071_v5  ;;  %v3471_v48 = vadd.f32 %v3470_v8, %v7421_v31  ;;  %v6233_v5 = vld [vmem:[#allocation5 + $0x3dc] sm:$0xf] }
 0x3fd   : > { %v3507_v43 = vpop.f32.mrf.mxu2  ;;  %v6309_v62 = vld [vmem:[#allocation5 + $0x634] sm:$0xf0]  ;;  %v5553_v17 = vld [vmem:[#allocation5 + $0x3f8] sm:$0xf0] }
 0x3fe   : > { %v4575_v27 = vrot.slane %v4493_v47, 4  ;;  %v4186_v25 = vmax.f32 %v3583_v9, %v4090_v24  ;;  %v3508_v52 = vadd.f32 %v3507_v43, %v3469_v35  ;;  %v3546_v33 = vpop.f32.mrf.mxu3  ;;  %v5840_v61 = vor.u32 %v6309_v62, %v5839_v20  ;;  %v5327_v46 = vld [vmem:[#allocation5 + $0x218] sm:$0xf]  ;;  %v6297_v20 = vld [vmem:[#allocation5 + $0x5dc] sm:$0xf] }
 0x3ff   : > { %3773 = vmatpush.bf16.msra.mxu1 %v5072_v19  ;;  %v6181_v42 = vld [vmem:[#allocation5 + $0x234] sm:$0xf0] }
 0x400   : > { %v4592_v21 = vsel %vm4578_vm1, %v4485_v53, %v4575_v27  ;;  %v4302_v6 = vmax.f32 %v4178_v40, %v4186_v25  ;;  %v3547_v32 = vadd.f32 %v3546_v33, %v3508_v52  ;;  %3890 = vmatpush.bf16.msra.mxu0 %v5840_v61  ;;  %v5328_v24 = vor.u32 %v6181_v42, %v5327_v46  ;;  %v6245_v14 = vld [vmem:[#allocation5 + $0x434] sm:$0xf0] }
 0x401   : > { %v4616_v55 = vrot.slane %v4592_v21, 5  ;;  %v3473_v30 = vpop.f32.mrf.mxu1 }
 0x402   : > { %v3586_v44 = vadd.f32 %v7441_v34, %v3547_v32  ;;  %v3590_v10 = vpop.f32.mrf.mxu0  ;;  %v5583_v34 = vld [vmem:[#allocation5 + $0x418] sm:$0xf]  ;;  %3812 = vmatpush.bf16.msra.mxu2 %v5328_v24  ;;  %v3474_v27 = vadd.f32 %v3473_v30, %v7421_v31  ;;  %v5809_v32 = vld [vmem:[#allocation5 + $0x5f8] sm:$0xf0] }
 0x403   : > { %v4617_v50 = vsel %vm4606_vm6, %v4616_v55, %v7435_v28  ;;  %v5584_v28 = vor.u32 %v6245_v14, %v5583_v34 }
 0x404   : > { %v4098_v36 = vmul.f32 0.01, %v3586_v44  ;;  %3638 = vmatmul.bf16.gmra.mxu1 %v7049_v26  ;;  %v4618_v9 = vsel %vm4608_vm7, %v4616_v55, %v4617_v50  ;;  %v5812_v55 = vor.u32 %v6297_v20, %v5809_v32  ;;  %v6065_v20 = vld [vmem:[#allocation5 + $0x7f8] sm:$0xf0] }
 0x405   : > { %3755 = vmatmul.bf16.gmra.mxu0 %v7052_v45  ;;  %v3509_v51 = vpop.f32.mrf.mxu2  ;;  %4642 = vst [vmem:[%s7292_s23 + $0x8] sm:$0xff] %v4618_v9  ;;  %3851 = vmatpush.bf16.msrb.mxu3 %v5584_v28 }
 0x406   : > { %v4194_v29 = vmax.f32 %v3586_v44, %v4098_v36  ;;  %v3510_v47 = vadd.f32 %v3509_v51, %v3471_v48  ;;  %v3548_v35 = vpop.f32.mrf.mxu3 }
 0x408   : > { %v7463_v37 = vmax.f32 %v4302_v6, %v4194_v29  ;;  %v3549_v8 = vadd.f32 %v3548_v35, %v3510_v47  ;;  %v5556_v6 = vor.u32 %v6233_v5, %v5553_v17  ;;  %v6361_v17 = vld [vmem:[#allocation5 + $0x7dc] sm:$0xf] }
 0x409   : > { %v3475_v53 = vpop.f32.mrf.mxu1  ;;  %4000 = vmatpush.bf16.msra.mxu3 %v5812_v55  ;;  %v6289_v55 = vld [vmem:[#allocation5 + $0x59c] sm:$0xf] }
 0x40a   : > { %v3588_v43 = vadd.f32 %v7448_v1, %v3549_v8  ;;  %v3592_v11 = vpop.f32.mrf.mxu0  ;;  %3677 = vmatmul.bf16.gmra.mxu2 %v7057_v56  ;;  %v3476_v61 = vadd.f32 %v3475_v53, %v7421_v31 }
 0x40b   : > { %3716 = vmatmul.bf16.gmra.mxu3 %v7059_v59  ;;  %3961 = vmatpush.bf16.msrb.mxu2 %v5556_v6 }
 0x40c   : > { %v4106_v19 = vmul.f32 0.01, %v3588_v43 }
 0x40d   : > { %v3512_v40 = vpop.f32.mrf.mxu2 }
 0x40e   : > { %v3513_v25 = vadd.f32 %v3512_v40, %v3474_v27  ;;  %v3551_v52 = vpop.f32.mrf.mxu3  ;;  %v4202_v50 = vmax.f32 %v3588_v43, %v4106_v19  ;;  %v6068_v19 = vor.u32 %v6361_v17, %v6065_v20 }
 0x410   : > { %v3552_v33 = vadd.f32 %v3551_v52, %v3513_v25  ;;  %v6169_v25 = vld [vmem:[#allocation5 + $0x1dc] sm:$0xf]  ;;  %4039 = vmatpush.bf16.msrb.mxu0 %v6068_v19 }
 0x411   : > { %v3478_v21 = vpop.f32.mrf.mxu1  ;;  %v5297_v52 = vld [vmem:[#allocation5 + $0x1f8] sm:$0xf0] }
 0x412   : > { %v3591_v62 = vadd.f32 %v3590_v10, %v3552_v33  ;;  %v3595_v1 = vpop.f32.mrf.mxu0  ;;  %v3479_v29 = vadd.f32 %v3478_v21, %v7421_v31  ;;  %v5300_v5 = vor.u32 %v6169_v25, %v5297_v52  ;;  %v6225_v21 = vld [vmem:[#allocation5 + $0x39c] sm:$0xf] }
 0x414   : > { %v4114_v44 = vmul.f32 0.01, %v3591_v62  ;;  %3643 = vmatmul.bf16.gmra.mxu1 %v7069_v38 }
 0x415   : > { %3760 = vmatmul.bf16.gmra.mxu0 %v7072_v39  ;;  %v3514_v30 = vpop.f32.mrf.mxu2  ;;  %3922 = vmatpush.bf16.msrb.mxu1 %v5300_v5 }
 0x416   : > { %v4210_v48 = vmax.f32 %v3591_v62, %v4114_v44  ;;  %v3515_v36 = vadd.f32 %v3514_v30, %v3476_v61  ;;  %v3553_v9 = vpop.f32.mrf.mxu3  ;;  %v5521_v62 = vld [vmem:[#allocation5 + $0x3b8] sm:$0xf0] }
 0x417   : > { %v5777_v61 = vld [vmem:[#allocation5 + $0x5b8] sm:$0xf0] }
 0x418   : > { %v4366_v51 = vmax.f32 %v4202_v50, %v4210_v48  ;;  %v3554_v46 = vadd.f32 %v3553_v9, %v3515_v36  ;;  %v6161_v44 = vld [vmem:[#allocation5 + $0x19c] sm:$0xf]  ;;  %v5780_v48 = vor.u32 %v6289_v55, %v5777_v61 }
 0x419   : > { %v3480_v42 = vpop.f32.mrf.mxu1  ;;  %v5265_v30 = vld [vmem:[#allocation5 + $0x1b8] sm:$0xf0] }
 0x41a   : > { %v3593_v10 = vadd.f32 %v3592_v11, %v3554_v46  ;;  %v3597_v34 = vpop.f32.mrf.mxu0  ;;  %3682 = vmatmul.bf16.gmra.mxu2 %v7077_v41  ;;  %v3481_v11 = vadd.f32 %v3480_v42, %v7421_v31  ;;  %v5268_v36 = vor.u32 %v6161_v44, %v5265_v30  ;;  %v6353_v9 = vld [vmem:[#allocation5 + $0x79c] sm:$0xf]  ;;  %4001 = vmatpush.bf16.msra.mxu3 %v5780_v48 }
 0x41b   : > { %3721 = vmatmul.bf16.gmra.mxu3 %v7079_v2  ;;  %v6217_v46 = vld [vmem:[#allocation5 + $0x35c] sm:$0xf] }
 0x41c   : > { %v4122_v47 = vmul.f32 0.01, %v3593_v10  ;;  %3923 = vmatpush.bf16.msrb.mxu1 %v5268_v36 }
 0x41d   : > { %v3517_v35 = vpop.f32.mrf.mxu2 }
 0x41e   : > { %v4218_v24 = vmax.f32 %v3593_v10, %v4122_v47  ;;  %v3518_v14 = vadd.f32 %v3517_v35, %v3479_v29  ;;  %v3556_v28 = vpop.f32.mrf.mxu3  ;;  %v5489_v29 = vld [vmem:[#allocation5 + $0x378] sm:$0xf0] }
 0x41f   : > { %v6281_v47 = vld [vmem:[#allocation5 + $0x55c] sm:$0xf] }
 0x420   : > { %v7475_v8 = vmax.f32 %v4366_v51, %v4218_v24  ;;  %v3557_v53 = vadd.f32 %v3556_v28, %v3518_v14  ;;  %v6033_v51 = vld [vmem:[#allocation5 + $0x7b8] sm:$0xf0] }
 0x421   : > { %v3483_v43 = vpop.f32.mrf.mxu1  ;;  %v6036_v10 = vor.u32 %v6353_v9, %v6033_v51  ;;  %v5745_v35 = vld [vmem:[#allocation5 + $0x578] sm:$0xf0] }
 0x422   : > { %v3596_v27 = vadd.f32 %v3595_v1, %v3557_v53  ;;  %v3600_v40 = vpop.f32.mrf.mxu0  ;;  %v5524_v1 = vor.u32 %v6225_v21, %v5521_v62  ;;  %v5492_v53 = vor.u32 %v6217_v46, %v5489_v29  ;;  %v3484_v25 = vadd.f32 %v3483_v43, %v7421_v31  ;;  %v6153_v51 = vld [vmem:[#allocation5 + $0x15c] sm:$0xf] }
 0x423   : > { %4040 = vmatpush.bf16.msrb.mxu0 %v6036_v10  ;;  %v5233_v46 = vld [vmem:[#allocation5 + $0x178] sm:$0xf0] }
 0x424   : > { %3774 = vmatmul.bf16.vlgmr.msra.gmra.mxu1 %v6969_v60  ;;  %3962 = vmatpush.bf16.msrb.mxu2 %v5524_v1  ;;  %v4130_v24 = vmul.f32 0.01, %v3596_v27  ;;  %v5236_v10 = vor.u32 %v6153_v51, %v5233_v46  ;;  %v6345_v29 = vld [vmem:[#allocation5 + $0x75c] sm:$0xf] }
 0x425   : > { %3891 = vmatmul.bf16.vlgmr.msra.gmra.mxu0 %v6972_v0  ;;  %v3519_v33 = vpop.f32.mrf.mxu2 }
 0x426   : > { %v3520_v6 = vadd.f32 %v3519_v33, %v3481_v11  ;;  %v3558_v32 = vpop.f32.mrf.mxu3  ;;  %v5748_v11 = vor.u32 %v6281_v47, %v5745_v35  ;;  %v4226_v5 = vmax.f32 %v3596_v27, %v4130_v24  ;;  %v6001_v47 = vld [vmem:[#allocation5 + $0x778] sm:$0xf0]  ;;  %3924 = vmatpush.bf16.msrb.mxu1 %v5236_v10 }
 0x427   : > { %v6209_v35 = vld [vmem:[#allocation5 + $0x31c] sm:$0xf] }
 0x428   : > { %v3559_v50 = vadd.f32 %v3558_v32, %v3520_v6  ;;  %3963 = vmatpush.bf16.msrb.mxu2 %v5492_v53  ;;  %4002 = vmatpush.bf16.msra.mxu3 %v5748_v11  ;;  %v6004_v53 = vor.u32 %v6345_v29, %v6001_v47  ;;  %v5457_v11 = vld [vmem:[#allocation5 + $0x338] sm:$0xf0] }
 0x429   : > { %v3485_v42 = vpop.f32.mrf.mxu1 }
 0x42a   : > { %v3598_v14 = vadd.f32 %v3597_v34, %v3559_v50  ;;  %v3602_v28 = vpop.f32.mrf.mxu0  ;;  %3813 = vmatmul.bf16.vlgmr.msra.gmra.mxu2 %v6977_v4  ;;  %v3486_v55 = vadd.f32 %v3485_v42, %v7421_v31  ;;  %4041 = vmatpush.bf16.msrb.mxu0 %v6004_v53 }
 0x42b   : > { %3852 = vmatmul.bf16.vlgmr.msrb.gmra.mxu3 %v6979_v18 }
 0x42c   : > { %v4138_v52 = vmul.f32 0.01, %v3598_v14 }
 0x42d   : > { %v3522_v33 = vpop.f32.mrf.mxu2 }
 0x42e   : > { %v4234_v17 = vmax.f32 %v3598_v14, %v4138_v52  ;;  %v3523_v20 = vadd.f32 %v3522_v33, %v3484_v25  ;;  %v3561_v21 = vpop.f32.mrf.mxu3  ;;  %v6273_v25 = vld [vmem:[#allocation5 + $0x51c] sm:$0xf] }
 0x42f   : > { %v5713_v52 = vld [vmem:[#allocation5 + $0x538] sm:$0xf0] }
 0x430   : > { %v4430_v34 = vmax.f32 %v4226_v5, %v4234_v17  ;;  %v3562_v6 = vadd.f32 %v3561_v21, %v3523_v20  ;;  %v6145_v33 = vld [vmem:[#allocation5 + $0x11c] sm:$0xf]  ;;  %v5716_v20 = vor.u32 %v6273_v25, %v5713_v52 }
 0x431   : > { %v3488_v32 = vpop.f32.mrf.mxu1  ;;  %v5201_v5 = vld [vmem:[#allocation5 + $0x138] sm:$0xf0] }
 0x432   : > { %v3601_v19 = vadd.f32 %v3600_v40, %v3562_v6  ;;  %v3605_v62 = vpop.f32.mrf.mxu0  ;;  %v3489_v40 = vadd.f32 %v3488_v32, %v7421_v31  ;;  %v5204_v21 = vor.u32 %v6145_v33, %v5201_v5  ;;  %v5969_v6 = vld [vmem:[#allocation5 + $0x738] sm:$0xf0]  ;;  %4003 = vmatpush.bf16.msra.mxu3 %v5716_v20 }
 0x433   : > { %v6201_v32 = vld [vmem:[#allocation5 + $0x2dc] sm:$0xf] }
 0x434   : > { %v4146_v1 = vmul.f32 0.01, %v3601_v19  ;;  %3779 = vmatmul.bf16.gmra.mxu1 %v6989_v54 }
 0x435   : > { %3896 = vmatmul.bf16.gmra.mxu0 %v6992_v58  ;;  %v3524_v43 = vpop.f32.mrf.mxu2  ;;  %3925 = vmatpush.bf16.msrb.mxu1 %v5204_v21 }
 0x436   : > { %v4242_v61 = vmax.f32 %v3601_v19, %v4146_v1  ;;  %v3525_v44 = vadd.f32 %v3524_v43, %v3486_v55  ;;  %v3563_v27 = vpop.f32.mrf.mxu3  ;;  %v5425_v1 = vld [vmem:[#allocation5 + $0x2f8] sm:$0xf0] }
 0x437   : > { %v6265_v43 = vld [vmem:[#allocation5 + $0x4dc] sm:$0xf] }
 0x438   : > { %v7486_v30 = vmax.f32 %v4430_v34, %v4242_v61  ;;  %v3564_v50 = vadd.f32 %v3563_v27, %v3525_v44  ;;  %v6337_v34 = vld [vmem:[#allocation5 + $0x71c] sm:$0xf] }
 0x439   : > { %v3490_v48 = vpop.f32.mrf.mxu1  ;;  %v5972_v55 = vor.u32 %v6337_v34, %v5969_v6  ;;  %v5681_v61 = vld [vmem:[#allocation5 + $0x4f8] sm:$0xf0] }
 0x43a   : > { %v3603_v36 = vadd.f32 %v3602_v28, %v3564_v50  ;;  %v3607_v9 = vpop.f32.mrf.mxu0  ;;  %3818 = vmatmul.bf16.gmra.mxu2 %v6997_v12  ;;  %v5460_v28 = vor.u32 %v6209_v35, %v5457_v11  ;;  %v5684_v51 = vor.u32 %v6265_v43, %v5681_v61  ;;  %v3491_v46 = vadd.f32 %v3490_v48, %v7421_v31  ;;  %v5169_v6 = vld [vmem:[#allocation5 + $0xf8] sm:$0xf0] }
 0x43b   : > { %3857 = vmatmul.bf16.gmra.mxu3 %v6999_v13  ;;  %4042 = vmatpush.bf16.msrb.mxu0 %v5972_v55 }
 0x43c   : > { %3964 = vmatpush.bf16.msrb.mxu2 %v5460_v28  ;;  %v4154_v44 = vmul.f32 0.01, %v3603_v36  ;;  %4004 = vmatpush.bf16.msra.mxu3 %v5684_v51  ;;  %v6321_v51 = vld [vmem:[#allocation5 + $0x69c] sm:$0xf] }
 0x43d   : > { %v3527_v42 = vpop.f32.mrf.mxu2 }
 0x43e   : > { %v3528_v24 = vadd.f32 %v3527_v42, %v3489_v40  ;;  %v3566_v14 = vpop.f32.mrf.mxu3  ;;  %v5428_v40 = vor.u32 %v6201_v32, %v5425_v1  ;;  %v4250_v29 = vmax.f32 %v3603_v36, %v4154_v44  ;;  %v6329_v32 = vld [vmem:[#allocation5 + $0x6dc] sm:$0xf] }
 0x43f   : > { %v5937_v1 = vld [vmem:[#allocation5 + $0x6f8] sm:$0xf0] }
 0x440   : > { %v3567_v17 = vadd.f32 %v3566_v14, %v3528_v24  ;;  %3965 = vmatpush.bf16.msrb.mxu2 %v5428_v40  ;;  %v7495_v14 = vperm.slane %v7418_v22, 5  ;;  %v5940_v61 = vor.u32 %v6329_v32, %v5937_v1  ;;  %v5137_v40 = vld [vmem:[#allocation5 + $0xb8] sm:$0xf0] }
 0x441   : > { %v3619_v19 = vpop.f32.mrf.mxu1  ;;  %v5105_v32 = vld [vmem:[#allocation5 + $0x78] sm:$0xf0] }
 0x442   : > { %v3606_v27 = vadd.f32 %v3605_v62, %v3567_v17  ;;  %v3736_v50 = vpop.f32.mrf.mxu0  ;;  %v3620_v25 = vadd.f32 %v3619_v19, %v7495_v14  ;;  %4043 = vmatpush.bf16.msrb.mxu0 %v5940_v61  ;;  %v5873_v61 = vld [vmem:[#allocation5 + $0x678] sm:$0xf0] }
 0x444   : > { %v4162_v42 = vmul.f32 0.01, %v3606_v27  ;;  %3784 = vmatmul.bf16.gmra.mxu1 %v7009_v49 }
 0x445   : > { %3901 = vmatmul.bf16.gmra.mxu0 %v7012_v57  ;;  %v3529_v10 = vpop.f32.mrf.mxu2 }
 0x446   : > { %v4258_v47 = vmax.f32 %v3606_v27, %v4162_v42  ;;  %v3530_v35 = vadd.f32 %v3529_v10, %v3491_v46  ;;  %v3568_v24 = vpop.f32.mrf.mxu3  ;;  %v6193_v42 = vld [vmem:[#allocation5 + $0x29c] sm:$0xf] }
 0x447   : > { %v5393_v10 = vld [vmem:[#allocation5 + $0x2b8] sm:$0xf0] }
 0x448   : > { %v4494_v62 = vmax.f32 %v4250_v29, %v4258_v47  ;;  %v3569_v53 = vadd.f32 %v3568_v24, %v3530_v35  ;;  %v6257_v29 = vld [vmem:[#allocation5 + $0x49c] sm:$0xf]  ;;  %v5396_v24 = vor.u32 %v6193_v42, %v5393_v10 }
 0x449   : > { %v3621_v11 = vpop.f32.mrf.mxu1  ;;  %v6113_v42 = vld [vmem:[#allocation5 + $0x1c] sm:$0xf] }
 0x44a   : > { %v3608_v31 = vadd.f32 %v3607_v9, %v3569_v53  ;;  %v3738_v48 = vpop.f32.mrf.mxu0  ;;  %3823 = vmatmul.bf16.gmra.mxu2 %v7017_v15  ;;  %v6137_v9 = vld [vmem:[#allocation5 + $0xdc] sm:$0xf]  ;;  %v3622_v55 = vadd.f32 %v3621_v11, %v7495_v14 }
 0x44b   : > { %3862 = vmatmul.bf16.gmra.mxu3 %v7019_v16  ;;  %v5172_v19 = vor.u32 %v6137_v9, %v5169_v6  ;;  %v5905_v53 = vld [vmem:[#allocation5 + $0x6b8] sm:$0xf0]  ;;  %3966 = vmatpush.bf16.msrb.mxu2 %v5396_v24 }
 0x44c   : > { %v4170_v28 = vmul.f32 0.01, %v3608_v31  ;;  %v6185_v11 = vld [vmem:[#allocation5 + $0x25c] sm:$0xf] }
 0x44d   : > { %v3658_v36 = vpop.f32.mrf.mxu2  ;;  %3926 = vmatpush.bf16.msrb.mxu1 %v5172_v19  ;;  %v5617_v9 = vld [vmem:[#allocation5 + $0x478] sm:$0xf0] }
 0x44e   : > { %v4266_v52 = vmax.f32 %v3608_v31, %v4170_v28  ;;  %v3659_v33 = vadd.f32 %v3658_v36, %v3620_v25  ;;  %v3697_v5 = vpop.f32.mrf.mxu3  ;;  %v6121_v6 = vld [vmem:[#allocation5 + $0x5c] sm:$0xf] }
 0x44f   : > { %v5108_v1 = vor.u32 %v6121_v6, %v5105_v32  ;;  %v5073_v10 = vld [vmem:[#allocation5 + $0x38] sm:$0xf0] }
 0x450   : > { %v7500_v17 = vmax.f32 %v4494_v62, %v4266_v52  ;;  %v3698_v20 = vadd.f32 %v3697_v5, %v3659_v33  ;;  %v5649_v62 = vld [vmem:[#allocation5 + $0x4b8] sm:$0xf0]  ;;  %v5908_v5 = vor.u32 %v6321_v51, %v5905_v53  ;;  %v5076_v24 = vor.u32 %v6113_v42, %v5073_v10 }
 0x451   : > { %v3624_v22 = vpop.f32.mrf.mxu1  ;;  %v5652_v36 = vor.u32 %v6257_v29, %v5649_v62  ;;  %v5361_v52 = vld [vmem:[#allocation5 + $0x278] sm:$0xf0] }
 0x452   : > { %v7502_v21 = vadd.f32 %v3736_v50, %v3698_v20  ;;  %v7504_v34 = vpop.f32.mrf.mxu0  ;;  %v6129_v50 = vld [vmem:[#allocation5 + $0x9c] sm:$0xf]  ;;  %v5364_v20 = vor.u32 %v6185_v11, %v5361_v52  ;;  %4044 = vmatpush.bf16.msrb.mxu0 %v5908_v5  ;;  %v4304_v11 = vrot.slane %v7463_v37, 4 }
 0x453   : > { %v5140_v47 = vor.u32 %v6129_v50, %v5137_v40  ;;  %v6249_v33 = vld [vmem:[#allocation5 + $0x45c] sm:$0xf]  ;;  %4005 = vmatpush.bf16.msra.mxu3 %v5652_v36 }
 0x454   : > { %3789 = vmatmul.bf16.gmra.mxu1 %v7029_v63  ;;  %v4083_v31 = vmul.f32 0.01, %v7502_v21  ;;  %3967 = vmatpush.bf16.msrb.mxu2 %v5364_v20  ;;  %v6305_v29 = vld [vmem:[#allocation5 + $0x61c] sm:$0xf] }
 0x455   : > { %3906 = vmatmul.bf16.gmra.mxu0 %v7032_v7  ;;  %v3660_v43 = vpop.f32.mrf.mxu2  ;;  %3927 = vmatpush.bf16.msrb.mxu1 %v5140_v47  ;;  %v5841_v62 = vld [vmem:[#allocation5 + $0x638] sm:$0xf0] }
 0x456   : > { %v3661_v44 = vadd.f32 %v3660_v43, %v3622_v55  ;;  %v3699_v27 = vpop.f32.mrf.mxu3  ;;  %v3625_v55 = vadd.f32 %v3624_v22, %v7495_v14  ;;  %v6313_v43 = vld [vmem:[#allocation5 + $0x65c] sm:$0xf]  ;;  %v4179_v50 = vmax.f32 %v7502_v21, %v4083_v31  ;;  %v5844_v31 = vor.u32 %v6305_v29, %v5841_v62 }
 0x457   : > { %v5329_v5 = vld [vmem:[#allocation5 + $0x238] sm:$0xf0] }
 0x458   : > { %v3700_v46 = vadd.f32 %v3699_v27, %v3661_v44  ;;  %v5876_v27 = vor.u32 %v6313_v43, %v5873_v61  ;;  %v6241_v20 = vld [vmem:[#allocation5 + $0x41c] sm:$0xf] }
 0x459   : > { %v7509_v35 = vpop.f32.mrf.mxu1  ;;  %3928 = vmatpush.bf16.msrb.mxu1 %v5108_v1 }
 0x45a   : > { %v3739_v25 = vadd.f32 %v3738_v48, %v3700_v46  ;;  %v7512_v28 = vpop.f32.mrf.mxu0  ;;  %3828 = vmatmul.bf16.gmra.mxu2 %v7037_v23  ;;  %v5620_v48 = vor.u32 %v6249_v33, %v5617_v9  ;;  %4045 = vmatpush.bf16.msrb.mxu0 %v5876_v27  ;;  %v6177_v33 = vld [vmem:[#allocation5 + $0x21c] sm:$0xf]  ;;  %v4305_v9 = vmax.f32 %v7463_v37, %v4304_v11 }
 0x45b   : > { %3867 = vmatmul.bf16.gmra.mxu3 %v7039_v3  ;;  %v3627_v61 = vadd.f32 %v7509_v35, %v7495_v14 }
 0x45c   : > { %v4091_v19 = vmul.f32 0.01, %v3739_v25  ;;  %4006 = vmatpush.bf16.msra.mxu3 %v5620_v48  ;;  %v4306_v43 = vrot.slane %v4305_v9, 2 }
 0x45d   : > { %v3663_v44 = vpop.f32.mrf.mxu2  ;;  %3929 = vmatpush.bf16.msrb.mxu1 %v5076_v24 }
 0x45e   : > { %v4187_v40 = vmax.f32 %v3739_v25, %v4091_v19  ;;  %v3664_v46 = vadd.f32 %v3663_v44, %v3625_v55  ;;  %v3702_v51 = vpop.f32.mrf.mxu3  ;;  %v5332_v55 = vor.u32 %v6177_v33, %v5329_v5  ;;  %v5585_v19 = vld [vmem:[#allocation5 + $0x438] sm:$0xf0]  ;;  %4046 = vmatpush.bf16.msrb.mxu0 %v5844_v31 }
 0x460   : > { %v4310_v22 = vmax.f32 %v4179_v50, %v4187_v40  ;;  %v3703_v47 = vadd.f32 %v3702_v51, %v3664_v46  ;;  %3968 = vmatpush.bf16.msrb.mxu2 %v5332_v55  ;;  %v4307_v51 = vmax.f32 %v4305_v9, %v4306_v43 }
 0x461   : > { %v3629_v53 = vpop.f32.mrf.mxu1 }
 0x462   : > { %v3742_v36 = vadd.f32 %v7504_v34, %v3703_v47  ;;  %v3746_v21 = vpop.f32.mrf.mxu0  ;;  %v5588_v34 = vor.u32 %v6241_v20, %v5585_v19  ;;  %v3630_v50 = vadd.f32 %v3629_v53, %v7495_v14  ;;  %v4308_v35 = vrot.slane %v4307_v51, 1 }
 0x464   : > { %v4099_v25 = vmul.f32 0.01, %v3742_v36  ;;  %3794 = vmatmul.bf16.gmra.mxu1 %v7049_v26  ;;  %4007 = vmatpush.bf16.msra.mxu3 %v5588_v34 }
 0x465   : > { %3911 = vmatmul.bf16.gmra.mxu0 %v7052_v45  ;;  %v3665_v52 = vpop.f32.mrf.mxu2 }
 0x466   : > { %v4195_v6 = vmax.f32 %v3742_v36, %v4099_v25  ;;  %v3704_v32 = vpop.f32.mrf.mxu3  ;;  %v3666_v40 = vadd.f32 %v3665_v52, %v3627_v61  ;;  %v4309_v52 = vmax.f32 %v4307_v51, %v4308_v35 }
 0x468   : > { %v4311_v48 = vmax.f32 %v4310_v22, %v4195_v6  ;;  %v3705_v47 = vadd.f32 %v3704_v32, %v3666_v40 }
 0x469   : > { %v3631_v1 = vpop.f32.mrf.mxu1 }
 0x46a   : > { %v4312_v44 = vrot.slane %v4311_v48, 4  ;;  %v3748_v27 = vpop.f32.mrf.mxu0  ;;  %3833 = vmatmul.bf16.gmra.mxu2 %v7057_v56  ;;  %v3744_v33 = vadd.f32 %v7512_v28, %v3705_v47  ;;  %v3632_v5 = vadd.f32 %v3631_v1, %v7495_v14 }
 0x46b   : > { %3872 = vmatmul.bf16.gmra.mxu3 %v7059_v59 }
 0x46c   : > { %v4313_v37 = vmax.f32 %v4311_v48, %v4312_v44  ;;  %v4107_v19 = vmul.f32 0.01, %v3744_v33  ;;  %v4368_v48 = vrot.slane %v7475_v8, 4 }
 0x46d   : > { %v3668_v46 = vpop.f32.mrf.mxu2 }
 0x46e   : > { %v4314_v42 = vrot.slane %v4313_v37, 2  ;;  %v3669_v10 = vadd.f32 %v3668_v46, %v3630_v50  ;;  %v3707_v29 = vpop.f32.mrf.mxu3  ;;  %v4203_v61 = vmax.f32 %v3744_v33, %v4107_v19  ;;  %v4369_v50 = vmax.f32 %v7475_v8, %v4368_v48 }
 0x470   : > { %v4315_v22 = vmax.f32 %v4313_v37, %v4314_v42  ;;  %v3708_v24 = vadd.f32 %v3707_v29, %v3669_v10  ;;  %v4370_v29 = vrot.slane %v4369_v50, 2 }
 0x471   : > { %v3634_v62 = vpop.f32.mrf.mxu1 }
 0x472   : > { %v4316_v11 = vrot.slane %v4315_v22, 1  ;;  %v3747_v36 = vadd.f32 %v3746_v21, %v3708_v24  ;;  %v3751_v31 = vpop.f32.mrf.mxu0  ;;  %v4371_v8 = vmax.f32 %v4369_v50, %v4370_v29 }
 0x474   : > { %v4317_v25 = vmax.f32 %v4315_v22, %v4316_v11  ;;  %3799 = vmatmul.bf16.gmra.mxu1 %v7069_v38  ;;  %v4115_v9 = vmul.f32 0.01, %v3747_v36  ;;  %v3635_v22 = vadd.f32 %v3634_v62, %v7495_v14  ;;  %v4372_v62 = vrot.slane %v4371_v8, 1 }
 0x475   : > { %3916 = vmatmul.bf16.gmra.mxu0 %v7072_v39  ;;  %v3670_v53 = vpop.f32.mrf.mxu2 }
 0x476   : > { %v4564_v20 = vrot.slane %v4317_v25, 4  ;;  %v3671_v6 = vadd.f32 %v3670_v53, %v3632_v5  ;;  %v3709_v32 = vpop.f32.mrf.mxu3  ;;  %v4211_v28 = vmax.f32 %v3747_v36, %v4115_v9  ;;  %v4373_v48 = vmax.f32 %v4371_v8, %v4372_v62 }
 0x478   : > { %v4581_v55 = vsel %vm4578_vm1, %v4309_v52, %v4564_v20  ;;  %v3710_v21 = vadd.f32 %v3709_v32, %v3671_v6  ;;  %v4374_v40 = vmax.f32 %v4203_v61, %v4211_v28 }
 0x479   : > { %v3636_v34 = vpop.f32.mrf.mxu1 }
 0x47a   : > { %v3749_v43 = vadd.f32 %v3748_v27, %v3710_v21  ;;  %v3753_v1 = vpop.f32.mrf.mxu0  ;;  %3838 = vmatmul.bf16.gmra.mxu2 %v7077_v41  ;;  %v3637_v35 = vadd.f32 %v3636_v34, %v7495_v14 }
 0x47b   : > { %3877 = vmatmul.bf16.gmra.mxu3 %v7079_v2 }
 0x47c   : > { %v4123_v44 = vmul.f32 0.01, %v3749_v43 }
 0x47d   : > { %v3673_v37 = vpop.f32.mrf.mxu2 }
 0x47e   : > { %v4219_v46 = vmax.f32 %v3749_v43, %v4123_v44  ;;  %v3712_v51 = vpop.f32.mrf.mxu3  ;;  %v3674_v11 = vadd.f32 %v3673_v37, %v3635_v22 }
 0x480   : > { %v4375_v42 = vmax.f32 %v4374_v40, %v4219_v46  ;;  %v3713_v52 = vadd.f32 %v3712_v51, %v3674_v11 }
 0x481   : > { %v3639_v10 = vpop.f32.mrf.mxu1 }
 0x482   : > { %v4376_v47 = vrot.slane %v4375_v42, 4  ;;  %v3756_v27 = vpop.f32.mrf.mxu0  ;;  %v3752_v21 = vadd.f32 %v3751_v31, %v3713_v52 }
 0x484   : > { %v4377_v24 = vmax.f32 %v4375_v42, %v4376_v47  ;;  %3930 = vmatmul.bf16.vlgmr.msrb.gmra.mxu1 %v6969_v60  ;;  %v4131_v50 = vmul.f32 0.01, %v3752_v21 }
 0x485   : > { %4047 = vmatmul.bf16.vlgmr.msrb.gmra.mxu0 %v6972_v0  ;;  %v3675_v36 = vpop.f32.mrf.mxu2  ;;  %v3640_v0 = vadd.f32 %v3639_v10, %v7495_v14 }
 0x486   : > { %v4378_v25 = vrot.slane %v4377_v24, 2  ;;  %v3676_v33 = vadd.f32 %v3675_v36, %v3637_v35  ;;  %v3714_v5 = vpop.f32.mrf.mxu3  ;;  %v4227_v29 = vmax.f32 %v3752_v21, %v4131_v50 }
 0x488   : > { %v4379_v53 = vmax.f32 %v4377_v24, %v4378_v25  ;;  %v3715_v20 = vadd.f32 %v3714_v5, %v3676_v33 }
 0x489   : > { %v3641_v9 = vpop.f32.mrf.mxu1 }
 0x48a   : > { %v4380_v6 = vrot.slane %v4379_v53, 1  ;;  %v3754_v32 = vadd.f32 %v3753_v1, %v3715_v20  ;;  %v3758_v19 = vpop.f32.mrf.mxu0  ;;  %3969 = vmatmul.bf16.vlgmr.msrb.gmra.mxu2 %v6977_v4  ;;  %v4432_v4 = vrot.slane %v7486_v30, 4  ;;  %v3642_v33 = vadd.f32 %v3641_v9, %v7495_v14 }
 0x48b   : > { %4008 = vmatmul.bf16.vlgmr.msra.gmra.mxu3 %v6979_v18 }
 0x48c   : > { %v4381_v60 = vmax.f32 %v4379_v53, %v4380_v6  ;;  %v4139_v43 = vmul.f32 0.01, %v3754_v32  ;;  %v4433_v24 = vmax.f32 %v7486_v30, %v4432_v4 }
 0x48d   : > { %v3678_v34 = vpop.f32.mrf.mxu2 }
 0x48e   : > { %v4568_v28 = vrot.slane %v4381_v60, 4  ;;  %v3679_v61 = vadd.f32 %v3678_v34, %v3640_v0  ;;  %v3717_v44 = vpop.f32.mrf.mxu3  ;;  %v4235_v51 = vmax.f32 %v3754_v32, %v4139_v43 }
 0x490   : > { %v4585_v37 = vsel %vm4578_vm1, %v4373_v48, %v4568_v28  ;;  %v3718_v40 = vadd.f32 %v3717_v44, %v3679_v61  ;;  %v4438_v35 = vmax.f32 %v4227_v29, %v4235_v51  ;;  %v7562_v51 = vld [vmem:[%s7690_s8] sm:$0xff] }
 0x491   : > { %v4619_v1 = vrot.slane %v4585_v37, 7  ;;  %v3644_v46 = vpop.f32.mrf.mxu1 }
 0x492   : > { %v3757_v18 = vadd.f32 %v3756_v27, %v3718_v40  ;;  %v3761_v42 = vpop.f32.mrf.mxu0  ;;  %v4434_v27 = vrot.slane %v4433_v24, 2 }
 0x493   : > { %v4620_v31 = vsel %vm4596_vm2, %v4619_v1, %v4581_v55 }
 0x494   : > { %v4621_v10 = vsel %vm4598_vm3, %v4619_v1, %v4620_v31  ;;  %v4147_v22 = vmul.f32 0.01, %v3757_v18  ;;  %3935 = vmatmul.bf16.gmra.mxu1 %v6989_v54  ;;  %v4435_v30 = vmax.f32 %v4433_v24, %v4434_v27 }
 0x495   : > { %4052 = vmatmul.bf16.gmra.mxu0 %v6992_v58  ;;  %v3680_v47 = vpop.f32.mrf.mxu2  ;;  %v3645_v58 = vadd.f32 %v3644_v46, %v7495_v14 }
 0x496   : > { %v4243_v11 = vmax.f32 %v3757_v18, %v4147_v22  ;;  %v3719_v36 = vpop.f32.mrf.mxu3  ;;  %v3681_v53 = vadd.f32 %v3680_v47, %v3642_v33  ;;  %v4436_v9 = vrot.slane %v4435_v30, 1 }
 0x498   : > { %v4439_v8 = vmax.f32 %v4438_v35, %v4243_v11  ;;  %v3720_v60 = vadd.f32 %v3719_v36, %v3681_v53  ;;  %v4437_v44 = vmax.f32 %v4435_v30, %v4436_v9 }
 0x499   : > { %v3646_v25 = vpop.f32.mrf.mxu1 }
 0x49a   : > { %v4440_v55 = vrot.slane %v4439_v8, 4  ;;  %v3763_v5 = vpop.f32.mrf.mxu0  ;;  %3974 = vmatmul.bf16.gmra.mxu2 %v6997_v12  ;;  %v3759_v43 = vadd.f32 %v3758_v19, %v3720_v60 }
 0x49b   : > { %4013 = vmatmul.bf16.gmra.mxu3 %v6999_v13  ;;  %v3647_v13 = vadd.f32 %v3646_v25, %v7495_v14  ;;  %v7565_v14 = vperm.slane %v7562_v51, 6 }
 0x49c   : > { %v4441_v54 = vmax.f32 %v4439_v8, %v4440_v55  ;;  %v4155_v4 = vmul.f32 0.01, %v3759_v43 }
 0x49d   : > { %v3683_v52 = vpop.f32.mrf.mxu2 }
 0x49e   : > { %v4442_v20 = vrot.slane %v4441_v54, 2  ;;  %v3684_v62 = vadd.f32 %v3683_v52, %v3645_v58  ;;  %v3722_v6 = vpop.f32.mrf.mxu3  ;;  %v4251_v47 = vmax.f32 %v3759_v43, %v4155_v4 }
 0x4a0   : > { %v4443_v32 = vmax.f32 %v4441_v54, %v4442_v20  ;;  %v3723_v21 = vadd.f32 %v3722_v6, %v3684_v62 }
 0x4a1   : > { %v3775_v0 = vpop.f32.mrf.mxu1 }
 0x4a2   : > { %v4444_v34 = vrot.slane %v4443_v32, 1  ;;  %v3762_v48 = vadd.f32 %v3761_v42, %v3723_v21  ;;  %v3892_v28 = vpop.f32.mrf.mxu0  ;;  %v3776_v24 = vadd.f32 %v3775_v0, %v7565_v14 }
 0x4a4   : > { %v4445_v12 = vmax.f32 %v4443_v32, %v4444_v34  ;;  %3940 = vmatmul.bf16.gmra.mxu1 %v7009_v49  ;;  %v4163_v50 = vmul.f32 0.01, %v3762_v48 }
 0x4a5   : > { %4057 = vmatmul.bf16.gmra.mxu0 %v7012_v57  ;;  %v3685_v61 = vpop.f32.mrf.mxu2  ;;  %v4496_v57 = vrot.slane %v7500_v17, 4 }
 0x4a6   : > { %v4572_v37 = vrot.slane %v4445_v12, 4  ;;  %v3686_v40 = vadd.f32 %v3685_v61, %v3647_v13  ;;  %v3724_v1 = vpop.f32.mrf.mxu3  ;;  %v4259_v42 = vmax.f32 %v3762_v48, %v4163_v50 }
 0x4a7   : > { %v4497_v36 = vmax.f32 %v7500_v17, %v4496_v57 }
 0x4a8   : > { %v4589_v46 = vsel %vm4578_vm1, %v4437_v44, %v4572_v37  ;;  %v3725_v49 = vadd.f32 %v3724_v1, %v3686_v40  ;;  %v4502_v25 = vmax.f32 %v4251_v47, %v4259_v42 }
 0x4a9   : > { %v4622_v19 = vrot.slane %v4589_v46, 6  ;;  %v3777_v18 = vpop.f32.mrf.mxu1 }
 0x4aa   : > { %v3764_v31 = vadd.f32 %v3763_v5, %v3725_v49  ;;  %v3894_v29 = vpop.f32.mrf.mxu0  ;;  %3979 = vmatmul.bf16.gmra.mxu2 %v7017_v15  ;;  %v4498_v15 = vrot.slane %v4497_v36, 2  ;;  %v3778_v30 = vadd.f32 %v3777_v18, %v7565_v14 }
 0x4ab   : > { %v4623_v22 = vsel %vm4601_vm4, %v4622_v19, %v4621_v10  ;;  %4018 = vmatmul.bf16.gmra.mxu3 %v7019_v16 }
 0x4ac   : > { %v4171_v35 = vmul.f32 0.01, %v3764_v31  ;;  %v4624_v11 = vsel %vm4603_vm5, %v4622_v19, %v4623_v22  ;;  %v4499_v20 = vmax.f32 %v4497_v36, %v4498_v15 }
 0x4ad   : > { %v3814_v8 = vpop.f32.mrf.mxu2 }
 0x4ae   : > { %v4267_v27 = vmax.f32 %v3764_v31, %v4171_v35  ;;  %v3815_v33 = vadd.f32 %v3814_v8, %v3776_v24  ;;  %v3853_v55 = vpop.f32.mrf.mxu3  ;;  %v4500_v0 = vrot.slane %v4499_v20, 1 }
 0x4b0   : > { %v4503_v5 = vmax.f32 %v4502_v25, %v4267_v27  ;;  %v3854_v54 = vadd.f32 %v3853_v55, %v3815_v33  ;;  %v4501_v13 = vmax.f32 %v4499_v20, %v4500_v0 }
 0x4b1   : > { %v3780_v58 = vpop.f32.mrf.mxu1 }
 0x4b2   : > { %v4504_v10 = vrot.slane %v4503_v5, 4  ;;  %v3893_v53 = vadd.f32 %v3892_v28, %v3854_v54  ;;  %v3897_v16 = vpop.f32.mrf.mxu0  ;;  %v3781_v43 = vadd.f32 %v3780_v58, %v7565_v14 }
 0x4b4   : > { %v4505_v52 = vmax.f32 %v4503_v5, %v4504_v10  ;;  %3945 = vmatmul.bf16.gmra.mxu1 %v7029_v63  ;;  %v4084_v48 = vmul.f32 0.01, %v3893_v53 }
 0x4b5   : > { %4062 = vmatmul.bf16.gmra.mxu0 %v7032_v7  ;;  %v3816_v17 = vpop.f32.mrf.mxu2 }
 0x4b6   : > { %v4506_v62 = vrot.slane %v4505_v52, 2  ;;  %v3817_v6 = vadd.f32 %v3816_v17, %v3778_v30  ;;  %v3855_v32 = vpop.f32.mrf.mxu3  ;;  %v4180_v37 = vmax.f32 %v3893_v53, %v4084_v48 }
 0x4b8   : > { %v4507_v60 = vmax.f32 %v4505_v52, %v4506_v62  ;;  %v3856_v21 = vadd.f32 %v3855_v32, %v3817_v6 }
 0x4b9   : > { %v3782_v9 = vpop.f32.mrf.mxu1 }
 0x4ba   : > { %v4508_v34 = vrot.slane %v4507_v60, 1  ;;  %v3895_v28 = vadd.f32 %v3894_v29, %v3856_v21  ;;  %v3899_v12 = vpop.f32.mrf.mxu0  ;;  %3984 = vmatmul.bf16.gmra.mxu2 %v7037_v23  ;;  %v3783_v42 = vadd.f32 %v3782_v9, %v7565_v14 }
 0x4bb   : > { %4023 = vmatmul.bf16.gmra.mxu3 %v7039_v3 }
 0x4bc   : > { %v4509_v63 = vmax.f32 %v4507_v60, %v4508_v34  ;;  %v4092_v7 = vmul.f32 0.01, %v3895_v28 }
 0x4bd   : > { %v3819_v61 = vpop.f32.mrf.mxu2 }
 0x4be   : > { %v4576_v44 = vrot.slane %v4509_v63, 4  ;;  %v4188_v50 = vmax.f32 %v3895_v28, %v4092_v7  ;;  %v3820_v40 = vadd.f32 %v3819_v61, %v3781_v43  ;;  %v3858_v1 = vpop.f32.mrf.mxu3 }
 0x4c0   : > { %v4593_v46 = vsel %vm4578_vm1, %v4501_v13, %v4576_v44  ;;  %v4318_v4 = vmax.f32 %v4180_v37, %v4188_v50  ;;  %v3859_v49 = vadd.f32 %v3858_v1, %v3820_v40 }
 0x4c1   : > { %v4625_v57 = vrot.slane %v4593_v46, 5  ;;  %v3785_v23 = vpop.f32.mrf.mxu1 }
 0x4c2   : > { %v3898_v19 = vadd.f32 %v3897_v16, %v3859_v49  ;;  %v3902_v3 = vpop.f32.mrf.mxu0 }
 0x4c3   : > { %v4626_v18 = vsel %vm4606_vm6, %v4625_v57, %v4624_v11 }
 0x4c4   : > { %v4100_v31 = vmul.f32 0.01, %v3898_v19  ;;  %3950 = vmatmul.bf16.gmra.mxu1 %v7049_v26  ;;  %v4627_v29 = vsel %vm4608_vm7, %v4625_v57, %v4626_v18  ;;  %v3786_v26 = vadd.f32 %v3785_v23, %v7565_v14 }
 0x4c5   : > { %4067 = vmatmul.bf16.gmra.mxu0 %v7052_v45  ;;  %v3821_v22 = vpop.f32.mrf.mxu2  ;;  %4643 = vst [vmem:[%s7292_s23 + $0x10] sm:$0xff] %v4627_v29 }
 0x4c6   : > { %v4196_v47 = vmax.f32 %v3898_v19, %v4100_v31  ;;  %v3822_v24 = vadd.f32 %v3821_v22, %v3783_v42  ;;  %v3860_v35 = vpop.f32.mrf.mxu3 }
 0x4c8   : > { %v7587_v36 = vmax.f32 %v4318_v4, %v4196_v47  ;;  %v3861_v8 = vadd.f32 %v3860_v35, %v3822_v24 }
 0x4c9   : > { %v3787_v25 = vpop.f32.mrf.mxu1 }
 0x4ca   : > { %v3900_v27 = vadd.f32 %v3899_v12, %v3861_v8  ;;  %v3904_v11 = vpop.f32.mrf.mxu0  ;;  %3989 = vmatmul.bf16.gmra.mxu2 %v7057_v56  ;;  %v3788_v53 = vadd.f32 %v3787_v25, %v7565_v14 }
 0x4cb   : > { %4028 = vmatmul.bf16.gmra.mxu3 %v7059_v59 }
 0x4cc   : > { %v4108_v15 = vmul.f32 0.01, %v3900_v27 }
 0x4cd   : > { %v3824_v33 = vpop.f32.mrf.mxu2 }
 0x4ce   : > { %v3825_v55 = vadd.f32 %v3824_v33, %v3786_v26  ;;  %v3863_v45 = vpop.f32.mrf.mxu3  ;;  %v4204_v52 = vmax.f32 %v3900_v27, %v4108_v15 }
 0x4d0   : > { %v3864_v5 = vadd.f32 %v3863_v45, %v3825_v55 }
 0x4d1   : > { %v3790_v54 = vpop.f32.mrf.mxu1 }
 0x4d2   : > { %v3903_v58 = vadd.f32 %v3902_v3, %v3864_v5  ;;  %v3907_v10 = vpop.f32.mrf.mxu0  ;;  %v3791_v21 = vadd.f32 %v3790_v54, %v7565_v14 }
 0x4d4   : > { %v4116_v16 = vmul.f32 0.01, %v3903_v58  ;;  %3955 = vmatmul.bf16.gmra.mxu1 %v7069_v38 }
 0x4d5   : > { %4072 = vmatmul.bf16.gmra.mxu0 %v7072_v39  ;;  %v3826_v56 = vpop.f32.mrf.mxu2 }
 0x4d6   : > { %v4212_v59 = vmax.f32 %v3903_v58, %v4116_v16  ;;  %v3827_v30 = vadd.f32 %v3826_v56, %v3788_v53  ;;  %v3865_v20 = vpop.f32.mrf.mxu3 }
 0x4d8   : > { %v4382_v17 = vmax.f32 %v4204_v52, %v4212_v59  ;;  %v3866_v62 = vadd.f32 %v3865_v20, %v3827_v30 }
 0x4d9   : > { %v3792_v6 = vpop.f32.mrf.mxu1 }
 0x4da   : > { %v3905_v32 = vadd.f32 %v3904_v11, %v3866_v62  ;;  %v3909_v60 = vpop.f32.mrf.mxu0  ;;  %3994 = vmatmul.bf16.gmra.mxu2 %v7077_v41  ;;  %v3793_v7 = vadd.f32 %v3792_v6, %v7565_v14 }
 0x4db   : > { %4033 = vmatmul.bf16.gmra.mxu3 %v7079_v2 }
 0x4dc   : > { %v4124_v0 = vmul.f32 0.01, %v3905_v32 }
 0x4dd   : > { %v3829_v38 = vpop.f32.mrf.mxu2 }
 0x4de   : > { %v4220_v9 = vmax.f32 %v3905_v32, %v4124_v0  ;;  %v3830_v39 = vadd.f32 %v3829_v38, %v3791_v21  ;;  %v3868_v34 = vpop.f32.mrf.mxu3 }
 0x4e0   : > { %v7598_v48 = vmax.f32 %v4382_v17, %v4220_v9  ;;  %v3869_v28 = vadd.f32 %v3868_v34, %v3830_v39 }
 0x4e1   : > { %v3795_v12 = vpop.f32.mrf.mxu1 }
 0x4e2   : > { %v3908_v63 = vadd.f32 %v3907_v10, %v3869_v28  ;;  %v3912_v43 = vpop.f32.mrf.mxu0  ;;  %v3796_v1 = vadd.f32 %v3795_v12, %v7565_v14 }
 0x4e4   : > { %v4132_v37 = vmul.f32 0.01, %v3908_v63 }
 0x4e5   : > { %v3831_v13 = vpop.f32.mrf.mxu2 }
 0x4e6   : > { %v3832_v61 = vadd.f32 %v3831_v13, %v3793_v7  ;;  %v3870_v41 = vpop.f32.mrf.mxu3  ;;  %v4228_v49 = vmax.f32 %v3908_v63, %v4132_v37 }
 0x4e8   : > { %v3871_v44 = vadd.f32 %v3870_v41, %v3832_v61 }
 0x4e9   : > { %v3797_v2 = vpop.f32.mrf.mxu1 }
 0x4ea   : > { %v3910_v50 = vadd.f32 %v3909_v60, %v3871_v44  ;;  %v3914_v40 = vpop.f32.mrf.mxu0  ;;  %v3798_v22 = vadd.f32 %v3797_v2, %v7565_v14  ;;  %v7608_v60 = vperm.slane %v7562_v51, 7 }
 0x4ec   : > { %v4140_v46 = vmul.f32 0.01, %v3910_v50 }
 0x4ed   : > { %v3834_v4 = vpop.f32.mrf.mxu2 }
 0x4ee   : > { %v4236_v57 = vmax.f32 %v3910_v50, %v4140_v46  ;;  %v3835_v23 = vadd.f32 %v3834_v4, %v3796_v1  ;;  %v3873_v19 = vpop.f32.mrf.mxu3 }
 0x4f0   : > { %v4446_v3 = vmax.f32 %v4228_v49, %v4236_v57  ;;  %v3874_v18 = vadd.f32 %v3873_v19, %v3835_v23 }
 0x4f1   : > { %v3800_v42 = vpop.f32.mrf.mxu1 }
 0x4f2   : > { %v3913_v31 = vadd.f32 %v3912_v43, %v3874_v18  ;;  %v3917_v29 = vpop.f32.mrf.mxu0  ;;  %v3801_v45 = vadd.f32 %v3800_v42, %v7565_v14 }
 0x4f4   : > { %v4148_v47 = vmul.f32 0.01, %v3913_v31 }
 0x4f5   : > { %v3836_v24 = vpop.f32.mrf.mxu2 }
 0x4f6   : > { %v4244_v35 = vmax.f32 %v3913_v31, %v4148_v47  ;;  %v3837_v8 = vadd.f32 %v3836_v24, %v3798_v22  ;;  %v3875_v25 = vpop.f32.mrf.mxu3  ;;  %v4320_v47 = vrot.slane %v7587_v36, 4 }
 0x4f8   : > { %v7603_v27 = vmax.f32 %v4446_v3, %v4244_v35  ;;  %v3876_v11 = vadd.f32 %v3875_v25, %v3837_v8 }
 0x4f9   : > { %v3802_v26 = vpop.f32.mrf.mxu1 }
 0x4fa   : > { %v3915_v33 = vadd.f32 %v3914_v40, %v3876_v11  ;;  %v3919_v55 = vpop.f32.mrf.mxu0  ;;  %v3803_v52 = vadd.f32 %v3802_v26, %v7565_v14  ;;  %v4321_v11 = vmax.f32 %v7587_v36, %v4320_v47 }
 0x4fc   : > { %v4156_v53 = vmul.f32 0.01, %v3915_v33 }
 0x4fd   : > { %v3839_v5 = vpop.f32.mrf.mxu2 }
 0x4fe   : > { %v3840_v54 = vadd.f32 %v3839_v5, %v3801_v45  ;;  %v3878_v15 = vpop.f32.mrf.mxu3  ;;  %v4252_v20 = vmax.f32 %v3915_v33, %v4156_v53  ;;  %v4322_v5 = vrot.slane %v4321_v11, 2 }
 0x500   : > { %v3879_v58 = vadd.f32 %v3878_v15, %v3840_v54 }
 0x501   : > { %v3931_v10 = vpop.f32.mrf.mxu1 }
 0x502   : > { %v3918_v16 = vadd.f32 %v3917_v29, %v3879_v58  ;;  %v4048_v56 = vpop.f32.mrf.mxu0  ;;  %v3932_v39 = vadd.f32 %v3931_v10, %v7608_v60 }
 0x504   : > { %v4164_v59 = vmul.f32 0.01, %v3918_v16 }
 0x505   : > { %v3841_v30 = vpop.f32.mrf.mxu2 }
 0x506   : > { %v4260_v17 = vmax.f32 %v3918_v16, %v4164_v59  ;;  %v3842_v62 = vadd.f32 %v3841_v30, %v3803_v52  ;;  %v3880_v6 = vpop.f32.mrf.mxu3  ;;  %v4323_v52 = vmax.f32 %v4321_v11, %v4322_v5 }
 0x508   : > { %v4510_v32 = vmax.f32 %v4252_v20, %v4260_v17  ;;  %v3881_v21 = vadd.f32 %v3880_v6, %v3842_v62 }
 0x509   : > { %v3933_v0 = vpop.f32.mrf.mxu1 }
 0x50a   : > { %v3920_v38 = vadd.f32 %v3919_v55, %v3881_v21  ;;  %v4050_v9 = vpop.f32.mrf.mxu0  ;;  %v3934_v51 = vadd.f32 %v3933_v0, %v7608_v60 }
 0x50c   : > { %v4172_v34 = vmul.f32 0.01, %v3920_v38 }
 0x50d   : > { %v3970_v28 = vpop.f32.mrf.mxu2 }
 0x50e   : > { %v4268_v12 = vmax.f32 %v3920_v38, %v4172_v34  ;;  %v3971_v14 = vadd.f32 %v3970_v28, %v3932_v39  ;;  %v4009_v63 = vpop.f32.mrf.mxu3 }
 0x510   : > { %v7611_v43 = vmax.f32 %v4510_v32, %v4268_v12  ;;  %v4010_v7 = vadd.f32 %v4009_v63, %v3971_v14  ;;  %v4324_v32 = vrot.slane %v4323_v52, 1 }
 0x511   : > { %v3936_v13 = vpop.f32.mrf.mxu1 }
 0x512   : > { %v4049_v61 = vadd.f32 %v4048_v56, %v4010_v7  ;;  %v4053_v41 = vpop.f32.mrf.mxu0  ;;  %v3937_v49 = vadd.f32 %v3936_v13, %v7608_v60  ;;  %v4325_v28 = vmax.f32 %v4323_v52, %v4324_v32 }
 0x514   : > { %v4085_v1 = vmul.f32 0.01, %v4049_v61 }
 0x515   : > { %v3972_v44 = vpop.f32.mrf.mxu2 }
 0x516   : > { %v3973_v2 = vadd.f32 %v3972_v44, %v3934_v51  ;;  %v4011_v37 = vpop.f32.mrf.mxu3  ;;  %v4181_v19 = vmax.f32 %v4049_v61, %v4085_v1 }
 0x518   : > { %v4012_v50 = vadd.f32 %v4011_v37, %v3973_v2  ;;  %v4384_v2 = vrot.slane %v7598_v48, 4 }
 0x519   : > { %v3938_v40 = vpop.f32.mrf.mxu1 }
 0x51a   : > { %v4051_v46 = vadd.f32 %v4050_v9, %v4012_v50  ;;  %v4055_v4 = vpop.f32.mrf.mxu0  ;;  %v3939_v54 = vadd.f32 %v3938_v40, %v7608_v60 }
 0x51c   : > { %v4093_v57 = vmul.f32 0.01, %v4051_v46 }
 0x51d   : > { %v3975_v23 = vpop.f32.mrf.mxu2 }
 0x51e   : > { %v4189_v3 = vmax.f32 %v4051_v46, %v4093_v57  ;;  %v3976_v18 = vadd.f32 %v3975_v23, %v3937_v49  ;;  %v4014_v42 = vpop.f32.mrf.mxu3 }
 0x520   : > { %v4326_v31 = vmax.f32 %v4181_v19, %v4189_v3  ;;  %v4015_v29 = vadd.f32 %v4014_v42, %v3976_v18 }
 0x521   : > { %v3941_v22 = vpop.f32.mrf.mxu1 }
 0x522   : > { %v4054_v24 = vadd.f32 %v4053_v41, %v4015_v29  ;;  %v4058_v35 = vpop.f32.mrf.mxu0  ;;  %v3942_v10 = vadd.f32 %v3941_v22, %v7608_v60 }
 0x524   : > { %v4101_v8 = vmul.f32 0.01, %v4054_v24 }
 0x525   : > { %v3977_v25 = vpop.f32.mrf.mxu2 }
 0x526   : > { %v4197_v26 = vmax.f32 %v4054_v24, %v4101_v8  ;;  %v4016_v33 = vpop.f32.mrf.mxu3  ;;  %v3978_v53 = vadd.f32 %v3977_v25, %v3939_v54 }
 0x528   : > { %v4327_v55 = vmax.f32 %v4326_v31, %v4197_v26  ;;  %v4017_v36 = vadd.f32 %v4016_v33, %v3978_v53 }
 0x529   : > { %v3943_v45 = vpop.f32.mrf.mxu1 }
 0x52a   : > { %v4328_v15 = vrot.slane %v4327_v55, 4  ;;  %v4060_v16 = vpop.f32.mrf.mxu0  ;;  %v4056_v9 = vadd.f32 %v4055_v4, %v4017_v36  ;;  %v3944_v39 = vadd.f32 %v3943_v45, %v7608_v60  ;;  %v4385_v4 = vmax.f32 %v7598_v48, %v4384_v2 }
 0x52c   : > { %v4329_v58 = vmax.f32 %v4327_v55, %v4328_v15  ;;  %v4109_v41 = vmul.f32 0.01, %v4056_v9  ;;  %v4386_v18 = vrot.slane %v4385_v4, 2 }
 0x52d   : > { %v3980_v56 = vpop.f32.mrf.mxu2 }
 0x52e   : > { %v4330_v59 = vrot.slane %v4329_v58, 2  ;;  %v3981_v30 = vadd.f32 %v3980_v56, %v3942_v10  ;;  %v4019_v20 = vpop.f32.mrf.mxu3  ;;  %v4205_v40 = vmax.f32 %v4056_v9, %v4109_v41  ;;  %v4387_v8 = vmax.f32 %v4385_v4, %v4386_v18 }
 0x530   : > { %v4331_v17 = vmax.f32 %v4329_v58, %v4330_v59  ;;  %v4020_v62 = vadd.f32 %v4019_v20, %v3981_v30  ;;  %v4388_v45 = vrot.slane %v4387_v8, 1 }
 0x531   : > { %v3946_v6 = vpop.f32.mrf.mxu1 }
 0x532   : > { %v4332_v21 = vrot.slane %v4331_v17, 1  ;;  %v4059_v0 = vadd.f32 %v4058_v35, %v4020_v62  ;;  %v4063_v13 = vpop.f32.mrf.mxu0  ;;  %v3947_v42 = vadd.f32 %v3946_v6, %v7608_v60  ;;  %v4389_v52 = vmax.f32 %v4387_v8, %v4388_v45 }
 0x534   : > { %v4333_v38 = vmax.f32 %v4331_v17, %v4332_v21  ;;  %v4117_v14 = vmul.f32 0.01, %v4059_v0  ;;  %v4448_v21 = vrot.slane %v7603_v27, 4 }
 0x535   : > { %v3982_v34 = vpop.f32.mrf.mxu2 }
 0x536   : > { %v4565_v12 = vrot.slane %v4333_v38, 4  ;;  %v3983_v63 = vadd.f32 %v3982_v34, %v3944_v39  ;;  %v4021_v7 = vpop.f32.mrf.mxu3  ;;  %v4213_v37 = vmax.f32 %v4059_v0, %v4117_v14 }
 0x538   : > { %v4582_v61 = vsel %vm4578_vm1, %v4325_v28, %v4565_v12  ;;  %v4022_v51 = vadd.f32 %v4021_v7, %v3983_v63  ;;  %v4390_v49 = vmax.f32 %v4205_v40, %v4213_v37  ;;  %v4449_v63 = vmax.f32 %v7603_v27, %v4448_v21 }
 0x539   : > { %v3948_v44 = vpop.f32.mrf.mxu1 }
 0x53a   : > { %v4061_v50 = vadd.f32 %v4060_v16, %v4022_v51  ;;  %v4065_v3 = vpop.f32.mrf.mxu0  ;;  %v3949_v47 = vadd.f32 %v3948_v44, %v7608_v60  ;;  %v4450_v2 = vrot.slane %v4449_v63, 2 }
 0x53c   : > { %v4125_v1 = vmul.f32 0.01, %v4061_v50  ;;  %v4451_v4 = vmax.f32 %v4449_v63, %v4450_v2 }
 0x53d   : > { %v3985_v46 = vpop.f32.mrf.mxu2 }
 0x53e   : > { %v4221_v57 = vmax.f32 %v4061_v50, %v4125_v1  ;;  %v4024_v23 = vpop.f32.mrf.mxu3  ;;  %v3986_v24 = vadd.f32 %v3985_v46, %v3947_v42 }
 0x540   : > { %v4391_v19 = vmax.f32 %v4390_v49, %v4221_v57  ;;  %v4025_v33 = vadd.f32 %v4024_v23, %v3986_v24 }
 0x541   : > { %v3951_v29 = vpop.f32.mrf.mxu1 }
 0x542   : > { %v4392_v31 = vrot.slane %v4391_v19, 4  ;;  %v4068_v15 = vpop.f32.mrf.mxu0  ;;  %v4064_v10 = vadd.f32 %v4063_v13, %v4025_v33  ;;  %v3952_v53 = vadd.f32 %v3951_v29, %v7608_v60 }
 0x544   : > { %v4393_v22 = vmax.f32 %v4391_v19, %v4392_v31  ;;  %v4133_v62 = vmul.f32 0.01, %v4064_v10  ;;  %v4452_v31 = vrot.slane %v4451_v4, 1 }
 0x545   : > { %v3987_v35 = vpop.f32.mrf.mxu2 }
 0x546   : > { %v4394_v25 = vrot.slane %v4393_v22, 2  ;;  %v3988_v11 = vadd.f32 %v3987_v35, %v3949_v47  ;;  %v4026_v26 = vpop.f32.mrf.mxu3  ;;  %v4229_v34 = vmax.f32 %v4064_v10, %v4133_v62 }
 0x548   : > { %v4395_v48 = vmax.f32 %v4393_v22, %v4394_v25  ;;  %v4027_v55 = vadd.f32 %v4026_v26, %v3988_v11  ;;  %v4453_v25 = vmax.f32 %v4451_v4, %v4452_v31 }
 0x549   : > { %v3953_v16 = vpop.f32.mrf.mxu1 }
 0x54a   : > { %v4396_v5 = vrot.slane %v4395_v48, 1  ;;  %v4066_v54 = vadd.f32 %v4065_v3, %v4027_v55  ;;  %v4070_v12 = vpop.f32.mrf.mxu0  ;;  %v3954_v37 = vadd.f32 %v3953_v16, %v7608_v60 }
 0x54c   : > { %v4397_v58 = vmax.f32 %v4395_v48, %v4396_v5  ;;  %v4141_v30 = vmul.f32 0.01, %v4066_v54 }
 0x54d   : > { %v3990_v56 = vpop.f32.mrf.mxu2 }
 0x54e   : > { %v4569_v59 = vrot.slane %v4397_v58, 4  ;;  %v3991_v20 = vadd.f32 %v3990_v56, %v3952_v53  ;;  %v4029_v17 = vpop.f32.mrf.mxu3  ;;  %v4237_v0 = vmax.f32 %v4066_v54, %v4141_v30  ;;  %v4512_v58 = vrot.slane %v7611_v43, 4 }
 0x550   : > { %v4586_v36 = vsel %vm4578_vm1, %v4389_v52, %v4569_v59  ;;  %v4030_v6 = vadd.f32 %v4029_v17, %v3991_v20  ;;  %v4454_v7 = vmax.f32 %v4229_v34, %v4237_v0  ;;  %v4513_v59 = vmax.f32 %v7611_v43, %v4512_v58 }
 0x551   : > { %v4628_v32 = vrot.slane %v4586_v36, 7  ;;  %v3956_v51 = vpop.f32.mrf.mxu1 }
 0x552   : > { %v4069_v38 = vadd.f32 %v4068_v15, %v4030_v6  ;;  %v4073_v19 = vpop.f32.mrf.mxu0  ;;  %v4514_v36 = vrot.slane %v4513_v59, 2 }
 0x553   : > { %v4629_v9 = vsel %vm4596_vm2, %v4628_v32, %v4582_v61  ;;  %v3957_v61 = vadd.f32 %v3956_v51, %v7608_v60 }
 0x554   : > { %v4630_v39 = vsel %vm4598_vm3, %v4628_v32, %v4629_v9  ;;  %v4149_v28 = vmul.f32 0.01, %v4069_v38  ;;  %v4515_v32 = vmax.f32 %v4513_v59, %v4514_v36 }
 0x555   : > { %v3992_v14 = vpop.f32.mrf.mxu2 }
 0x556   : > { %v4245_v13 = vmax.f32 %v4069_v38, %v4149_v28  ;;  %v4031_v41 = vpop.f32.mrf.mxu3  ;;  %v3993_v1 = vadd.f32 %v3992_v14, %v3954_v37  ;;  %v4516_v38 = vrot.slane %v4515_v32, 1 }
 0x558   : > { %v4455_v44 = vmax.f32 %v4454_v7, %v4245_v13  ;;  %v4032_v3 = vadd.f32 %v4031_v41, %v3993_v1  ;;  %v4517_v43 = vmax.f32 %v4515_v32, %v4516_v38 }
 0x559   : > { %v3958_v42 = vpop.f32.mrf.mxu1 }
 0x55a   : > { %v4456_v50 = vrot.slane %v4455_v44, 4  ;;  %v4071_v24 = vadd.f32 %v4070_v12, %v4032_v3  ;;  %v3959_v35 = vadd.f32 %v3958_v42, %v7608_v60  ;;  %v4075_v15 = vpop.f32.mrf.mxu0 }
 0x55c   : > { %v4457_v40 = vmax.f32 %v4455_v44, %v4456_v50  ;;  %v4157_v45 = vmul.f32 0.01, %v4071_v24 }
 0x55d   : > { %v3995_v46 = vpop.f32.mrf.mxu2 }
 0x55e   : > { %v4458_v49 = vrot.slane %v4457_v40, 2  ;;  %v3996_v57 = vadd.f32 %v3995_v46, %v3957_v61  ;;  %v4034_v23 = vpop.f32.mrf.mxu3  ;;  %v4253_v60 = vmax.f32 %v4071_v24, %v4157_v45 }
 0x560   : > { %v4459_v27 = vmax.f32 %v4457_v40, %v4458_v49  ;;  %v4035_v18 = vadd.f32 %v4034_v23, %v3996_v57 }
 0x562   : > { %v4460_v29 = vrot.slane %v4459_v27, 1  ;;  %v4074_v22 = vadd.f32 %v4073_v19, %v4035_v18 }
 0x564   : > { %v4461_v47 = vmax.f32 %v4459_v27, %v4460_v29  ;;  %v4165_v26 = vmul.f32 0.01, %v4074_v22 }
 0x565   : > { %v3997_v8 = vpop.f32.mrf.mxu2 }
 0x566   : > { %v4573_v11 = vrot.slane %v4461_v47, 4  ;;  %v3998_v48 = vadd.f32 %v3997_v8, %v3959_v35  ;;  %v4036_v33 = vpop.f32.mrf.mxu3  ;;  %v4261_v10 = vmax.f32 %v4074_v22, %v4165_v26 }
 0x568   : > { %v4590_v55 = vsel %vm4578_vm1, %v4453_v25, %v4573_v11  ;;  %v4037_v5 = vadd.f32 %v4036_v33, %v3998_v48  ;;  %v4518_v30 = vmax.f32 %v4253_v60, %v4261_v10 }
 0x569   : > { %v4631_v54 = vrot.slane %v4590_v55, 6 }
 0x56a   : > { %v4076_v53 = vadd.f32 %v4075_v15, %v4037_v5 }
 0x56b   : > { %v4632_v16 = vsel %vm4601_vm4, %v4631_v54, %v4630_v39 }
 0x56c   : > { %v4173_v56 = vmul.f32 0.01, %v4076_v53  ;;  %v4633_v52 = vsel %vm4603_vm5, %v4631_v54, %v4632_v16 }
 0x56e   : > { %v4269_v20 = vmax.f32 %v4076_v53, %v4173_v56 }
 0x570   : > { %v4519_v17 = vmax.f32 %v4518_v30, %v4269_v20 }
 0x572   : > { %v4520_v62 = vrot.slane %v4519_v17, 4 }
 0x574   : > { %v4521_v6 = vmax.f32 %v4519_v17, %v4520_v62 }
 0x576   : > { %v4522_v21 = vrot.slane %v4521_v6, 2 }
 0x578   : > { %v4523_v0 = vmax.f32 %v4521_v6, %v4522_v21 }
 0x57a   : > { %v4524_v9 = vrot.slane %v4523_v0, 1 }
 0x57c   : > { %v4525_v39 = vmax.f32 %v4523_v0, %v4524_v9 }
 0x57e   : > { %v4577_v34 = vrot.slane %v4525_v39, 4 }
 0x580   : > { %v4594_v28 = vsel %vm4578_vm1, %v4517_v43, %v4577_v34 }
 0x581   : > { %v4634_v12 = vrot.slane %v4594_v28, 5 }
 0x583   : > { %v4635_v14 = vsel %vm4606_vm6, %v4634_v12, %v4633_v52 }
 0x584   : > { %v4636_v63 = vsel %vm4608_vm7, %v4634_v12, %v4635_v14 }
 0x585   : > { %4644 = vst [vmem:[%s7292_s23 + $0x18] sm:$0xff] %v4636_v63 }
 0x586   : > { %6584 = shalt.err (!%p6581_p9)
}
 0x587   : > { %6384 = dma.vmem_to_hbm [thread:$0]  (%p6744_p4), %s4787_s25, 512, %s4789_s26, %s4773_s12  }
 0x588 PF: > { %p6401_p10 = scmp.ge.s32.totalorder %s6643_s14, 2  ;;  %s4800_s13 = sand.u32 1, %s6623_s30  }
 0x589   : > { %s4801_s23 = scalar_lea.sflag [#allocation4], %s4800_s13 }
 0x58a   : > { %p6394_p11 = pnand %p6401_p10, %p6751_p8 }
 0x58c   : > { %p6395_p12 = pneg %p6394_p11 }
 0x58e   : > { %6618 = dma.done.wait (%p6395_p12), %s4801_s23, 512  }
 0x58f   : > { %6620 = vsyncadd (%p6395_p12), %s4801_s23, 4294966784  ;;  %s24_s14 = sadd.s32 1, %s6643_s14   ;;  %s7702_s12 = sld [smem:[#allocation11_spill]] }
 0x590   : > { %p21_p13 = scmp.ge.s32.totalorder %s24_s14, 4   ;;  %s7703_s13 = sld [smem:[#allocation12_spill]] }
 0x591   : > { %s7704_s30 = smov %s6627_s10  ;;  %s7705_s10 = smov %s6631_s11 }
 0x592   : > { %s7706_s11 = smov %s6757_s22  ;;  %23 = sbr.rel (!%p21_p13) target bundleno = 8 (0x8), region = 108 }
 0x597   :  { %4807 = vsyncpa [#allocation3], 1 }
 0x598   :  { %4809 = vsyncpa [#allocation3 + $0x1], 1 }
 0x599   :  { %4810 = vsyncpa [#allocation6], 1 }
 0x59a   :  { %4811 = vsyncpa [#allocation4], 1 }
 0x59b   :  { %4813 = vsyncpa [#allocation4 + $0x1], 1 }

</bundles_post_ra>
